<compile_context>
chip_gen: v7x
topology: tpu7x:2x2x1
jax: 0.10.0
libtpu: 0.0.40
codegen_flags: <defaults>
</compile_context>

<pallas_src>
import functools

import jax
import jax.numpy as jnp
from jax.experimental import pallas as pl
from jax.experimental.pallas import tpu as pltpu


# ----------------------------------------------------------------------------
# Fused bidirectional LSTM layer: single pallas_call, in-kernel unrolled time loop
# ----------------------------------------------------------------------------
def _bilstm_layer_kernel(x_ref, wih_ref, whh_ref, b_ref, out_ref, gx_scr,
                         *, seq_len, batch, hidden):
    """x_ref: (T*B, Din) bf16, time-major rows t*B+b (B padded to a multiple of 8).
    wih_ref: (Din, 8H) bf16, columns [fwd i,f,o,g | bwd i,f,o,g].
    whh_ref: (2, H, 4H) bf16 ([fwd, bwd], gate cols i,f,o,g).
    b_ref:   (1, 8H) f32 (b_ih + b_hh, both directions, reordered gates).
    out_ref: (T*B, 2H) bf16 = [fwd | bwd] hidden states, time-major."""
    T, B, H = seq_len, batch, hidden
    G = 4 * H

    # 1) Bulk input projection for all timesteps, both directions (one big MXU matmul).
    gx_scr[...] = jnp.dot(x_ref[...], wih_ref[...],
                          preferred_element_type=jnp.float32) + b_ref[...]

    whh_f = whh_ref[0]                                 # (H, 4H) bf16, hoisted
    whh_b = whh_ref[1]

    def cell(g, c):
        # Gate column order [i | f | o | g]: one sigmoid over 3H, one tanh over H.
        s = jax.nn.sigmoid(g[:, 0:3 * H])
        gg = jnp.tanh(g[:, 3 * H:4 * H])
        c_new = s[:, H:2 * H] * c + s[:, 0:H] * gg
        h_new = s[:, 2 * H:3 * H] * jnp.tanh(c_new)
        return h_new, c_new

    # 2) Recurrence, fully unrolled (T small & static).  State lives in vregs.
    h_f = jnp.zeros((B, H), jnp.float32)
    c_f = jnp.zeros((B, H), jnp.float32)
    h_b = jnp.zeros((B, H), jnp.float32)
    c_b = jnp.zeros((B, H), jnp.float32)
    hs_f = [None] * T
    hs_b = [None] * T
    for s in range(T):
        r = T - 1 - s
        # Column split at the 4H (=128-lane at H=32) boundary, sublane-dense row slices.
        gx_f = gx_scr[pl.ds(s * B, B), pl.ds(0, G)]
        gx_b = gx_scr[pl.ds(r * B, B), pl.ds(G, G)]
        gh_f = jnp.dot(h_f.astype(jnp.bfloat16), whh_f,
                       preferred_element_type=jnp.float32)
        gh_b = jnp.dot(h_b.astype(jnp.bfloat16), whh_b,
                       preferred_element_type=jnp.float32)
        h_f, c_f = cell(gx_f + gh_f, c_f)
        h_b, c_b = cell(gx_b + gh_b, c_b)
        hs_f[s] = h_f
        hs_b[r] = h_b

    # 3) Single bulk output write: (T*B, 2H) = [fwd | bwd], cast once to bf16.
    out_f = jnp.concatenate(hs_f, axis=0)              # (T*B, H)
    out_b = jnp.concatenate(hs_b, axis=0)              # (T*B, H)
    out_ref[...] = jnp.concatenate([out_f, out_b], axis=-1).astype(out_ref.dtype)


def bilstm_layer(x2d, w_ih, w_hh, b, *, seq_len, batch):
    TB = x2d.shape[0]
    H = w_hh.shape[1]
    kernel = functools.partial(_bilstm_layer_kernel,
                               seq_len=seq_len, batch=batch, hidden=H)
    return pl.pallas_call(
        kernel,
        out_shape=jax.ShapeDtypeStruct((TB, 2 * H), jnp.bfloat16),
        in_specs=[pl.BlockSpec(memory_space=pltpu.MemorySpace.VMEM) for _ in range(4)],
        out_specs=pl.BlockSpec(memory_space=pltpu.MemorySpace.VMEM),
        scratch_shapes=[
            pltpu.VMEM((TB, 8 * H), jnp.float32),      # precomputed input-projection gates
        ],
        compiler_params=pltpu.CompilerParams(vmem_limit_bytes=32 * 1024 * 1024),
    )(x2d, w_ih, w_hh, b)


# ----------------------------------------------------------------------------
# Fused head: 3x (Conv1d -> ReLU -> global max-pool) -> concat -> fc1 -> ReLU -> fc2
# ----------------------------------------------------------------------------
def _conv_mlp_kernel(*refs, num_branches, seq_len, batch):
    x_ref = refs[0]                                    # (T*B, 2H) bf16, rows t*B+b
    conv_refs = refs[1:1 + 2 * num_branches]           # (w, b) per branch
    w1_ref, b1_ref, w2_ref, b2_ref, out_ref = refs[1 + 2 * num_branches:]
    T, B = seq_len, batch
    x = x_ref[...]

    pooled = []
    for br in range(num_branches):
        w_ref = conv_refs[2 * br]                      # (k, Cin, Cout) bf16
        b_ref = conv_refs[2 * br + 1]                  # (1, Cout) f32
        k = w_ref.shape[0]
        cout = w_ref.shape[-1]
        T_out = T - k + 1
        # Conv1d as k accumulated tap-shifted matmuls (no (T_out*B, k*C) patches buffer).
        acc = jnp.zeros((T_out * B, cout), jnp.float32)
        for j in range(k):
            acc = acc + jnp.dot(x[j * B:(j + T_out) * B, :], w_ref[j],
                                preferred_element_type=jnp.float32)
        acc = jnp.maximum(acc + b_ref[...], 0.0)       # bias + ReLU
        # Global max-pool over time: pairwise tree reduction (log2(T_out) VPU depth).
        parts = [acc[t * B:(t + 1) * B] for t in range(T_out)]
        while len(parts) > 1:
            nxt = [jnp.maximum(a, b2) for a, b2 in zip(parts[0::2], parts[1::2])]
            if len(parts) % 2:
                nxt.append(parts[-1])
            parts = nxt
        pooled.append(parts[0])                        # (B, Cout)

    feat = jnp.concatenate(pooled, axis=-1).astype(jnp.bfloat16)    # (B, nb*Cout)
    h = jnp.dot(feat, w1_ref[...], preferred_element_type=jnp.float32) + b1_ref[...]
    h = jnp.maximum(h, 0.0)
    out_ref[...] = jnp.dot(h.astype(jnp.bfloat16), w2_ref[...],
                           preferred_element_type=jnp.float32) + b2_ref[...]


def conv_mlp_head(x2d, convs, fc1_w, fc1_b, fc2_w, fc2_b, *, seq_len, batch):
    n_cls = fc2_w.shape[1]
    flat = []
    for (w, b) in convs:
        flat += [w, b]
    args = [x2d] + flat + [fc1_w, fc1_b, fc2_w, fc2_b]
    kernel = functools.partial(_conv_mlp_kernel, num_branches=len(convs),
                               seq_len=seq_len, batch=batch)
    return pl.pallas_call(
        kernel,
        out_shape=jax.ShapeDtypeStruct((batch, n_cls), jnp.float32),
        in_specs=[pl.BlockSpec(memory_space=pltpu.MemorySpace.VMEM) for _ in args],
        out_specs=pl.BlockSpec(memory_space=pltpu.MemorySpace.VMEM),
        compiler_params=pltpu.CompilerParams(vmem_limit_bytes=32 * 1024 * 1024),
    )(*args)


# ----------------------------------------------------------------------------
# Parameter initialization (deterministic, synthetic) — weights pre-fused/reordered
# ----------------------------------------------------------------------------
def _reorder_ifgo_to_ifog(w):
    """Columns in PyTorch gate order [i,f,g,o] -> kernel order [i,f,o,g]."""
    H = w.shape[1] // 4
    i, f, g, o = (w[:, n * H:(n + 1) * H] for n in range(4))
    return jnp.concatenate([i, f, o, g], axis=1)


def init_params(key, *, vocab_size, embedding_dim, hidden_dim, num_layers,
                cnn_out_channels, kernel_sizes, num_classes, padding_idx=0):
    keys = iter(jax.random.split(key, 128))
    scale = 0.1
    H = hidden_dim

    emb = scale * jax.random.normal(next(keys), (vocab_size, embedding_dim), jnp.float32)
    emb = emb.at[padding_idx].set(0.0)                 # padding_idx row is zero

    lstm_layers = []
    for layer in range(num_layers):
        din = embedding_dim if layer == 0 else 2 * H
        w_ih_dirs, w_hh_dirs, b_dirs = [], [], []
        for _ in range(2):                             # fwd, bwd
            # Generated in PyTorch's [i,f,g,o] column order, then reordered to [i,f,o,g].
            w_ih = scale * jax.random.normal(next(keys), (din, 4 * H), jnp.float32)
            w_hh = scale * jax.random.normal(next(keys), (H, 4 * H), jnp.float32)
            b_ih = scale * jax.random.normal(next(keys), (1, 4 * H), jnp.float32)
            b_hh = scale * jax.random.normal(next(keys), (1, 4 * H), jnp.float32)
            w_ih_dirs.append(_reorder_ifgo_to_ifog(w_ih))
            w_hh_dirs.append(_reorder_ifgo_to_ifog(w_hh))
            b_dirs.append(_reorder_ifgo_to_ifog(b_ih + b_hh))
        w_ih_f = jnp.concatenate(w_ih_dirs, axis=1).astype(jnp.bfloat16)   # (din, 8H)
        w_hh_f = jnp.stack(w_hh_dirs, axis=0).astype(jnp.bfloat16)         # (2, H, 4H)
        b_f = jnp.concatenate(b_dirs, axis=1)                              # (1, 8H) f32
        lstm_layers.append({"w_ih": w_ih_f, "w_hh": w_hh_f, "b": b_f})

    convs = []
    for k in kernel_sizes:
        # PyTorch Conv1d layout (Cout, Cin, k) -> kernel layout (k, Cin, Cout).
        w_pt = scale * jax.random.normal(next(keys), (cnn_out_channels, 2 * H, k),
                                         jnp.float32)
        w = jnp.transpose(w_pt, (2, 1, 0)).astype(jnp.bfloat16)
        b = scale * jax.random.normal(next(keys), (1, cnn_out_channels), jnp.float32)
        convs.append((w, b))

    fc1_w = (scale * jax.random.normal(
        next(keys), (len(kernel_sizes) * cnn_out_channels, 128), jnp.float32)
    ).astype(jnp.bfloat16)
    fc1_b = scale * jax.random.normal(next(keys), (1, 128), jnp.float32)
    fc2_w = (scale * jax.random.normal(next(keys), (128, num_classes), jnp.float32)
             ).astype(jnp.bfloat16)
    fc2_b = scale * jax.random.normal(next(keys), (1, num_classes), jnp.float32)

    return {"embedding": emb, "lstm": lstm_layers, "convs": convs,
            "fc1_w": fc1_w, "fc1_b": fc1_b, "fc2_w": fc2_w, "fc2_b": fc2_b}


# ----------------------------------------------------------------------------
# Full forward pass (time-major flattened bf16 activations between kernels)
# ----------------------------------------------------------------------------
def lstm_cnn_forward(params, tokens, *, padding_idx=0):
    B, T = tokens.shape
    BP = ((B + 7) // 8) * 8                            # pad batch to sublane multiple
    if BP != B:
        pad = jnp.full((BP - B, T), padding_idx, dtype=tokens.dtype)
        tokens_p = jnp.concatenate([tokens, pad], axis=0)
    else:
        tokens_p = tokens

    # Embedding lookup directly in time-major flattened layout (row = t*BP + b).
    emb = params["embedding"][tokens_p.T]              # (T, BP, E)  plain JAX gather (glue)
    x = emb.reshape(T * BP, emb.shape[-1]).astype(jnp.bfloat16)

    for layer_p in params["lstm"]:
        x = bilstm_layer(x, layer_p["w_ih"], layer_p["w_hh"], layer_p["b"],
                         seq_len=T, batch=BP)          # (T*BP, 2H) bf16
        # TODO(synk): inter-layer LSTM dropout omitted (eval-mode identity).

    # nn.Dropout before/after fc1 -> identity in eval mode.
    logits = conv_mlp_head(x, params["convs"], params["fc1_w"], params["fc1_b"],
                           params["fc2_w"], params["fc2_b"], seq_len=T, batch=BP)
    return logits[:B]                                  # drop padded batch rows


if __name__ == "__main__":
    VOCAB = 50
    EMB = 32
    HID = 32
    LAYERS = 2
    C_OUT = 32
    K_SIZES = [3, 5, 7]
    N_CLASSES = 2
    B, T = 2, 16

    root = jax.random.PRNGKey(0)
    k_params, k_tokens = jax.random.split(root)
    params = init_params(k_params, vocab_size=VOCAB, embedding_dim=EMB,
                         hidden_dim=HID, num_layers=LAYERS,
                         cnn_out_channels=C_OUT, kernel_sizes=K_SIZES,
                         num_classes=N_CLASSES)
    tokens = jax.random.randint(k_tokens, (B, T), 0, VOCAB, dtype=jnp.int32)

    logits = jax.jit(lstm_cnn_forward)(params, tokens)
    logits = jax.block_until_ready(logits)

    assert logits.shape == (B, N_CLASSES), logits.shape
    assert bool(jnp.all(jnp.isfinite(logits)))
    print("KERNEL_OK")
</pallas_src>

<mosaic_0001>
module attributes {stable_mosaic.version = 11 : i64} {
  func.func @_bilstm_layer_kernel(%arg0: memref<128x64xbf16, #tpu.memory_space<vmem>>, %arg1: memref<64x256xbf16, #tpu.memory_space<vmem>>, %arg2: memref<2x32x128xbf16, #tpu.memory_space<vmem>>, %arg3: memref<1x256xf32, #tpu.memory_space<vmem>>, %arg4: memref<128x64xbf16, #tpu.memory_space<vmem>>, %arg5: memref<128x256xf32, #tpu.memory_space<vmem>>) attributes {dimension_semantics = [], scalar_prefetch = 0 : i64, scratch_operands = 1 : i64, tpu.core_type = #tpu.core_type<tc>} {
    %c0 = arith.constant 0 : index
    %c0_0 = arith.constant 0 : index
    %0 = vector.load %arg0[%c0, %c0_0] : memref<128x64xbf16, #tpu.memory_space<vmem>>, vector<128x64xbf16>
    %c0_1 = arith.constant 0 : index
    %c0_2 = arith.constant 0 : index
    %1 = vector.load %arg1[%c0_1, %c0_2] : memref<64x256xbf16, #tpu.memory_space<vmem>>, vector<64x256xbf16>
    %cst = arith.constant dense<0.000000e+00> : vector<128x256xf32>
    %2 = tpu.matmul %0, %1, %cst {dimension_numbers = #tpu.dot_dimension_numbers<[1], [0], [0], [1], [0, 0, 1, 1], [], []>} : vector<128x64xbf16>, vector<64x256xbf16>, vector<128x256xf32> -> vector<128x256xf32>
    %c0_3 = arith.constant 0 : index
    %c0_4 = arith.constant 0 : index
    %3 = vector.load %arg3[%c0_3, %c0_4] : memref<1x256xf32, #tpu.memory_space<vmem>>, vector<1x256xf32>
    %4 = vector.broadcast %3 : vector<1x256xf32> to vector<128x256xf32>
    %5 = arith.addf %2, %4 : vector<128x256xf32>
    %c0_5 = arith.constant 0 : index
    %c0_6 = arith.constant 0 : index
    %6 = vector.load %arg5[%c0_5, %c0_6] : memref<128x256xf32, #tpu.memory_space<vmem>>, vector<128x256xf32>
    tpu.vector_store %arg5[%c0_5, %c0_6], %5 {strides = array<i32>} : memref<128x256xf32, #tpu.memory_space<vmem>>, vector<128x256xf32>,
    %c0_7 = arith.constant 0 : index
    %c0_8 = arith.constant 0 : index
    %c0_9 = arith.constant 0 : index
    %7 = vector.load %arg2[%c0_7, %c0_8, %c0_9] : memref<2x32x128xbf16, #tpu.memory_space<vmem>>, vector<1x32x128xbf16>
    %8 = vector.shape_cast %7 : vector<1x32x128xbf16> to vector<32x128xbf16>
    %c1 = arith.constant 1 : index
    %c0_10 = arith.constant 0 : index
    %c0_11 = arith.constant 0 : index
    %9 = vector.load %arg2[%c1, %c0_10, %c0_11] : memref<2x32x128xbf16, #tpu.memory_space<vmem>>, vector<1x32x128xbf16>
    %10 = vector.shape_cast %9 : vector<1x32x128xbf16> to vector<32x128xbf16>
    %cst_12 = arith.constant 0.000000e+00 : f32
    %11 = vector.broadcast %cst_12 : f32 to vector<8x32xf32>
    %cst_13 = arith.constant 0.000000e+00 : f32
    %12 = vector.broadcast %cst_13 : f32 to vector<8x32xf32>
    %cst_14 = arith.constant 0.000000e+00 : f32
    %13 = vector.broadcast %cst_14 : f32 to vector<8x32xf32>
    %cst_15 = arith.constant 0.000000e+00 : f32
    %14 = vector.broadcast %cst_15 : f32 to vector<8x32xf32>
    %c0_16 = arith.constant 0 : index
    %c0_17 = arith.constant 0 : index
    %15 = vector.load %arg5[%c0_16, %c0_17] : memref<128x256xf32, #tpu.memory_space<vmem>>, vector<8x128xf32>
    %c120 = arith.constant 120 : index
    %c128 = arith.constant 128 : index
    %16 = vector.load %arg5[%c120, %c128] : memref<128x256xf32, #tpu.memory_space<vmem>>, vector<8x128xf32>
    %17 = arith.truncf %11 : vector<8x32xf32> to vector<8x32xbf16>
    %cst_18 = arith.constant dense<0.000000e+00> : vector<8x128xf32>
    %18 = tpu.matmul %17, %8, %cst_18 {dimension_numbers = #tpu.dot_dimension_numbers<[1], [0], [0], [1], [0, 0, 1, 1], [], []>} : vector<8x32xbf16>, vector<32x128xbf16>, vector<8x128xf32> -> vector<8x128xf32>
    %19 = arith.truncf %13 : vector<8x32xf32> to vector<8x32xbf16>
    %cst_19 = arith.constant dense<0.000000e+00> : vector<8x128xf32>
    %20 = tpu.matmul %19, %10, %cst_19 {dimension_numbers = #tpu.dot_dimension_numbers<[1], [0], [0], [1], [0, 0, 1, 1], [], []>} : vector<8x32xbf16>, vector<32x128xbf16>, vector<8x128xf32> -> vector<8x128xf32>
    %21 = arith.addf %15, %18 : vector<8x128xf32>
    %22 = vector.extract_strided_slice %21 {offsets = [0, 0], sizes = [8, 96], strides = [1, 1]} : vector<8x128xf32> to vector<8x96xf32>
    %23 = arith.negf %22 : vector<8x96xf32>
    %24 = math.exp %23 : vector<8x96xf32>
    %cst_20 = arith.constant 1.000000e+00 : f32
    %25 = vector.broadcast %cst_20 : f32 to vector<8x96xf32>
    %26 = arith.addf %25, %24 : vector<8x96xf32>
    %27 = arith.divf %25, %26 : vector<8x96xf32>
    %28 = vector.extract_strided_slice %21 {offsets = [0, 96], sizes = [8, 32], strides = [1, 1]} : vector<8x128xf32> to vector<8x32xf32>
    %29 = math.tanh %28 : vector<8x32xf32>
    %30 = vector.extract_strided_slice %27 {offsets = [0, 32], sizes = [8, 32], strides = [1, 1]} : vector<8x96xf32> to vector<8x32xf32>
    %31 = arith.mulf %30, %12 : vector<8x32xf32>
    %32 = vector.extract_strided_slice %27 {offsets = [0, 0], sizes = [8, 32], strides = [1, 1]} : vector<8x96xf32> to vector<8x32xf32>
    %33 = arith.mulf %32, %29 : vector<8x32xf32>
    %34 = arith.addf %31, %33 : vector<8x32xf32>
    %35 = vector.extract_strided_slice %27 {offsets = [0, 64], sizes = [8, 32], strides = [1, 1]} : vector<8x96xf32> to vector<8x32xf32>
    %36 = math.tanh %34 : vector<8x32xf32>
    %37 = arith.mulf %35, %36 : vector<8x32xf32>
    %38 = arith.addf %16, %20 : vector<8x128xf32>
    %39 = vector.extract_strided_slice %38 {offsets = [0, 0], sizes = [8, 96], strides = [1, 1]} : vector<8x128xf32> to vector<8x96xf32>
    %40 = arith.negf %39 : vector<8x96xf32>
    %41 = math.exp %40 : vector<8x96xf32>
    %cst_21 = arith.constant 1.000000e+00 : f32
    %42 = vector.broadcast %cst_21 : f32 to vector<8x96xf32>
    %43 = arith.addf %42, %41 : vector<8x96xf32>
    %44 = arith.divf %42, %43 : vector<8x96xf32>
    %45 = vector.extract_strided_slice %38 {offsets = [0, 96], sizes = [8, 32], strides = [1, 1]} : vector<8x128xf32> to vector<8x32xf32>
    %46 = math.tanh %45 : vector<8x32xf32>
    %47 = vector.extract_strided_slice %44 {offsets = [0, 32], sizes = [8, 32], strides = [1, 1]} : vector<8x96xf32> to vector<8x32xf32>
    %48 = arith.mulf %47, %14 : vector<8x32xf32>
    %49 = vector.extract_strided_slice %44 {offsets = [0, 0], sizes = [8, 32], strides = [1, 1]} : vector<8x96xf32> to vector<8x32xf32>
    %50 = arith.mulf %49, %46 : vector<8x32xf32>
    %51 = arith.addf %48, %50 : vector<8x32xf32>
    %52 = vector.extract_strided_slice %44 {offsets = [0, 64], sizes = [8, 32], strides = [1, 1]} : vector<8x96xf32> to vector<8x32xf32>
    %53 = math.tanh %51 : vector<8x32xf32>
    %54 = arith.mulf %52, %53 : vector<8x32xf32>
    %c8 = arith.constant 8 : index
    %c0_22 = arith.constant 0 : index
    %55 = vector.load %arg5[%c8, %c0_22] : memref<128x256xf32, #tpu.memory_space<vmem>>, vector<8x128xf32>
    %c112 = arith.constant 112 : index
    %c128_23 = arith.constant 128 : index
    %56 = vector.load %arg5[%c112, %c128_23] : memref<128x256xf32, #tpu.memory_space<vmem>>, vector<8x128xf32>
    %57 = arith.truncf %37 : vector<8x32xf32> to vector<8x32xbf16>
    %cst_24 = arith.constant dense<0.000000e+00> : vector<8x128xf32>
    %58 = tpu.matmul %57, %8, %cst_24 {dimension_numbers = #tpu.dot_dimension_numbers<[1], [0], [0], [1], [0, 0, 1, 1], [], []>} : vector<8x32xbf16>, vector<32x128xbf16>, vector<8x128xf32> -> vector<8x128xf32>
    %59 = arith.truncf %54 : vector<8x32xf32> to vector<8x32xbf16>
    %cst_25 = arith.constant dense<0.000000e+00> : vector<8x128xf32>
    %60 = tpu.matmul %59, %10, %cst_25 {dimension_numbers = #tpu.dot_dimension_numbers<[1], [0], [0], [1], [0, 0, 1, 1], [], []>} : vector<8x32xbf16>, vector<32x128xbf16>, vector<8x128xf32> -> vector<8x128xf32>
    %61 = arith.addf %55, %58 : vector<8x128xf32>
    %62 = vector.extract_strided_slice %61 {offsets = [0, 0], sizes = [8, 96], strides = [1, 1]} : vector<8x128xf32> to vector<8x96xf32>
    %63 = arith.negf %62 : vector<8x96xf32>
    %64 = math.exp %63 : vector<8x96xf32>
    %cst_26 = arith.constant 1.000000e+00 : f32
    %65 = vector.broadcast %cst_26 : f32 to vector<8x96xf32>
    %66 = arith.addf %65, %64 : vector<8x96xf32>
    %67 = arith.divf %65, %66 : vector<8x96xf32>
    %68 = vector.extract_strided_slice %61 {offsets = [0, 96], sizes = [8, 32], strides = [1, 1]} : vector<8x128xf32> to vector<8x32xf32>
    %69 = math.tanh %68 : vector<8x32xf32>
    %70 = vector.extract_strided_slice %67 {offsets = [0, 32], sizes = [8, 32], strides = [1, 1]} : vector<8x96xf32> to vector<8x32xf32>
    %71 = arith.mulf %70, %34 : vector<8x32xf32>
    %72 = vector.extract_strided_slice %67 {offsets = [0, 0], sizes = [8, 32], strides = [1, 1]} : vector<8x96xf32> to vector<8x32xf32>
    %73 = arith.mulf %72, %69 : vector<8x32xf32>
    %74 = arith.addf %71, %73 : vector<8x32xf32>
    %75 = vector.extract_strided_slice %67 {offsets = [0, 64], sizes = [8, 32], strides = [1, 1]} : vector<8x96xf32> to vector<8x32xf32>
    %76 = math.tanh %74 : vector<8x32xf32>
    %77 = arith.mulf %75, %76 : vector<8x32xf32>
    %78 = arith.addf %56, %60 : vector<8x128xf32>
    %79 = vector.extract_strided_slice %78 {offsets = [0, 0], sizes = [8, 96], strides = [1, 1]} : vector<8x128xf32> to vector<8x96xf32>
    %80 = arith.negf %79 : vector<8x96xf32>
    %81 = math.exp %80 : vector<8x96xf32>
    %cst_27 = arith.constant 1.000000e+00 : f32
    %82 = vector.broadcast %cst_27 : f32 to vector<8x96xf32>
    %83 = arith.addf %82, %81 : vector<8x96xf32>
    %84 = arith.divf %82, %83 : vector<8x96xf32>
    %85 = vector.extract_strided_slice %78 {offsets = [0, 96], sizes = [8, 32], strides = [1, 1]} : vector<8x128xf32> to vector<8x32xf32>
    %86 = math.tanh %85 : vector<8x32xf32>
    %87 = vector.extract_strided_slice %84 {offsets = [0, 32], sizes = [8, 32], strides = [1, 1]} : vector<8x96xf32> to vector<8x32xf32>
    %88 = arith.mulf %87, %51 : vector<8x32xf32>
    %89 = vector.extract_strided_slice %84 {offsets = [0, 0], sizes = [8, 32], strides = [1, 1]} : vector<8x96xf32> to vector<8x32xf32>
    %90 = arith.mulf %89, %86 : vector<8x32xf32>
    %91 = arith.addf %88, %90 : vector<8x32xf32>
    %92 = vector.extract_strided_slice %84 {offsets = [0, 64], sizes = [8, 32], strides = [1, 1]} : vector<8x96xf32> to vector<8x32xf32>
    %93 = math.tanh %91 : vector<8x32xf32>
    %94 = arith.mulf %92, %93 : vector<8x32xf32>
    %c16 = arith.constant 16 : index
    %c0_28 = arith.constant 0 : index
    %95 = vector.load %arg5[%c16, %c0_28] : memref<128x256xf32, #tpu.memory_space<vmem>>, vector<8x128xf32>
    %c104 = arith.constant 104 : index
    %c128_29 = arith.constant 128 : index
    %96 = vector.load %arg5[%c104, %c128_29] : memref<128x256xf32, #tpu.memory_space<vmem>>, vector<8x128xf32>
    %97 = arith.truncf %77 : vector<8x32xf32> to vector<8x32xbf16>
    %cst_30 = arith.constant dense<0.000000e+00> : vector<8x128xf32>
    %98 = tpu.matmul %97, %8, %cst_30 {dimension_numbers = #tpu.dot_dimension_numbers<[1], [0], [0], [1], [0, 0, 1, 1], [], []>} : vector<8x32xbf16>, vector<32x128xbf16>, vector<8x128xf32> -> vector<8x128xf32>
    %99 = arith.truncf %94 : vector<8x32xf32> to vector<8x32xbf16>
    %cst_31 = arith.constant dense<0.000000e+00> : vector<8x128xf32>
    %100 = tpu.matmul %99, %10, %cst_31 {dimension_numbers = #tpu.dot_dimension_numbers<[1], [0], [0], [1], [0, 0, 1, 1], [], []>} : vector<8x32xbf16>, vector<32x128xbf16>, vector<8x128xf32> -> vector<8x128xf32>
    %101 = arith.addf %95, %98 : vector<8x128xf32>
    %102 = vector.extract_strided_slice %101 {offsets = [0, 0], sizes = [8, 96], strides = [1, 1]} : vector<8x128xf32> to vector<8x96xf32>
    %103 = arith.negf %102 : vector<8x96xf32>
    %104 = math.exp %103 : vector<8x96xf32>
    %cst_32 = arith.constant 1.000000e+00 : f32
    %105 = vector.broadcast %cst_32 : f32 to vector<8x96xf32>
    %106 = arith.addf %105, %104 : vector<8x96xf32>
    %107 = arith.divf %105, %106 : vector<8x96xf32>
    %108 = vector.extract_strided_slice %101 {offsets = [0, 96], sizes = [8, 32], strides = [1, 1]} : vector<8x128xf32> to vector<8x32xf32>
    %109 = math.tanh %108 : vector<8x32xf32>
    %110 = vector.extract_strided_slice %107 {offsets = [0, 32], sizes = [8, 32], strides = [1, 1]} : vector<8x96xf32> to vector<8x32xf32>
    %111 = arith.mulf %110, %74 : vector<8x32xf32>
    %112 = vector.extract_strided_slice %107 {offsets = [0, 0], sizes = [8, 32], strides = [1, 1]} : vector<8x96xf32> to vector<8x32xf32>
    %113 = arith.mulf %112, %109 : vector<8x32xf32>
    %114 = arith.addf %111, %113 : vector<8x32xf32>
    %115 = vector.extract_strided_slice %107 {offsets = [0, 64], sizes = [8, 32], strides = [1, 1]} : vector<8x96xf32> to vector<8x32xf32>
    %116 = math.tanh %114 : vector<8x32xf32>
    %117 = arith.mulf %115, %116 : vector<8x32xf32>
    %118 = arith.addf %96, %100 : vector<8x128xf32>
    %119 = vector.extract_strided_slice %118 {offsets = [0, 0], sizes = [8, 96], strides = [1, 1]} : vector<8x128xf32> to vector<8x96xf32>
    %120 = arith.negf %119 : vector<8x96xf32>
    %121 = math.exp %120 : vector<8x96xf32>
    %cst_33 = arith.constant 1.000000e+00 : f32
    %122 = vector.broadcast %cst_33 : f32 to vector<8x96xf32>
    %123 = arith.addf %122, %121 : vector<8x96xf32>
    %124 = arith.divf %122, %123 : vector<8x96xf32>
    %125 = vector.extract_strided_slice %118 {offsets = [0, 96], sizes = [8, 32], strides = [1, 1]} : vector<8x128xf32> to vector<8x32xf32>
    %126 = math.tanh %125 : vector<8x32xf32>
    %127 = vector.extract_strided_slice %124 {offsets = [0, 32], sizes = [8, 32], strides = [1, 1]} : vector<8x96xf32> to vector<8x32xf32>
    %128 = arith.mulf %127, %91 : vector<8x32xf32>
    %129 = vector.extract_strided_slice %124 {offsets = [0, 0], sizes = [8, 32], strides = [1, 1]} : vector<8x96xf32> to vector<8x32xf32>
    %130 = arith.mulf %129, %126 : vector<8x32xf32>
    %131 = arith.addf %128, %130 : vector<8x32xf32>
    %132 = vector.extract_strided_slice %124 {offsets = [0, 64], sizes = [8, 32], strides = [1, 1]} : vector<8x96xf32> to vector<8x32xf32>
    %133 = math.tanh %131 : vector<8x32xf32>
    %134 = arith.mulf %132, %133 : vector<8x32xf32>
    %c24 = arith.constant 24 : index
    %c0_34 = arith.constant 0 : index
    %135 = vector.load %arg5[%c24, %c0_34] : memref<128x256xf32, #tpu.memory_space<vmem>>, vector<8x128xf32>
    %c96 = arith.constant 96 : index
    %c128_35 = arith.constant 128 : index
    %136 = vector.load %arg5[%c96, %c128_35] : memref<128x256xf32, #tpu.memory_space<vmem>>, vector<8x128xf32>
    %137 = arith.truncf %117 : vector<8x32xf32> to vector<8x32xbf16>
    %cst_36 = arith.constant dense<0.000000e+00> : vector<8x128xf32>
    %138 = tpu.matmul %137, %8, %cst_36 {dimension_numbers = #tpu.dot_dimension_numbers<[1], [0], [0], [1], [0, 0, 1, 1], [], []>} : vector<8x32xbf16>, vector<32x128xbf16>, vector<8x128xf32> -> vector<8x128xf32>
    %139 = arith.truncf %134 : vector<8x32xf32> to vector<8x32xbf16>
    %cst_37 = arith.constant dense<0.000000e+00> : vector<8x128xf32>
    %140 = tpu.matmul %139, %10, %cst_37 {dimension_numbers = #tpu.dot_dimension_numbers<[1], [0], [0], [1], [0, 0, 1, 1], [], []>} : vector<8x32xbf16>, vector<32x128xbf16>, vector<8x128xf32> -> vector<8x128xf32>
    %141 = arith.addf %135, %138 : vector<8x128xf32>
    %142 = vector.extract_strided_slice %141 {offsets = [0, 0], sizes = [8, 96], strides = [1, 1]} : vector<8x128xf32> to vector<8x96xf32>
    %143 = arith.negf %142 : vector<8x96xf32>
    %144 = math.exp %143 : vector<8x96xf32>
    %cst_38 = arith.constant 1.000000e+00 : f32
    %145 = vector.broadcast %cst_38 : f32 to vector<8x96xf32>
    %146 = arith.addf %145, %144 : vector<8x96xf32>
    %147 = arith.divf %145, %146 : vector<8x96xf32>
    %148 = vector.extract_strided_slice %141 {offsets = [0, 96], sizes = [8, 32], strides = [1, 1]} : vector<8x128xf32> to vector<8x32xf32>
    %149 = math.tanh %148 : vector<8x32xf32>
    %150 = vector.extract_strided_slice %147 {offsets = [0, 32], sizes = [8, 32], strides = [1, 1]} : vector<8x96xf32> to vector<8x32xf32>
    %151 = arith.mulf %150, %114 : vector<8x32xf32>
    %152 = vector.extract_strided_slice %147 {offsets = [0, 0], sizes = [8, 32], strides = [1, 1]} : vector<8x96xf32> to vector<8x32xf32>
    %153 = arith.mulf %152, %149 : vector<8x32xf32>
    %154 = arith.addf %151, %153 : vector<8x32xf32>
    %155 = vector.extract_strided_slice %147 {offsets = [0, 64], sizes = [8, 32], strides = [1, 1]} : vector<8x96xf32> to vector<8x32xf32>
    %156 = math.tanh %154 : vector<8x32xf32>
    %157 = arith.mulf %155, %156 : vector<8x32xf32>
    %158 = arith.addf %136, %140 : vector<8x128xf32>
    %159 = vector.extract_strided_slice %158 {offsets = [0, 0], sizes = [8, 96], strides = [1, 1]} : vector<8x128xf32> to vector<8x96xf32>
    %160 = arith.negf %159 : vector<8x96xf32>
    %161 = math.exp %160 : vector<8x96xf32>
    %cst_39 = arith.constant 1.000000e+00 : f32
    %162 = vector.broadcast %cst_39 : f32 to vector<8x96xf32>
    %163 = arith.addf %162, %161 : vector<8x96xf32>
    %164 = arith.divf %162, %163 : vector<8x96xf32>
    %165 = vector.extract_strided_slice %158 {offsets = [0, 96], sizes = [8, 32], strides = [1, 1]} : vector<8x128xf32> to vector<8x32xf32>
    %166 = math.tanh %165 : vector<8x32xf32>
    %167 = vector.extract_strided_slice %164 {offsets = [0, 32], sizes = [8, 32], strides = [1, 1]} : vector<8x96xf32> to vector<8x32xf32>
    %168 = arith.mulf %167, %131 : vector<8x32xf32>
    %169 = vector.extract_strided_slice %164 {offsets = [0, 0], sizes = [8, 32], strides = [1, 1]} : vector<8x96xf32> to vector<8x32xf32>
    %170 = arith.mulf %169, %166 : vector<8x32xf32>
    %171 = arith.addf %168, %170 : vector<8x32xf32>
    %172 = vector.extract_strided_slice %164 {offsets = [0, 64], sizes = [8, 32], strides = [1, 1]} : vector<8x96xf32> to vector<8x32xf32>
    %173 = math.tanh %171 : vector<8x32xf32>
    %174 = arith.mulf %172, %173 : vector<8x32xf32>
    %c32 = arith.constant 32 : index
    %c0_40 = arith.constant 0 : index
    %175 = vector.load %arg5[%c32, %c0_40] : memref<128x256xf32, #tpu.memory_space<vmem>>, vector<8x128xf32>
    %c88 = arith.constant 88 : index
    %c128_41 = arith.constant 128 : index
    %176 = vector.load %arg5[%c88, %c128_41] : memref<128x256xf32, #tpu.memory_space<vmem>>, vector<8x128xf32>
    %177 = arith.truncf %157 : vector<8x32xf32> to vector<8x32xbf16>
    %cst_42 = arith.constant dense<0.000000e+00> : vector<8x128xf32>
    %178 = tpu.matmul %177, %8, %cst_42 {dimension_numbers = #tpu.dot_dimension_numbers<[1], [0], [0], [1], [0, 0, 1, 1], [], []>} : vector<8x32xbf16>, vector<32x128xbf16>, vector<8x128xf32> -> vector<8x128xf32>
    %179 = arith.truncf %174 : vector<8x32xf32> to vector<8x32xbf16>
    %cst_43 = arith.constant dense<0.000000e+00> : vector<8x128xf32>
    %180 = tpu.matmul %179, %10, %cst_43 {dimension_numbers = #tpu.dot_dimension_numbers<[1], [0], [0], [1], [0, 0, 1, 1], [], []>} : vector<8x32xbf16>, vector<32x128xbf16>, vector<8x128xf32> -> vector<8x128xf32>
    %181 = arith.addf %175, %178 : vector<8x128xf32>
    %182 = vector.extract_strided_slice %181 {offsets = [0, 0], sizes = [8, 96], strides = [1, 1]} : vector<8x128xf32> to vector<8x96xf32>
    %183 = arith.negf %182 : vector<8x96xf32>
    %184 = math.exp %183 : vector<8x96xf32>
    %cst_44 = arith.constant 1.000000e+00 : f32
    %185 = vector.broadcast %cst_44 : f32 to vector<8x96xf32>
    %186 = arith.addf %185, %184 : vector<8x96xf32>
    %187 = arith.divf %185, %186 : vector<8x96xf32>
    %188 = vector.extract_strided_slice %181 {offsets = [0, 96], sizes = [8, 32], strides = [1, 1]} : vector<8x128xf32> to vector<8x32xf32>
    %189 = math.tanh %188 : vector<8x32xf32>
    %190 = vector.extract_strided_slice %187 {offsets = [0, 32], sizes = [8, 32], strides = [1, 1]} : vector<8x96xf32> to vector<8x32xf32>
    %191 = arith.mulf %190, %154 : vector<8x32xf32>
    %192 = vector.extract_strided_slice %187 {offsets = [0, 0], sizes = [8, 32], strides = [1, 1]} : vector<8x96xf32> to vector<8x32xf32>
    %193 = arith.mulf %192, %189 : vector<8x32xf32>
    %194 = arith.addf %191, %193 : vector<8x32xf32>
    %195 = vector.extract_strided_slice %187 {offsets = [0, 64], sizes = [8, 32], strides = [1, 1]} : vector<8x96xf32> to vector<8x32xf32>
    %196 = math.tanh %194 : vector<8x32xf32>
    %197 = arith.mulf %195, %196 : vector<8x32xf32>
    %198 = arith.addf %176, %180 : vector<8x128xf32>
    %199 = vector.extract_strided_slice %198 {offsets = [0, 0], sizes = [8, 96], strides = [1, 1]} : vector<8x128xf32> to vector<8x96xf32>
    %200 = arith.negf %199 : vector<8x96xf32>
    %201 = math.exp %200 : vector<8x96xf32>
    %cst_45 = arith.constant 1.000000e+00 : f32
    %202 = vector.broadcast %cst_45 : f32 to vector<8x96xf32>
    %203 = arith.addf %202, %201 : vector<8x96xf32>
    %204 = arith.divf %202, %203 : vector<8x96xf32>
    %205 = vector.extract_strided_slice %198 {offsets = [0, 96], sizes = [8, 32], strides = [1, 1]} : vector<8x128xf32> to vector<8x32xf32>
    %206 = math.tanh %205 : vector<8x32xf32>
    %207 = vector.extract_strided_slice %204 {offsets = [0, 32], sizes = [8, 32], strides = [1, 1]} : vector<8x96xf32> to vector<8x32xf32>
    %208 = arith.mulf %207, %171 : vector<8x32xf32>
    %209 = vector.extract_strided_slice %204 {offsets = [0, 0], sizes = [8, 32], strides = [1, 1]} : vector<8x96xf32> to vector<8x32xf32>
    %210 = arith.mulf %209, %206 : vector<8x32xf32>
    %211 = arith.addf %208, %210 : vector<8x32xf32>
    %212 = vector.extract_strided_slice %204 {offsets = [0, 64], sizes = [8, 32], strides = [1, 1]} : vector<8x96xf32> to vector<8x32xf32>
    %213 = math.tanh %211 : vector<8x32xf32>
    %214 = arith.mulf %212, %213 : vector<8x32xf32>
    %c40 = arith.constant 40 : index
    %c0_46 = arith.constant 0 : index
    %215 = vector.load %arg5[%c40, %c0_46] : memref<128x256xf32, #tpu.memory_space<vmem>>, vector<8x128xf32>
    %c80 = arith.constant 80 : index
    %c128_47 = arith.constant 128 : index
    %216 = vector.load %arg5[%c80, %c128_47] : memref<128x256xf32, #tpu.memory_space<vmem>>, vector<8x128xf32>
    %217 = arith.truncf %197 : vector<8x32xf32> to vector<8x32xbf16>
    %cst_48 = arith.constant dense<0.000000e+00> : vector<8x128xf32>
    %218 = tpu.matmul %217, %8, %cst_48 {dimension_numbers = #tpu.dot_dimension_numbers<[1], [0], [0], [1], [0, 0, 1, 1], [], []>} : vector<8x32xbf16>, vector<32x128xbf16>, vector<8x128xf32> -> vector<8x128xf32>
    %219 = arith.truncf %214 : vector<8x32xf32> to vector<8x32xbf16>
    %cst_49 = arith.constant dense<0.000000e+00> : vector<8x128xf32>
    %220 = tpu.matmul %219, %10, %cst_49 {dimension_numbers = #tpu.dot_dimension_numbers<[1], [0], [0], [1], [0, 0, 1, 1], [], []>} : vector<8x32xbf16>, vector<32x128xbf16>, vector<8x128xf32> -> vector<8x128xf32>
    %221 = arith.addf %215, %218 : vector<8x128xf32>
    %222 = vector.extract_strided_slice %221 {offsets = [0, 0], sizes = [8, 96], strides = [1, 1]} : vector<8x128xf32> to vector<8x96xf32>
    %223 = arith.negf %222 : vector<8x96xf32>
    %224 = math.exp %223 : vector<8x96xf32>
    %cst_50 = arith.constant 1.000000e+00 : f32
    %225 = vector.broadcast %cst_50 : f32 to vector<8x96xf32>
    %226 = arith.addf %225, %224 : vector<8x96xf32>
    %227 = arith.divf %225, %226 : vector<8x96xf32>
    %228 = vector.extract_strided_slice %221 {offsets = [0, 96], sizes = [8, 32], strides = [1, 1]} : vector<8x128xf32> to vector<8x32xf32>
    %229 = math.tanh %228 : vector<8x32xf32>
    %230 = vector.extract_strided_slice %227 {offsets = [0, 32], sizes = [8, 32], strides = [1, 1]} : vector<8x96xf32> to vector<8x32xf32>
    %231 = arith.mulf %230, %194 : vector<8x32xf32>
    %232 = vector.extract_strided_slice %227 {offsets = [0, 0], sizes = [8, 32], strides = [1, 1]} : vector<8x96xf32> to vector<8x32xf32>
    %233 = arith.mulf %232, %229 : vector<8x32xf32>
    %234 = arith.addf %231, %233 : vector<8x32xf32>
    %235 = vector.extract_strided_slice %227 {offsets = [0, 64], sizes = [8, 32], strides = [1, 1]} : vector<8x96xf32> to vector<8x32xf32>
    %236 = math.tanh %234 : vector<8x32xf32>
    %237 = arith.mulf %235, %236 : vector<8x32xf32>
    %238 = arith.addf %216, %220 : vector<8x128xf32>
    %239 = vector.extract_strided_slice %238 {offsets = [0, 0], sizes = [8, 96], strides = [1, 1]} : vector<8x128xf32> to vector<8x96xf32>
    %240 = arith.negf %239 : vector<8x96xf32>
    %241 = math.exp %240 : vector<8x96xf32>
    %cst_51 = arith.constant 1.000000e+00 : f32
    %242 = vector.broadcast %cst_51 : f32 to vector<8x96xf32>
    %243 = arith.addf %242, %241 : vector<8x96xf32>
    %244 = arith.divf %242, %243 : vector<8x96xf32>
    %245 = vector.extract_strided_slice %238 {offsets = [0, 96], sizes = [8, 32], strides = [1, 1]} : vector<8x128xf32> to vector<8x32xf32>
    %246 = math.tanh %245 : vector<8x32xf32>
    %247 = vector.extract_strided_slice %244 {offsets = [0, 32], sizes = [8, 32], strides = [1, 1]} : vector<8x96xf32> to vector<8x32xf32>
    %248 = arith.mulf %247, %211 : vector<8x32xf32>
    %249 = vector.extract_strided_slice %244 {offsets = [0, 0], sizes = [8, 32], strides = [1, 1]} : vector<8x96xf32> to vector<8x32xf32>
    %250 = arith.mulf %249, %246 : vector<8x32xf32>
    %251 = arith.addf %248, %250 : vector<8x32xf32>
    %252 = vector.extract_strided_slice %244 {offsets = [0, 64], sizes = [8, 32], strides = [1, 1]} : vector<8x96xf32> to vector<8x32xf32>
    %253 = math.tanh %251 : vector<8x32xf32>
    %254 = arith.mulf %252, %253 : vector<8x32xf32>
    %c48 = arith.constant 48 : index
    %c0_52 = arith.constant 0 : index
    %255 = vector.load %arg5[%c48, %c0_52] : memref<128x256xf32, #tpu.memory_space<vmem>>, vector<8x128xf32>
    %c72 = arith.constant 72 : index
    %c128_53 = arith.constant 128 : index
    %256 = vector.load %arg5[%c72, %c128_53] : memref<128x256xf32, #tpu.memory_space<vmem>>, vector<8x128xf32>
    %257 = arith.truncf %237 : vector<8x32xf32> to vector<8x32xbf16>
    %cst_54 = arith.constant dense<0.000000e+00> : vector<8x128xf32>
    %258 = tpu.matmul %257, %8, %cst_54 {dimension_numbers = #tpu.dot_dimension_numbers<[1], [0], [0], [1], [0, 0, 1, 1], [], []>} : vector<8x32xbf16>, vector<32x128xbf16>, vector<8x128xf32> -> vector<8x128xf32>
    %259 = arith.truncf %254 : vector<8x32xf32> to vector<8x32xbf16>
    %cst_55 = arith.constant dense<0.000000e+00> : vector<8x128xf32>
    %260 = tpu.matmul %259, %10, %cst_55 {dimension_numbers = #tpu.dot_dimension_numbers<[1], [0], [0], [1], [0, 0, 1, 1], [], []>} : vector<8x32xbf16>, vector<32x128xbf16>, vector<8x128xf32> -> vector<8x128xf32>
    %261 = arith.addf %255, %258 : vector<8x128xf32>
    %262 = vector.extract_strided_slice %261 {offsets = [0, 0], sizes = [8, 96], strides = [1, 1]} : vector<8x128xf32> to vector<8x96xf32>
    %263 = arith.negf %262 : vector<8x96xf32>
    %264 = math.exp %263 : vector<8x96xf32>
    %cst_56 = arith.constant 1.000000e+00 : f32
    %265 = vector.broadcast %cst_56 : f32 to vector<8x96xf32>
    %266 = arith.addf %265, %264 : vector<8x96xf32>
    %267 = arith.divf %265, %266 : vector<8x96xf32>
    %268 = vector.extract_strided_slice %261 {offsets = [0, 96], sizes = [8, 32], strides = [1, 1]} : vector<8x128xf32> to vector<8x32xf32>
    %269 = math.tanh %268 : vector<8x32xf32>
    %270 = vector.extract_strided_slice %267 {offsets = [0, 32], sizes = [8, 32], strides = [1, 1]} : vector<8x96xf32> to vector<8x32xf32>
    %271 = arith.mulf %270, %234 : vector<8x32xf32>
    %272 = vector.extract_strided_slice %267 {offsets = [0, 0], sizes = [8, 32], strides = [1, 1]} : vector<8x96xf32> to vector<8x32xf32>
    %273 = arith.mulf %272, %269 : vector<8x32xf32>
    %274 = arith.addf %271, %273 : vector<8x32xf32>
    %275 = vector.extract_strided_slice %267 {offsets = [0, 64], sizes = [8, 32], strides = [1, 1]} : vector<8x96xf32> to vector<8x32xf32>
    %276 = math.tanh %274 : vector<8x32xf32>
    %277 = arith.mulf %275, %276 : vector<8x32xf32>
    %278 = arith.addf %256, %260 : vector<8x128xf32>
    %279 = vector.extract_strided_slice %278 {offsets = [0, 0], sizes = [8, 96], strides = [1, 1]} : vector<8x128xf32> to vector<8x96xf32>
    %280 = arith.negf %279 : vector<8x96xf32>
    %281 = math.exp %280 : vector<8x96xf32>
    %cst_57 = arith.constant 1.000000e+00 : f32
    %282 = vector.broadcast %cst_57 : f32 to vector<8x96xf32>
    %283 = arith.addf %282, %281 : vector<8x96xf32>
    %284 = arith.divf %282, %283 : vector<8x96xf32>
    %285 = vector.extract_strided_slice %278 {offsets = [0, 96], sizes = [8, 32], strides = [1, 1]} : vector<8x128xf32> to vector<8x32xf32>
    %286 = math.tanh %285 : vector<8x32xf32>
    %287 = vector.extract_strided_slice %284 {offsets = [0, 32], sizes = [8, 32], strides = [1, 1]} : vector<8x96xf32> to vector<8x32xf32>
    %288 = arith.mulf %287, %251 : vector<8x32xf32>
    %289 = vector.extract_strided_slice %284 {offsets = [0, 0], sizes = [8, 32], strides = [1, 1]} : vector<8x96xf32> to vector<8x32xf32>
    %290 = arith.mulf %289, %286 : vector<8x32xf32>
    %291 = arith.addf %288, %290 : vector<8x32xf32>
    %292 = vector.extract_strided_slice %284 {offsets = [0, 64], sizes = [8, 32], strides = [1, 1]} : vector<8x96xf32> to vector<8x32xf32>
    %293 = math.tanh %291 : vector<8x32xf32>
    %294 = arith.mulf %292, %293 : vector<8x32xf32>
    %c56 = arith.constant 56 : index
    %c0_58 = arith.constant 0 : index
    %295 = vector.load %arg5[%c56, %c0_58] : memref<128x256xf32, #tpu.memory_space<vmem>>, vector<8x128xf32>
    %c64 = arith.constant 64 : index
    %c128_59 = arith.constant 128 : index
    %296 = vector.load %arg5[%c64, %c128_59] : memref<128x256xf32, #tpu.memory_space<vmem>>, vector<8x128xf32>
    %297 = arith.truncf %277 : vector<8x32xf32> to vector<8x32xbf16>
    %cst_60 = arith.constant dense<0.000000e+00> : vector<8x128xf32>
    %298 = tpu.matmul %297, %8, %cst_60 {dimension_numbers = #tpu.dot_dimension_numbers<[1], [0], [0], [1], [0, 0, 1, 1], [], []>} : vector<8x32xbf16>, vector<32x128xbf16>, vector<8x128xf32> -> vector<8x128xf32>
    %299 = arith.truncf %294 : vector<8x32xf32> to vector<8x32xbf16>
    %cst_61 = arith.constant dense<0.000000e+00> : vector<8x128xf32>
    %300 = tpu.matmul %299, %10, %cst_61 {dimension_numbers = #tpu.dot_dimension_numbers<[1], [0], [0], [1], [0, 0, 1, 1], [], []>} : vector<8x32xbf16>, vector<32x128xbf16>, vector<8x128xf32> -> vector<8x128xf32>
    %301 = arith.addf %295, %298 : vector<8x128xf32>
    %302 = vector.extract_strided_slice %301 {offsets = [0, 0], sizes = [8, 96], strides = [1, 1]} : vector<8x128xf32> to vector<8x96xf32>
    %303 = arith.negf %302 : vector<8x96xf32>
    %304 = math.exp %303 : vector<8x96xf32>
    %cst_62 = arith.constant 1.000000e+00 : f32
    %305 = vector.broadcast %cst_62 : f32 to vector<8x96xf32>
    %306 = arith.addf %305, %304 : vector<8x96xf32>
    %307 = arith.divf %305, %306 : vector<8x96xf32>
    %308 = vector.extract_strided_slice %301 {offsets = [0, 96], sizes = [8, 32], strides = [1, 1]} : vector<8x128xf32> to vector<8x32xf32>
    %309 = math.tanh %308 : vector<8x32xf32>
    %310 = vector.extract_strided_slice %307 {offsets = [0, 32], sizes = [8, 32], strides = [1, 1]} : vector<8x96xf32> to vector<8x32xf32>
    %311 = arith.mulf %310, %274 : vector<8x32xf32>
    %312 = vector.extract_strided_slice %307 {offsets = [0, 0], sizes = [8, 32], strides = [1, 1]} : vector<8x96xf32> to vector<8x32xf32>
    %313 = arith.mulf %312, %309 : vector<8x32xf32>
    %314 = arith.addf %311, %313 : vector<8x32xf32>
    %315 = vector.extract_strided_slice %307 {offsets = [0, 64], sizes = [8, 32], strides = [1, 1]} : vector<8x96xf32> to vector<8x32xf32>
    %316 = math.tanh %314 : vector<8x32xf32>
    %317 = arith.mulf %315, %316 : vector<8x32xf32>
    %318 = arith.addf %296, %300 : vector<8x128xf32>
    %319 = vector.extract_strided_slice %318 {offsets = [0, 0], sizes = [8, 96], strides = [1, 1]} : vector<8x128xf32> to vector<8x96xf32>
    %320 = arith.negf %319 : vector<8x96xf32>
    %321 = math.exp %320 : vector<8x96xf32>
    %cst_63 = arith.constant 1.000000e+00 : f32
    %322 = vector.broadcast %cst_63 : f32 to vector<8x96xf32>
    %323 = arith.addf %322, %321 : vector<8x96xf32>
    %324 = arith.divf %322, %323 : vector<8x96xf32>
    %325 = vector.extract_strided_slice %318 {offsets = [0, 96], sizes = [8, 32], strides = [1, 1]} : vector<8x128xf32> to vector<8x32xf32>
    %326 = math.tanh %325 : vector<8x32xf32>
    %327 = vector.extract_strided_slice %324 {offsets = [0, 32], sizes = [8, 32], strides = [1, 1]} : vector<8x96xf32> to vector<8x32xf32>
    %328 = arith.mulf %327, %291 : vector<8x32xf32>
    %329 = vector.extract_strided_slice %324 {offsets = [0, 0], sizes = [8, 32], strides = [1, 1]} : vector<8x96xf32> to vector<8x32xf32>
    %330 = arith.mulf %329, %326 : vector<8x32xf32>
    %331 = arith.addf %328, %330 : vector<8x32xf32>
    %332 = vector.extract_strided_slice %324 {offsets = [0, 64], sizes = [8, 32], strides = [1, 1]} : vector<8x96xf32> to vector<8x32xf32>
    %333 = math.tanh %331 : vector<8x32xf32>
    %334 = arith.mulf %332, %333 : vector<8x32xf32>
    %c64_64 = arith.constant 64 : index
    %c0_65 = arith.constant 0 : index
    %335 = vector.load %arg5[%c64_64, %c0_65] : memref<128x256xf32, #tpu.memory_space<vmem>>, vector<8x128xf32>
    %c56_66 = arith.constant 56 : index
    %c128_67 = arith.constant 128 : index
    %336 = vector.load %arg5[%c56_66, %c128_67] : memref<128x256xf32, #tpu.memory_space<vmem>>, vector<8x128xf32>
    %337 = arith.truncf %317 : vector<8x32xf32> to vector<8x32xbf16>
    %cst_68 = arith.constant dense<0.000000e+00> : vector<8x128xf32>
    %338 = tpu.matmul %337, %8, %cst_68 {dimension_numbers = #tpu.dot_dimension_numbers<[1], [0], [0], [1], [0, 0, 1, 1], [], []>} : vector<8x32xbf16>, vector<32x128xbf16>, vector<8x128xf32> -> vector<8x128xf32>
    %339 = arith.truncf %334 : vector<8x32xf32> to vector<8x32xbf16>
    %cst_69 = arith.constant dense<0.000000e+00> : vector<8x128xf32>
    %340 = tpu.matmul %339, %10, %cst_69 {dimension_numbers = #tpu.dot_dimension_numbers<[1], [0], [0], [1], [0, 0, 1, 1], [], []>} : vector<8x32xbf16>, vector<32x128xbf16>, vector<8x128xf32> -> vector<8x128xf32>
    %341 = arith.addf %335, %338 : vector<8x128xf32>
    %342 = vector.extract_strided_slice %341 {offsets = [0, 0], sizes = [8, 96], strides = [1, 1]} : vector<8x128xf32> to vector<8x96xf32>
    %343 = arith.negf %342 : vector<8x96xf32>
    %344 = math.exp %343 : vector<8x96xf32>
    %cst_70 = arith.constant 1.000000e+00 : f32
    %345 = vector.broadcast %cst_70 : f32 to vector<8x96xf32>
    %346 = arith.addf %345, %344 : vector<8x96xf32>
    %347 = arith.divf %345, %346 : vector<8x96xf32>
    %348 = vector.extract_strided_slice %341 {offsets = [0, 96], sizes = [8, 32], strides = [1, 1]} : vector<8x128xf32> to vector<8x32xf32>
    %349 = math.tanh %348 : vector<8x32xf32>
    %350 = vector.extract_strided_slice %347 {offsets = [0, 32], sizes = [8, 32], strides = [1, 1]} : vector<8x96xf32> to vector<8x32xf32>
    %351 = arith.mulf %350, %314 : vector<8x32xf32>
    %352 = vector.extract_strided_slice %347 {offsets = [0, 0], sizes = [8, 32], strides = [1, 1]} : vector<8x96xf32> to vector<8x32xf32>
    %353 = arith.mulf %352, %349 : vector<8x32xf32>
    %354 = arith.addf %351, %353 : vector<8x32xf32>
    %355 = vector.extract_strided_slice %347 {offsets = [0, 64], sizes = [8, 32], strides = [1, 1]} : vector<8x96xf32> to vector<8x32xf32>
    %356 = math.tanh %354 : vector<8x32xf32>
    %357 = arith.mulf %355, %356 : vector<8x32xf32>
    %358 = arith.addf %336, %340 : vector<8x128xf32>
    %359 = vector.extract_strided_slice %358 {offsets = [0, 0], sizes = [8, 96], strides = [1, 1]} : vector<8x128xf32> to vector<8x96xf32>
    %360 = arith.negf %359 : vector<8x96xf32>
    %361 = math.exp %360 : vector<8x96xf32>
    %cst_71 = arith.constant 1.000000e+00 : f32
    %362 = vector.broadcast %cst_71 : f32 to vector<8x96xf32>
    %363 = arith.addf %362, %361 : vector<8x96xf32>
    %364 = arith.divf %362, %363 : vector<8x96xf32>
    %365 = vector.extract_strided_slice %358 {offsets = [0, 96], sizes = [8, 32], strides = [1, 1]} : vector<8x128xf32> to vector<8x32xf32>
    %366 = math.tanh %365 : vector<8x32xf32>
    %367 = vector.extract_strided_slice %364 {offsets = [0, 32], sizes = [8, 32], strides = [1, 1]} : vector<8x96xf32> to vector<8x32xf32>
    %368 = arith.mulf %367, %331 : vector<8x32xf32>
    %369 = vector.extract_strided_slice %364 {offsets = [0, 0], sizes = [8, 32], strides = [1, 1]} : vector<8x96xf32> to vector<8x32xf32>
    %370 = arith.mulf %369, %366 : vector<8x32xf32>
    %371 = arith.addf %368, %370 : vector<8x32xf32>
    %372 = vector.extract_strided_slice %364 {offsets = [0, 64], sizes = [8, 32], strides = [1, 1]} : vector<8x96xf32> to vector<8x32xf32>
    %373 = math.tanh %371 : vector<8x32xf32>
    %374 = arith.mulf %372, %373 : vector<8x32xf32>
    %c72_72 = arith.constant 72 : index
    %c0_73 = arith.constant 0 : index
    %375 = vector.load %arg5[%c72_72, %c0_73] : memref<128x256xf32, #tpu.memory_space<vmem>>, vector<8x128xf32>
    %c48_74 = arith.constant 48 : index
    %c128_75 = arith.constant 128 : index
    %376 = vector.load %arg5[%c48_74, %c128_75] : memref<128x256xf32, #tpu.memory_space<vmem>>, vector<8x128xf32>
    %377 = arith.truncf %357 : vector<8x32xf32> to vector<8x32xbf16>
    %cst_76 = arith.constant dense<0.000000e+00> : vector<8x128xf32>
    %378 = tpu.matmul %377, %8, %cst_76 {dimension_numbers = #tpu.dot_dimension_numbers<[1], [0], [0], [1], [0, 0, 1, 1], [], []>} : vector<8x32xbf16>, vector<32x128xbf16>, vector<8x128xf32> -> vector<8x128xf32>
    %379 = arith.truncf %374 : vector<8x32xf32> to vector<8x32xbf16>
    %cst_77 = arith.constant dense<0.000000e+00> : vector<8x128xf32>
    %380 = tpu.matmul %379, %10, %cst_77 {dimension_numbers = #tpu.dot_dimension_numbers<[1], [0], [0], [1], [0, 0, 1, 1], [], []>} : vector<8x32xbf16>, vector<32x128xbf16>, vector<8x128xf32> -> vector<8x128xf32>
    %381 = arith.addf %375, %378 : vector<8x128xf32>
    %382 = vector.extract_strided_slice %381 {offsets = [0, 0], sizes = [8, 96], strides = [1, 1]} : vector<8x128xf32> to vector<8x96xf32>
    %383 = arith.negf %382 : vector<8x96xf32>
    %384 = math.exp %383 : vector<8x96xf32>
    %cst_78 = arith.constant 1.000000e+00 : f32
    %385 = vector.broadcast %cst_78 : f32 to vector<8x96xf32>
    %386 = arith.addf %385, %384 : vector<8x96xf32>
    %387 = arith.divf %385, %386 : vector<8x96xf32>
    %388 = vector.extract_strided_slice %381 {offsets = [0, 96], sizes = [8, 32], strides = [1, 1]} : vector<8x128xf32> to vector<8x32xf32>
    %389 = math.tanh %388 : vector<8x32xf32>
    %390 = vector.extract_strided_slice %387 {offsets = [0, 32], sizes = [8, 32], strides = [1, 1]} : vector<8x96xf32> to vector<8x32xf32>
    %391 = arith.mulf %390, %354 : vector<8x32xf32>
    %392 = vector.extract_strided_slice %387 {offsets = [0, 0], sizes = [8, 32], strides = [1, 1]} : vector<8x96xf32> to vector<8x32xf32>
    %393 = arith.mulf %392, %389 : vector<8x32xf32>
    %394 = arith.addf %391, %393 : vector<8x32xf32>
    %395 = vector.extract_strided_slice %387 {offsets = [0, 64], sizes = [8, 32], strides = [1, 1]} : vector<8x96xf32> to vector<8x32xf32>
    %396 = math.tanh %394 : vector<8x32xf32>
    %397 = arith.mulf %395, %396 : vector<8x32xf32>
    %398 = arith.addf %376, %380 : vector<8x128xf32>
    %399 = vector.extract_strided_slice %398 {offsets = [0, 0], sizes = [8, 96], strides = [1, 1]} : vector<8x128xf32> to vector<8x96xf32>
    %400 = arith.negf %399 : vector<8x96xf32>
    %401 = math.exp %400 : vector<8x96xf32>
    %cst_79 = arith.constant 1.000000e+00 : f32
    %402 = vector.broadcast %cst_79 : f32 to vector<8x96xf32>
    %403 = arith.addf %402, %401 : vector<8x96xf32>
    %404 = arith.divf %402, %403 : vector<8x96xf32>
    %405 = vector.extract_strided_slice %398 {offsets = [0, 96], sizes = [8, 32], strides = [1, 1]} : vector<8x128xf32> to vector<8x32xf32>
    %406 = math.tanh %405 : vector<8x32xf32>
    %407 = vector.extract_strided_slice %404 {offsets = [0, 32], sizes = [8, 32], strides = [1, 1]} : vector<8x96xf32> to vector<8x32xf32>
    %408 = arith.mulf %407, %371 : vector<8x32xf32>
    %409 = vector.extract_strided_slice %404 {offsets = [0, 0], sizes = [8, 32], strides = [1, 1]} : vector<8x96xf32> to vector<8x32xf32>
    %410 = arith.mulf %409, %406 : vector<8x32xf32>
    %411 = arith.addf %408, %410 : vector<8x32xf32>
    %412 = vector.extract_strided_slice %404 {offsets = [0, 64], sizes = [8, 32], strides = [1, 1]} : vector<8x96xf32> to vector<8x32xf32>
    %413 = math.tanh %411 : vector<8x32xf32>
    %414 = arith.mulf %412, %413 : vector<8x32xf32>
    %c80_80 = arith.constant 80 : index
    %c0_81 = arith.constant 0 : index
    %415 = vector.load %arg5[%c80_80, %c0_81] : memref<128x256xf32, #tpu.memory_space<vmem>>, vector<8x128xf32>
    %c40_82 = arith.constant 40 : index
    %c128_83 = arith.constant 128 : index
    %416 = vector.load %arg5[%c40_82, %c128_83] : memref<128x256xf32, #tpu.memory_space<vmem>>, vector<8x128xf32>
    %417 = arith.truncf %397 : vector<8x32xf32> to vector<8x32xbf16>
    %cst_84 = arith.constant dense<0.000000e+00> : vector<8x128xf32>
    %418 = tpu.matmul %417, %8, %cst_84 {dimension_numbers = #tpu.dot_dimension_numbers<[1], [0], [0], [1], [0, 0, 1, 1], [], []>} : vector<8x32xbf16>, vector<32x128xbf16>, vector<8x128xf32> -> vector<8x128xf32>
    %419 = arith.truncf %414 : vector<8x32xf32> to vector<8x32xbf16>
    %cst_85 = arith.constant dense<0.000000e+00> : vector<8x128xf32>
    %420 = tpu.matmul %419, %10, %cst_85 {dimension_numbers = #tpu.dot_dimension_numbers<[1], [0], [0], [1], [0, 0, 1, 1], [], []>} : vector<8x32xbf16>, vector<32x128xbf16>, vector<8x128xf32> -> vector<8x128xf32>
    %421 = arith.addf %415, %418 : vector<8x128xf32>
    %422 = vector.extract_strided_slice %421 {offsets = [0, 0], sizes = [8, 96], strides = [1, 1]} : vector<8x128xf32> to vector<8x96xf32>
    %423 = arith.negf %422 : vector<8x96xf32>
    %424 = math.exp %423 : vector<8x96xf32>
    %cst_86 = arith.constant 1.000000e+00 : f32
    %425 = vector.broadcast %cst_86 : f32 to vector<8x96xf32>
    %426 = arith.addf %425, %424 : vector<8x96xf32>
    %427 = arith.divf %425, %426 : vector<8x96xf32>
    %428 = vector.extract_strided_slice %421 {offsets = [0, 96], sizes = [8, 32], strides = [1, 1]} : vector<8x128xf32> to vector<8x32xf32>
    %429 = math.tanh %428 : vector<8x32xf32>
    %430 = vector.extract_strided_slice %427 {offsets = [0, 32], sizes = [8, 32], strides = [1, 1]} : vector<8x96xf32> to vector<8x32xf32>
    %431 = arith.mulf %430, %394 : vector<8x32xf32>
    %432 = vector.extract_strided_slice %427 {offsets = [0, 0], sizes = [8, 32], strides = [1, 1]} : vector<8x96xf32> to vector<8x32xf32>
    %433 = arith.mulf %432, %429 : vector<8x32xf32>
    %434 = arith.addf %431, %433 : vector<8x32xf32>
    %435 = vector.extract_strided_slice %427 {offsets = [0, 64], sizes = [8, 32], strides = [1, 1]} : vector<8x96xf32> to vector<8x32xf32>
    %436 = math.tanh %434 : vector<8x32xf32>
    %437 = arith.mulf %435, %436 : vector<8x32xf32>
    %438 = arith.addf %416, %420 : vector<8x128xf32>
    %439 = vector.extract_strided_slice %438 {offsets = [0, 0], sizes = [8, 96], strides = [1, 1]} : vector<8x128xf32> to vector<8x96xf32>
    %440 = arith.negf %439 : vector<8x96xf32>
    %441 = math.exp %440 : vector<8x96xf32>
    %cst_87 = arith.constant 1.000000e+00 : f32
    %442 = vector.broadcast %cst_87 : f32 to vector<8x96xf32>
    %443 = arith.addf %442, %441 : vector<8x96xf32>
    %444 = arith.divf %442, %443 : vector<8x96xf32>
    %445 = vector.extract_strided_slice %438 {offsets = [0, 96], sizes = [8, 32], strides = [1, 1]} : vector<8x128xf32> to vector<8x32xf32>
    %446 = math.tanh %445 : vector<8x32xf32>
    %447 = vector.extract_strided_slice %444 {offsets = [0, 32], sizes = [8, 32], strides = [1, 1]} : vector<8x96xf32> to vector<8x32xf32>
    %448 = arith.mulf %447, %411 : vector<8x32xf32>
    %449 = vector.extract_strided_slice %444 {offsets = [0, 0], sizes = [8, 32], strides = [1, 1]} : vector<8x96xf32> to vector<8x32xf32>
    %450 = arith.mulf %449, %446 : vector<8x32xf32>
    %451 = arith.addf %448, %450 : vector<8x32xf32>
    %452 = vector.extract_strided_slice %444 {offsets = [0, 64], sizes = [8, 32], strides = [1, 1]} : vector<8x96xf32> to vector<8x32xf32>
    %453 = math.tanh %451 : vector<8x32xf32>
    %454 = arith.mulf %452, %453 : vector<8x32xf32>
    %c88_88 = arith.constant 88 : index
    %c0_89 = arith.constant 0 : index
    %455 = vector.load %arg5[%c88_88, %c0_89] : memref<128x256xf32, #tpu.memory_space<vmem>>, vector<8x128xf32>
    %c32_90 = arith.constant 32 : index
    %c128_91 = arith.constant 128 : index
    %456 = vector.load %arg5[%c32_90, %c128_91] : memref<128x256xf32, #tpu.memory_space<vmem>>, vector<8x128xf32>
    %457 = arith.truncf %437 : vector<8x32xf32> to vector<8x32xbf16>
    %cst_92 = arith.constant dense<0.000000e+00> : vector<8x128xf32>
    %458 = tpu.matmul %457, %8, %cst_92 {dimension_numbers = #tpu.dot_dimension_numbers<[1], [0], [0], [1], [0, 0, 1, 1], [], []>} : vector<8x32xbf16>, vector<32x128xbf16>, vector<8x128xf32> -> vector<8x128xf32>
    %459 = arith.truncf %454 : vector<8x32xf32> to vector<8x32xbf16>
    %cst_93 = arith.constant dense<0.000000e+00> : vector<8x128xf32>
    %460 = tpu.matmul %459, %10, %cst_93 {dimension_numbers = #tpu.dot_dimension_numbers<[1], [0], [0], [1], [0, 0, 1, 1], [], []>} : vector<8x32xbf16>, vector<32x128xbf16>, vector<8x128xf32> -> vector<8x128xf32>
    %461 = arith.addf %455, %458 : vector<8x128xf32>
    %462 = vector.extract_strided_slice %461 {offsets = [0, 0], sizes = [8, 96], strides = [1, 1]} : vector<8x128xf32> to vector<8x96xf32>
    %463 = arith.negf %462 : vector<8x96xf32>
    %464 = math.exp %463 : vector<8x96xf32>
    %cst_94 = arith.constant 1.000000e+00 : f32
    %465 = vector.broadcast %cst_94 : f32 to vector<8x96xf32>
    %466 = arith.addf %465, %464 : vector<8x96xf32>
    %467 = arith.divf %465, %466 : vector<8x96xf32>
    %468 = vector.extract_strided_slice %461 {offsets = [0, 96], sizes = [8, 32], strides = [1, 1]} : vector<8x128xf32> to vector<8x32xf32>
    %469 = math.tanh %468 : vector<8x32xf32>
    %470 = vector.extract_strided_slice %467 {offsets = [0, 32], sizes = [8, 32], strides = [1, 1]} : vector<8x96xf32> to vector<8x32xf32>
    %471 = arith.mulf %470, %434 : vector<8x32xf32>
    %472 = vector.extract_strided_slice %467 {offsets = [0, 0], sizes = [8, 32], strides = [1, 1]} : vector<8x96xf32> to vector<8x32xf32>
    %473 = arith.mulf %472, %469 : vector<8x32xf32>
    %474 = arith.addf %471, %473 : vector<8x32xf32>
    %475 = vector.extract_strided_slice %467 {offsets = [0, 64], sizes = [8, 32], strides = [1, 1]} : vector<8x96xf32> to vector<8x32xf32>
    %476 = math.tanh %474 : vector<8x32xf32>
    %477 = arith.mulf %475, %476 : vector<8x32xf32>
    %478 = arith.addf %456, %460 : vector<8x128xf32>
    %479 = vector.extract_strided_slice %478 {offsets = [0, 0], sizes = [8, 96], strides = [1, 1]} : vector<8x128xf32> to vector<8x96xf32>
    %480 = arith.negf %479 : vector<8x96xf32>
    %481 = math.exp %480 : vector<8x96xf32>
    %cst_95 = arith.constant 1.000000e+00 : f32
    %482 = vector.broadcast %cst_95 : f32 to vector<8x96xf32>
    %483 = arith.addf %482, %481 : vector<8x96xf32>
    %484 = arith.divf %482, %483 : vector<8x96xf32>
    %485 = vector.extract_strided_slice %478 {offsets = [0, 96], sizes = [8, 32], strides = [1, 1]} : vector<8x128xf32> to vector<8x32xf32>
    %486 = math.tanh %485 : vector<8x32xf32>
    %487 = vector.extract_strided_slice %484 {offsets = [0, 32], sizes = [8, 32], strides = [1, 1]} : vector<8x96xf32> to vector<8x32xf32>
    %488 = arith.mulf %487, %451 : vector<8x32xf32>
    %489 = vector.extract_strided_slice %484 {offsets = [0, 0], sizes = [8, 32], strides = [1, 1]} : vector<8x96xf32> to vector<8x32xf32>
    %490 = arith.mulf %489, %486 : vector<8x32xf32>
    %491 = arith.addf %488, %490 : vector<8x32xf32>
    %492 = vector.extract_strided_slice %484 {offsets = [0, 64], sizes = [8, 32], strides = [1, 1]} : vector<8x96xf32> to vector<8x32xf32>
    %493 = math.tanh %491 : vector<8x32xf32>
    %494 = arith.mulf %492, %493 : vector<8x32xf32>
    %c96_96 = arith.constant 96 : index
    %c0_97 = arith.constant 0 : index
    %495 = vector.load %arg5[%c96_96, %c0_97] : memref<128x256xf32, #tpu.memory_space<vmem>>, vector<8x128xf32>
    %c24_98 = arith.constant 24 : index
    %c128_99 = arith.constant 128 : index
    %496 = vector.load %arg5[%c24_98, %c128_99] : memref<128x256xf32, #tpu.memory_space<vmem>>, vector<8x128xf32>
    %497 = arith.truncf %477 : vector<8x32xf32> to vector<8x32xbf16>
    %cst_100 = arith.constant dense<0.000000e+00> : vector<8x128xf32>
    %498 = tpu.matmul %497, %8, %cst_100 {dimension_numbers = #tpu.dot_dimension_numbers<[1], [0], [0], [1], [0, 0, 1, 1], [], []>} : vector<8x32xbf16>, vector<32x128xbf16>, vector<8x128xf32> -> vector<8x128xf32>
    %499 = arith.truncf %494 : vector<8x32xf32> to vector<8x32xbf16>
    %cst_101 = arith.constant dense<0.000000e+00> : vector<8x128xf32>
    %500 = tpu.matmul %499, %10, %cst_101 {dimension_numbers = #tpu.dot_dimension_numbers<[1], [0], [0], [1], [0, 0, 1, 1], [], []>} : vector<8x32xbf16>, vector<32x128xbf16>, vector<8x128xf32> -> vector<8x128xf32>
    %501 = arith.addf %495, %498 : vector<8x128xf32>
    %502 = vector.extract_strided_slice %501 {offsets = [0, 0], sizes = [8, 96], strides = [1, 1]} : vector<8x128xf32> to vector<8x96xf32>
    %503 = arith.negf %502 : vector<8x96xf32>
    %504 = math.exp %503 : vector<8x96xf32>
    %cst_102 = arith.constant 1.000000e+00 : f32
    %505 = vector.broadcast %cst_102 : f32 to vector<8x96xf32>
    %506 = arith.addf %505, %504 : vector<8x96xf32>
    %507 = arith.divf %505, %506 : vector<8x96xf32>
    %508 = vector.extract_strided_slice %501 {offsets = [0, 96], sizes = [8, 32], strides = [1, 1]} : vector<8x128xf32> to vector<8x32xf32>
    %509 = math.tanh %508 : vector<8x32xf32>
    %510 = vector.extract_strided_slice %507 {offsets = [0, 32], sizes = [8, 32], strides = [1, 1]} : vector<8x96xf32> to vector<8x32xf32>
    %511 = arith.mulf %510, %474 : vector<8x32xf32>
    %512 = vector.extract_strided_slice %507 {offsets = [0, 0], sizes = [8, 32], strides = [1, 1]} : vector<8x96xf32> to vector<8x32xf32>
    %513 = arith.mulf %512, %509 : vector<8x32xf32>
    %514 = arith.addf %511, %513 : vector<8x32xf32>
    %515 = vector.extract_strided_slice %507 {offsets = [0, 64], sizes = [8, 32], strides = [1, 1]} : vector<8x96xf32> to vector<8x32xf32>
    %516 = math.tanh %514 : vector<8x32xf32>
    %517 = arith.mulf %515, %516 : vector<8x32xf32>
    %518 = arith.addf %496, %500 : vector<8x128xf32>
    %519 = vector.extract_strided_slice %518 {offsets = [0, 0], sizes = [8, 96], strides = [1, 1]} : vector<8x128xf32> to vector<8x96xf32>
    %520 = arith.negf %519 : vector<8x96xf32>
    %521 = math.exp %520 : vector<8x96xf32>
    %cst_103 = arith.constant 1.000000e+00 : f32
    %522 = vector.broadcast %cst_103 : f32 to vector<8x96xf32>
    %523 = arith.addf %522, %521 : vector<8x96xf32>
    %524 = arith.divf %522, %523 : vector<8x96xf32>
    %525 = vector.extract_strided_slice %518 {offsets = [0, 96], sizes = [8, 32], strides = [1, 1]} : vector<8x128xf32> to vector<8x32xf32>
    %526 = math.tanh %525 : vector<8x32xf32>
    %527 = vector.extract_strided_slice %524 {offsets = [0, 32], sizes = [8, 32], strides = [1, 1]} : vector<8x96xf32> to vector<8x32xf32>
    %528 = arith.mulf %527, %491 : vector<8x32xf32>
    %529 = vector.extract_strided_slice %524 {offsets = [0, 0], sizes = [8, 32], strides = [1, 1]} : vector<8x96xf32> to vector<8x32xf32>
    %530 = arith.mulf %529, %526 : vector<8x32xf32>
    %531 = arith.addf %528, %530 : vector<8x32xf32>
    %532 = vector.extract_strided_slice %524 {offsets = [0, 64], sizes = [8, 32], strides = [1, 1]} : vector<8x96xf32> to vector<8x32xf32>
    %533 = math.tanh %531 : vector<8x32xf32>
    %534 = arith.mulf %532, %533 : vector<8x32xf32>
    %c104_104 = arith.constant 104 : index
    %c0_105 = arith.constant 0 : index
    %535 = vector.load %arg5[%c104_104, %c0_105] : memref<128x256xf32, #tpu.memory_space<vmem>>, vector<8x128xf32>
    %c16_106 = arith.constant 16 : index
    %c128_107 = arith.constant 128 : index
    %536 = vector.load %arg5[%c16_106, %c128_107] : memref<128x256xf32, #tpu.memory_space<vmem>>, vector<8x128xf32>
    %537 = arith.truncf %517 : vector<8x32xf32> to vector<8x32xbf16>
    %cst_108 = arith.constant dense<0.000000e+00> : vector<8x128xf32>
    %538 = tpu.matmul %537, %8, %cst_108 {dimension_numbers = #tpu.dot_dimension_numbers<[1], [0], [0], [1], [0, 0, 1, 1], [], []>} : vector<8x32xbf16>, vector<32x128xbf16>, vector<8x128xf32> -> vector<8x128xf32>
    %539 = arith.truncf %534 : vector<8x32xf32> to vector<8x32xbf16>
    %cst_109 = arith.constant dense<0.000000e+00> : vector<8x128xf32>
    %540 = tpu.matmul %539, %10, %cst_109 {dimension_numbers = #tpu.dot_dimension_numbers<[1], [0], [0], [1], [0, 0, 1, 1], [], []>} : vector<8x32xbf16>, vector<32x128xbf16>, vector<8x128xf32> -> vector<8x128xf32>
    %541 = arith.addf %535, %538 : vector<8x128xf32>
    %542 = vector.extract_strided_slice %541 {offsets = [0, 0], sizes = [8, 96], strides = [1, 1]} : vector<8x128xf32> to vector<8x96xf32>
    %543 = arith.negf %542 : vector<8x96xf32>
    %544 = math.exp %543 : vector<8x96xf32>
    %cst_110 = arith.constant 1.000000e+00 : f32
    %545 = vector.broadcast %cst_110 : f32 to vector<8x96xf32>
    %546 = arith.addf %545, %544 : vector<8x96xf32>
    %547 = arith.divf %545, %546 : vector<8x96xf32>
    %548 = vector.extract_strided_slice %541 {offsets = [0, 96], sizes = [8, 32], strides = [1, 1]} : vector<8x128xf32> to vector<8x32xf32>
    %549 = math.tanh %548 : vector<8x32xf32>
    %550 = vector.extract_strided_slice %547 {offsets = [0, 32], sizes = [8, 32], strides = [1, 1]} : vector<8x96xf32> to vector<8x32xf32>
    %551 = arith.mulf %550, %514 : vector<8x32xf32>
    %552 = vector.extract_strided_slice %547 {offsets = [0, 0], sizes = [8, 32], strides = [1, 1]} : vector<8x96xf32> to vector<8x32xf32>
    %553 = arith.mulf %552, %549 : vector<8x32xf32>
    %554 = arith.addf %551, %553 : vector<8x32xf32>
    %555 = vector.extract_strided_slice %547 {offsets = [0, 64], sizes = [8, 32], strides = [1, 1]} : vector<8x96xf32> to vector<8x32xf32>
    %556 = math.tanh %554 : vector<8x32xf32>
    %557 = arith.mulf %555, %556 : vector<8x32xf32>
    %558 = arith.addf %536, %540 : vector<8x128xf32>
    %559 = vector.extract_strided_slice %558 {offsets = [0, 0], sizes = [8, 96], strides = [1, 1]} : vector<8x128xf32> to vector<8x96xf32>
    %560 = arith.negf %559 : vector<8x96xf32>
    %561 = math.exp %560 : vector<8x96xf32>
    %cst_111 = arith.constant 1.000000e+00 : f32
    %562 = vector.broadcast %cst_111 : f32 to vector<8x96xf32>
    %563 = arith.addf %562, %561 : vector<8x96xf32>
    %564 = arith.divf %562, %563 : vector<8x96xf32>
    %565 = vector.extract_strided_slice %558 {offsets = [0, 96], sizes = [8, 32], strides = [1, 1]} : vector<8x128xf32> to vector<8x32xf32>
    %566 = math.tanh %565 : vector<8x32xf32>
    %567 = vector.extract_strided_slice %564 {offsets = [0, 32], sizes = [8, 32], strides = [1, 1]} : vector<8x96xf32> to vector<8x32xf32>
    %568 = arith.mulf %567, %531 : vector<8x32xf32>
    %569 = vector.extract_strided_slice %564 {offsets = [0, 0], sizes = [8, 32], strides = [1, 1]} : vector<8x96xf32> to vector<8x32xf32>
    %570 = arith.mulf %569, %566 : vector<8x32xf32>
    %571 = arith.addf %568, %570 : vector<8x32xf32>
    %572 = vector.extract_strided_slice %564 {offsets = [0, 64], sizes = [8, 32], strides = [1, 1]} : vector<8x96xf32> to vector<8x32xf32>
    %573 = math.tanh %571 : vector<8x32xf32>
    %574 = arith.mulf %572, %573 : vector<8x32xf32>
    %c112_112 = arith.constant 112 : index
    %c0_113 = arith.constant 0 : index
    %575 = vector.load %arg5[%c112_112, %c0_113] : memref<128x256xf32, #tpu.memory_space<vmem>>, vector<8x128xf32>
    %c8_114 = arith.constant 8 : index
    %c128_115 = arith.constant 128 : index
    %576 = vector.load %arg5[%c8_114, %c128_115] : memref<128x256xf32, #tpu.memory_space<vmem>>, vector<8x128xf32>
    %577 = arith.truncf %557 : vector<8x32xf32> to vector<8x32xbf16>
    %cst_116 = arith.constant dense<0.000000e+00> : vector<8x128xf32>
    %578 = tpu.matmul %577, %8, %cst_116 {dimension_numbers = #tpu.dot_dimension_numbers<[1], [0], [0], [1], [0, 0, 1, 1], [], []>} : vector<8x32xbf16>, vector<32x128xbf16>, vector<8x128xf32> -> vector<8x128xf32>
    %579 = arith.truncf %574 : vector<8x32xf32> to vector<8x32xbf16>
    %cst_117 = arith.constant dense<0.000000e+00> : vector<8x128xf32>
    %580 = tpu.matmul %579, %10, %cst_117 {dimension_numbers = #tpu.dot_dimension_numbers<[1], [0], [0], [1], [0, 0, 1, 1], [], []>} : vector<8x32xbf16>, vector<32x128xbf16>, vector<8x128xf32> -> vector<8x128xf32>
    %581 = arith.addf %575, %578 : vector<8x128xf32>
    %582 = vector.extract_strided_slice %581 {offsets = [0, 0], sizes = [8, 96], strides = [1, 1]} : vector<8x128xf32> to vector<8x96xf32>
    %583 = arith.negf %582 : vector<8x96xf32>
    %584 = math.exp %583 : vector<8x96xf32>
    %cst_118 = arith.constant 1.000000e+00 : f32
    %585 = vector.broadcast %cst_118 : f32 to vector<8x96xf32>
    %586 = arith.addf %585, %584 : vector<8x96xf32>
    %587 = arith.divf %585, %586 : vector<8x96xf32>
    %588 = vector.extract_strided_slice %581 {offsets = [0, 96], sizes = [8, 32], strides = [1, 1]} : vector<8x128xf32> to vector<8x32xf32>
    %589 = math.tanh %588 : vector<8x32xf32>
    %590 = vector.extract_strided_slice %587 {offsets = [0, 32], sizes = [8, 32], strides = [1, 1]} : vector<8x96xf32> to vector<8x32xf32>
    %591 = arith.mulf %590, %554 : vector<8x32xf32>
    %592 = vector.extract_strided_slice %587 {offsets = [0, 0], sizes = [8, 32], strides = [1, 1]} : vector<8x96xf32> to vector<8x32xf32>
    %593 = arith.mulf %592, %589 : vector<8x32xf32>
    %594 = arith.addf %591, %593 : vector<8x32xf32>
    %595 = vector.extract_strided_slice %587 {offsets = [0, 64], sizes = [8, 32], strides = [1, 1]} : vector<8x96xf32> to vector<8x32xf32>
    %596 = math.tanh %594 : vector<8x32xf32>
    %597 = arith.mulf %595, %596 : vector<8x32xf32>
    %598 = arith.addf %576, %580 : vector<8x128xf32>
    %599 = vector.extract_strided_slice %598 {offsets = [0, 0], sizes = [8, 96], strides = [1, 1]} : vector<8x128xf32> to vector<8x96xf32>
    %600 = arith.negf %599 : vector<8x96xf32>
    %601 = math.exp %600 : vector<8x96xf32>
    %cst_119 = arith.constant 1.000000e+00 : f32
    %602 = vector.broadcast %cst_119 : f32 to vector<8x96xf32>
    %603 = arith.addf %602, %601 : vector<8x96xf32>
    %604 = arith.divf %602, %603 : vector<8x96xf32>
    %605 = vector.extract_strided_slice %598 {offsets = [0, 96], sizes = [8, 32], strides = [1, 1]} : vector<8x128xf32> to vector<8x32xf32>
    %606 = math.tanh %605 : vector<8x32xf32>
    %607 = vector.extract_strided_slice %604 {offsets = [0, 32], sizes = [8, 32], strides = [1, 1]} : vector<8x96xf32> to vector<8x32xf32>
    %608 = arith.mulf %607, %571 : vector<8x32xf32>
    %609 = vector.extract_strided_slice %604 {offsets = [0, 0], sizes = [8, 32], strides = [1, 1]} : vector<8x96xf32> to vector<8x32xf32>
    %610 = arith.mulf %609, %606 : vector<8x32xf32>
    %611 = arith.addf %608, %610 : vector<8x32xf32>
    %612 = vector.extract_strided_slice %604 {offsets = [0, 64], sizes = [8, 32], strides = [1, 1]} : vector<8x96xf32> to vector<8x32xf32>
    %613 = math.tanh %611 : vector<8x32xf32>
    %614 = arith.mulf %612, %613 : vector<8x32xf32>
    %c120_120 = arith.constant 120 : index
    %c0_121 = arith.constant 0 : index
    %615 = vector.load %arg5[%c120_120, %c0_121] : memref<128x256xf32, #tpu.memory_space<vmem>>, vector<8x128xf32>
    %c0_122 = arith.constant 0 : index
    %c128_123 = arith.constant 128 : index
    %616 = vector.load %arg5[%c0_122, %c128_123] : memref<128x256xf32, #tpu.memory_space<vmem>>, vector<8x128xf32>
    %617 = arith.truncf %597 : vector<8x32xf32> to vector<8x32xbf16>
    %cst_124 = arith.constant dense<0.000000e+00> : vector<8x128xf32>
    %618 = tpu.matmul %617, %8, %cst_124 {dimension_numbers = #tpu.dot_dimension_numbers<[1], [0], [0], [1], [0, 0, 1, 1], [], []>} : vector<8x32xbf16>, vector<32x128xbf16>, vector<8x128xf32> -> vector<8x128xf32>
    %619 = arith.truncf %614 : vector<8x32xf32> to vector<8x32xbf16>
    %cst_125 = arith.constant dense<0.000000e+00> : vector<8x128xf32>
    %620 = tpu.matmul %619, %10, %cst_125 {dimension_numbers = #tpu.dot_dimension_numbers<[1], [0], [0], [1], [0, 0, 1, 1], [], []>} : vector<8x32xbf16>, vector<32x128xbf16>, vector<8x128xf32> -> vector<8x128xf32>
    %621 = arith.addf %615, %618 : vector<8x128xf32>
    %622 = vector.extract_strided_slice %621 {offsets = [0, 0], sizes = [8, 96], strides = [1, 1]} : vector<8x128xf32> to vector<8x96xf32>
    %623 = arith.negf %622 : vector<8x96xf32>
    %624 = math.exp %623 : vector<8x96xf32>
    %cst_126 = arith.constant 1.000000e+00 : f32
    %625 = vector.broadcast %cst_126 : f32 to vector<8x96xf32>
    %626 = arith.addf %625, %624 : vector<8x96xf32>
    %627 = arith.divf %625, %626 : vector<8x96xf32>
    %628 = vector.extract_strided_slice %621 {offsets = [0, 96], sizes = [8, 32], strides = [1, 1]} : vector<8x128xf32> to vector<8x32xf32>
    %629 = math.tanh %628 : vector<8x32xf32>
    %630 = vector.extract_strided_slice %627 {offsets = [0, 32], sizes = [8, 32], strides = [1, 1]} : vector<8x96xf32> to vector<8x32xf32>
    %631 = arith.mulf %630, %594 : vector<8x32xf32>
    %632 = vector.extract_strided_slice %627 {offsets = [0, 0], sizes = [8, 32], strides = [1, 1]} : vector<8x96xf32> to vector<8x32xf32>
    %633 = arith.mulf %632, %629 : vector<8x32xf32>
    %634 = arith.addf %631, %633 : vector<8x32xf32>
    %635 = vector.extract_strided_slice %627 {offsets = [0, 64], sizes = [8, 32], strides = [1, 1]} : vector<8x96xf32> to vector<8x32xf32>
    %636 = math.tanh %634 : vector<8x32xf32>
    %637 = arith.mulf %635, %636 : vector<8x32xf32>
    %638 = arith.addf %616, %620 : vector<8x128xf32>
    %639 = vector.extract_strided_slice %638 {offsets = [0, 0], sizes = [8, 96], strides = [1, 1]} : vector<8x128xf32> to vector<8x96xf32>
    %640 = arith.negf %639 : vector<8x96xf32>
    %641 = math.exp %640 : vector<8x96xf32>
    %cst_127 = arith.constant 1.000000e+00 : f32
    %642 = vector.broadcast %cst_127 : f32 to vector<8x96xf32>
    %643 = arith.addf %642, %641 : vector<8x96xf32>
    %644 = arith.divf %642, %643 : vector<8x96xf32>
    %645 = vector.extract_strided_slice %638 {offsets = [0, 96], sizes = [8, 32], strides = [1, 1]} : vector<8x128xf32> to vector<8x32xf32>
    %646 = math.tanh %645 : vector<8x32xf32>
    %647 = vector.extract_strided_slice %644 {offsets = [0, 32], sizes = [8, 32], strides = [1, 1]} : vector<8x96xf32> to vector<8x32xf32>
    %648 = arith.mulf %647, %611 : vector<8x32xf32>
    %649 = vector.extract_strided_slice %644 {offsets = [0, 0], sizes = [8, 32], strides = [1, 1]} : vector<8x96xf32> to vector<8x32xf32>
    %650 = arith.mulf %649, %646 : vector<8x32xf32>
    %651 = arith.addf %648, %650 : vector<8x32xf32>
    %652 = vector.extract_strided_slice %644 {offsets = [0, 64], sizes = [8, 32], strides = [1, 1]} : vector<8x96xf32> to vector<8x32xf32>
    %653 = math.tanh %651 : vector<8x32xf32>
    %654 = arith.mulf %652, %653 : vector<8x32xf32>
    %655 = tpu.concatenate %37, %77, %117, %157, %197, %237, %277, %317, %357, %397, %437, %477, %517, %557, %597, %637 in 0 : vector<8x32xf32>, vector<8x32xf32>, vector<8x32xf32>, vector<8x32xf32>, vector<8x32xf32>, vector<8x32xf32>, vector<8x32xf32>, vector<8x32xf32>, vector<8x32xf32>, vector<8x32xf32>, vector<8x32xf32>, vector<8x32xf32>, vector<8x32xf32>, vector<8x32xf32>, vector<8x32xf32>, vector<8x32xf32> -> vector<128x32xf32>
    %656 = tpu.concatenate %654, %614, %574, %534, %494, %454, %414, %374, %334, %294, %254, %214, %174, %134, %94, %54 in 0 : vector<8x32xf32>, vector<8x32xf32>, vector<8x32xf32>, vector<8x32xf32>, vector<8x32xf32>, vector<8x32xf32>, vector<8x32xf32>, vector<8x32xf32>, vector<8x32xf32>, vector<8x32xf32>, vector<8x32xf32>, vector<8x32xf32>, vector<8x32xf32>, vector<8x32xf32>, vector<8x32xf32>, vector<8x32xf32> -> vector<128x32xf32>
    %657 = tpu.concatenate %655, %656 in 1 : vector<128x32xf32>, vector<128x32xf32> -> vector<128x64xf32>
    %658 = arith.truncf %657 : vector<128x64xf32> to vector<128x64xbf16>
    %c0_128 = arith.constant 0 : index
    %c0_129 = arith.constant 0 : index
    %659 = vector.load %arg4[%c0_128, %c0_129] : memref<128x64xbf16, #tpu.memory_space<vmem>>, vector<128x64xbf16>
    tpu.vector_store %arg4[%c0_128, %c0_129], %658 {strides = array<i32>} : memref<128x64xbf16, #tpu.memory_space<vmem>>, vector<128x64xbf16>,
    return
  }
}

module attributes {stable_mosaic.version = 11 : i64} {
  func.func @_bilstm_layer_kernel(%arg0: memref<128x32xbf16, #tpu.memory_space<vmem>>, %arg1: memref<32x256xbf16, #tpu.memory_space<vmem>>, %arg2: memref<2x32x128xbf16, #tpu.memory_space<vmem>>, %arg3: memref<1x256xf32, #tpu.memory_space<vmem>>, %arg4: memref<128x64xbf16, #tpu.memory_space<vmem>>, %arg5: memref<128x256xf32, #tpu.memory_space<vmem>>) attributes {dimension_semantics = [], scalar_prefetch = 0 : i64, scratch_operands = 1 : i64, tpu.core_type = #tpu.core_type<tc>} {
    %c0 = arith.constant 0 : index
    %c0_0 = arith.constant 0 : index
    %0 = vector.load %arg0[%c0, %c0_0] : memref<128x32xbf16, #tpu.memory_space<vmem>>, vector<128x32xbf16>
    %c0_1 = arith.constant 0 : index
    %c0_2 = arith.constant 0 : index
    %1 = vector.load %arg1[%c0_1, %c0_2] : memref<32x256xbf16, #tpu.memory_space<vmem>>, vector<32x256xbf16>
    %cst = arith.constant dense<0.000000e+00> : vector<128x256xf32>
    %2 = tpu.matmul %0, %1, %cst {dimension_numbers = #tpu.dot_dimension_numbers<[1], [0], [0], [1], [0, 0, 1, 1], [], []>} : vector<128x32xbf16>, vector<32x256xbf16>, vector<128x256xf32> -> vector<128x256xf32>
    %c0_3 = arith.constant 0 : index
    %c0_4 = arith.constant 0 : index
    %3 = vector.load %arg3[%c0_3, %c0_4] : memref<1x256xf32, #tpu.memory_space<vmem>>, vector<1x256xf32>
    %4 = vector.broadcast %3 : vector<1x256xf32> to vector<128x256xf32>
    %5 = arith.addf %2, %4 : vector<128x256xf32>
    %c0_5 = arith.constant 0 : index
    %c0_6 = arith.constant 0 : index
    %6 = vector.load %arg5[%c0_5, %c0_6] : memref<128x256xf32, #tpu.memory_space<vmem>>, vector<128x256xf32>
    tpu.vector_store %arg5[%c0_5, %c0_6], %5 {strides = array<i32>} : memref<128x256xf32, #tpu.memory_space<vmem>>, vector<128x256xf32>,
    %c0_7 = arith.constant 0 : index
    %c0_8 = arith.constant 0 : index
    %c0_9 = arith.constant 0 : index
    %7 = vector.load %arg2[%c0_7, %c0_8, %c0_9] : memref<2x32x128xbf16, #tpu.memory_space<vmem>>, vector<1x32x128xbf16>
    %8 = vector.shape_cast %7 : vector<1x32x128xbf16> to vector<32x128xbf16>
    %c1 = arith.constant 1 : index
    %c0_10 = arith.constant 0 : index
    %c0_11 = arith.constant 0 : index
    %9 = vector.load %arg2[%c1, %c0_10, %c0_11] : memref<2x32x128xbf16, #tpu.memory_space<vmem>>, vector<1x32x128xbf16>
    %10 = vector.shape_cast %9 : vector<1x32x128xbf16> to vector<32x128xbf16>
    %cst_12 = arith.constant 0.000000e+00 : f32
    %11 = vector.broadcast %cst_12 : f32 to vector<8x32xf32>
    %cst_13 = arith.constant 0.000000e+00 : f32
    %12 = vector.broadcast %cst_13 : f32 to vector<8x32xf32>
    %cst_14 = arith.constant 0.000000e+00 : f32
    %13 = vector.broadcast %cst_14 : f32 to vector<8x32xf32>
    %cst_15 = arith.constant 0.000000e+00 : f32
    %14 = vector.broadcast %cst_15 : f32 to vector<8x32xf32>
    %c0_16 = arith.constant 0 : index
    %c0_17 = arith.constant 0 : index
    %15 = vector.load %arg5[%c0_16, %c0_17] : memref<128x256xf32, #tpu.memory_space<vmem>>, vector<8x128xf32>
    %c120 = arith.constant 120 : index
    %c128 = arith.constant 128 : index
    %16 = vector.load %arg5[%c120, %c128] : memref<128x256xf32, #tpu.memory_space<vmem>>, vector<8x128xf32>
    %17 = arith.truncf %11 : vector<8x32xf32> to vector<8x32xbf16>
    %cst_18 = arith.constant dense<0.000000e+00> : vector<8x128xf32>
    %18 = tpu.matmul %17, %8, %cst_18 {dimension_numbers = #tpu.dot_dimension_numbers<[1], [0], [0], [1], [0, 0, 1, 1], [], []>} : vector<8x32xbf16>, vector<32x128xbf16>, vector<8x128xf32> -> vector<8x128xf32>
    %19 = arith.truncf %13 : vector<8x32xf32> to vector<8x32xbf16>
    %cst_19 = arith.constant dense<0.000000e+00> : vector<8x128xf32>
    %20 = tpu.matmul %19, %10, %cst_19 {dimension_numbers = #tpu.dot_dimension_numbers<[1], [0], [0], [1], [0, 0, 1, 1], [], []>} : vector<8x32xbf16>, vector<32x128xbf16>, vector<8x128xf32> -> vector<8x128xf32>
    %21 = arith.addf %15, %18 : vector<8x128xf32>
    %22 = vector.extract_strided_slice %21 {offsets = [0, 0], sizes = [8, 96], strides = [1, 1]} : vector<8x128xf32> to vector<8x96xf32>
    %23 = arith.negf %22 : vector<8x96xf32>
    %24 = math.exp %23 : vector<8x96xf32>
    %cst_20 = arith.constant 1.000000e+00 : f32
    %25 = vector.broadcast %cst_20 : f32 to vector<8x96xf32>
    %26 = arith.addf %25, %24 : vector<8x96xf32>
    %27 = arith.divf %25, %26 : vector<8x96xf32>
    %28 = vector.extract_strided_slice %21 {offsets = [0, 96], sizes = [8, 32], strides = [1, 1]} : vector<8x128xf32> to vector<8x32xf32>
    %29 = math.tanh %28 : vector<8x32xf32>
    %30 = vector.extract_strided_slice %27 {offsets = [0, 32], sizes = [8, 32], strides = [1, 1]} : vector<8x96xf32> to vector<8x32xf32>
    %31 = arith.mulf %30, %12 : vector<8x32xf32>
    %32 = vector.extract_strided_slice %27 {offsets = [0, 0], sizes = [8, 32], strides = [1, 1]} : vector<8x96xf32> to vector<8x32xf32>
    %33 = arith.mulf %32, %29 : vector<8x32xf32>
    %34 = arith.addf %31, %33 : vector<8x32xf32>
    %35 = vector.extract_strided_slice %27 {offsets = [0, 64], sizes = [8, 32], strides = [1, 1]} : vector<8x96xf32> to vector<8x32xf32>
    %36 = math.tanh %34 : vector<8x32xf32>
    %37 = arith.mulf %35, %36 : vector<8x32xf32>
    %38 = arith.addf %16, %20 : vector<8x128xf32>
    %39 = vector.extract_strided_slice %38 {offsets = [0, 0], sizes = [8, 96], strides = [1, 1]} : vector<8x128xf32> to vector<8x96xf32>
    %40 = arith.negf %39 : vector<8x96xf32>
    %41 = math.exp %40 : vector<8x96xf32>
    %cst_21 = arith.constant 1.000000e+00 : f32
    %42 = vector.broadcast %cst_21 : f32 to vector<8x96xf32>
    %43 = arith.addf %42, %41 : vector<8x96xf32>
    %44 = arith.divf %42, %43 : vector<8x96xf32>
    %45 = vector.extract_strided_slice %38 {offsets = [0, 96], sizes = [8, 32], strides = [1, 1]} : vector<8x128xf32> to vector<8x32xf32>
    %46 = math.tanh %45 : vector<8x32xf32>
    %47 = vector.extract_strided_slice %44 {offsets = [0, 32], sizes = [8, 32], strides = [1, 1]} : vector<8x96xf32> to vector<8x32xf32>
    %48 = arith.mulf %47, %14 : vector<8x32xf32>
    %49 = vector.extract_strided_slice %44 {offsets = [0, 0], sizes = [8, 32], strides = [1, 1]} : vector<8x96xf32> to vector<8x32xf32>
    %50 = arith.mulf %49, %46 : vector<8x32xf32>
    %51 = arith.addf %48, %50 : vector<8x32xf32>
    %52 = vector.extract_strided_slice %44 {offsets = [0, 64], sizes = [8, 32], strides = [1, 1]} : vector<8x96xf32> to vector<8x32xf32>
    %53 = math.tanh %51 : vector<8x32xf32>
    %54 = arith.mulf %52, %53 : vector<8x32xf32>
    %c8 = arith.constant 8 : index
    %c0_22 = arith.constant 0 : index
    %55 = vector.load %arg5[%c8, %c0_22] : memref<128x256xf32, #tpu.memory_space<vmem>>, vector<8x128xf32>
    %c112 = arith.constant 112 : index
    %c128_23 = arith.constant 128 : index
    %56 = vector.load %arg5[%c112, %c128_23] : memref<128x256xf32, #tpu.memory_space<vmem>>, vector<8x128xf32>
    %57 = arith.truncf %37 : vector<8x32xf32> to vector<8x32xbf16>
    %cst_24 = arith.constant dense<0.000000e+00> : vector<8x128xf32>
    %58 = tpu.matmul %57, %8, %cst_24 {dimension_numbers = #tpu.dot_dimension_numbers<[1], [0], [0], [1], [0, 0, 1, 1], [], []>} : vector<8x32xbf16>, vector<32x128xbf16>, vector<8x128xf32> -> vector<8x128xf32>
    %59 = arith.truncf %54 : vector<8x32xf32> to vector<8x32xbf16>
    %cst_25 = arith.constant dense<0.000000e+00> : vector<8x128xf32>
    %60 = tpu.matmul %59, %10, %cst_25 {dimension_numbers = #tpu.dot_dimension_numbers<[1], [0], [0], [1], [0, 0, 1, 1], [], []>} : vector<8x32xbf16>, vector<32x128xbf16>, vector<8x128xf32> -> vector<8x128xf32>
    %61 = arith.addf %55, %58 : vector<8x128xf32>
    %62 = vector.extract_strided_slice %61 {offsets = [0, 0], sizes = [8, 96], strides = [1, 1]} : vector<8x128xf32> to vector<8x96xf32>
    %63 = arith.negf %62 : vector<8x96xf32>
    %64 = math.exp %63 : vector<8x96xf32>
    %cst_26 = arith.constant 1.000000e+00 : f32
    %65 = vector.broadcast %cst_26 : f32 to vector<8x96xf32>
    %66 = arith.addf %65, %64 : vector<8x96xf32>
    %67 = arith.divf %65, %66 : vector<8x96xf32>
    %68 = vector.extract_strided_slice %61 {offsets = [0, 96], sizes = [8, 32], strides = [1, 1]} : vector<8x128xf32> to vector<8x32xf32>
    %69 = math.tanh %68 : vector<8x32xf32>
    %70 = vector.extract_strided_slice %67 {offsets = [0, 32], sizes = [8, 32], strides = [1, 1]} : vector<8x96xf32> to vector<8x32xf32>
    %71 = arith.mulf %70, %34 : vector<8x32xf32>
    %72 = vector.extract_strided_slice %67 {offsets = [0, 0], sizes = [8, 32], strides = [1, 1]} : vector<8x96xf32> to vector<8x32xf32>
    %73 = arith.mulf %72, %69 : vector<8x32xf32>
    %74 = arith.addf %71, %73 : vector<8x32xf32>
    %75 = vector.extract_strided_slice %67 {offsets = [0, 64], sizes = [8, 32], strides = [1, 1]} : vector<8x96xf32> to vector<8x32xf32>
    %76 = math.tanh %74 : vector<8x32xf32>
    %77 = arith.mulf %75, %76 : vector<8x32xf32>
    %78 = arith.addf %56, %60 : vector<8x128xf32>
    %79 = vector.extract_strided_slice %78 {offsets = [0, 0], sizes = [8, 96], strides = [1, 1]} : vector<8x128xf32> to vector<8x96xf32>
    %80 = arith.negf %79 : vector<8x96xf32>
    %81 = math.exp %80 : vector<8x96xf32>
    %cst_27 = arith.constant 1.000000e+00 : f32
    %82 = vector.broadcast %cst_27 : f32 to vector<8x96xf32>
    %83 = arith.addf %82, %81 : vector<8x96xf32>
    %84 = arith.divf %82, %83 : vector<8x96xf32>
    %85 = vector.extract_strided_slice %78 {offsets = [0, 96], sizes = [8, 32], strides = [1, 1]} : vector<8x128xf32> to vector<8x32xf32>
    %86 = math.tanh %85 : vector<8x32xf32>
    %87 = vector.extract_strided_slice %84 {offsets = [0, 32], sizes = [8, 32], strides = [1, 1]} : vector<8x96xf32> to vector<8x32xf32>
    %88 = arith.mulf %87, %51 : vector<8x32xf32>
    %89 = vector.extract_strided_slice %84 {offsets = [0, 0], sizes = [8, 32], strides = [1, 1]} : vector<8x96xf32> to vector<8x32xf32>
    %90 = arith.mulf %89, %86 : vector<8x32xf32>
    %91 = arith.addf %88, %90 : vector<8x32xf32>
    %92 = vector.extract_strided_slice %84 {offsets = [0, 64], sizes = [8, 32], strides = [1, 1]} : vector<8x96xf32> to vector<8x32xf32>
    %93 = math.tanh %91 : vector<8x32xf32>
    %94 = arith.mulf %92, %93 : vector<8x32xf32>
    %c16 = arith.constant 16 : index
    %c0_28 = arith.constant 0 : index
    %95 = vector.load %arg5[%c16, %c0_28] : memref<128x256xf32, #tpu.memory_space<vmem>>, vector<8x128xf32>
    %c104 = arith.constant 104 : index
    %c128_29 = arith.constant 128 : index
    %96 = vector.load %arg5[%c104, %c128_29] : memref<128x256xf32, #tpu.memory_space<vmem>>, vector<8x128xf32>
    %97 = arith.truncf %77 : vector<8x32xf32> to vector<8x32xbf16>
    %cst_30 = arith.constant dense<0.000000e+00> : vector<8x128xf32>
    %98 = tpu.matmul %97, %8, %cst_30 {dimension_numbers = #tpu.dot_dimension_numbers<[1], [0], [0], [1], [0, 0, 1, 1], [], []>} : vector<8x32xbf16>, vector<32x128xbf16>, vector<8x128xf32> -> vector<8x128xf32>
    %99 = arith.truncf %94 : vector<8x32xf32> to vector<8x32xbf16>
    %cst_31 = arith.constant dense<0.000000e+00> : vector<8x128xf32>
    %100 = tpu.matmul %99, %10, %cst_31 {dimension_numbers = #tpu.dot_dimension_numbers<[1], [0], [0], [1], [0, 0, 1, 1], [], []>} : vector<8x32xbf16>, vector<32x128xbf16>, vector<8x128xf32> -> vector<8x128xf32>
    %101 = arith.addf %95, %98 : vector<8x128xf32>
    %102 = vector.extract_strided_slice %101 {offsets = [0, 0], sizes = [8, 96], strides = [1, 1]} : vector<8x128xf32> to vector<8x96xf32>
    %103 = arith.negf %102 : vector<8x96xf32>
    %104 = math.exp %103 : vector<8x96xf32>
    %cst_32 = arith.constant 1.000000e+00 : f32
    %105 = vector.broadcast %cst_32 : f32 to vector<8x96xf32>
    %106 = arith.addf %105, %104 : vector<8x96xf32>
    %107 = arith.divf %105, %106 : vector<8x96xf32>
    %108 = vector.extract_strided_slice %101 {offsets = [0, 96], sizes = [8, 32], strides = [1, 1]} : vector<8x128xf32> to vector<8x32xf32>
    %109 = math.tanh %108 : vector<8x32xf32>
    %110 = vector.extract_strided_slice %107 {offsets = [0, 32], sizes = [8, 32], strides = [1, 1]} : vector<8x96xf32> to vector<8x32xf32>
    %111 = arith.mulf %110, %74 : vector<8x32xf32>
    %112 = vector.extract_strided_slice %107 {offsets = [0, 0], sizes = [8, 32], strides = [1, 1]} : vector<8x96xf32> to vector<8x32xf32>
    %113 = arith.mulf %112, %109 : vector<8x32xf32>
    %114 = arith.addf %111, %113 : vector<8x32xf32>
    %115 = vector.extract_strided_slice %107 {offsets = [0, 64], sizes = [8, 32], strides = [1, 1]} : vector<8x96xf32> to vector<8x32xf32>
    %116 = math.tanh %114 : vector<8x32xf32>
    %117 = arith.mulf %115, %116 : vector<8x32xf32>
    %118 = arith.addf %96, %100 : vector<8x128xf32>
    %119 = vector.extract_strided_slice %118 {offsets = [0, 0], sizes = [8, 96], strides = [1, 1]} : vector<8x128xf32> to vector<8x96xf32>
    %120 = arith.negf %119 : vector<8x96xf32>
    %121 = math.exp %120 : vector<8x96xf32>
    %cst_33 = arith.constant 1.000000e+00 : f32
    %122 = vector.broadcast %cst_33 : f32 to vector<8x96xf32>
    %123 = arith.addf %122, %121 : vector<8x96xf32>
    %124 = arith.divf %122, %123 : vector<8x96xf32>
    %125 = vector.extract_strided_slice %118 {offsets = [0, 96], sizes = [8, 32], strides = [1, 1]} : vector<8x128xf32> to vector<8x32xf32>
    %126 = math.tanh %125 : vector<8x32xf32>
    %127 = vector.extract_strided_slice %124 {offsets = [0, 32], sizes = [8, 32], strides = [1, 1]} : vector<8x96xf32> to vector<8x32xf32>
    %128 = arith.mulf %127, %91 : vector<8x32xf32>
    %129 = vector.extract_strided_slice %124 {offsets = [0, 0], sizes = [8, 32], strides = [1, 1]} : vector<8x96xf32> to vector<8x32xf32>
    %130 = arith.mulf %129, %126 : vector<8x32xf32>
    %131 = arith.addf %128, %130 : vector<8x32xf32>
    %132 = vector.extract_strided_slice %124 {offsets = [0, 64], sizes = [8, 32], strides = [1, 1]} : vector<8x96xf32> to vector<8x32xf32>
    %133 = math.tanh %131 : vector<8x32xf32>
    %134 = arith.mulf %132, %133 : vector<8x32xf32>
    %c24 = arith.constant 24 : index
    %c0_34 = arith.constant 0 : index
    %135 = vector.load %arg5[%c24, %c0_34] : memref<128x256xf32, #tpu.memory_space<vmem>>, vector<8x128xf32>
    %c96 = arith.constant 96 : index
    %c128_35 = arith.constant 128 : index
    %136 = vector.load %arg5[%c96, %c128_35] : memref<128x256xf32, #tpu.memory_space<vmem>>, vector<8x128xf32>
    %137 = arith.truncf %117 : vector<8x32xf32> to vector<8x32xbf16>
    %cst_36 = arith.constant dense<0.000000e+00> : vector<8x128xf32>
    %138 = tpu.matmul %137, %8, %cst_36 {dimension_numbers = #tpu.dot_dimension_numbers<[1], [0], [0], [1], [0, 0, 1, 1], [], []>} : vector<8x32xbf16>, vector<32x128xbf16>, vector<8x128xf32> -> vector<8x128xf32>
    %139 = arith.truncf %134 : vector<8x32xf32> to vector<8x32xbf16>
    %cst_37 = arith.constant dense<0.000000e+00> : vector<8x128xf32>
    %140 = tpu.matmul %139, %10, %cst_37 {dimension_numbers = #tpu.dot_dimension_numbers<[1], [0], [0], [1], [0, 0, 1, 1], [], []>} : vector<8x32xbf16>, vector<32x128xbf16>, vector<8x128xf32> -> vector<8x128xf32>
    %141 = arith.addf %135, %138 : vector<8x128xf32>
    %142 = vector.extract_strided_slice %141 {offsets = [0, 0], sizes = [8, 96], strides = [1, 1]} : vector<8x128xf32> to vector<8x96xf32>
    %143 = arith.negf %142 : vector<8x96xf32>
    %144 = math.exp %143 : vector<8x96xf32>
    %cst_38 = arith.constant 1.000000e+00 : f32
    %145 = vector.broadcast %cst_38 : f32 to vector<8x96xf32>
    %146 = arith.addf %145, %144 : vector<8x96xf32>
    %147 = arith.divf %145, %146 : vector<8x96xf32>
    %148 = vector.extract_strided_slice %141 {offsets = [0, 96], sizes = [8, 32], strides = [1, 1]} : vector<8x128xf32> to vector<8x32xf32>
    %149 = math.tanh %148 : vector<8x32xf32>
    %150 = vector.extract_strided_slice %147 {offsets = [0, 32], sizes = [8, 32], strides = [1, 1]} : vector<8x96xf32> to vector<8x32xf32>
    %151 = arith.mulf %150, %114 : vector<8x32xf32>
    %152 = vector.extract_strided_slice %147 {offsets = [0, 0], sizes = [8, 32], strides = [1, 1]} : vector<8x96xf32> to vector<8x32xf32>
    %153 = arith.mulf %152, %149 : vector<8x32xf32>
    %154 = arith.addf %151, %153 : vector<8x32xf32>
    %155 = vector.extract_strided_slice %147 {offsets = [0, 64], sizes = [8, 32], strides = [1, 1]} : vector<8x96xf32> to vector<8x32xf32>
    %156 = math.tanh %154 : vector<8x32xf32>
    %157 = arith.mulf %155, %156 : vector<8x32xf32>
    %158 = arith.addf %136, %140 : vector<8x128xf32>
    %159 = vector.extract_strided_slice %158 {offsets = [0, 0], sizes = [8, 96], strides = [1, 1]} : vector<8x128xf32> to vector<8x96xf32>
    %160 = arith.negf %159 : vector<8x96xf32>
    %161 = math.exp %160 : vector<8x96xf32>
    %cst_39 = arith.constant 1.000000e+00 : f32
    %162 = vector.broadcast %cst_39 : f32 to vector<8x96xf32>
    %163 = arith.addf %162, %161 : vector<8x96xf32>
    %164 = arith.divf %162, %163 : vector<8x96xf32>
    %165 = vector.extract_strided_slice %158 {offsets = [0, 96], sizes = [8, 32], strides = [1, 1]} : vector<8x128xf32> to vector<8x32xf32>
    %166 = math.tanh %165 : vector<8x32xf32>
    %167 = vector.extract_strided_slice %164 {offsets = [0, 32], sizes = [8, 32], strides = [1, 1]} : vector<8x96xf32> to vector<8x32xf32>
    %168 = arith.mulf %167, %131 : vector<8x32xf32>
    %169 = vector.extract_strided_slice %164 {offsets = [0, 0], sizes = [8, 32], strides = [1, 1]} : vector<8x96xf32> to vector<8x32xf32>
    %170 = arith.mulf %169, %166 : vector<8x32xf32>
    %171 = arith.addf %168, %170 : vector<8x32xf32>
    %172 = vector.extract_strided_slice %164 {offsets = [0, 64], sizes = [8, 32], strides = [1, 1]} : vector<8x96xf32> to vector<8x32xf32>
    %173 = math.tanh %171 : vector<8x32xf32>
    %174 = arith.mulf %172, %173 : vector<8x32xf32>
    %c32 = arith.constant 32 : index
    %c0_40 = arith.constant 0 : index
    %175 = vector.load %arg5[%c32, %c0_40] : memref<128x256xf32, #tpu.memory_space<vmem>>, vector<8x128xf32>
    %c88 = arith.constant 88 : index
    %c128_41 = arith.constant 128 : index
    %176 = vector.load %arg5[%c88, %c128_41] : memref<128x256xf32, #tpu.memory_space<vmem>>, vector<8x128xf32>
    %177 = arith.truncf %157 : vector<8x32xf32> to vector<8x32xbf16>
    %cst_42 = arith.constant dense<0.000000e+00> : vector<8x128xf32>
    %178 = tpu.matmul %177, %8, %cst_42 {dimension_numbers = #tpu.dot_dimension_numbers<[1], [0], [0], [1], [0, 0, 1, 1], [], []>} : vector<8x32xbf16>, vector<32x128xbf16>, vector<8x128xf32> -> vector<8x128xf32>
    %179 = arith.truncf %174 : vector<8x32xf32> to vector<8x32xbf16>
    %cst_43 = arith.constant dense<0.000000e+00> : vector<8x128xf32>
    %180 = tpu.matmul %179, %10, %cst_43 {dimension_numbers = #tpu.dot_dimension_numbers<[1], [0], [0], [1], [0, 0, 1, 1], [], []>} : vector<8x32xbf16>, vector<32x128xbf16>, vector<8x128xf32> -> vector<8x128xf32>
    %181 = arith.addf %175, %178 : vector<8x128xf32>
    %182 = vector.extract_strided_slice %181 {offsets = [0, 0], sizes = [8, 96], strides = [1, 1]} : vector<8x128xf32> to vector<8x96xf32>
    %183 = arith.negf %182 : vector<8x96xf32>
    %184 = math.exp %183 : vector<8x96xf32>
    %cst_44 = arith.constant 1.000000e+00 : f32
    %185 = vector.broadcast %cst_44 : f32 to vector<8x96xf32>
    %186 = arith.addf %185, %184 : vector<8x96xf32>
    %187 = arith.divf %185, %186 : vector<8x96xf32>
    %188 = vector.extract_strided_slice %181 {offsets = [0, 96], sizes = [8, 32], strides = [1, 1]} : vector<8x128xf32> to vector<8x32xf32>
    %189 = math.tanh %188 : vector<8x32xf32>
    %190 = vector.extract_strided_slice %187 {offsets = [0, 32], sizes = [8, 32], strides = [1, 1]} : vector<8x96xf32> to vector<8x32xf32>
    %191 = arith.mulf %190, %154 : vector<8x32xf32>
    %192 = vector.extract_strided_slice %187 {offsets = [0, 0], sizes = [8, 32], strides = [1, 1]} : vector<8x96xf32> to vector<8x32xf32>
    %193 = arith.mulf %192, %189 : vector<8x32xf32>
    %194 = arith.addf %191, %193 : vector<8x32xf32>
    %195 = vector.extract_strided_slice %187 {offsets = [0, 64], sizes = [8, 32], strides = [1, 1]} : vector<8x96xf32> to vector<8x32xf32>
    %196 = math.tanh %194 : vector<8x32xf32>
    %197 = arith.mulf %195, %196 : vector<8x32xf32>
    %198 = arith.addf %176, %180 : vector<8x128xf32>
    %199 = vector.extract_strided_slice %198 {offsets = [0, 0], sizes = [8, 96], strides = [1, 1]} : vector<8x128xf32> to vector<8x96xf32>
    %200 = arith.negf %199 : vector<8x96xf32>
    %201 = math.exp %200 : vector<8x96xf32>
    %cst_45 = arith.constant 1.000000e+00 : f32
    %202 = vector.broadcast %cst_45 : f32 to vector<8x96xf32>
    %203 = arith.addf %202, %201 : vector<8x96xf32>
    %204 = arith.divf %202, %203 : vector<8x96xf32>
    %205 = vector.extract_strided_slice %198 {offsets = [0, 96], sizes = [8, 32], strides = [1, 1]} : vector<8x128xf32> to vector<8x32xf32>
    %206 = math.tanh %205 : vector<8x32xf32>
    %207 = vector.extract_strided_slice %204 {offsets = [0, 32], sizes = [8, 32], strides = [1, 1]} : vector<8x96xf32> to vector<8x32xf32>
    %208 = arith.mulf %207, %171 : vector<8x32xf32>
    %209 = vector.extract_strided_slice %204 {offsets = [0, 0], sizes = [8, 32], strides = [1, 1]} : vector<8x96xf32> to vector<8x32xf32>
    %210 = arith.mulf %209, %206 : vector<8x32xf32>
    %211 = arith.addf %208, %210 : vector<8x32xf32>
    %212 = vector.extract_strided_slice %204 {offsets = [0, 64], sizes = [8, 32], strides = [1, 1]} : vector<8x96xf32> to vector<8x32xf32>
    %213 = math.tanh %211 : vector<8x32xf32>
    %214 = arith.mulf %212, %213 : vector<8x32xf32>
    %c40 = arith.constant 40 : index
    %c0_46 = arith.constant 0 : index
    %215 = vector.load %arg5[%c40, %c0_46] : memref<128x256xf32, #tpu.memory_space<vmem>>, vector<8x128xf32>
    %c80 = arith.constant 80 : index
    %c128_47 = arith.constant 128 : index
    %216 = vector.load %arg5[%c80, %c128_47] : memref<128x256xf32, #tpu.memory_space<vmem>>, vector<8x128xf32>
    %217 = arith.truncf %197 : vector<8x32xf32> to vector<8x32xbf16>
    %cst_48 = arith.constant dense<0.000000e+00> : vector<8x128xf32>
    %218 = tpu.matmul %217, %8, %cst_48 {dimension_numbers = #tpu.dot_dimension_numbers<[1], [0], [0], [1], [0, 0, 1, 1], [], []>} : vector<8x32xbf16>, vector<32x128xbf16>, vector<8x128xf32> -> vector<8x128xf32>
    %219 = arith.truncf %214 : vector<8x32xf32> to vector<8x32xbf16>
    %cst_49 = arith.constant dense<0.000000e+00> : vector<8x128xf32>
    %220 = tpu.matmul %219, %10, %cst_49 {dimension_numbers = #tpu.dot_dimension_numbers<[1], [0], [0], [1], [0, 0, 1, 1], [], []>} : vector<8x32xbf16>, vector<32x128xbf16>, vector<8x128xf32> -> vector<8x128xf32>
    %221 = arith.addf %215, %218 : vector<8x128xf32>
    %222 = vector.extract_strided_slice %221 {offsets = [0, 0], sizes = [8, 96], strides = [1, 1]} : vector<8x128xf32> to vector<8x96xf32>
    %223 = arith.negf %222 : vector<8x96xf32>
    %224 = math.exp %223 : vector<8x96xf32>
    %cst_50 = arith.constant 1.000000e+00 : f32
    %225 = vector.broadcast %cst_50 : f32 to vector<8x96xf32>
    %226 = arith.addf %225, %224 : vector<8x96xf32>
    %227 = arith.divf %225, %226 : vector<8x96xf32>
    %228 = vector.extract_strided_slice %221 {offsets = [0, 96], sizes = [8, 32], strides = [1, 1]} : vector<8x128xf32> to vector<8x32xf32>
    %229 = math.tanh %228 : vector<8x32xf32>
    %230 = vector.extract_strided_slice %227 {offsets = [0, 32], sizes = [8, 32], strides = [1, 1]} : vector<8x96xf32> to vector<8x32xf32>
    %231 = arith.mulf %230, %194 : vector<8x32xf32>
    %232 = vector.extract_strided_slice %227 {offsets = [0, 0], sizes = [8, 32], strides = [1, 1]} : vector<8x96xf32> to vector<8x32xf32>
    %233 = arith.mulf %232, %229 : vector<8x32xf32>
    %234 = arith.addf %231, %233 : vector<8x32xf32>
    %235 = vector.extract_strided_slice %227 {offsets = [0, 64], sizes = [8, 32], strides = [1, 1]} : vector<8x96xf32> to vector<8x32xf32>
    %236 = math.tanh %234 : vector<8x32xf32>
    %237 = arith.mulf %235, %236 : vector<8x32xf32>
    %238 = arith.addf %216, %220 : vector<8x128xf32>
    %239 = vector.extract_strided_slice %238 {offsets = [0, 0], sizes = [8, 96], strides = [1, 1]} : vector<8x128xf32> to vector<8x96xf32>
    %240 = arith.negf %239 : vector<8x96xf32>
    %241 = math.exp %240 : vector<8x96xf32>
    %cst_51 = arith.constant 1.000000e+00 : f32
    %242 = vector.broadcast %cst_51 : f32 to vector<8x96xf32>
    %243 = arith.addf %242, %241 : vector<8x96xf32>
    %244 = arith.divf %242, %243 : vector<8x96xf32>
    %245 = vector.extract_strided_slice %238 {offsets = [0, 96], sizes = [8, 32], strides = [1, 1]} : vector<8x128xf32> to vector<8x32xf32>
    %246 = math.tanh %245 : vector<8x32xf32>
    %247 = vector.extract_strided_slice %244 {offsets = [0, 32], sizes = [8, 32], strides = [1, 1]} : vector<8x96xf32> to vector<8x32xf32>
    %248 = arith.mulf %247, %211 : vector<8x32xf32>
    %249 = vector.extract_strided_slice %244 {offsets = [0, 0], sizes = [8, 32], strides = [1, 1]} : vector<8x96xf32> to vector<8x32xf32>
    %250 = arith.mulf %249, %246 : vector<8x32xf32>
    %251 = arith.addf %248, %250 : vector<8x32xf32>
    %252 = vector.extract_strided_slice %244 {offsets = [0, 64], sizes = [8, 32], strides = [1, 1]} : vector<8x96xf32> to vector<8x32xf32>
    %253 = math.tanh %251 : vector<8x32xf32>
    %254 = arith.mulf %252, %253 : vector<8x32xf32>
    %c48 = arith.constant 48 : index
    %c0_52 = arith.constant 0 : index
    %255 = vector.load %arg5[%c48, %c0_52] : memref<128x256xf32, #tpu.memory_space<vmem>>, vector<8x128xf32>
    %c72 = arith.constant 72 : index
    %c128_53 = arith.constant 128 : index
    %256 = vector.load %arg5[%c72, %c128_53] : memref<128x256xf32, #tpu.memory_space<vmem>>, vector<8x128xf32>
    %257 = arith.truncf %237 : vector<8x32xf32> to vector<8x32xbf16>
    %cst_54 = arith.constant dense<0.000000e+00> : vector<8x128xf32>
    %258 = tpu.matmul %257, %8, %cst_54 {dimension_numbers = #tpu.dot_dimension_numbers<[1], [0], [0], [1], [0, 0, 1, 1], [], []>} : vector<8x32xbf16>, vector<32x128xbf16>, vector<8x128xf32> -> vector<8x128xf32>
    %259 = arith.truncf %254 : vector<8x32xf32> to vector<8x32xbf16>
    %cst_55 = arith.constant dense<0.000000e+00> : vector<8x128xf32>
    %260 = tpu.matmul %259, %10, %cst_55 {dimension_numbers = #tpu.dot_dimension_numbers<[1], [0], [0], [1], [0, 0, 1, 1], [], []>} : vector<8x32xbf16>, vector<32x128xbf16>, vector<8x128xf32> -> vector<8x128xf32>
    %261 = arith.addf %255, %258 : vector<8x128xf32>
    %262 = vector.extract_strided_slice %261 {offsets = [0, 0], sizes = [8, 96], strides = [1, 1]} : vector<8x128xf32> to vector<8x96xf32>
    %263 = arith.negf %262 : vector<8x96xf32>
    %264 = math.exp %263 : vector<8x96xf32>
    %cst_56 = arith.constant 1.000000e+00 : f32
    %265 = vector.broadcast %cst_56 : f32 to vector<8x96xf32>
    %266 = arith.addf %265, %264 : vector<8x96xf32>
    %267 = arith.divf %265, %266 : vector<8x96xf32>
    %268 = vector.extract_strided_slice %261 {offsets = [0, 96], sizes = [8, 32], strides = [1, 1]} : vector<8x128xf32> to vector<8x32xf32>
    %269 = math.tanh %268 : vector<8x32xf32>
    %270 = vector.extract_strided_slice %267 {offsets = [0, 32], sizes = [8, 32], strides = [1, 1]} : vector<8x96xf32> to vector<8x32xf32>
    %271 = arith.mulf %270, %234 : vector<8x32xf32>
    %272 = vector.extract_strided_slice %267 {offsets = [0, 0], sizes = [8, 32], strides = [1, 1]} : vector<8x96xf32> to vector<8x32xf32>
    %273 = arith.mulf %272, %269 : vector<8x32xf32>
    %274 = arith.addf %271, %273 : vector<8x32xf32>
    %275 = vector.extract_strided_slice %267 {offsets = [0, 64], sizes = [8, 32], strides = [1, 1]} : vector<8x96xf32> to vector<8x32xf32>
    %276 = math.tanh %274 : vector<8x32xf32>
    %277 = arith.mulf %275, %276 : vector<8x32xf32>
    %278 = arith.addf %256, %260 : vector<8x128xf32>
    %279 = vector.extract_strided_slice %278 {offsets = [0, 0], sizes = [8, 96], strides = [1, 1]} : vector<8x128xf32> to vector<8x96xf32>
    %280 = arith.negf %279 : vector<8x96xf32>
    %281 = math.exp %280 : vector<8x96xf32>
    %cst_57 = arith.constant 1.000000e+00 : f32
    %282 = vector.broadcast %cst_57 : f32 to vector<8x96xf32>
    %283 = arith.addf %282, %281 : vector<8x96xf32>
    %284 = arith.divf %282, %283 : vector<8x96xf32>
    %285 = vector.extract_strided_slice %278 {offsets = [0, 96], sizes = [8, 32], strides = [1, 1]} : vector<8x128xf32> to vector<8x32xf32>
    %286 = math.tanh %285 : vector<8x32xf32>
    %287 = vector.extract_strided_slice %284 {offsets = [0, 32], sizes = [8, 32], strides = [1, 1]} : vector<8x96xf32> to vector<8x32xf32>
    %288 = arith.mulf %287, %251 : vector<8x32xf32>
    %289 = vector.extract_strided_slice %284 {offsets = [0, 0], sizes = [8, 32], strides = [1, 1]} : vector<8x96xf32> to vector<8x32xf32>
    %290 = arith.mulf %289, %286 : vector<8x32xf32>
    %291 = arith.addf %288, %290 : vector<8x32xf32>
    %292 = vector.extract_strided_slice %284 {offsets = [0, 64], sizes = [8, 32], strides = [1, 1]} : vector<8x96xf32> to vector<8x32xf32>
    %293 = math.tanh %291 : vector<8x32xf32>
    %294 = arith.mulf %292, %293 : vector<8x32xf32>
    %c56 = arith.constant 56 : index
    %c0_58 = arith.constant 0 : index
    %295 = vector.load %arg5[%c56, %c0_58] : memref<128x256xf32, #tpu.memory_space<vmem>>, vector<8x128xf32>
    %c64 = arith.constant 64 : index
    %c128_59 = arith.constant 128 : index
    %296 = vector.load %arg5[%c64, %c128_59] : memref<128x256xf32, #tpu.memory_space<vmem>>, vector<8x128xf32>
    %297 = arith.truncf %277 : vector<8x32xf32> to vector<8x32xbf16>
    %cst_60 = arith.constant dense<0.000000e+00> : vector<8x128xf32>
    %298 = tpu.matmul %297, %8, %cst_60 {dimension_numbers = #tpu.dot_dimension_numbers<[1], [0], [0], [1], [0, 0, 1, 1], [], []>} : vector<8x32xbf16>, vector<32x128xbf16>, vector<8x128xf32> -> vector<8x128xf32>
    %299 = arith.truncf %294 : vector<8x32xf32> to vector<8x32xbf16>
    %cst_61 = arith.constant dense<0.000000e+00> : vector<8x128xf32>
    %300 = tpu.matmul %299, %10, %cst_61 {dimension_numbers = #tpu.dot_dimension_numbers<[1], [0], [0], [1], [0, 0, 1, 1], [], []>} : vector<8x32xbf16>, vector<32x128xbf16>, vector<8x128xf32> -> vector<8x128xf32>
    %301 = arith.addf %295, %298 : vector<8x128xf32>
    %302 = vector.extract_strided_slice %301 {offsets = [0, 0], sizes = [8, 96], strides = [1, 1]} : vector<8x128xf32> to vector<8x96xf32>
    %303 = arith.negf %302 : vector<8x96xf32>
    %304 = math.exp %303 : vector<8x96xf32>
    %cst_62 = arith.constant 1.000000e+00 : f32
    %305 = vector.broadcast %cst_62 : f32 to vector<8x96xf32>
    %306 = arith.addf %305, %304 : vector<8x96xf32>
    %307 = arith.divf %305, %306 : vector<8x96xf32>
    %308 = vector.extract_strided_slice %301 {offsets = [0, 96], sizes = [8, 32], strides = [1, 1]} : vector<8x128xf32> to vector<8x32xf32>
    %309 = math.tanh %308 : vector<8x32xf32>
    %310 = vector.extract_strided_slice %307 {offsets = [0, 32], sizes = [8, 32], strides = [1, 1]} : vector<8x96xf32> to vector<8x32xf32>
    %311 = arith.mulf %310, %274 : vector<8x32xf32>
    %312 = vector.extract_strided_slice %307 {offsets = [0, 0], sizes = [8, 32], strides = [1, 1]} : vector<8x96xf32> to vector<8x32xf32>
    %313 = arith.mulf %312, %309 : vector<8x32xf32>
    %314 = arith.addf %311, %313 : vector<8x32xf32>
    %315 = vector.extract_strided_slice %307 {offsets = [0, 64], sizes = [8, 32], strides = [1, 1]} : vector<8x96xf32> to vector<8x32xf32>
    %316 = math.tanh %314 : vector<8x32xf32>
    %317 = arith.mulf %315, %316 : vector<8x32xf32>
    %318 = arith.addf %296, %300 : vector<8x128xf32>
    %319 = vector.extract_strided_slice %318 {offsets = [0, 0], sizes = [8, 96], strides = [1, 1]} : vector<8x128xf32> to vector<8x96xf32>
    %320 = arith.negf %319 : vector<8x96xf32>
    %321 = math.exp %320 : vector<8x96xf32>
    %cst_63 = arith.constant 1.000000e+00 : f32
    %322 = vector.broadcast %cst_63 : f32 to vector<8x96xf32>
    %323 = arith.addf %322, %321 : vector<8x96xf32>
    %324 = arith.divf %322, %323 : vector<8x96xf32>
    %325 = vector.extract_strided_slice %318 {offsets = [0, 96], sizes = [8, 32], strides = [1, 1]} : vector<8x128xf32> to vector<8x32xf32>
    %326 = math.tanh %325 : vector<8x32xf32>
    %327 = vector.extract_strided_slice %324 {offsets = [0, 32], sizes = [8, 32], strides = [1, 1]} : vector<8x96xf32> to vector<8x32xf32>
    %328 = arith.mulf %327, %291 : vector<8x32xf32>
    %329 = vector.extract_strided_slice %324 {offsets = [0, 0], sizes = [8, 32], strides = [1, 1]} : vector<8x96xf32> to vector<8x32xf32>
    %330 = arith.mulf %329, %326 : vector<8x32xf32>
    %331 = arith.addf %328, %330 : vector<8x32xf32>
    %332 = vector.extract_strided_slice %324 {offsets = [0, 64], sizes = [8, 32], strides = [1, 1]} : vector<8x96xf32> to vector<8x32xf32>
    %333 = math.tanh %331 : vector<8x32xf32>
    %334 = arith.mulf %332, %333 : vector<8x32xf32>
    %c64_64 = arith.constant 64 : index
    %c0_65 = arith.constant 0 : index
    %335 = vector.load %arg5[%c64_64, %c0_65] : memref<128x256xf32, #tpu.memory_space<vmem>>, vector<8x128xf32>
    %c56_66 = arith.constant 56 : index
    %c128_67 = arith.constant 128 : index
    %336 = vector.load %arg5[%c56_66, %c128_67] : memref<128x256xf32, #tpu.memory_space<vmem>>, vector<8x128xf32>
    %337 = arith.truncf %317 : vector<8x32xf32> to vector<8x32xbf16>
    %cst_68 = arith.constant dense<0.000000e+00> : vector<8x128xf32>
    %338 = tpu.matmul %337, %8, %cst_68 {dimension_numbers = #tpu.dot_dimension_numbers<[1], [0], [0], [1], [0, 0, 1, 1], [], []>} : vector<8x32xbf16>, vector<32x128xbf16>, vector<8x128xf32> -> vector<8x128xf32>
    %339 = arith.truncf %334 : vector<8x32xf32> to vector<8x32xbf16>
    %cst_69 = arith.constant dense<0.000000e+00> : vector<8x128xf32>
    %340 = tpu.matmul %339, %10, %cst_69 {dimension_numbers = #tpu.dot_dimension_numbers<[1], [0], [0], [1], [0, 0, 1, 1], [], []>} : vector<8x32xbf16>, vector<32x128xbf16>, vector<8x128xf32> -> vector<8x128xf32>
    %341 = arith.addf %335, %338 : vector<8x128xf32>
    %342 = vector.extract_strided_slice %341 {offsets = [0, 0], sizes = [8, 96], strides = [1, 1]} : vector<8x128xf32> to vector<8x96xf32>
    %343 = arith.negf %342 : vector<8x96xf32>
    %344 = math.exp %343 : vector<8x96xf32>
    %cst_70 = arith.constant 1.000000e+00 : f32
    %345 = vector.broadcast %cst_70 : f32 to vector<8x96xf32>
    %346 = arith.addf %345, %344 : vector<8x96xf32>
    %347 = arith.divf %345, %346 : vector<8x96xf32>
    %348 = vector.extract_strided_slice %341 {offsets = [0, 96], sizes = [8, 32], strides = [1, 1]} : vector<8x128xf32> to vector<8x32xf32>
    %349 = math.tanh %348 : vector<8x32xf32>
    %350 = vector.extract_strided_slice %347 {offsets = [0, 32], sizes = [8, 32], strides = [1, 1]} : vector<8x96xf32> to vector<8x32xf32>
    %351 = arith.mulf %350, %314 : vector<8x32xf32>
    %352 = vector.extract_strided_slice %347 {offsets = [0, 0], sizes = [8, 32], strides = [1, 1]} : vector<8x96xf32> to vector<8x32xf32>
    %353 = arith.mulf %352, %349 : vector<8x32xf32>
    %354 = arith.addf %351, %353 : vector<8x32xf32>
    %355 = vector.extract_strided_slice %347 {offsets = [0, 64], sizes = [8, 32], strides = [1, 1]} : vector<8x96xf32> to vector<8x32xf32>
    %356 = math.tanh %354 : vector<8x32xf32>
    %357 = arith.mulf %355, %356 : vector<8x32xf32>
    %358 = arith.addf %336, %340 : vector<8x128xf32>
    %359 = vector.extract_strided_slice %358 {offsets = [0, 0], sizes = [8, 96], strides = [1, 1]} : vector<8x128xf32> to vector<8x96xf32>
    %360 = arith.negf %359 : vector<8x96xf32>
    %361 = math.exp %360 : vector<8x96xf32>
    %cst_71 = arith.constant 1.000000e+00 : f32
    %362 = vector.broadcast %cst_71 : f32 to vector<8x96xf32>
    %363 = arith.addf %362, %361 : vector<8x96xf32>
    %364 = arith.divf %362, %363 : vector<8x96xf32>
    %365 = vector.extract_strided_slice %358 {offsets = [0, 96], sizes = [8, 32], strides = [1, 1]} : vector<8x128xf32> to vector<8x32xf32>
    %366 = math.tanh %365 : vector<8x32xf32>
    %367 = vector.extract_strided_slice %364 {offsets = [0, 32], sizes = [8, 32], strides = [1, 1]} : vector<8x96xf32> to vector<8x32xf32>
    %368 = arith.mulf %367, %331 : vector<8x32xf32>
    %369 = vector.extract_strided_slice %364 {offsets = [0, 0], sizes = [8, 32], strides = [1, 1]} : vector<8x96xf32> to vector<8x32xf32>
    %370 = arith.mulf %369, %366 : vector<8x32xf32>
    %371 = arith.addf %368, %370 : vector<8x32xf32>
    %372 = vector.extract_strided_slice %364 {offsets = [0, 64], sizes = [8, 32], strides = [1, 1]} : vector<8x96xf32> to vector<8x32xf32>
    %373 = math.tanh %371 : vector<8x32xf32>
    %374 = arith.mulf %372, %373 : vector<8x32xf32>
    %c72_72 = arith.constant 72 : index
    %c0_73 = arith.constant 0 : index
    %375 = vector.load %arg5[%c72_72, %c0_73] : memref<128x256xf32, #tpu.memory_space<vmem>>, vector<8x128xf32>
    %c48_74 = arith.constant 48 : index
    %c128_75 = arith.constant 128 : index
    %376 = vector.load %arg5[%c48_74, %c128_75] : memref<128x256xf32, #tpu.memory_space<vmem>>, vector<8x128xf32>
    %377 = arith.truncf %357 : vector<8x32xf32> to vector<8x32xbf16>
    %cst_76 = arith.constant dense<0.000000e+00> : vector<8x128xf32>
    %378 = tpu.matmul %377, %8, %cst_76 {dimension_numbers = #tpu.dot_dimension_numbers<[1], [0], [0], [1], [0, 0, 1, 1], [], []>} : vector<8x32xbf16>, vector<32x128xbf16>, vector<8x128xf32> -> vector<8x128xf32>
    %379 = arith.truncf %374 : vector<8x32xf32> to vector<8x32xbf16>
    %cst_77 = arith.constant dense<0.000000e+00> : vector<8x128xf32>
    %380 = tpu.matmul %379, %10, %cst_77 {dimension_numbers = #tpu.dot_dimension_numbers<[1], [0], [0], [1], [0, 0, 1, 1], [], []>} : vector<8x32xbf16>, vector<32x128xbf16>, vector<8x128xf32> -> vector<8x128xf32>
    %381 = arith.addf %375, %378 : vector<8x128xf32>
    %382 = vector.extract_strided_slice %381 {offsets = [0, 0], sizes = [8, 96], strides = [1, 1]} : vector<8x128xf32> to vector<8x96xf32>
    %383 = arith.negf %382 : vector<8x96xf32>
    %384 = math.exp %383 : vector<8x96xf32>
    %cst_78 = arith.constant 1.000000e+00 : f32
    %385 = vector.broadcast %cst_78 : f32 to vector<8x96xf32>
    %386 = arith.addf %385, %384 : vector<8x96xf32>
    %387 = arith.divf %385, %386 : vector<8x96xf32>
    %388 = vector.extract_strided_slice %381 {offsets = [0, 96], sizes = [8, 32], strides = [1, 1]} : vector<8x128xf32> to vector<8x32xf32>
    %389 = math.tanh %388 : vector<8x32xf32>
    %390 = vector.extract_strided_slice %387 {offsets = [0, 32], sizes = [8, 32], strides = [1, 1]} : vector<8x96xf32> to vector<8x32xf32>
    %391 = arith.mulf %390, %354 : vector<8x32xf32>
    %392 = vector.extract_strided_slice %387 {offsets = [0, 0], sizes = [8, 32], strides = [1, 1]} : vector<8x96xf32> to vector<8x32xf32>
    %393 = arith.mulf %392, %389 : vector<8x32xf32>
    %394 = arith.addf %391, %393 : vector<8x32xf32>
    %395 = vector.extract_strided_slice %387 {offsets = [0, 64], sizes = [8, 32], strides = [1, 1]} : vector<8x96xf32> to vector<8x32xf32>
    %396 = math.tanh %394 : vector<8x32xf32>
    %397 = arith.mulf %395, %396 : vector<8x32xf32>
    %398 = arith.addf %376, %380 : vector<8x128xf32>
    %399 = vector.extract_strided_slice %398 {offsets = [0, 0], sizes = [8, 96], strides = [1, 1]} : vector<8x128xf32> to vector<8x96xf32>
    %400 = arith.negf %399 : vector<8x96xf32>
    %401 = math.exp %400 : vector<8x96xf32>
    %cst_79 = arith.constant 1.000000e+00 : f32
    %402 = vector.broadcast %cst_79 : f32 to vector<8x96xf32>
    %403 = arith.addf %402, %401 : vector<8x96xf32>
    %404 = arith.divf %402, %403 : vector<8x96xf32>
    %405 = vector.extract_strided_slice %398 {offsets = [0, 96], sizes = [8, 32], strides = [1, 1]} : vector<8x128xf32> to vector<8x32xf32>
    %406 = math.tanh %405 : vector<8x32xf32>
    %407 = vector.extract_strided_slice %404 {offsets = [0, 32], sizes = [8, 32], strides = [1, 1]} : vector<8x96xf32> to vector<8x32xf32>
    %408 = arith.mulf %407, %371 : vector<8x32xf32>
    %409 = vector.extract_strided_slice %404 {offsets = [0, 0], sizes = [8, 32], strides = [1, 1]} : vector<8x96xf32> to vector<8x32xf32>
    %410 = arith.mulf %409, %406 : vector<8x32xf32>
    %411 = arith.addf %408, %410 : vector<8x32xf32>
    %412 = vector.extract_strided_slice %404 {offsets = [0, 64], sizes = [8, 32], strides = [1, 1]} : vector<8x96xf32> to vector<8x32xf32>
    %413 = math.tanh %411 : vector<8x32xf32>
    %414 = arith.mulf %412, %413 : vector<8x32xf32>
    %c80_80 = arith.constant 80 : index
    %c0_81 = arith.constant 0 : index
    %415 = vector.load %arg5[%c80_80, %c0_81] : memref<128x256xf32, #tpu.memory_space<vmem>>, vector<8x128xf32>
    %c40_82 = arith.constant 40 : index
    %c128_83 = arith.constant 128 : index
    %416 = vector.load %arg5[%c40_82, %c128_83] : memref<128x256xf32, #tpu.memory_space<vmem>>, vector<8x128xf32>
    %417 = arith.truncf %397 : vector<8x32xf32> to vector<8x32xbf16>
    %cst_84 = arith.constant dense<0.000000e+00> : vector<8x128xf32>
    %418 = tpu.matmul %417, %8, %cst_84 {dimension_numbers = #tpu.dot_dimension_numbers<[1], [0], [0], [1], [0, 0, 1, 1], [], []>} : vector<8x32xbf16>, vector<32x128xbf16>, vector<8x128xf32> -> vector<8x128xf32>
    %419 = arith.truncf %414 : vector<8x32xf32> to vector<8x32xbf16>
    %cst_85 = arith.constant dense<0.000000e+00> : vector<8x128xf32>
    %420 = tpu.matmul %419, %10, %cst_85 {dimension_numbers = #tpu.dot_dimension_numbers<[1], [0], [0], [1], [0, 0, 1, 1], [], []>} : vector<8x32xbf16>, vector<32x128xbf16>, vector<8x128xf32> -> vector<8x128xf32>
    %421 = arith.addf %415, %418 : vector<8x128xf32>
    %422 = vector.extract_strided_slice %421 {offsets = [0, 0], sizes = [8, 96], strides = [1, 1]} : vector<8x128xf32> to vector<8x96xf32>
    %423 = arith.negf %422 : vector<8x96xf32>
    %424 = math.exp %423 : vector<8x96xf32>
    %cst_86 = arith.constant 1.000000e+00 : f32
    %425 = vector.broadcast %cst_86 : f32 to vector<8x96xf32>
    %426 = arith.addf %425, %424 : vector<8x96xf32>
    %427 = arith.divf %425, %426 : vector<8x96xf32>
    %428 = vector.extract_strided_slice %421 {offsets = [0, 96], sizes = [8, 32], strides = [1, 1]} : vector<8x128xf32> to vector<8x32xf32>
    %429 = math.tanh %428 : vector<8x32xf32>
    %430 = vector.extract_strided_slice %427 {offsets = [0, 32], sizes = [8, 32], strides = [1, 1]} : vector<8x96xf32> to vector<8x32xf32>
    %431 = arith.mulf %430, %394 : vector<8x32xf32>
    %432 = vector.extract_strided_slice %427 {offsets = [0, 0], sizes = [8, 32], strides = [1, 1]} : vector<8x96xf32> to vector<8x32xf32>
    %433 = arith.mulf %432, %429 : vector<8x32xf32>
    %434 = arith.addf %431, %433 : vector<8x32xf32>
    %435 = vector.extract_strided_slice %427 {offsets = [0, 64], sizes = [8, 32], strides = [1, 1]} : vector<8x96xf32> to vector<8x32xf32>
    %436 = math.tanh %434 : vector<8x32xf32>
    %437 = arith.mulf %435, %436 : vector<8x32xf32>
    %438 = arith.addf %416, %420 : vector<8x128xf32>
    %439 = vector.extract_strided_slice %438 {offsets = [0, 0], sizes = [8, 96], strides = [1, 1]} : vector<8x128xf32> to vector<8x96xf32>
    %440 = arith.negf %439 : vector<8x96xf32>
    %441 = math.exp %440 : vector<8x96xf32>
    %cst_87 = arith.constant 1.000000e+00 : f32
    %442 = vector.broadcast %cst_87 : f32 to vector<8x96xf32>
    %443 = arith.addf %442, %441 : vector<8x96xf32>
    %444 = arith.divf %442, %443 : vector<8x96xf32>
    %445 = vector.extract_strided_slice %438 {offsets = [0, 96], sizes = [8, 32], strides = [1, 1]} : vector<8x128xf32> to vector<8x32xf32>
    %446 = math.tanh %445 : vector<8x32xf32>
    %447 = vector.extract_strided_slice %444 {offsets = [0, 32], sizes = [8, 32], strides = [1, 1]} : vector<8x96xf32> to vector<8x32xf32>
    %448 = arith.mulf %447, %411 : vector<8x32xf32>
    %449 = vector.extract_strided_slice %444 {offsets = [0, 0], sizes = [8, 32], strides = [1, 1]} : vector<8x96xf32> to vector<8x32xf32>
    %450 = arith.mulf %449, %446 : vector<8x32xf32>
    %451 = arith.addf %448, %450 : vector<8x32xf32>
    %452 = vector.extract_strided_slice %444 {offsets = [0, 64], sizes = [8, 32], strides = [1, 1]} : vector<8x96xf32> to vector<8x32xf32>
    %453 = math.tanh %451 : vector<8x32xf32>
    %454 = arith.mulf %452, %453 : vector<8x32xf32>
    %c88_88 = arith.constant 88 : index
    %c0_89 = arith.constant 0 : index
    %455 = vector.load %arg5[%c88_88, %c0_89] : memref<128x256xf32, #tpu.memory_space<vmem>>, vector<8x128xf32>
    %c32_90 = arith.constant 32 : index
    %c128_91 = arith.constant 128 : index
    %456 = vector.load %arg5[%c32_90, %c128_91] : memref<128x256xf32, #tpu.memory_space<vmem>>, vector<8x128xf32>
    %457 = arith.truncf %437 : vector<8x32xf32> to vector<8x32xbf16>
    %cst_92 = arith.constant dense<0.000000e+00> : vector<8x128xf32>
    %458 = tpu.matmul %457, %8, %cst_92 {dimension_numbers = #tpu.dot_dimension_numbers<[1], [0], [0], [1], [0, 0, 1, 1], [], []>} : vector<8x32xbf16>, vector<32x128xbf16>, vector<8x128xf32> -> vector<8x128xf32>
    %459 = arith.truncf %454 : vector<8x32xf32> to vector<8x32xbf16>
    %cst_93 = arith.constant dense<0.000000e+00> : vector<8x128xf32>
    %460 = tpu.matmul %459, %10, %cst_93 {dimension_numbers = #tpu.dot_dimension_numbers<[1], [0], [0], [1], [0, 0, 1, 1], [], []>} : vector<8x32xbf16>, vector<32x128xbf16>, vector<8x128xf32> -> vector<8x128xf32>
    %461 = arith.addf %455, %458 : vector<8x128xf32>
    %462 = vector.extract_strided_slice %461 {offsets = [0, 0], sizes = [8, 96], strides = [1, 1]} : vector<8x128xf32> to vector<8x96xf32>
    %463 = arith.negf %462 : vector<8x96xf32>
    %464 = math.exp %463 : vector<8x96xf32>
    %cst_94 = arith.constant 1.000000e+00 : f32
    %465 = vector.broadcast %cst_94 : f32 to vector<8x96xf32>
    %466 = arith.addf %465, %464 : vector<8x96xf32>
    %467 = arith.divf %465, %466 : vector<8x96xf32>
    %468 = vector.extract_strided_slice %461 {offsets = [0, 96], sizes = [8, 32], strides = [1, 1]} : vector<8x128xf32> to vector<8x32xf32>
    %469 = math.tanh %468 : vector<8x32xf32>
    %470 = vector.extract_strided_slice %467 {offsets = [0, 32], sizes = [8, 32], strides = [1, 1]} : vector<8x96xf32> to vector<8x32xf32>
    %471 = arith.mulf %470, %434 : vector<8x32xf32>
    %472 = vector.extract_strided_slice %467 {offsets = [0, 0], sizes = [8, 32], strides = [1, 1]} : vector<8x96xf32> to vector<8x32xf32>
    %473 = arith.mulf %472, %469 : vector<8x32xf32>
    %474 = arith.addf %471, %473 : vector<8x32xf32>
    %475 = vector.extract_strided_slice %467 {offsets = [0, 64], sizes = [8, 32], strides = [1, 1]} : vector<8x96xf32> to vector<8x32xf32>
    %476 = math.tanh %474 : vector<8x32xf32>
    %477 = arith.mulf %475, %476 : vector<8x32xf32>
    %478 = arith.addf %456, %460 : vector<8x128xf32>
    %479 = vector.extract_strided_slice %478 {offsets = [0, 0], sizes = [8, 96], strides = [1, 1]} : vector<8x128xf32> to vector<8x96xf32>
    %480 = arith.negf %479 : vector<8x96xf32>
    %481 = math.exp %480 : vector<8x96xf32>
    %cst_95 = arith.constant 1.000000e+00 : f32
    %482 = vector.broadcast %cst_95 : f32 to vector<8x96xf32>
    %483 = arith.addf %482, %481 : vector<8x96xf32>
    %484 = arith.divf %482, %483 : vector<8x96xf32>
    %485 = vector.extract_strided_slice %478 {offsets = [0, 96], sizes = [8, 32], strides = [1, 1]} : vector<8x128xf32> to vector<8x32xf32>
    %486 = math.tanh %485 : vector<8x32xf32>
    %487 = vector.extract_strided_slice %484 {offsets = [0, 32], sizes = [8, 32], strides = [1, 1]} : vector<8x96xf32> to vector<8x32xf32>
    %488 = arith.mulf %487, %451 : vector<8x32xf32>
    %489 = vector.extract_strided_slice %484 {offsets = [0, 0], sizes = [8, 32], strides = [1, 1]} : vector<8x96xf32> to vector<8x32xf32>
    %490 = arith.mulf %489, %486 : vector<8x32xf32>
    %491 = arith.addf %488, %490 : vector<8x32xf32>
    %492 = vector.extract_strided_slice %484 {offsets = [0, 64], sizes = [8, 32], strides = [1, 1]} : vector<8x96xf32> to vector<8x32xf32>
    %493 = math.tanh %491 : vector<8x32xf32>
    %494 = arith.mulf %492, %493 : vector<8x32xf32>
    %c96_96 = arith.constant 96 : index
    %c0_97 = arith.constant 0 : index
    %495 = vector.load %arg5[%c96_96, %c0_97] : memref<128x256xf32, #tpu.memory_space<vmem>>, vector<8x128xf32>
    %c24_98 = arith.constant 24 : index
    %c128_99 = arith.constant 128 : index
    %496 = vector.load %arg5[%c24_98, %c128_99] : memref<128x256xf32, #tpu.memory_space<vmem>>, vector<8x128xf32>
    %497 = arith.truncf %477 : vector<8x32xf32> to vector<8x32xbf16>
    %cst_100 = arith.constant dense<0.000000e+00> : vector<8x128xf32>
    %498 = tpu.matmul %497, %8, %cst_100 {dimension_numbers = #tpu.dot_dimension_numbers<[1], [0], [0], [1], [0, 0, 1, 1], [], []>} : vector<8x32xbf16>, vector<32x128xbf16>, vector<8x128xf32> -> vector<8x128xf32>
    %499 = arith.truncf %494 : vector<8x32xf32> to vector<8x32xbf16>
    %cst_101 = arith.constant dense<0.000000e+00> : vector<8x128xf32>
    %500 = tpu.matmul %499, %10, %cst_101 {dimension_numbers = #tpu.dot_dimension_numbers<[1], [0], [0], [1], [0, 0, 1, 1], [], []>} : vector<8x32xbf16>, vector<32x128xbf16>, vector<8x128xf32> -> vector<8x128xf32>
    %501 = arith.addf %495, %498 : vector<8x128xf32>
    %502 = vector.extract_strided_slice %501 {offsets = [0, 0], sizes = [8, 96], strides = [1, 1]} : vector<8x128xf32> to vector<8x96xf32>
    %503 = arith.negf %502 : vector<8x96xf32>
    %504 = math.exp %503 : vector<8x96xf32>
    %cst_102 = arith.constant 1.000000e+00 : f32
    %505 = vector.broadcast %cst_102 : f32 to vector<8x96xf32>
    %506 = arith.addf %505, %504 : vector<8x96xf32>
    %507 = arith.divf %505, %506 : vector<8x96xf32>
    %508 = vector.extract_strided_slice %501 {offsets = [0, 96], sizes = [8, 32], strides = [1, 1]} : vector<8x128xf32> to vector<8x32xf32>
    %509 = math.tanh %508 : vector<8x32xf32>
    %510 = vector.extract_strided_slice %507 {offsets = [0, 32], sizes = [8, 32], strides = [1, 1]} : vector<8x96xf32> to vector<8x32xf32>
    %511 = arith.mulf %510, %474 : vector<8x32xf32>
    %512 = vector.extract_strided_slice %507 {offsets = [0, 0], sizes = [8, 32], strides = [1, 1]} : vector<8x96xf32> to vector<8x32xf32>
    %513 = arith.mulf %512, %509 : vector<8x32xf32>
    %514 = arith.addf %511, %513 : vector<8x32xf32>
    %515 = vector.extract_strided_slice %507 {offsets = [0, 64], sizes = [8, 32], strides = [1, 1]} : vector<8x96xf32> to vector<8x32xf32>
    %516 = math.tanh %514 : vector<8x32xf32>
    %517 = arith.mulf %515, %516 : vector<8x32xf32>
    %518 = arith.addf %496, %500 : vector<8x128xf32>
    %519 = vector.extract_strided_slice %518 {offsets = [0, 0], sizes = [8, 96], strides = [1, 1]} : vector<8x128xf32> to vector<8x96xf32>
    %520 = arith.negf %519 : vector<8x96xf32>
    %521 = math.exp %520 : vector<8x96xf32>
    %cst_103 = arith.constant 1.000000e+00 : f32
    %522 = vector.broadcast %cst_103 : f32 to vector<8x96xf32>
    %523 = arith.addf %522, %521 : vector<8x96xf32>
    %524 = arith.divf %522, %523 : vector<8x96xf32>
    %525 = vector.extract_strided_slice %518 {offsets = [0, 96], sizes = [8, 32], strides = [1, 1]} : vector<8x128xf32> to vector<8x32xf32>
    %526 = math.tanh %525 : vector<8x32xf32>
    %527 = vector.extract_strided_slice %524 {offsets = [0, 32], sizes = [8, 32], strides = [1, 1]} : vector<8x96xf32> to vector<8x32xf32>
    %528 = arith.mulf %527, %491 : vector<8x32xf32>
    %529 = vector.extract_strided_slice %524 {offsets = [0, 0], sizes = [8, 32], strides = [1, 1]} : vector<8x96xf32> to vector<8x32xf32>
    %530 = arith.mulf %529, %526 : vector<8x32xf32>
    %531 = arith.addf %528, %530 : vector<8x32xf32>
    %532 = vector.extract_strided_slice %524 {offsets = [0, 64], sizes = [8, 32], strides = [1, 1]} : vector<8x96xf32> to vector<8x32xf32>
    %533 = math.tanh %531 : vector<8x32xf32>
    %534 = arith.mulf %532, %533 : vector<8x32xf32>
    %c104_104 = arith.constant 104 : index
    %c0_105 = arith.constant 0 : index
    %535 = vector.load %arg5[%c104_104, %c0_105] : memref<128x256xf32, #tpu.memory_space<vmem>>, vector<8x128xf32>
    %c16_106 = arith.constant 16 : index
    %c128_107 = arith.constant 128 : index
    %536 = vector.load %arg5[%c16_106, %c128_107] : memref<128x256xf32, #tpu.memory_space<vmem>>, vector<8x128xf32>
    %537 = arith.truncf %517 : vector<8x32xf32> to vector<8x32xbf16>
    %cst_108 = arith.constant dense<0.000000e+00> : vector<8x128xf32>
    %538 = tpu.matmul %537, %8, %cst_108 {dimension_numbers = #tpu.dot_dimension_numbers<[1], [0], [0], [1], [0, 0, 1, 1], [], []>} : vector<8x32xbf16>, vector<32x128xbf16>, vector<8x128xf32> -> vector<8x128xf32>
    %539 = arith.truncf %534 : vector<8x32xf32> to vector<8x32xbf16>
    %cst_109 = arith.constant dense<0.000000e+00> : vector<8x128xf32>
    %540 = tpu.matmul %539, %10, %cst_109 {dimension_numbers = #tpu.dot_dimension_numbers<[1], [0], [0], [1], [0, 0, 1, 1], [], []>} : vector<8x32xbf16>, vector<32x128xbf16>, vector<8x128xf32> -> vector<8x128xf32>
    %541 = arith.addf %535, %538 : vector<8x128xf32>
    %542 = vector.extract_strided_slice %541 {offsets = [0, 0], sizes = [8, 96], strides = [1, 1]} : vector<8x128xf32> to vector<8x96xf32>
    %543 = arith.negf %542 : vector<8x96xf32>
    %544 = math.exp %543 : vector<8x96xf32>
    %cst_110 = arith.constant 1.000000e+00 : f32
    %545 = vector.broadcast %cst_110 : f32 to vector<8x96xf32>
    %546 = arith.addf %545, %544 : vector<8x96xf32>
    %547 = arith.divf %545, %546 : vector<8x96xf32>
    %548 = vector.extract_strided_slice %541 {offsets = [0, 96], sizes = [8, 32], strides = [1, 1]} : vector<8x128xf32> to vector<8x32xf32>
    %549 = math.tanh %548 : vector<8x32xf32>
    %550 = vector.extract_strided_slice %547 {offsets = [0, 32], sizes = [8, 32], strides = [1, 1]} : vector<8x96xf32> to vector<8x32xf32>
    %551 = arith.mulf %550, %514 : vector<8x32xf32>
    %552 = vector.extract_strided_slice %547 {offsets = [0, 0], sizes = [8, 32], strides = [1, 1]} : vector<8x96xf32> to vector<8x32xf32>
    %553 = arith.mulf %552, %549 : vector<8x32xf32>
    %554 = arith.addf %551, %553 : vector<8x32xf32>
    %555 = vector.extract_strided_slice %547 {offsets = [0, 64], sizes = [8, 32], strides = [1, 1]} : vector<8x96xf32> to vector<8x32xf32>
    %556 = math.tanh %554 : vector<8x32xf32>
    %557 = arith.mulf %555, %556 : vector<8x32xf32>
    %558 = arith.addf %536, %540 : vector<8x128xf32>
    %559 = vector.extract_strided_slice %558 {offsets = [0, 0], sizes = [8, 96], strides = [1, 1]} : vector<8x128xf32> to vector<8x96xf32>
    %560 = arith.negf %559 : vector<8x96xf32>
    %561 = math.exp %560 : vector<8x96xf32>
    %cst_111 = arith.constant 1.000000e+00 : f32
    %562 = vector.broadcast %cst_111 : f32 to vector<8x96xf32>
    %563 = arith.addf %562, %561 : vector<8x96xf32>
    %564 = arith.divf %562, %563 : vector<8x96xf32>
    %565 = vector.extract_strided_slice %558 {offsets = [0, 96], sizes = [8, 32], strides = [1, 1]} : vector<8x128xf32> to vector<8x32xf32>
    %566 = math.tanh %565 : vector<8x32xf32>
    %567 = vector.extract_strided_slice %564 {offsets = [0, 32], sizes = [8, 32], strides = [1, 1]} : vector<8x96xf32> to vector<8x32xf32>
    %568 = arith.mulf %567, %531 : vector<8x32xf32>
    %569 = vector.extract_strided_slice %564 {offsets = [0, 0], sizes = [8, 32], strides = [1, 1]} : vector<8x96xf32> to vector<8x32xf32>
    %570 = arith.mulf %569, %566 : vector<8x32xf32>
    %571 = arith.addf %568, %570 : vector<8x32xf32>
    %572 = vector.extract_strided_slice %564 {offsets = [0, 64], sizes = [8, 32], strides = [1, 1]} : vector<8x96xf32> to vector<8x32xf32>
    %573 = math.tanh %571 : vector<8x32xf32>
    %574 = arith.mulf %572, %573 : vector<8x32xf32>
    %c112_112 = arith.constant 112 : index
    %c0_113 = arith.constant 0 : index
    %575 = vector.load %arg5[%c112_112, %c0_113] : memref<128x256xf32, #tpu.memory_space<vmem>>, vector<8x128xf32>
    %c8_114 = arith.constant 8 : index
    %c128_115 = arith.constant 128 : index
    %576 = vector.load %arg5[%c8_114, %c128_115] : memref<128x256xf32, #tpu.memory_space<vmem>>, vector<8x128xf32>
    %577 = arith.truncf %557 : vector<8x32xf32> to vector<8x32xbf16>
    %cst_116 = arith.constant dense<0.000000e+00> : vector<8x128xf32>
    %578 = tpu.matmul %577, %8, %cst_116 {dimension_numbers = #tpu.dot_dimension_numbers<[1], [0], [0], [1], [0, 0, 1, 1], [], []>} : vector<8x32xbf16>, vector<32x128xbf16>, vector<8x128xf32> -> vector<8x128xf32>
    %579 = arith.truncf %574 : vector<8x32xf32> to vector<8x32xbf16>
    %cst_117 = arith.constant dense<0.000000e+00> : vector<8x128xf32>
    %580 = tpu.matmul %579, %10, %cst_117 {dimension_numbers = #tpu.dot_dimension_numbers<[1], [0], [0], [1], [0, 0, 1, 1], [], []>} : vector<8x32xbf16>, vector<32x128xbf16>, vector<8x128xf32> -> vector<8x128xf32>
    %581 = arith.addf %575, %578 : vector<8x128xf32>
    %582 = vector.extract_strided_slice %581 {offsets = [0, 0], sizes = [8, 96], strides = [1, 1]} : vector<8x128xf32> to vector<8x96xf32>
    %583 = arith.negf %582 : vector<8x96xf32>
    %584 = math.exp %583 : vector<8x96xf32>
    %cst_118 = arith.constant 1.000000e+00 : f32
    %585 = vector.broadcast %cst_118 : f32 to vector<8x96xf32>
    %586 = arith.addf %585, %584 : vector<8x96xf32>
    %587 = arith.divf %585, %586 : vector<8x96xf32>
    %588 = vector.extract_strided_slice %581 {offsets = [0, 96], sizes = [8, 32], strides = [1, 1]} : vector<8x128xf32> to vector<8x32xf32>
    %589 = math.tanh %588 : vector<8x32xf32>
    %590 = vector.extract_strided_slice %587 {offsets = [0, 32], sizes = [8, 32], strides = [1, 1]} : vector<8x96xf32> to vector<8x32xf32>
    %591 = arith.mulf %590, %554 : vector<8x32xf32>
    %592 = vector.extract_strided_slice %587 {offsets = [0, 0], sizes = [8, 32], strides = [1, 1]} : vector<8x96xf32> to vector<8x32xf32>
    %593 = arith.mulf %592, %589 : vector<8x32xf32>
    %594 = arith.addf %591, %593 : vector<8x32xf32>
    %595 = vector.extract_strided_slice %587 {offsets = [0, 64], sizes = [8, 32], strides = [1, 1]} : vector<8x96xf32> to vector<8x32xf32>
    %596 = math.tanh %594 : vector<8x32xf32>
    %597 = arith.mulf %595, %596 : vector<8x32xf32>
    %598 = arith.addf %576, %580 : vector<8x128xf32>
    %599 = vector.extract_strided_slice %598 {offsets = [0, 0], sizes = [8, 96], strides = [1, 1]} : vector<8x128xf32> to vector<8x96xf32>
    %600 = arith.negf %599 : vector<8x96xf32>
    %601 = math.exp %600 : vector<8x96xf32>
    %cst_119 = arith.constant 1.000000e+00 : f32
    %602 = vector.broadcast %cst_119 : f32 to vector<8x96xf32>
    %603 = arith.addf %602, %601 : vector<8x96xf32>
    %604 = arith.divf %602, %603 : vector<8x96xf32>
    %605 = vector.extract_strided_slice %598 {offsets = [0, 96], sizes = [8, 32], strides = [1, 1]} : vector<8x128xf32> to vector<8x32xf32>
    %606 = math.tanh %605 : vector<8x32xf32>
    %607 = vector.extract_strided_slice %604 {offsets = [0, 32], sizes = [8, 32], strides = [1, 1]} : vector<8x96xf32> to vector<8x32xf32>
    %608 = arith.mulf %607, %571 : vector<8x32xf32>
    %609 = vector.extract_strided_slice %604 {offsets = [0, 0], sizes = [8, 32], strides = [1, 1]} : vector<8x96xf32> to vector<8x32xf32>
    %610 = arith.mulf %609, %606 : vector<8x32xf32>
    %611 = arith.addf %608, %610 : vector<8x32xf32>
    %612 = vector.extract_strided_slice %604 {offsets = [0, 64], sizes = [8, 32], strides = [1, 1]} : vector<8x96xf32> to vector<8x32xf32>
    %613 = math.tanh %611 : vector<8x32xf32>
    %614 = arith.mulf %612, %613 : vector<8x32xf32>
    %c120_120 = arith.constant 120 : index
    %c0_121 = arith.constant 0 : index
    %615 = vector.load %arg5[%c120_120, %c0_121] : memref<128x256xf32, #tpu.memory_space<vmem>>, vector<8x128xf32>
    %c0_122 = arith.constant 0 : index
    %c128_123 = arith.constant 128 : index
    %616 = vector.load %arg5[%c0_122, %c128_123] : memref<128x256xf32, #tpu.memory_space<vmem>>, vector<8x128xf32>
    %617 = arith.truncf %597 : vector<8x32xf32> to vector<8x32xbf16>
    %cst_124 = arith.constant dense<0.000000e+00> : vector<8x128xf32>
    %618 = tpu.matmul %617, %8, %cst_124 {dimension_numbers = #tpu.dot_dimension_numbers<[1], [0], [0], [1], [0, 0, 1, 1], [], []>} : vector<8x32xbf16>, vector<32x128xbf16>, vector<8x128xf32> -> vector<8x128xf32>
    %619 = arith.truncf %614 : vector<8x32xf32> to vector<8x32xbf16>
    %cst_125 = arith.constant dense<0.000000e+00> : vector<8x128xf32>
    %620 = tpu.matmul %619, %10, %cst_125 {dimension_numbers = #tpu.dot_dimension_numbers<[1], [0], [0], [1], [0, 0, 1, 1], [], []>} : vector<8x32xbf16>, vector<32x128xbf16>, vector<8x128xf32> -> vector<8x128xf32>
    %621 = arith.addf %615, %618 : vector<8x128xf32>
    %622 = vector.extract_strided_slice %621 {offsets = [0, 0], sizes = [8, 96], strides = [1, 1]} : vector<8x128xf32> to vector<8x96xf32>
    %623 = arith.negf %622 : vector<8x96xf32>
    %624 = math.exp %623 : vector<8x96xf32>
    %cst_126 = arith.constant 1.000000e+00 : f32
    %625 = vector.broadcast %cst_126 : f32 to vector<8x96xf32>
    %626 = arith.addf %625, %624 : vector<8x96xf32>
    %627 = arith.divf %625, %626 : vector<8x96xf32>
    %628 = vector.extract_strided_slice %621 {offsets = [0, 96], sizes = [8, 32], strides = [1, 1]} : vector<8x128xf32> to vector<8x32xf32>
    %629 = math.tanh %628 : vector<8x32xf32>
    %630 = vector.extract_strided_slice %627 {offsets = [0, 32], sizes = [8, 32], strides = [1, 1]} : vector<8x96xf32> to vector<8x32xf32>
    %631 = arith.mulf %630, %594 : vector<8x32xf32>
    %632 = vector.extract_strided_slice %627 {offsets = [0, 0], sizes = [8, 32], strides = [1, 1]} : vector<8x96xf32> to vector<8x32xf32>
    %633 = arith.mulf %632, %629 : vector<8x32xf32>
    %634 = arith.addf %631, %633 : vector<8x32xf32>
    %635 = vector.extract_strided_slice %627 {offsets = [0, 64], sizes = [8, 32], strides = [1, 1]} : vector<8x96xf32> to vector<8x32xf32>
    %636 = math.tanh %634 : vector<8x32xf32>
    %637 = arith.mulf %635, %636 : vector<8x32xf32>
    %638 = arith.addf %616, %620 : vector<8x128xf32>
    %639 = vector.extract_strided_slice %638 {offsets = [0, 0], sizes = [8, 96], strides = [1, 1]} : vector<8x128xf32> to vector<8x96xf32>
    %640 = arith.negf %639 : vector<8x96xf32>
    %641 = math.exp %640 : vector<8x96xf32>
    %cst_127 = arith.constant 1.000000e+00 : f32
    %642 = vector.broadcast %cst_127 : f32 to vector<8x96xf32>
    %643 = arith.addf %642, %641 : vector<8x96xf32>
    %644 = arith.divf %642, %643 : vector<8x96xf32>
    %645 = vector.extract_strided_slice %638 {offsets = [0, 96], sizes = [8, 32], strides = [1, 1]} : vector<8x128xf32> to vector<8x32xf32>
    %646 = math.tanh %645 : vector<8x32xf32>
    %647 = vector.extract_strided_slice %644 {offsets = [0, 32], sizes = [8, 32], strides = [1, 1]} : vector<8x96xf32> to vector<8x32xf32>
    %648 = arith.mulf %647, %611 : vector<8x32xf32>
    %649 = vector.extract_strided_slice %644 {offsets = [0, 0], sizes = [8, 32], strides = [1, 1]} : vector<8x96xf32> to vector<8x32xf32>
    %650 = arith.mulf %649, %646 : vector<8x32xf32>
    %651 = arith.addf %648, %650 : vector<8x32xf32>
    %652 = vector.extract_strided_slice %644 {offsets = [0, 64], sizes = [8, 32], strides = [1, 1]} : vector<8x96xf32> to vector<8x32xf32>
    %653 = math.tanh %651 : vector<8x32xf32>
    %654 = arith.mulf %652, %653 : vector<8x32xf32>
    %655 = tpu.concatenate %37, %77, %117, %157, %197, %237, %277, %317, %357, %397, %437, %477, %517, %557, %597, %637 in 0 : vector<8x32xf32>, vector<8x32xf32>, vector<8x32xf32>, vector<8x32xf32>, vector<8x32xf32>, vector<8x32xf32>, vector<8x32xf32>, vector<8x32xf32>, vector<8x32xf32>, vector<8x32xf32>, vector<8x32xf32>, vector<8x32xf32>, vector<8x32xf32>, vector<8x32xf32>, vector<8x32xf32>, vector<8x32xf32> -> vector<128x32xf32>
    %656 = tpu.concatenate %654, %614, %574, %534, %494, %454, %414, %374, %334, %294, %254, %214, %174, %134, %94, %54 in 0 : vector<8x32xf32>, vector<8x32xf32>, vector<8x32xf32>, vector<8x32xf32>, vector<8x32xf32>, vector<8x32xf32>, vector<8x32xf32>, vector<8x32xf32>, vector<8x32xf32>, vector<8x32xf32>, vector<8x32xf32>, vector<8x32xf32>, vector<8x32xf32>, vector<8x32xf32>, vector<8x32xf32>, vector<8x32xf32> -> vector<128x32xf32>
    %657 = tpu.concatenate %655, %656 in 1 : vector<128x32xf32>, vector<128x32xf32> -> vector<128x64xf32>
    %658 = arith.truncf %657 : vector<128x64xf32> to vector<128x64xbf16>
    %c0_128 = arith.constant 0 : index
    %c0_129 = arith.constant 0 : index
    %659 = vector.load %arg4[%c0_128, %c0_129] : memref<128x64xbf16, #tpu.memory_space<vmem>>, vector<128x64xbf16>
    tpu.vector_store %arg4[%c0_128, %c0_129], %658 {strides = array<i32>} : memref<128x64xbf16, #tpu.memory_space<vmem>>, vector<128x64xbf16>,
    return
  }
}

module attributes {stable_mosaic.version = 11 : i64} {
  func.func @_conv_mlp_kernel(%arg0: memref<128x64xbf16, #tpu.memory_space<vmem>>, %arg1: memref<3x64x32xbf16, #tpu.memory_space<vmem>>, %arg2: memref<1x32xf32, #tpu.memory_space<vmem>>, %arg3: memref<5x64x32xbf16, #tpu.memory_space<vmem>>, %arg4: memref<1x32xf32, #tpu.memory_space<vmem>>, %arg5: memref<7x64x32xbf16, #tpu.memory_space<vmem>>, %arg6: memref<1x32xf32, #tpu.memory_space<vmem>>, %arg7: memref<96x128xbf16, #tpu.memory_space<vmem>>, %arg8: memref<1x128xf32, #tpu.memory_space<vmem>>, %arg9: memref<128x2xbf16, #tpu.memory_space<vmem>>, %arg10: memref<1x2xf32, #tpu.memory_space<vmem>>, %arg11: memref<8x2xf32, #tpu.memory_space<vmem>>) attributes {dimension_semantics = [], scalar_prefetch = 0 : i64, scratch_operands = 0 : i64, tpu.core_type = #tpu.core_type<tc>} {
    %c0 = arith.constant 0 : index
    %c0_0 = arith.constant 0 : index
    %0 = vector.load %arg0[%c0, %c0_0] : memref<128x64xbf16, #tpu.memory_space<vmem>>, vector<128x64xbf16>
    %cst = arith.constant 0.000000e+00 : f32
    %1 = vector.broadcast %cst : f32 to vector<112x32xf32>
    %2 = vector.extract_strided_slice %0 {offsets = [0, 0], sizes = [112, 64], strides = [1, 1]} : vector<128x64xbf16> to vector<112x64xbf16>
    %c0_1 = arith.constant 0 : index
    %c0_2 = arith.constant 0 : index
    %c0_3 = arith.constant 0 : index
    %3 = vector.load %arg1[%c0_1, %c0_2, %c0_3] : memref<3x64x32xbf16, #tpu.memory_space<vmem>>, vector<1x64x32xbf16>
    %4 = vector.shape_cast %3 : vector<1x64x32xbf16> to vector<64x32xbf16>
    %cst_4 = arith.constant dense<0.000000e+00> : vector<112x32xf32>
    %5 = tpu.matmul %2, %4, %cst_4 {dimension_numbers = #tpu.dot_dimension_numbers<[1], [0], [0], [1], [0, 0, 1, 1], [], []>} : vector<112x64xbf16>, vector<64x32xbf16>, vector<112x32xf32> -> vector<112x32xf32>
    %6 = arith.addf %1, %5 : vector<112x32xf32>
    %7 = vector.extract_strided_slice %0 {offsets = [8, 0], sizes = [112, 64], strides = [1, 1]} : vector<128x64xbf16> to vector<112x64xbf16>
    %c1 = arith.constant 1 : index
    %c0_5 = arith.constant 0 : index
    %c0_6 = arith.constant 0 : index
    %8 = vector.load %arg1[%c1, %c0_5, %c0_6] : memref<3x64x32xbf16, #tpu.memory_space<vmem>>, vector<1x64x32xbf16>
    %9 = vector.shape_cast %8 : vector<1x64x32xbf16> to vector<64x32xbf16>
    %cst_7 = arith.constant dense<0.000000e+00> : vector<112x32xf32>
    %10 = tpu.matmul %7, %9, %cst_7 {dimension_numbers = #tpu.dot_dimension_numbers<[1], [0], [0], [1], [0, 0, 1, 1], [], []>} : vector<112x64xbf16>, vector<64x32xbf16>, vector<112x32xf32> -> vector<112x32xf32>
    %11 = arith.addf %6, %10 : vector<112x32xf32>
    %12 = vector.extract_strided_slice %0 {offsets = [16, 0], sizes = [112, 64], strides = [1, 1]} : vector<128x64xbf16> to vector<112x64xbf16>
    %c2 = arith.constant 2 : index
    %c0_8 = arith.constant 0 : index
    %c0_9 = arith.constant 0 : index
    %13 = vector.load %arg1[%c2, %c0_8, %c0_9] : memref<3x64x32xbf16, #tpu.memory_space<vmem>>, vector<1x64x32xbf16>
    %14 = vector.shape_cast %13 : vector<1x64x32xbf16> to vector<64x32xbf16>
    %cst_10 = arith.constant dense<0.000000e+00> : vector<112x32xf32>
    %15 = tpu.matmul %12, %14, %cst_10 {dimension_numbers = #tpu.dot_dimension_numbers<[1], [0], [0], [1], [0, 0, 1, 1], [], []>} : vector<112x64xbf16>, vector<64x32xbf16>, vector<112x32xf32> -> vector<112x32xf32>
    %16 = arith.addf %11, %15 : vector<112x32xf32>
    %c0_11 = arith.constant 0 : index
    %c0_12 = arith.constant 0 : index
    %17 = vector.load %arg2[%c0_11, %c0_12] : memref<1x32xf32, #tpu.memory_space<vmem>>, vector<1x32xf32>
    %18 = vector.broadcast %17 : vector<1x32xf32> to vector<112x32xf32>
    %19 = arith.addf %16, %18 : vector<112x32xf32>
    %cst_13 = arith.constant 0.000000e+00 : f32
    %20 = vector.broadcast %cst_13 : f32 to vector<112x32xf32>
    %21 = arith.maximumf %19, %20 : vector<112x32xf32>
    %22 = vector.extract_strided_slice %21 {offsets = [0, 0], sizes = [8, 32], strides = [1, 1]} : vector<112x32xf32> to vector<8x32xf32>
    %23 = vector.extract_strided_slice %21 {offsets = [8, 0], sizes = [8, 32], strides = [1, 1]} : vector<112x32xf32> to vector<8x32xf32>
    %24 = vector.extract_strided_slice %21 {offsets = [16, 0], sizes = [8, 32], strides = [1, 1]} : vector<112x32xf32> to vector<8x32xf32>
    %25 = vector.extract_strided_slice %21 {offsets = [24, 0], sizes = [8, 32], strides = [1, 1]} : vector<112x32xf32> to vector<8x32xf32>
    %26 = vector.extract_strided_slice %21 {offsets = [32, 0], sizes = [8, 32], strides = [1, 1]} : vector<112x32xf32> to vector<8x32xf32>
    %27 = vector.extract_strided_slice %21 {offsets = [40, 0], sizes = [8, 32], strides = [1, 1]} : vector<112x32xf32> to vector<8x32xf32>
    %28 = vector.extract_strided_slice %21 {offsets = [48, 0], sizes = [8, 32], strides = [1, 1]} : vector<112x32xf32> to vector<8x32xf32>
    %29 = vector.extract_strided_slice %21 {offsets = [56, 0], sizes = [8, 32], strides = [1, 1]} : vector<112x32xf32> to vector<8x32xf32>
    %30 = vector.extract_strided_slice %21 {offsets = [64, 0], sizes = [8, 32], strides = [1, 1]} : vector<112x32xf32> to vector<8x32xf32>
    %31 = vector.extract_strided_slice %21 {offsets = [72, 0], sizes = [8, 32], strides = [1, 1]} : vector<112x32xf32> to vector<8x32xf32>
    %32 = vector.extract_strided_slice %21 {offsets = [80, 0], sizes = [8, 32], strides = [1, 1]} : vector<112x32xf32> to vector<8x32xf32>
    %33 = vector.extract_strided_slice %21 {offsets = [88, 0], sizes = [8, 32], strides = [1, 1]} : vector<112x32xf32> to vector<8x32xf32>
    %34 = vector.extract_strided_slice %21 {offsets = [96, 0], sizes = [8, 32], strides = [1, 1]} : vector<112x32xf32> to vector<8x32xf32>
    %35 = vector.extract_strided_slice %21 {offsets = [104, 0], sizes = [8, 32], strides = [1, 1]} : vector<112x32xf32> to vector<8x32xf32>
    %36 = arith.maximumf %22, %23 : vector<8x32xf32>
    %37 = arith.maximumf %24, %25 : vector<8x32xf32>
    %38 = arith.maximumf %26, %27 : vector<8x32xf32>
    %39 = arith.maximumf %28, %29 : vector<8x32xf32>
    %40 = arith.maximumf %30, %31 : vector<8x32xf32>
    %41 = arith.maximumf %32, %33 : vector<8x32xf32>
    %42 = arith.maximumf %34, %35 : vector<8x32xf32>
    %43 = arith.maximumf %36, %37 : vector<8x32xf32>
    %44 = arith.maximumf %38, %39 : vector<8x32xf32>
    %45 = arith.maximumf %40, %41 : vector<8x32xf32>
    %46 = arith.maximumf %43, %44 : vector<8x32xf32>
    %47 = arith.maximumf %45, %42 : vector<8x32xf32>
    %48 = arith.maximumf %46, %47 : vector<8x32xf32>
    %cst_14 = arith.constant 0.000000e+00 : f32
    %49 = vector.broadcast %cst_14 : f32 to vector<96x32xf32>
    %50 = vector.extract_strided_slice %0 {offsets = [0, 0], sizes = [96, 64], strides = [1, 1]} : vector<128x64xbf16> to vector<96x64xbf16>
    %c0_15 = arith.constant 0 : index
    %c0_16 = arith.constant 0 : index
    %c0_17 = arith.constant 0 : index
    %51 = vector.load %arg3[%c0_15, %c0_16, %c0_17] : memref<5x64x32xbf16, #tpu.memory_space<vmem>>, vector<1x64x32xbf16>
    %52 = vector.shape_cast %51 : vector<1x64x32xbf16> to vector<64x32xbf16>
    %cst_18 = arith.constant dense<0.000000e+00> : vector<96x32xf32>
    %53 = tpu.matmul %50, %52, %cst_18 {dimension_numbers = #tpu.dot_dimension_numbers<[1], [0], [0], [1], [0, 0, 1, 1], [], []>} : vector<96x64xbf16>, vector<64x32xbf16>, vector<96x32xf32> -> vector<96x32xf32>
    %54 = arith.addf %49, %53 : vector<96x32xf32>
    %55 = vector.extract_strided_slice %0 {offsets = [8, 0], sizes = [96, 64], strides = [1, 1]} : vector<128x64xbf16> to vector<96x64xbf16>
    %c1_19 = arith.constant 1 : index
    %c0_20 = arith.constant 0 : index
    %c0_21 = arith.constant 0 : index
    %56 = vector.load %arg3[%c1_19, %c0_20, %c0_21] : memref<5x64x32xbf16, #tpu.memory_space<vmem>>, vector<1x64x32xbf16>
    %57 = vector.shape_cast %56 : vector<1x64x32xbf16> to vector<64x32xbf16>
    %cst_22 = arith.constant dense<0.000000e+00> : vector<96x32xf32>
    %58 = tpu.matmul %55, %57, %cst_22 {dimension_numbers = #tpu.dot_dimension_numbers<[1], [0], [0], [1], [0, 0, 1, 1], [], []>} : vector<96x64xbf16>, vector<64x32xbf16>, vector<96x32xf32> -> vector<96x32xf32>
    %59 = arith.addf %54, %58 : vector<96x32xf32>
    %60 = vector.extract_strided_slice %0 {offsets = [16, 0], sizes = [96, 64], strides = [1, 1]} : vector<128x64xbf16> to vector<96x64xbf16>
    %c2_23 = arith.constant 2 : index
    %c0_24 = arith.constant 0 : index
    %c0_25 = arith.constant 0 : index
    %61 = vector.load %arg3[%c2_23, %c0_24, %c0_25] : memref<5x64x32xbf16, #tpu.memory_space<vmem>>, vector<1x64x32xbf16>
    %62 = vector.shape_cast %61 : vector<1x64x32xbf16> to vector<64x32xbf16>
    %cst_26 = arith.constant dense<0.000000e+00> : vector<96x32xf32>
    %63 = tpu.matmul %60, %62, %cst_26 {dimension_numbers = #tpu.dot_dimension_numbers<[1], [0], [0], [1], [0, 0, 1, 1], [], []>} : vector<96x64xbf16>, vector<64x32xbf16>, vector<96x32xf32> -> vector<96x32xf32>
    %64 = arith.addf %59, %63 : vector<96x32xf32>
    %65 = vector.extract_strided_slice %0 {offsets = [24, 0], sizes = [96, 64], strides = [1, 1]} : vector<128x64xbf16> to vector<96x64xbf16>
    %c3 = arith.constant 3 : index
    %c0_27 = arith.constant 0 : index
    %c0_28 = arith.constant 0 : index
    %66 = vector.load %arg3[%c3, %c0_27, %c0_28] : memref<5x64x32xbf16, #tpu.memory_space<vmem>>, vector<1x64x32xbf16>
    %67 = vector.shape_cast %66 : vector<1x64x32xbf16> to vector<64x32xbf16>
    %cst_29 = arith.constant dense<0.000000e+00> : vector<96x32xf32>
    %68 = tpu.matmul %65, %67, %cst_29 {dimension_numbers = #tpu.dot_dimension_numbers<[1], [0], [0], [1], [0, 0, 1, 1], [], []>} : vector<96x64xbf16>, vector<64x32xbf16>, vector<96x32xf32> -> vector<96x32xf32>
    %69 = arith.addf %64, %68 : vector<96x32xf32>
    %70 = vector.extract_strided_slice %0 {offsets = [32, 0], sizes = [96, 64], strides = [1, 1]} : vector<128x64xbf16> to vector<96x64xbf16>
    %c4 = arith.constant 4 : index
    %c0_30 = arith.constant 0 : index
    %c0_31 = arith.constant 0 : index
    %71 = vector.load %arg3[%c4, %c0_30, %c0_31] : memref<5x64x32xbf16, #tpu.memory_space<vmem>>, vector<1x64x32xbf16>
    %72 = vector.shape_cast %71 : vector<1x64x32xbf16> to vector<64x32xbf16>
    %cst_32 = arith.constant dense<0.000000e+00> : vector<96x32xf32>
    %73 = tpu.matmul %70, %72, %cst_32 {dimension_numbers = #tpu.dot_dimension_numbers<[1], [0], [0], [1], [0, 0, 1, 1], [], []>} : vector<96x64xbf16>, vector<64x32xbf16>, vector<96x32xf32> -> vector<96x32xf32>
    %74 = arith.addf %69, %73 : vector<96x32xf32>
    %c0_33 = arith.constant 0 : index
    %c0_34 = arith.constant 0 : index
    %75 = vector.load %arg4[%c0_33, %c0_34] : memref<1x32xf32, #tpu.memory_space<vmem>>, vector<1x32xf32>
    %76 = vector.broadcast %75 : vector<1x32xf32> to vector<96x32xf32>
    %77 = arith.addf %74, %76 : vector<96x32xf32>
    %cst_35 = arith.constant 0.000000e+00 : f32
    %78 = vector.broadcast %cst_35 : f32 to vector<96x32xf32>
    %79 = arith.maximumf %77, %78 : vector<96x32xf32>
    %80 = vector.extract_strided_slice %79 {offsets = [0, 0], sizes = [8, 32], strides = [1, 1]} : vector<96x32xf32> to vector<8x32xf32>
    %81 = vector.extract_strided_slice %79 {offsets = [8, 0], sizes = [8, 32], strides = [1, 1]} : vector<96x32xf32> to vector<8x32xf32>
    %82 = vector.extract_strided_slice %79 {offsets = [16, 0], sizes = [8, 32], strides = [1, 1]} : vector<96x32xf32> to vector<8x32xf32>
    %83 = vector.extract_strided_slice %79 {offsets = [24, 0], sizes = [8, 32], strides = [1, 1]} : vector<96x32xf32> to vector<8x32xf32>
    %84 = vector.extract_strided_slice %79 {offsets = [32, 0], sizes = [8, 32], strides = [1, 1]} : vector<96x32xf32> to vector<8x32xf32>
    %85 = vector.extract_strided_slice %79 {offsets = [40, 0], sizes = [8, 32], strides = [1, 1]} : vector<96x32xf32> to vector<8x32xf32>
    %86 = vector.extract_strided_slice %79 {offsets = [48, 0], sizes = [8, 32], strides = [1, 1]} : vector<96x32xf32> to vector<8x32xf32>
    %87 = vector.extract_strided_slice %79 {offsets = [56, 0], sizes = [8, 32], strides = [1, 1]} : vector<96x32xf32> to vector<8x32xf32>
    %88 = vector.extract_strided_slice %79 {offsets = [64, 0], sizes = [8, 32], strides = [1, 1]} : vector<96x32xf32> to vector<8x32xf32>
    %89 = vector.extract_strided_slice %79 {offsets = [72, 0], sizes = [8, 32], strides = [1, 1]} : vector<96x32xf32> to vector<8x32xf32>
    %90 = vector.extract_strided_slice %79 {offsets = [80, 0], sizes = [8, 32], strides = [1, 1]} : vector<96x32xf32> to vector<8x32xf32>
    %91 = vector.extract_strided_slice %79 {offsets = [88, 0], sizes = [8, 32], strides = [1, 1]} : vector<96x32xf32> to vector<8x32xf32>
    %92 = arith.maximumf %80, %81 : vector<8x32xf32>
    %93 = arith.maximumf %82, %83 : vector<8x32xf32>
    %94 = arith.maximumf %84, %85 : vector<8x32xf32>
    %95 = arith.maximumf %86, %87 : vector<8x32xf32>
    %96 = arith.maximumf %88, %89 : vector<8x32xf32>
    %97 = arith.maximumf %90, %91 : vector<8x32xf32>
    %98 = arith.maximumf %92, %93 : vector<8x32xf32>
    %99 = arith.maximumf %94, %95 : vector<8x32xf32>
    %100 = arith.maximumf %96, %97 : vector<8x32xf32>
    %101 = arith.maximumf %98, %99 : vector<8x32xf32>
    %102 = arith.maximumf %101, %100 : vector<8x32xf32>
    %cst_36 = arith.constant 0.000000e+00 : f32
    %103 = vector.broadcast %cst_36 : f32 to vector<80x32xf32>
    %104 = vector.extract_strided_slice %0 {offsets = [0, 0], sizes = [80, 64], strides = [1, 1]} : vector<128x64xbf16> to vector<80x64xbf16>
    %c0_37 = arith.constant 0 : index
    %c0_38 = arith.constant 0 : index
    %c0_39 = arith.constant 0 : index
    %105 = vector.load %arg5[%c0_37, %c0_38, %c0_39] : memref<7x64x32xbf16, #tpu.memory_space<vmem>>, vector<1x64x32xbf16>
    %106 = vector.shape_cast %105 : vector<1x64x32xbf16> to vector<64x32xbf16>
    %cst_40 = arith.constant dense<0.000000e+00> : vector<80x32xf32>
    %107 = tpu.matmul %104, %106, %cst_40 {dimension_numbers = #tpu.dot_dimension_numbers<[1], [0], [0], [1], [0, 0, 1, 1], [], []>} : vector<80x64xbf16>, vector<64x32xbf16>, vector<80x32xf32> -> vector<80x32xf32>
    %108 = arith.addf %103, %107 : vector<80x32xf32>
    %109 = vector.extract_strided_slice %0 {offsets = [8, 0], sizes = [80, 64], strides = [1, 1]} : vector<128x64xbf16> to vector<80x64xbf16>
    %c1_41 = arith.constant 1 : index
    %c0_42 = arith.constant 0 : index
    %c0_43 = arith.constant 0 : index
    %110 = vector.load %arg5[%c1_41, %c0_42, %c0_43] : memref<7x64x32xbf16, #tpu.memory_space<vmem>>, vector<1x64x32xbf16>
    %111 = vector.shape_cast %110 : vector<1x64x32xbf16> to vector<64x32xbf16>
    %cst_44 = arith.constant dense<0.000000e+00> : vector<80x32xf32>
    %112 = tpu.matmul %109, %111, %cst_44 {dimension_numbers = #tpu.dot_dimension_numbers<[1], [0], [0], [1], [0, 0, 1, 1], [], []>} : vector<80x64xbf16>, vector<64x32xbf16>, vector<80x32xf32> -> vector<80x32xf32>
    %113 = arith.addf %108, %112 : vector<80x32xf32>
    %114 = vector.extract_strided_slice %0 {offsets = [16, 0], sizes = [80, 64], strides = [1, 1]} : vector<128x64xbf16> to vector<80x64xbf16>
    %c2_45 = arith.constant 2 : index
    %c0_46 = arith.constant 0 : index
    %c0_47 = arith.constant 0 : index
    %115 = vector.load %arg5[%c2_45, %c0_46, %c0_47] : memref<7x64x32xbf16, #tpu.memory_space<vmem>>, vector<1x64x32xbf16>
    %116 = vector.shape_cast %115 : vector<1x64x32xbf16> to vector<64x32xbf16>
    %cst_48 = arith.constant dense<0.000000e+00> : vector<80x32xf32>
    %117 = tpu.matmul %114, %116, %cst_48 {dimension_numbers = #tpu.dot_dimension_numbers<[1], [0], [0], [1], [0, 0, 1, 1], [], []>} : vector<80x64xbf16>, vector<64x32xbf16>, vector<80x32xf32> -> vector<80x32xf32>
    %118 = arith.addf %113, %117 : vector<80x32xf32>
    %119 = vector.extract_strided_slice %0 {offsets = [24, 0], sizes = [80, 64], strides = [1, 1]} : vector<128x64xbf16> to vector<80x64xbf16>
    %c3_49 = arith.constant 3 : index
    %c0_50 = arith.constant 0 : index
    %c0_51 = arith.constant 0 : index
    %120 = vector.load %arg5[%c3_49, %c0_50, %c0_51] : memref<7x64x32xbf16, #tpu.memory_space<vmem>>, vector<1x64x32xbf16>
    %121 = vector.shape_cast %120 : vector<1x64x32xbf16> to vector<64x32xbf16>
    %cst_52 = arith.constant dense<0.000000e+00> : vector<80x32xf32>
    %122 = tpu.matmul %119, %121, %cst_52 {dimension_numbers = #tpu.dot_dimension_numbers<[1], [0], [0], [1], [0, 0, 1, 1], [], []>} : vector<80x64xbf16>, vector<64x32xbf16>, vector<80x32xf32> -> vector<80x32xf32>
    %123 = arith.addf %118, %122 : vector<80x32xf32>
    %124 = vector.extract_strided_slice %0 {offsets = [32, 0], sizes = [80, 64], strides = [1, 1]} : vector<128x64xbf16> to vector<80x64xbf16>
    %c4_53 = arith.constant 4 : index
    %c0_54 = arith.constant 0 : index
    %c0_55 = arith.constant 0 : index
    %125 = vector.load %arg5[%c4_53, %c0_54, %c0_55] : memref<7x64x32xbf16, #tpu.memory_space<vmem>>, vector<1x64x32xbf16>
    %126 = vector.shape_cast %125 : vector<1x64x32xbf16> to vector<64x32xbf16>
    %cst_56 = arith.constant dense<0.000000e+00> : vector<80x32xf32>
    %127 = tpu.matmul %124, %126, %cst_56 {dimension_numbers = #tpu.dot_dimension_numbers<[1], [0], [0], [1], [0, 0, 1, 1], [], []>} : vector<80x64xbf16>, vector<64x32xbf16>, vector<80x32xf32> -> vector<80x32xf32>
    %128 = arith.addf %123, %127 : vector<80x32xf32>
    %129 = vector.extract_strided_slice %0 {offsets = [40, 0], sizes = [80, 64], strides = [1, 1]} : vector<128x64xbf16> to vector<80x64xbf16>
    %c5 = arith.constant 5 : index
    %c0_57 = arith.constant 0 : index
    %c0_58 = arith.constant 0 : index
    %130 = vector.load %arg5[%c5, %c0_57, %c0_58] : memref<7x64x32xbf16, #tpu.memory_space<vmem>>, vector<1x64x32xbf16>
    %131 = vector.shape_cast %130 : vector<1x64x32xbf16> to vector<64x32xbf16>
    %cst_59 = arith.constant dense<0.000000e+00> : vector<80x32xf32>
    %132 = tpu.matmul %129, %131, %cst_59 {dimension_numbers = #tpu.dot_dimension_numbers<[1], [0], [0], [1], [0, 0, 1, 1], [], []>} : vector<80x64xbf16>, vector<64x32xbf16>, vector<80x32xf32> -> vector<80x32xf32>
    %133 = arith.addf %128, %132 : vector<80x32xf32>
    %134 = vector.extract_strided_slice %0 {offsets = [48, 0], sizes = [80, 64], strides = [1, 1]} : vector<128x64xbf16> to vector<80x64xbf16>
    %c6 = arith.constant 6 : index
    %c0_60 = arith.constant 0 : index
    %c0_61 = arith.constant 0 : index
    %135 = vector.load %arg5[%c6, %c0_60, %c0_61] : memref<7x64x32xbf16, #tpu.memory_space<vmem>>, vector<1x64x32xbf16>
    %136 = vector.shape_cast %135 : vector<1x64x32xbf16> to vector<64x32xbf16>
    %cst_62 = arith.constant dense<0.000000e+00> : vector<80x32xf32>
    %137 = tpu.matmul %134, %136, %cst_62 {dimension_numbers = #tpu.dot_dimension_numbers<[1], [0], [0], [1], [0, 0, 1, 1], [], []>} : vector<80x64xbf16>, vector<64x32xbf16>, vector<80x32xf32> -> vector<80x32xf32>
    %138 = arith.addf %133, %137 : vector<80x32xf32>
    %c0_63 = arith.constant 0 : index
    %c0_64 = arith.constant 0 : index
    %139 = vector.load %arg6[%c0_63, %c0_64] : memref<1x32xf32, #tpu.memory_space<vmem>>, vector<1x32xf32>
    %140 = vector.broadcast %139 : vector<1x32xf32> to vector<80x32xf32>
    %141 = arith.addf %138, %140 : vector<80x32xf32>
    %cst_65 = arith.constant 0.000000e+00 : f32
    %142 = vector.broadcast %cst_65 : f32 to vector<80x32xf32>
    %143 = arith.maximumf %141, %142 : vector<80x32xf32>
    %144 = vector.extract_strided_slice %143 {offsets = [0, 0], sizes = [8, 32], strides = [1, 1]} : vector<80x32xf32> to vector<8x32xf32>
    %145 = vector.extract_strided_slice %143 {offsets = [8, 0], sizes = [8, 32], strides = [1, 1]} : vector<80x32xf32> to vector<8x32xf32>
    %146 = vector.extract_strided_slice %143 {offsets = [16, 0], sizes = [8, 32], strides = [1, 1]} : vector<80x32xf32> to vector<8x32xf32>
    %147 = vector.extract_strided_slice %143 {offsets = [24, 0], sizes = [8, 32], strides = [1, 1]} : vector<80x32xf32> to vector<8x32xf32>
    %148 = vector.extract_strided_slice %143 {offsets = [32, 0], sizes = [8, 32], strides = [1, 1]} : vector<80x32xf32> to vector<8x32xf32>
    %149 = vector.extract_strided_slice %143 {offsets = [40, 0], sizes = [8, 32], strides = [1, 1]} : vector<80x32xf32> to vector<8x32xf32>
    %150 = vector.extract_strided_slice %143 {offsets = [48, 0], sizes = [8, 32], strides = [1, 1]} : vector<80x32xf32> to vector<8x32xf32>
    %151 = vector.extract_strided_slice %143 {offsets = [56, 0], sizes = [8, 32], strides = [1, 1]} : vector<80x32xf32> to vector<8x32xf32>
    %152 = vector.extract_strided_slice %143 {offsets = [64, 0], sizes = [8, 32], strides = [1, 1]} : vector<80x32xf32> to vector<8x32xf32>
    %153 = vector.extract_strided_slice %143 {offsets = [72, 0], sizes = [8, 32], strides = [1, 1]} : vector<80x32xf32> to vector<8x32xf32>
    %154 = arith.maximumf %144, %145 : vector<8x32xf32>
    %155 = arith.maximumf %146, %147 : vector<8x32xf32>
    %156 = arith.maximumf %148, %149 : vector<8x32xf32>
    %157 = arith.maximumf %150, %151 : vector<8x32xf32>
    %158 = arith.maximumf %152, %153 : vector<8x32xf32>
    %159 = arith.maximumf %154, %155 : vector<8x32xf32>
    %160 = arith.maximumf %156, %157 : vector<8x32xf32>
    %161 = arith.maximumf %159, %160 : vector<8x32xf32>
    %162 = arith.maximumf %161, %158 : vector<8x32xf32>
    %163 = tpu.concatenate %48, %102, %162 in 1 : vector<8x32xf32>, vector<8x32xf32>, vector<8x32xf32> -> vector<8x96xf32>
    %164 = arith.truncf %163 : vector<8x96xf32> to vector<8x96xbf16>
    %c0_66 = arith.constant 0 : index
    %c0_67 = arith.constant 0 : index
    %165 = vector.load %arg7[%c0_66, %c0_67] : memref<96x128xbf16, #tpu.memory_space<vmem>>, vector<96x128xbf16>
    %cst_68 = arith.constant dense<0.000000e+00> : vector<8x128xf32>
    %166 = tpu.matmul %164, %165, %cst_68 {dimension_numbers = #tpu.dot_dimension_numbers<[1], [0], [0], [1], [0, 0, 1, 1], [], []>} : vector<8x96xbf16>, vector<96x128xbf16>, vector<8x128xf32> -> vector<8x128xf32>
    %c0_69 = arith.constant 0 : index
    %c0_70 = arith.constant 0 : index
    %167 = vector.load %arg8[%c0_69, %c0_70] : memref<1x128xf32, #tpu.memory_space<vmem>>, vector<1x128xf32>
    %168 = vector.broadcast %167 : vector<1x128xf32> to vector<8x128xf32>
    %169 = arith.addf %166, %168 : vector<8x128xf32>
    %cst_71 = arith.constant 0.000000e+00 : f32
    %170 = vector.broadcast %cst_71 : f32 to vector<8x128xf32>
    %171 = arith.maximumf %169, %170 : vector<8x128xf32>
    %172 = arith.truncf %171 : vector<8x128xf32> to vector<8x128xbf16>
    %c0_72 = arith.constant 0 : index
    %c0_73 = arith.constant 0 : index
    %173 = vector.load %arg9[%c0_72, %c0_73] : memref<128x2xbf16, #tpu.memory_space<vmem>>, vector<128x2xbf16>
    %cst_74 = arith.constant dense<0.000000e+00> : vector<8x2xf32>
    %174 = tpu.matmul %172, %173, %cst_74 {dimension_numbers = #tpu.dot_dimension_numbers<[1], [0], [0], [1], [0, 0, 1, 1], [], []>} : vector<8x128xbf16>, vector<128x2xbf16>, vector<8x2xf32> -> vector<8x2xf32>
    %c0_75 = arith.constant 0 : index
    %c0_76 = arith.constant 0 : index
    %175 = vector.load %arg10[%c0_75, %c0_76] : memref<1x2xf32, #tpu.memory_space<vmem>>, vector<1x2xf32>
    %176 = vector.broadcast %175 : vector<1x2xf32> to vector<8x2xf32>
    %177 = arith.addf %174, %176 : vector<8x2xf32>
    %c0_77 = arith.constant 0 : index
    %c0_78 = arith.constant 0 : index
    %178 = vector.load %arg11[%c0_77, %c0_78] : memref<8x2xf32, #tpu.memory_space<vmem>>, vector<8x2xf32>
    tpu.vector_store %arg11[%c0_77, %c0_78], %177 {strides = array<i32>} : memref<8x2xf32, #tpu.memory_space<vmem>>, vector<8x2xf32>,
    return
  }
}

</mosaic_0001>

<bundles_post_ra>
// kernel: lstm_cnn_forward.3
= control target key start
LH: loop header
LB: loop body
LE: loop exit
PB: predicated region body
PF: predicated region fallthrough
CT: control target
= control target key end

     0   :  { %v3709_v1 = vmov 0.0   ;;  %v3710_v2 = vmov 0   ;;  %vm3711_vm0 = vmmov 0   ;;  %vm110_vm1 = vcmask 261120   ;;  %s4688_s1 = inlined_call_operand.vmem [shape: bf16[32,256], index: 1, kind: input, shape index: {}]   ;;  %s4689_s2 = inlined_call_operand.vmem [shape: bf16[2,32,128], index: 2, kind: input, shape index: {}]   ;;  %s4690_s0 = inlined_call_operand.vmem [shape: bf16[128,32], index: 0, kind: input, shape index: {}]   ;;  %s4691_s3 = inlined_call_operand.vmem [shape: f32[1,256], index: 3, kind: input, shape index: {}]   ;;  %s4692_s4 = inlined_call_operand.vmem [shape: bf16[128,64], index: 4, kind: output, shape index: {}]  }
   0x1   :  { %v3427_v0 = vld [vmem:[%s4688_s1 + $0x4] ss:$8 sps:$4 sm:$0xff]   ;;  %3085 = vmatprep.subr.bf16.mxu1 %v3709_v1  ;;  %167 = vmatprep.mubr.bf16.mxu0 %v3710_v2  ;;  %v3429_v3 = vld [vmem:[%s4688_s1] ss:$8 sps:$4 sm:$0xff]   ;;  %v3431_v5 = vld [vmem:[%s4688_s1 + $0x14] ss:$8 sps:$4 sm:$0xff]   ;;  %v40_v18 = vlaneseq }
   0x2   :  { %3089 = vmatprep.mubr.msk.bf16.mxu1 %vm3711_vm0, %v3709_v1  ;;  %135 = vmatprep.subr.bf16.mxu0 %v3427_v0  ;;  %v3752_v4 = vld [vmem:[%s4689_s2] sm:$0xff]   ;;  %v3433_v6 = vld [vmem:[%s4688_s1 + $0x10] ss:$8 sps:$4 sm:$0xff]   ;;  %v3764_v7 = vld [vmem:[%s4689_s2 + $0x8] sm:$0xff]   ;;  %vm2846_vm2 = vcmask 519168  }
   0x3   :  { %136 = vmatpush1.bf16.msra.mxu0 %v3429_v3  ;;  %3086 = vmatpush3.bf16.msra.mxu1 %v3752_v4  ;;  %v3435_v8 = vld [vmem:[%s4690_s0] sm:$0xff]   ;;  %v3777_v9 = vld [vmem:[%s4689_s2 + $0x10] sm:$0xff]   ;;  %v3436_v10 = vld [vmem:[%s4690_s0 + $0x8] sm:$0xff]   ;;  %v41_v19 = vshrl.u32 %v40_v18, 7 }
   0x4   :  { %137 = vmatprep.subr.bf16.mxu0 %v3431_v5  ;;  %3087 = vmatprep.subr.bf16.mxu1 %v3709_v1  ;;  %v3790_v11 = vld [vmem:[%s4689_s2 + $0x18] sm:$0xff]   ;;  %v3437_v12 = vld [vmem:[%s4690_s0 + $0x10] sm:$0xff]   ;;  %v3439_v14 = vld [vmem:[%s4690_s0 + $0x20] sm:$0xff]  }
   0x5   :  { %v3438_v13 = vld [vmem:[%s4690_s0 + $0x18] sm:$0xff]   ;;  %v3440_v15 = vld [vmem:[%s4690_s0 + $0x28] sm:$0xff]   ;;  %v3441_v16 = vld [vmem:[%s4690_s0 + $0x30] sm:$0xff]   ;;  %v42_v20 = vsub.s32 0, %v41_v19  ;;  %v46_v22 = vsub.s32 1, %v41_v19 }
   0x6   :  { %v3444_v17 = vld [vmem:[%s4690_s0 + $0x38] sm:$0xff]   ;;  %v38_v21 = vld [vmem:[%s4691_s3] sm:$0x3]  ;;  %s3712_s0 = smov 32   ;;  %s3713_s3 = smov 64  }
   0x7   :  { %138 = vmatpush1.bf16.msra.mxu0 %v3433_v6  ;;  %3088 = vmatpush3.bf16.msra.mxu1 %v3764_v7  ;;  %v3833_v23 = vrot.slane %v38_v21, %v42_v20  ;;  %v3835_v24 = vrot.slane %v38_v21, %v46_v22 }
   0x8   :  { %3149 = vmatprep.subr.bf16.mxu0 %v3709_v1  ;;  %3093 = vmatprep.subr.bf16.mxu1 %v3709_v1 }
   0xa   :  { %2879 = vmatmul.mubr.msk.bf16.vlgmr.msra.gmra.mrb[0].mxu0 %vm110_vm1, %v3435_v8  ;;  %3090 = vmatmul.mubr.bf16.vlgmr.msra.gmra.mrb[0].mxu1 %v3710_v2 }
   0xb   :  { %177 = vmatprep.mubr.bf16.mxu0 %v3710_v2  ;;  %3097 = vmatprep.mubr.msk.bf16.mxu1 %vm3711_vm0, %v3709_v1 }
   0xc   :  { %3150 = vmatpush3.bf16.msra.mxu0 %v3752_v4  ;;  %3094 = vmatpush3.bf16.msra.mxu1 %v3777_v9 }
   0xd   :  { %3151 = vmatprep.subr.bf16.mxu0 %v3709_v1  ;;  %3095 = vmatprep.subr.bf16.mxu1 %v3709_v1 }
  0x10   :  { %3152 = vmatpush3.bf16.msra.mxu0 %v3764_v7  ;;  %3096 = vmatpush3.bf16.msra.mxu1 %v3790_v11 }
  0x11   :  { %3165 = vmatprep.subr.bf16.mxu0 %v3709_v1  ;;  %3101 = vmatprep.subr.bf16.mxu1 %v3709_v1 }
  0x12   :  { %2880 = vmatmul.mubr.msk.bf16.gmra.mrb[4].mxu0 %vm110_vm1, %v3436_v10 }
  0x13   :  { %187 = vmatprep.mubr.bf16.mxu0 %v3710_v2  ;;  %3098 = vmatmul.mubr.bf16.vlgmr.msra.gmra.mrb[4].mxu1 %v3710_v2 }
  0x14   :  { %3102 = vmatpush3.bf16.msra.mxu1 %v3752_v4  ;;  %3105 = vmatprep.mubr.msk.bf16.mxu1 %vm3711_vm0, %v3709_v1 }
  0x15   :  { %3103 = vmatprep.subr.bf16.mxu1 %v3709_v1 }
  0x18   :  { %3104 = vmatpush3.bf16.msra.mxu1 %v3764_v7 }
  0x19   :  { %3109 = vmatprep.subr.bf16.mxu1 %v3709_v1 }
  0x1a   :  { %2881 = vmatmul.mubr.msk.bf16.gmra.mrb[8].mxu0 %vm110_vm1, %v3437_v12 }
  0x1b   :  { %197 = vmatprep.mubr.bf16.mxu0 %v3710_v2 }
  0x22   :  { %2882 = vmatmul.mubr.msk.bf16.gmra.mrb[12].mxu0 %vm110_vm1, %v3438_v13 }
  0x23   :  { %207 = vmatprep.mubr.bf16.mxu0 %v3710_v2 }
  0x2a   :  { %2883 = vmatmul.mubr.msk.bf16.gmra.mrb[16].mxu0 %vm110_vm1, %v3439_v14 }
  0x2b   :  { %217 = vmatprep.mubr.bf16.mxu0 %v3710_v2 }
  0x32   :  { %2884 = vmatmul.mubr.msk.bf16.gmra.mrb[20].mxu0 %vm110_vm1, %v3440_v15 }
  0x33   :  { %227 = vmatprep.mubr.bf16.mxu0 %v3710_v2 }
  0x3a   :  { %2885 = vmatmul.mubr.msk.bf16.gmra.mrb[24].mxu0 %vm110_vm1, %v3441_v16 }
  0x3b   :  { %237 = vmatprep.mubr.bf16.mxu0 %v3710_v2 }
  0x42   :  { %2886 = vmatmul.mubr.msk.bf16.gmra.mrb[28].mxu0 %vm110_vm1, %v3444_v17 }
  0x43   :  { %3153 = vmatprep.mubr.msk.bf16.mxu0 %vm3711_vm0, %v3709_v1 }
  0xdd   :  { %v169_v25 = vpop.f32.mrb[0].mxu0  ;;  %v340_v28 = vpop.f32.mrb[0].mxu1 }
  0xde   :  { %v170_v26 = vadd.f32 %v169_v25, %v3833_v23  ;;  %v171_v27 = vpop.f32.mrb[1].mxu0  ;;  %v3091_v31 = vpop.f32.mrb[1].mxu1 }
  0xdf   :  { %v3839_v29 = vadd.f32 %v171_v27, %v3835_v24  ;;  %v173_v30 = vpop.f32.mrb[2].mxu0  ;;  %v343_v35 = vpop.f32.mrb[2].mxu1 }
  0xe0   :  { %v3842_v32 = vadd.f32 %v173_v30, %v3833_v23  ;;  %v3844_v33 = vadd.f32 %v340_v28, %v170_v26  ;;  %v175_v34 = vpop.f32.mrb[3].mxu0  ;;  %v3092_v37 = vpop.f32.mrb[3].mxu1 }
  0xe1   :  { %v3847_v36 = vadd.f32 %v175_v34, %v3835_v24 }
  0xe2   :  { %3445 = vtanh.f32 %v3844_v33 }
  0xe5   :  { %v179_v38 = vpop.f32.mrb[4].mxu0 }
  0xe6   :  { %v3851_v39 = vadd.f32 %v179_v38, %v3833_v23  ;;  %v181_v40 = vpop.f32.mrb[5].mxu0  ;;  %v392_v45 = vpop.f32.mrb[4].mxu1 }
  0xe7   :  { %v3854_v41 = vadd.f32 %v181_v40, %v3835_v24  ;;  %v183_v42 = vpop.f32.mrb[6].mxu0  ;;  %v3099_v47 = vpop.f32.mrb[5].mxu1 }
  0xe8   :  { %v3857_v43 = vadd.f32 %v183_v42, %v3833_v23  ;;  %v185_v44 = vpop.f32.mrb[7].mxu0  ;;  %v395_v48 = vpop.f32.mrb[6].mxu1 }
  0xe9   :  { %v3860_v46 = vadd.f32 %v185_v44, %v3835_v24  ;;  %v3100_v49 = vpop.f32.mrb[7].mxu1 }
  0xec   :  { %v3446_v50 = vpop.eup %3445 }
  0xed   :  { %v189_v51 = vpop.f32.mrb[8].mxu0  ;;  %408 = vrot.lane.b32.xlu0 %v3446_v50, %s3712_s0 }
  0xee   :  { %v3864_v52 = vadd.f32 %v189_v51, %v3833_v23  ;;  %v191_v53 = vpop.f32.mrb[9].mxu0 }
  0xef   :  { %v3867_v54 = vadd.f32 %v191_v53, %v3835_v24  ;;  %v193_v55 = vpop.f32.mrb[10].mxu0 }
  0xf0   :  { %v3870_v56 = vadd.f32 %v193_v55, %v3833_v23  ;;  %v195_v57 = vpop.f32.mrb[11].mxu0  ;;  %v2895_v55 = vmul.f32 -1.442695, %v3844_v33 }
  0xf1   :  { %v3873_v58 = vadd.f32 %v195_v57, %v3835_v24 }
  0xf5   :  { %v199_v59 = vpop.f32.mrb[12].mxu0 }
  0xf6   :  { %v3876_v60 = vadd.f32 %v199_v59, %v3833_v23  ;;  %v201_v61 = vpop.f32.mrb[13].mxu0 }
  0xf7   :  { %v3879_v62 = vadd.f32 %v201_v61, %v3835_v24  ;;  %v203_v63 = vpop.f32.mrb[14].mxu0 }
  0xf8   :  { %v3882_v0 = vadd.f32 %v203_v63, %v3833_v23  ;;  %v205_v2 = vpop.f32.mrb[15].mxu0 }
  0xf9   :  { %v3885_v3 = vadd.f32 %v205_v2, %v3835_v24 }
  0xfd   :  { %v209_v5 = vpop.f32.mrb[16].mxu0 }
  0xfe   :  { %v3888_v6 = vadd.f32 %v209_v5, %v3833_v23  ;;  %v211_v8 = vpop.f32.mrb[17].mxu0 }
  0xff   :  { %v3891_v10 = vadd.f32 %v211_v8, %v3835_v24  ;;  %v213_v12 = vpop.f32.mrb[18].mxu0 }
 0x100   :  { %v3894_v13 = vadd.f32 %v213_v12, %v3833_v23  ;;  %v215_v14 = vpop.f32.mrb[19].mxu0 }
 0x101   :  { %v3897_v15 = vadd.f32 %v215_v14, %v3835_v24 }
 0x105   :  { %v219_v16 = vpop.f32.mrb[20].mxu0 }
 0x106   :  { %v3900_v17 = vadd.f32 %v219_v16, %v3833_v23  ;;  %v221_v18 = vpop.f32.mrb[21].mxu0 }
 0x107   :  { %v3903_v19 = vadd.f32 %v221_v18, %v3835_v24  ;;  %v223_v20 = vpop.f32.mrb[22].mxu0 }
 0x108   :  { %v3906_v21 = vadd.f32 %v223_v20, %v3833_v23  ;;  %v225_v22 = vpop.f32.mrb[23].mxu0 }
 0x109   :  { %v3909_v25 = vadd.f32 %v225_v22, %v3835_v24 }
 0x10d   :  { %v229_v26 = vpop.f32.mrb[24].mxu0 }
 0x10e   :  { %v3912_v27 = vadd.f32 %v229_v26, %v3833_v23  ;;  %v231_v28 = vpop.f32.mrb[25].mxu0 }
 0x10f   :  { %v3915_v30 = vadd.f32 %v231_v28, %v3835_v24  ;;  %v233_v31 = vpop.f32.mrb[26].mxu0 }
 0x110   :  { %v3918_v34 = vadd.f32 %v233_v31, %v3833_v23  ;;  %v235_v35 = vpop.f32.mrb[27].mxu0 }
 0x111   :  { %v3921_v37 = vadd.f32 %v235_v35, %v3835_v24 }
 0x115   :  { %v239_v38 = vpop.f32.mrb[28].mxu0 }
 0x116   :  { %v3924_v40 = vadd.f32 %v239_v38, %v3833_v23  ;;  %v241_v42 = vpop.f32.mrb[29].mxu0 }
 0x117   :  { %v3927_v44 = vadd.f32 %v241_v42, %v3835_v24  ;;  %v243_v47 = vpop.f32.mrb[30].mxu0 }
 0x118   :  { %v3930_v48 = vadd.f32 %v243_v47, %v3833_v23  ;;  %v245_v49 = vpop.f32.mrb[31].mxu0 }
 0x119   :  { %v246_v50 = vadd.f32 %v245_v49, %v3835_v24 }
 0x11b   :  { %v423_v51 = vadd.f32 %v392_v45, %v246_v50 }
 0x11d   :  { %3447 = vtanh.f32 %v423_v51  ;;  %v2896_v23 = vmul.f32 -1.442695, %v423_v51 }
 0x11e   :  { %3449 = vpow2.f32 %v2895_v55 }
 0x127   :  { %v3448_v53 = vpop.eup %3447 }
 0x128   :  { %433 = vrot.lane.b32.xlu0 %v3448_v53, %s3712_s0  ;;  %v3450_v57 = vpop.eup %3449 }
 0x129   :  { %v402_v59 = vadd.f32 1.0, %v3450_v57 }
 0x12b   :  { %3451 = vrcp.f32 %v402_v59 }
 0x12c   :  { %3453 = vpow2.f32 %v2896_v23 }
 0x135   :  { %v3452_v61 = vpop.eup %3451 }
 0x136   :  { %v3454_v5 = vpop.eup %3453  ;;  %v406_v33 = vmul.f32 0.0, %v3452_v61 }
 0x137   :  { %v427_v24 = vadd.f32 1.0, %v3454_v5 }
 0x139   :  { %3455 = vrcp.f32 %v427_v24 }
 0x143   :  { %v3456_v45 = vpop.eup %3455 }
 0x144   :  { %v431_v20 = vmul.f32 0.0, %v3456_v45 }
 0x15f   :  { %v409_v63 = vpop.permute.xlu0 %408 }
 0x160   :  { %v411_v2 = vmul.f32 %v3452_v61, %v409_v63 }
 0x162   :  { %413 = vrot.lane.b32.xlu1 %v411_v2, %s3712_s0 }
 0x19a   :  { %v434_v8 = vpop.permute.xlu0 %433 }
 0x19b   :  { %v436_v12 = vmul.f32 %v3456_v45, %v434_v8 }
 0x19d   :  { %438 = vrot.lane.b32.xlu1 %v436_v12, %s3712_s0 }
 0x1d4   :  { %v414_v14 = vpop.permute.xlu1 %413 }
 0x1d5   :  { %v3937_v16 = vadd.f32 %v414_v14, %v406_v33 }
 0x1d7   :  { %3457 = vtanh.f32 %v3937_v16 }
 0x1e1   :  { %v3458_v18 = vpop.eup %3457 }
 0x1e2   :  { %419 = vrot.lane.b32.xlu0 %v3458_v18, %s3712_s0 }
 0x20f   :  { %v439_v22 = vpop.permute.xlu1 %438 }
 0x210   :  { %v3941_v26 = vadd.f32 %v439_v22, %v431_v20 }
 0x212   :  { %3459 = vtanh.f32 %v3941_v26 }
 0x21c   :  { %v3460_v28 = vpop.eup %3459 }
 0x21d   :  { %444 = vrot.lane.b32.xlu1 %v3460_v28, %s3712_s0 }
 0x254   :  { %v420_v31 = vpop.permute.xlu0 %419 }
 0x255   :  { %v3945_v35 = vmul.f32 %v3452_v61, %v420_v31 }
 0x257   :  { %v450_v38 = vpack.c.bf16 %v3945_v35, %v3945_v35 }
 0x259   :  { %452 = vrot.lane.b32.xlu0 %v450_v38, %s3713_s3 }
 0x28f   :  { %v445_v42 = vpop.permute.xlu1 %444 }
 0x290   :  { %v3950_v47 = vmul.f32 %v3456_v45, %v445_v42 }
 0x292   :  { %v497_v49 = vpack.c.bf16 %v3950_v47, %v3950_v47 }
 0x294   :  { %499 = vrot.lane.b32.xlu1 %v497_v49, %s3713_s3 }
 0x2cb   :  { %v453_v50 = vpop.permute.xlu0 %452 }
 0x2cc   :  { %3106 = vmatmul.mubr.msk.bf16.vlgmr.msra.gmra.mrb[8].mxu1 %vm110_vm1, %v453_v50 }
 0x2cd   :  { %3110 = vmatpush3.bf16.msra.mxu1 %v3777_v9  ;;  %3113 = vmatprep.mubr.msk.bf16.mxu1 %vm3711_vm0, %v3709_v1 }
 0x2ce   :  { %3111 = vmatprep.subr.bf16.mxu1 %v3709_v1 }
 0x2d1   :  { %3112 = vmatpush3.bf16.msra.mxu1 %v3790_v11 }
 0x2d2   :  { %3117 = vmatprep.subr.bf16.mxu1 %v3709_v1 }
 0x306   :  { %v500_v51 = vpop.permute.xlu1 %499 }
 0x307   :  { %3114 = vmatmul.mubr.msk.bf16.vlgmr.msra.gmra.mrb[12].mxu1 %vm110_vm1, %v500_v51 }
 0x308   :  { %3118 = vmatpush3.bf16.msra.mxu1 %v3752_v4  ;;  %3121 = vmatprep.mubr.msk.bf16.mxu1 %vm3711_vm0, %v3709_v1 }
 0x309   :  { %3119 = vmatprep.subr.bf16.mxu1 %v3709_v1 }
 0x30c   :  { %3120 = vmatpush3.bf16.msra.mxu1 %v3764_v7 }
 0x30d   :  { %3125 = vmatprep.subr.bf16.mxu1 %v3709_v1 }
 0x39f   :  { %v491_v53 = vpop.f32.mrb[8].mxu1 }
 0x3a0   :  { %v544_v55 = vadd.f32 %v491_v53, %v3842_v32  ;;  %v3107_v57 = vpop.f32.mrb[9].mxu1 }
 0x3a1   :  { %v494_v59 = vpop.f32.mrb[10].mxu1 }
 0x3a2   :  { %3461 = vtanh.f32 %v544_v55  ;;  %v3108_v61 = vpop.f32.mrb[11].mxu1  ;;  %v2899_v12 = vmul.f32 -1.442695, %v544_v55 }
 0x3ac   :  { %v3462_v63 = vpop.eup %3461 }
 0x3ad   :  { %554 = vrot.lane.b32.xlu0 %v3462_v63, %s3712_s0 }
 0x3da   :  { %v538_v2 = vpop.f32.mrb[12].mxu1 }
 0x3db   :  { %v569_v23 = vadd.f32 %v538_v2, %v3927_v44  ;;  %v3115_v5 = vpop.f32.mrb[13].mxu1 }
 0x3dc   :  { %v541_v24 = vpop.f32.mrb[14].mxu1 }
 0x3dd   :  { %3463 = vtanh.f32 %v569_v23  ;;  %v3116_v45 = vpop.f32.mrb[15].mxu1  ;;  %v2900_v22 = vmul.f32 -1.442695, %v569_v23 }
 0x3de   :  { %3465 = vpow2.f32 %v2899_v12 }
 0x3e7   :  { %v3464_v8 = vpop.eup %3463 }
 0x3e8   :  { %579 = vrot.lane.b32.xlu1 %v3464_v8, %s3712_s0  ;;  %v3466_v32 = vpop.eup %3465 }
 0x3e9   :  { %v548_v33 = vadd.f32 1.0, %v3466_v32 }
 0x3eb   :  { %3467 = vrcp.f32 %v548_v33 }
 0x3ec   :  { %3469 = vpow2.f32 %v2900_v22 }
 0x3f5   :  { %v3468_v14 = vpop.eup %3467 }
 0x3f6   :  { %v3470_v44 = vpop.eup %3469  ;;  %v552_v49 = vmul.f32 %v3468_v14, %v3937_v16 }
 0x3f7   :  { %v573_v28 = vadd.f32 1.0, %v3470_v44 }
 0x3f9   :  { %3471 = vrcp.f32 %v573_v28 }
 0x403   :  { %v3472_v31 = vpop.eup %3471 }
 0x404   :  { %v577_v55 = vmul.f32 %v3472_v31, %v3941_v26 }
 0x41f   :  { %v555_v18 = vpop.permute.xlu0 %554 }
 0x420   :  { %v557_v20 = vmul.f32 %v3468_v14, %v555_v18 }
 0x422   :  { %559 = vrot.lane.b32.xlu0 %v557_v20, %s3712_s0 }
 0x45a   :  { %v580_v38 = vpop.permute.xlu1 %579 }
 0x45b   :  { %v582_v42 = vmul.f32 %v3472_v31, %v580_v38 }
 0x45d   :  { %584 = vrot.lane.b32.xlu1 %v582_v42, %s3712_s0 }
 0x494   :  { %v560_v50 = vpop.permute.xlu0 %559 }
 0x495   :  { %v3976_v51 = vadd.f32 %v560_v50, %v552_v49 }
 0x497   :  { %3473 = vtanh.f32 %v3976_v51 }
 0x4a1   :  { %v3474_v53 = vpop.eup %3473 }
 0x4a2   :  { %565 = vrot.lane.b32.xlu0 %v3474_v53, %s3712_s0 }
 0x4cf   :  { %v585_v57 = vpop.permute.xlu1 %584 }
 0x4d0   :  { %v3981_v59 = vadd.f32 %v585_v57, %v577_v55 }
 0x4d2   :  { %3475 = vtanh.f32 %v3981_v59 }
 0x4dc   :  { %v3476_v61 = vpop.eup %3475 }
 0x4dd   :  { %590 = vrot.lane.b32.xlu1 %v3476_v61, %s3712_s0 }
 0x514   :  { %v566_v63 = vpop.permute.xlu0 %565 }
 0x515   :  { %v3985_v16 = vmul.f32 %v3468_v14, %v566_v63 }
 0x517   :  { %v596_v2 = vpack.c.bf16 %v3985_v16, %v3985_v16 }
 0x519   :  { %598 = vrot.lane.b32.xlu0 %v596_v2, %s3713_s3 }
 0x54f   :  { %v591_v23 = vpop.permute.xlu1 %590 }
 0x550   :  { %v3990_v5 = vmul.f32 %v3472_v31, %v591_v23 }
 0x552   :  { %v643_v26 = vpack.c.bf16 %v3990_v5, %v3990_v5 }
 0x554   :  { %645 = vrot.lane.b32.xlu1 %v643_v26, %s3713_s3 }
 0x58b   :  { %v599_v24 = vpop.permute.xlu0 %598 }
 0x58c   :  { %3122 = vmatmul.mubr.msk.bf16.vlgmr.msra.gmra.mrb[16].mxu1 %vm110_vm1, %v599_v24 }
 0x58d   :  { %3126 = vmatpush3.bf16.msra.mxu1 %v3777_v9  ;;  %3129 = vmatprep.mubr.msk.bf16.mxu1 %vm3711_vm0, %v3709_v1 }
 0x58e   :  { %3127 = vmatprep.subr.bf16.mxu1 %v3709_v1 }
 0x591   :  { %3128 = vmatpush3.bf16.msra.mxu1 %v3790_v11 }
 0x592   :  { %3133 = vmatprep.subr.bf16.mxu1 %v3709_v1 }
 0x5c6   :  { %v646_v45 = vpop.permute.xlu1 %645 }
 0x5c7   :  { %3130 = vmatmul.mubr.msk.bf16.vlgmr.msra.gmra.mrb[20].mxu1 %vm110_vm1, %v646_v45 }
 0x5c8   :  { %3134 = vmatpush3.bf16.msra.mxu1 %v3752_v4  ;;  %3137 = vmatprep.mubr.msk.bf16.mxu1 %vm3711_vm0, %v3709_v1 }
 0x5c9   :  { %3135 = vmatprep.subr.bf16.mxu1 %v3709_v1 }
 0x5cc   :  { %3136 = vmatpush3.bf16.msra.mxu1 %v3764_v7 }
 0x5cd   :  { %3141 = vmatprep.subr.bf16.mxu1 %v3709_v1 }
 0x65f   :  { %v637_v8 = vpop.f32.mrb[16].mxu1 }
 0x660   :  { %v690_v12 = vadd.f32 %v637_v8, %v3851_v39  ;;  %v3123_v32 = vpop.f32.mrb[17].mxu1 }
 0x661   :  { %v640_v33 = vpop.f32.mrb[18].mxu1 }
 0x662   :  { %3477 = vtanh.f32 %v690_v12  ;;  %v3124_v14 = vpop.f32.mrb[19].mxu1  ;;  %v2903_v42 = vmul.f32 -1.442695, %v690_v12 }
 0x66c   :  { %v3478_v18 = vpop.eup %3477 }
 0x66d   :  { %700 = vrot.lane.b32.xlu0 %v3478_v18, %s3712_s0 }
 0x69a   :  { %v684_v20 = vpop.f32.mrb[20].mxu1 }
 0x69b   :  { %v715_v22 = vadd.f32 %v684_v20, %v3921_v37  ;;  %v3131_v44 = vpop.f32.mrb[21].mxu1 }
 0x69c   :  { %v687_v28 = vpop.f32.mrb[22].mxu1 }
 0x69d   :  { %3479 = vtanh.f32 %v715_v22  ;;  %v3132_v31 = vpop.f32.mrb[23].mxu1  ;;  %v2904_v57 = vmul.f32 -1.442695, %v715_v22 }
 0x69e   :  { %3481 = vpow2.f32 %v2903_v42 }
 0x6a7   :  { %v3480_v38 = vpop.eup %3479 }
 0x6a8   :  { %725 = vrot.lane.b32.xlu1 %v3480_v38, %s3712_s0  ;;  %v3482_v39 = vpop.eup %3481 }
 0x6a9   :  { %v694_v49 = vadd.f32 1.0, %v3482_v39 }
 0x6ab   :  { %3483 = vrcp.f32 %v694_v49 }
 0x6ac   :  { %3485 = vpow2.f32 %v2904_v57 }
 0x6b5   :  { %v3484_v50 = vpop.eup %3483 }
 0x6b6   :  { %v3486_v37 = vpop.eup %3485  ;;  %v698_v26 = vmul.f32 %v3484_v50, %v3976_v51 }
 0x6b7   :  { %v719_v61 = vadd.f32 1.0, %v3486_v37 }
 0x6b9   :  { %3487 = vrcp.f32 %v719_v61 }
 0x6c3   :  { %v3488_v63 = vpop.eup %3487 }
 0x6c4   :  { %v723_v12 = vmul.f32 %v3488_v63, %v3981_v59 }
 0x6df   :  { %v701_v53 = vpop.permute.xlu0 %700 }
 0x6e0   :  { %v703_v55 = vmul.f32 %v3484_v50, %v701_v53 }
 0x6e2   :  { %705 = vrot.lane.b32.xlu0 %v703_v55, %s3712_s0 }
 0x71a   :  { %v726_v2 = vpop.permute.xlu1 %725 }
 0x71b   :  { %v728_v23 = vmul.f32 %v3488_v63, %v726_v2 }
 0x71d   :  { %730 = vrot.lane.b32.xlu1 %v728_v23, %s3712_s0 }
 0x754   :  { %v706_v24 = vpop.permute.xlu0 %705 }
 0x755   :  { %v4016_v45 = vadd.f32 %v706_v24, %v698_v26 }
 0x757   :  { %3489 = vtanh.f32 %v4016_v45 }
 0x761   :  { %v3490_v8 = vpop.eup %3489 }
 0x762   :  { %711 = vrot.lane.b32.xlu0 %v3490_v8, %s3712_s0 }
 0x78f   :  { %v731_v32 = vpop.permute.xlu1 %730 }
 0x790   :  { %v4021_v33 = vadd.f32 %v731_v32, %v723_v12 }
 0x792   :  { %3491 = vtanh.f32 %v4021_v33 }
 0x79c   :  { %v3492_v14 = vpop.eup %3491 }
 0x79d   :  { %736 = vrot.lane.b32.xlu1 %v3492_v14, %s3712_s0 }
 0x7d4   :  { %v712_v18 = vpop.permute.xlu0 %711 }
 0x7d5   :  { %v4025_v51 = vmul.f32 %v3484_v50, %v712_v18 }
 0x7d7   :  { %v742_v20 = vpack.c.bf16 %v4025_v51, %v4025_v51 }
 0x7d9   :  { %744 = vrot.lane.b32.xlu0 %v742_v20, %s3713_s3 }
 0x80f   :  { %v737_v22 = vpop.permute.xlu1 %736 }
 0x810   :  { %v4030_v44 = vmul.f32 %v3488_v63, %v737_v22 }
 0x812   :  { %v789_v59 = vpack.c.bf16 %v4030_v44, %v4030_v44 }
 0x814   :  { %791 = vrot.lane.b32.xlu1 %v789_v59, %s3713_s3 }
 0x84b   :  { %v745_v28 = vpop.permute.xlu0 %744 }
 0x84c   :  { %3138 = vmatmul.mubr.msk.bf16.vlgmr.msra.gmra.mrb[24].mxu1 %vm110_vm1, %v745_v28 }
 0x84d   :  { %3142 = vmatpush3.bf16.msra.mxu1 %v3777_v9  ;;  %3145 = vmatprep.mubr.msk.bf16.mxu1 %vm3711_vm0, %v3709_v1 }
 0x84e   :  { %3143 = vmatprep.subr.bf16.mxu1 %v3709_v1 }
 0x851   :  { %3144 = vmatpush3.bf16.msra.mxu1 %v3790_v11 }
 0x852   :  { %3157 = vmatprep.subr.bf16.mxu1 %v3709_v1 }
 0x886   :  { %v792_v31 = vpop.permute.xlu1 %791 }
 0x887   :  { %3146 = vmatmul.mubr.msk.bf16.vlgmr.msra.gmra.mrb[28].mxu1 %vm110_vm1, %v792_v31 }
 0x888   :  { %3158 = vmatpush3.bf16.msra.mxu1 %v3777_v9  ;;  %3161 = vmatprep.mubr.msk.bf16.mxu1 %vm3711_vm0, %v3709_v1 }
 0x889   :  { %3159 = vmatprep.subr.bf16.mxu1 %v3709_v1 }
 0x88c   :  { %3160 = vmatpush3.bf16.msra.mxu1 %v3790_v11 }
 0x88d   :  { %3173 = vmatprep.subr.bf16.mxu1 %v3709_v1 }
 0x91f   :  { %v783_v38 = vpop.f32.mrb[24].mxu1 }
 0x920   :  { %v836_v42 = vadd.f32 %v783_v38, %v3857_v43  ;;  %v3139_v39 = vpop.f32.mrb[25].mxu1 }
 0x921   :  { %v786_v49 = vpop.f32.mrb[26].mxu1 }
 0x922   :  { %3493 = vtanh.f32 %v836_v42  ;;  %v3140_v50 = vpop.f32.mrb[27].mxu1  ;;  %v2907_v23 = vmul.f32 -1.442695, %v836_v42 }
 0x92c   :  { %v3494_v53 = vpop.eup %3493 }
 0x92d   :  { %846 = vrot.lane.b32.xlu0 %v3494_v53, %s3712_s0 }
 0x95a   :  { %v830_v55 = vpop.f32.mrb[28].mxu1 }
 0x95b   :  { %v861_v57 = vadd.f32 %v830_v55, %v3915_v30  ;;  %v3147_v37 = vpop.f32.mrb[29].mxu1 }
 0x95c   :  { %v833_v61 = vpop.f32.mrb[30].mxu1 }
 0x95d   :  { %3495 = vtanh.f32 %v861_v57  ;;  %v3148_v63 = vpop.f32.mrb[31].mxu1  ;;  %v2908_v32 = vmul.f32 -1.442695, %v861_v57 }
 0x95e   :  { %3497 = vpow2.f32 %v2907_v23 }
 0x967   :  { %v3496_v2 = vpop.eup %3495 }
 0x968   :  { %871 = vrot.lane.b32.xlu1 %v3496_v2, %s3712_s0  ;;  %v3498_v43 = vpop.eup %3497 }
 0x969   :  { %v840_v26 = vadd.f32 1.0, %v3498_v43 }
 0x96b   :  { %3499 = vrcp.f32 %v840_v26 }
 0x96c   :  { %3501 = vpow2.f32 %v2908_v32 }
 0x975   :  { %v3500_v24 = vpop.eup %3499 }
 0x976   :  { %v3502_v30 = vpop.eup %3501  ;;  %v844_v59 = vmul.f32 %v3500_v24, %v4016_v45 }
 0x977   :  { %v865_v14 = vadd.f32 1.0, %v3502_v30 }
 0x979   :  { %3503 = vrcp.f32 %v865_v14 }
 0x983   :  { %v3504_v18 = vpop.eup %3503 }
 0x984   :  { %v869_v42 = vmul.f32 %v3504_v18, %v4021_v33 }
 0x99f   :  { %v847_v8 = vpop.permute.xlu0 %846 }
 0x9a0   :  { %v849_v12 = vmul.f32 %v3500_v24, %v847_v8 }
 0x9a2   :  { %851 = vrot.lane.b32.xlu0 %v849_v12, %s3712_s0 }
 0x9da   :  { %v872_v20 = vpop.permute.xlu1 %871 }
 0x9db   :  { %v874_v22 = vmul.f32 %v3504_v18, %v872_v20 }
 0x9dd   :  { %876 = vrot.lane.b32.xlu1 %v874_v22, %s3712_s0 }
 0xa14   :  { %v852_v28 = vpop.permute.xlu0 %851 }
 0xa15   :  { %v4056_v31 = vadd.f32 %v852_v28, %v844_v59 }
 0xa17   :  { %3505 = vtanh.f32 %v4056_v31 }
 0xa21   :  { %v3506_v38 = vpop.eup %3505 }
 0xa22   :  { %857 = vrot.lane.b32.xlu0 %v3506_v38, %s3712_s0 }
 0xa4f   :  { %v877_v39 = vpop.permute.xlu1 %876 }
 0xa50   :  { %v4061_v49 = vadd.f32 %v877_v39, %v869_v42 }
 0xa52   :  { %3507 = vtanh.f32 %v4061_v49 }
 0xa5c   :  { %v3508_v50 = vpop.eup %3507 }
 0xa5d   :  { %882 = vrot.lane.b32.xlu1 %v3508_v50, %s3712_s0 }
 0xa94   :  { %v858_v53 = vpop.permute.xlu0 %857 }
 0xa95   :  { %v4065_v45 = vmul.f32 %v3500_v24, %v858_v53 }
 0xa97   :  { %v888_v55 = vpack.c.bf16 %v4065_v45, %v4065_v45 }
 0xa99   :  { %890 = vrot.lane.b32.xlu0 %v888_v55, %s3713_s3 }
 0xacf   :  { %v883_v57 = vpop.permute.xlu1 %882 }
 0xad0   :  { %v4070_v37 = vmul.f32 %v3504_v18, %v883_v57 }
 0xad2   :  { %v935_v33 = vpack.c.bf16 %v4070_v37, %v4070_v37 }
 0xad4   :  { %937 = vrot.lane.b32.xlu1 %v935_v33, %s3713_s3 }
 0xb0b   :  { %v891_v61 = vpop.permute.xlu0 %890 }
 0xb0c   :  { %3154 = vmatmul.mubr.msk.bf16.vlgmr.msra.gmra.mrb[32].mxu0 %vm110_vm1, %v891_v61 }
 0xb0d   :  { %3166 = vmatpush3.bf16.msra.mxu0 %v3752_v4  ;;  %3169 = vmatprep.mubr.msk.bf16.mxu0 %vm3711_vm0, %v3709_v1 }
 0xb0e   :  { %3167 = vmatprep.subr.bf16.mxu0 %v3709_v1 }
 0xb11   :  { %3168 = vmatpush3.bf16.msra.mxu0 %v3764_v7 }
 0xb12   :  { %3181 = vmatprep.subr.bf16.mxu0 %v3709_v1 }
 0xb46   :  { %v938_v63 = vpop.permute.xlu1 %937 }
 0xb47   :  { %3162 = vmatmul.mubr.msk.bf16.vlgmr.msra.gmra.mrb[32].mxu1 %vm110_vm1, %v938_v63 }
 0xb48   :  { %3174 = vmatpush3.bf16.msra.mxu1 %v3777_v9  ;;  %3177 = vmatprep.mubr.msk.bf16.mxu1 %vm3711_vm0, %v3709_v1 }
 0xb49   :  { %3175 = vmatprep.subr.bf16.mxu1 %v3709_v1 }
 0xb4c   :  { %3176 = vmatpush3.bf16.msra.mxu1 %v3790_v11 }
 0xb4d   :  { %3189 = vmatprep.subr.bf16.mxu1 %v3709_v1 }
 0xbdf   :  { %v929_v2 = vpop.f32.mrb[32].mxu0 }
 0xbe0   :  { %v982_v23 = vadd.f32 %v929_v2, %v3864_v52  ;;  %v3155_v43 = vpop.f32.mrb[33].mxu0 }
 0xbe1   :  { %v932_v26 = vpop.f32.mrb[34].mxu0 }
 0xbe2   :  { %3509 = vtanh.f32 %v982_v23  ;;  %v3156_v24 = vpop.f32.mrb[35].mxu0  ;;  %v2911_v22 = vmul.f32 -1.442695, %v982_v23 }
 0xbec   :  { %v3510_v8 = vpop.eup %3509 }
 0xbed   :  { %992 = vrot.lane.b32.xlu0 %v3510_v8, %s3712_s0 }
 0xc1a   :  { %v976_v12 = vpop.f32.mrb[32].mxu1 }
 0xc1b   :  { %v1007_v32 = vadd.f32 %v976_v12, %v3909_v25  ;;  %v3163_v30 = vpop.f32.mrb[33].mxu1 }
 0xc1c   :  { %v979_v14 = vpop.f32.mrb[34].mxu1 }
 0xc1d   :  { %3511 = vtanh.f32 %v1007_v32  ;;  %v3164_v18 = vpop.f32.mrb[35].mxu1  ;;  %v2912_v39 = vmul.f32 -1.442695, %v1007_v32 }
 0xc1e   :  { %3513 = vpow2.f32 %v2911_v22 }
 0xc27   :  { %v3512_v20 = vpop.eup %3511 }
 0xc28   :  { %1017 = vrot.lane.b32.xlu1 %v3512_v20, %s3712_s0  ;;  %v3514_v52 = vpop.eup %3513 }
 0xc29   :  { %v986_v59 = vadd.f32 1.0, %v3514_v52 }
 0xc2b   :  { %3515 = vrcp.f32 %v986_v59 }
 0xc2c   :  { %3517 = vpow2.f32 %v2912_v39 }
 0xc35   :  { %v3516_v28 = vpop.eup %3515 }
 0xc36   :  { %v3518_v25 = vpop.eup %3517  ;;  %v990_v33 = vmul.f32 %v3516_v28, %v4056_v31 }
 0xc37   :  { %v1011_v50 = vadd.f32 1.0, %v3518_v25 }
 0xc39   :  { %3519 = vrcp.f32 %v1011_v50 }
 0xc43   :  { %v3520_v53 = vpop.eup %3519 }
 0xc44   :  { %v1015_v23 = vmul.f32 %v3520_v53, %v4061_v49 }
 0xc5f   :  { %v993_v38 = vpop.permute.xlu0 %992 }
 0xc60   :  { %v995_v42 = vmul.f32 %v3516_v28, %v993_v38 }
 0xc62   :  { %997 = vrot.lane.b32.xlu0 %v995_v42, %s3712_s0 }
 0xc9a   :  { %v1018_v55 = vpop.permute.xlu1 %1017 }
 0xc9b   :  { %v1020_v57 = vmul.f32 %v3520_v53, %v1018_v55 }
 0xc9d   :  { %1022 = vrot.lane.b32.xlu1 %v1020_v57, %s3712_s0 }
 0xcd4   :  { %v998_v61 = vpop.permute.xlu0 %997 }
 0xcd5   :  { %v4096_v63 = vadd.f32 %v998_v61, %v990_v33 }
 0xcd7   :  { %3521 = vtanh.f32 %v4096_v63 }
 0xce1   :  { %v3522_v2 = vpop.eup %3521 }
 0xce2   :  { %1003 = vrot.lane.b32.xlu0 %v3522_v2, %s3712_s0 }
 0xd0f   :  { %v1023_v43 = vpop.permute.xlu1 %1022 }
 0xd10   :  { %v4101_v26 = vadd.f32 %v1023_v43, %v1015_v23 }
 0xd12   :  { %3523 = vtanh.f32 %v4101_v26 }
 0xd1c   :  { %v3524_v24 = vpop.eup %3523 }
 0xd1d   :  { %1028 = vrot.lane.b32.xlu1 %v3524_v24, %s3712_s0 }
 0xd54   :  { %v1004_v8 = vpop.permute.xlu0 %1003 }
 0xd55   :  { %v4105_v31 = vmul.f32 %v3516_v28, %v1004_v8 }
 0xd57   :  { %v1034_v12 = vpack.c.bf16 %v4105_v31, %v4105_v31 }
 0xd59   :  { %1036 = vrot.lane.b32.xlu0 %v1034_v12, %s3713_s3 }
 0xd8f   :  { %v1029_v32 = vpop.permute.xlu1 %1028 }
 0xd90   :  { %v4110_v30 = vmul.f32 %v3520_v53, %v1029_v32 }
 0xd92   :  { %v1081_v49 = vpack.c.bf16 %v4110_v30, %v4110_v30 }
 0xd94   :  { %1083 = vrot.lane.b32.xlu1 %v1081_v49, %s3713_s3 }
 0xdcb   :  { %v1037_v14 = vpop.permute.xlu0 %1036 }
 0xdcc   :  { %3170 = vmatmul.mubr.msk.bf16.vlgmr.msra.gmra.mrb[36].mxu0 %vm110_vm1, %v1037_v14 }
 0xdcd   :  { %3182 = vmatpush3.bf16.msra.mxu0 %v3752_v4  ;;  %3185 = vmatprep.mubr.msk.bf16.mxu0 %vm3711_vm0, %v3709_v1 }
 0xdce   :  { %3183 = vmatprep.subr.bf16.mxu0 %v3709_v1 }
 0xdd1   :  { %3184 = vmatpush3.bf16.msra.mxu0 %v3764_v7 }
 0xdd2   :  { %3197 = vmatprep.subr.bf16.mxu0 %v3709_v1 }
 0xe06   :  { %v1084_v18 = vpop.permute.xlu1 %1083 }
 0xe07   :  { %3178 = vmatmul.mubr.msk.bf16.vlgmr.msra.gmra.mrb[36].mxu1 %vm110_vm1, %v1084_v18 }
 0xe08   :  { %3190 = vmatpush3.bf16.msra.mxu1 %v3777_v9  ;;  %3193 = vmatprep.mubr.msk.bf16.mxu1 %vm3711_vm0, %v3709_v1 }
 0xe09   :  { %3191 = vmatprep.subr.bf16.mxu1 %v3709_v1 }
 0xe0c   :  { %3192 = vmatpush3.bf16.msra.mxu1 %v3790_v11 }
 0xe0d   :  { %3205 = vmatprep.subr.bf16.mxu1 %v3709_v1 }
 0xe9f   :  { %v1075_v4 = vpop.f32.mrb[36].mxu0 }
 0xea0   :  { %v1128_v20 = vadd.f32 %v1075_v4, %v3870_v56  ;;  %v3171_v7 = vpop.f32.mrb[37].mxu0 }
 0xea1   :  { %v1078_v22 = vpop.f32.mrb[38].mxu0 }
 0xea2   :  { %3525 = vtanh.f32 %v1128_v20  ;;  %v3172_v52 = vpop.f32.mrb[39].mxu0  ;;  %v2915_v25 = vmul.f32 -1.442695, %v1128_v20 }
 0xeac   :  { %v3526_v59 = vpop.eup %3525 }
 0xead   :  { %1138 = vrot.lane.b32.xlu0 %v3526_v59, %s3712_s0 }
 0xeda   :  { %v1122_v9 = vpop.f32.mrb[36].mxu1 }
 0xedb   :  { %v1153_v28 = vadd.f32 %v1122_v9, %v3903_v19  ;;  %v3179_v38 = vpop.f32.mrb[37].mxu1  ;;  %v4159_v9 = vld [vmem:[%s4689_s2] sm:$0xff]  }
 0xedc   :  { %v1125_v42 = vpop.f32.mrb[38].mxu1 }
 0xedd   :  { %3527 = vtanh.f32 %v1153_v28  ;;  %v3180_v39 = vpop.f32.mrb[39].mxu1  ;;  %v2916_v33 = vmul.f32 -1.442695, %v1153_v28  ;;  %v4168_v28 = vld [vmem:[%s4689_s2 + $0x8] sm:$0xff]   ;;  %v4176_v42 = vld [vmem:[%s4689_s2 + $0x10] sm:$0xff]  }
 0xede   :  { %3529 = vpow2.f32 %v2915_v25  ;;  %v4185_v39 = vld [vmem:[%s4689_s2 + $0x18] sm:$0xff]  }
 0xee7   :  { %v3528_v11 = vpop.eup %3527 }
 0xee8   :  { %1163 = vrot.lane.b32.xlu1 %v3528_v11, %s3712_s0  ;;  %v3530_v56 = vpop.eup %3529 }
 0xee9   :  { %v1132_v50 = vadd.f32 1.0, %v3530_v56 }
 0xeeb   :  { %3531 = vrcp.f32 %v1132_v50 }
 0xeec   :  { %3533 = vpow2.f32 %v2916_v33 }
 0xef5   :  { %v3532_v53 = vpop.eup %3531 }
 0xef6   :  { %v3534_v19 = vpop.eup %3533  ;;  %v1136_v24 = vmul.f32 %v3532_v53, %v4096_v63 }
 0xef7   :  { %v1157_v61 = vadd.f32 1.0, %v3534_v19 }
 0xef9   :  { %3535 = vrcp.f32 %v1157_v61 }
 0xf03   :  { %v3536_v2 = vpop.eup %3535 }
 0xf04   :  { %v1161_v49 = vmul.f32 %v3536_v2, %v4101_v26 }
 0xf1f   :  { %v1139_v55 = vpop.permute.xlu0 %1138 }
 0xf20   :  { %v1141_v57 = vmul.f32 %v3532_v53, %v1139_v55 }
 0xf22   :  { %1143 = vrot.lane.b32.xlu0 %v1141_v57, %s3712_s0 }
 0xf5a   :  { %v1164_v23 = vpop.permute.xlu1 %1163 }
 0xf5b   :  { %v1166_v43 = vmul.f32 %v3536_v2, %v1164_v23 }
 0xf5d   :  { %1168 = vrot.lane.b32.xlu1 %v1166_v43, %s3712_s0 }
 0xf94   :  { %v1144_v8 = vpop.permute.xlu0 %1143 }
 0xf95   :  { %v4136_v12 = vadd.f32 %v1144_v8, %v1136_v24 }
 0xf97   :  { %3537 = vtanh.f32 %v4136_v12 }
 0xfa1   :  { %v3538_v32 = vpop.eup %3537 }
 0xfa2   :  { %1149 = vrot.lane.b32.xlu0 %v3538_v32, %s3712_s0 }
 0xfcf   :  { %v1169_v14 = vpop.permute.xlu1 %1168 }
 0xfd0   :  { %v4141_v18 = vadd.f32 %v1169_v14, %v1161_v49 }
 0xfd2   :  { %3539 = vtanh.f32 %v4141_v18 }
 0xfdc   :  { %v3540_v4 = vpop.eup %3539 }
 0xfdd   :  { %1174 = vrot.lane.b32.xlu1 %v3540_v4, %s3712_s0 }
0x1014   :  { %v1150_v20 = vpop.permute.xlu0 %1149 }
0x1015   :  { %v4145_v63 = vmul.f32 %v3532_v53, %v1150_v20 }
0x1017   :  { %v1180_v7 = vpack.c.bf16 %v4145_v63, %v4145_v63 }
0x1019   :  { %1182 = vrot.lane.b32.xlu0 %v1180_v7, %s3713_s3 }
0x104f   :  { %v1175_v22 = vpop.permute.xlu1 %1174 }
0x1050   :  { %v4150_v52 = vmul.f32 %v3536_v2, %v1175_v22 }
0x1052   :  { %v1227_v26 = vpack.c.bf16 %v4150_v52, %v4150_v52 }
0x1054   :  { %1229 = vrot.lane.b32.xlu1 %v1227_v26, %s3713_s3 }
0x108b   :  { %v1183_v59 = vpop.permute.xlu0 %1182 }
0x108c   :  { %3186 = vmatmul.mubr.msk.bf16.vlgmr.msra.gmra.mrb[40].mxu0 %vm110_vm1, %v1183_v59 }
0x108d   :  { %3198 = vmatpush3.bf16.msra.mxu0 %v4159_v9  ;;  %3201 = vmatprep.mubr.msk.bf16.mxu0 %vm3711_vm0, %v3709_v1 }
0x108e   :  { %3199 = vmatprep.subr.bf16.mxu0 %v3709_v1 }
0x1091   :  { %3200 = vmatpush3.bf16.msra.mxu0 %v4168_v28 }
0x1092   :  { %3213 = vmatprep.subr.bf16.mxu0 %v3709_v1 }
0x10c6   :  { %v1230_v38 = vpop.permute.xlu1 %1229 }
0x10c7   :  { %3194 = vmatmul.mubr.msk.bf16.vlgmr.msra.gmra.mrb[40].mxu1 %vm110_vm1, %v1230_v38 }
0x10c8   :  { %3206 = vmatpush3.bf16.msra.mxu1 %v4176_v42  ;;  %3209 = vmatprep.mubr.msk.bf16.mxu1 %vm3711_vm0, %v3709_v1 }
0x10c9   :  { %3207 = vmatprep.subr.bf16.mxu1 %v3709_v1 }
0x10cc   :  { %3208 = vmatpush3.bf16.msra.mxu1 %v4185_v39 }
0x10cd   :  { %3221 = vmatprep.subr.bf16.mxu1 %v3709_v1 }
0x115f   :  { %v1221_v11 = vpop.f32.mrb[40].mxu0 }
0x1160   :  { %v1274_v25 = vadd.f32 %v1221_v11, %v3876_v60  ;;  %v3187_v56 = vpop.f32.mrb[41].mxu0 }
0x1161   :  { %v1224_v50 = vpop.f32.mrb[42].mxu0 }
0x1162   :  { %3541 = vtanh.f32 %v1274_v25  ;;  %v3188_v53 = vpop.f32.mrb[43].mxu0  ;;  %v2919_v43 = vmul.f32 -1.442695, %v1274_v25 }
0x116c   :  { %v3542_v55 = vpop.eup %3541 }
0x116d   :  { %1284 = vrot.lane.b32.xlu0 %v3542_v55, %s3712_s0 }
0x119a   :  { %v1268_v57 = vpop.f32.mrb[40].mxu1 }
0x119b   :  { %v1299_v33 = vadd.f32 %v1268_v57, %v3897_v15  ;;  %v3195_v19 = vpop.f32.mrb[41].mxu1 }
0x119c   :  { %v1271_v61 = vpop.f32.mrb[42].mxu1 }
0x119d   :  { %3543 = vtanh.f32 %v1299_v33  ;;  %v3196_v2 = vpop.f32.mrb[43].mxu1  ;;  %v2920_v14 = vmul.f32 -1.442695, %v1299_v33 }
0x119e   :  { %3545 = vpow2.f32 %v2919_v43 }
0x11a7   :  { %v3544_v23 = vpop.eup %3543 }
0x11a8   :  { %1309 = vrot.lane.b32.xlu1 %v3544_v23, %s3712_s0  ;;  %v3546_v60 = vpop.eup %3545 }
0x11a9   :  { %v1278_v24 = vadd.f32 1.0, %v3546_v60 }
0x11ab   :  { %3547 = vrcp.f32 %v1278_v24 }
0x11ac   :  { %3549 = vpow2.f32 %v2920_v14 }
0x11b5   :  { %v3548_v8 = vpop.eup %3547 }
0x11b6   :  { %v3550_v15 = vpop.eup %3549  ;;  %v1282_v26 = vmul.f32 %v3548_v8, %v4136_v12 }
0x11b7   :  { %v1303_v4 = vadd.f32 1.0, %v3550_v15 }
0x11b9   :  { %3551 = vrcp.f32 %v1303_v4 }
0x11c3   :  { %v3552_v20 = vpop.eup %3551 }
0x11c4   :  { %v1307_v25 = vmul.f32 %v3552_v20, %v4141_v18 }
0x11df   :  { %v1285_v32 = vpop.permute.xlu0 %1284 }
0x11e0   :  { %v1287_v49 = vmul.f32 %v3548_v8, %v1285_v32 }
0x11e2   :  { %1289 = vrot.lane.b32.xlu0 %v1287_v49, %s3712_s0 }
0x121a   :  { %v1310_v7 = vpop.permute.xlu1 %1309 }
0x121b   :  { %v1312_v22 = vmul.f32 %v3552_v20, %v1310_v7 }
0x121d   :  { %1314 = vrot.lane.b32.xlu1 %v1312_v22, %s3712_s0 }
0x1254   :  { %v1290_v59 = vpop.permute.xlu0 %1289 }
0x1255   :  { %v4196_v38 = vadd.f32 %v1290_v59, %v1282_v26 }
0x1257   :  { %3553 = vtanh.f32 %v4196_v38 }
0x1261   :  { %v3554_v11 = vpop.eup %3553 }
0x1262   :  { %1295 = vrot.lane.b32.xlu0 %v3554_v11, %s3712_s0 }
0x128f   :  { %v1315_v56 = vpop.permute.xlu1 %1314 }
0x1290   :  { %v4201_v50 = vadd.f32 %v1315_v56, %v1307_v25 }
0x1292   :  { %3555 = vtanh.f32 %v4201_v50 }
0x129c   :  { %v3556_v53 = vpop.eup %3555 }
0x129d   :  { %1320 = vrot.lane.b32.xlu1 %v3556_v53, %s3712_s0 }
0x12d4   :  { %v1296_v55 = vpop.permute.xlu0 %1295 }
0x12d5   :  { %v4205_v12 = vmul.f32 %v3548_v8, %v1296_v55 }
0x12d7   :  { %v1326_v57 = vpack.c.bf16 %v4205_v12, %v4205_v12 }
0x12d9   :  { %1328 = vrot.lane.b32.xlu0 %v1326_v57, %s3713_s3 }
0x130f   :  { %v1321_v33 = vpop.permute.xlu1 %1320 }
0x1310   :  { %v4210_v19 = vmul.f32 %v3552_v20, %v1321_v33 }
0x1312   :  { %v1373_v18 = vpack.c.bf16 %v4210_v19, %v4210_v19 }
0x1314   :  { %1375 = vrot.lane.b32.xlu1 %v1373_v18, %s3713_s3 }
0x134b   :  { %v1329_v61 = vpop.permute.xlu0 %1328 }
0x134c   :  { %3202 = vmatmul.mubr.msk.bf16.vlgmr.msra.gmra.mrb[44].mxu0 %vm110_vm1, %v1329_v61 }
0x134d   :  { %3214 = vmatpush3.bf16.msra.mxu0 %v4159_v9  ;;  %3217 = vmatprep.mubr.msk.bf16.mxu0 %vm3711_vm0, %v3709_v1 }
0x134e   :  { %3215 = vmatprep.subr.bf16.mxu0 %v3709_v1 }
0x1351   :  { %3216 = vmatpush3.bf16.msra.mxu0 %v4168_v28 }
0x1352   :  { %3229 = vmatprep.subr.bf16.mxu0 %v3709_v1 }
0x1386   :  { %v1376_v2 = vpop.permute.xlu1 %1375 }
0x1387   :  { %3210 = vmatmul.mubr.msk.bf16.vlgmr.msra.gmra.mrb[44].mxu1 %vm110_vm1, %v1376_v2 }
0x1388   :  { %3222 = vmatpush3.bf16.msra.mxu1 %v4176_v42  ;;  %3225 = vmatprep.mubr.msk.bf16.mxu1 %vm3711_vm0, %v3709_v1 }
0x1389   :  { %3223 = vmatprep.subr.bf16.mxu1 %v3709_v1 }
0x138c   :  { %3224 = vmatpush3.bf16.msra.mxu1 %v4185_v39 }
0x138d   :  { %3237 = vmatprep.subr.bf16.mxu1 %v3709_v1 }
0x141f   :  { %v1367_v23 = vpop.f32.mrb[44].mxu0 }
0x1420   :  { %v1420_v43 = vadd.f32 %v1367_v23, %v3882_v0  ;;  %v3203_v60 = vpop.f32.mrb[45].mxu0 }
0x1421   :  { %v1370_v24 = vpop.f32.mrb[46].mxu0 }
0x1422   :  { %3557 = vtanh.f32 %v1420_v43  ;;  %v3204_v8 = vpop.f32.mrb[47].mxu0  ;;  %v2923_v22 = vmul.f32 -1.442695, %v1420_v43 }
0x142c   :  { %v3558_v32 = vpop.eup %3557 }
0x142d   :  { %1430 = vrot.lane.b32.xlu0 %v3558_v32, %s3712_s0 }
0x145a   :  { %v1414_v49 = vpop.f32.mrb[44].mxu1 }
0x145b   :  { %v1445_v14 = vadd.f32 %v1414_v49, %v3891_v10  ;;  %v3211_v15 = vpop.f32.mrb[45].mxu1 }
0x145c   :  { %v1417_v4 = vpop.f32.mrb[46].mxu1 }
0x145d   :  { %3559 = vtanh.f32 %v1445_v14  ;;  %v3212_v20 = vpop.f32.mrb[47].mxu1  ;;  %v2924_v56 = vmul.f32 -1.442695, %v1445_v14 }
0x145e   :  { %3561 = vpow2.f32 %v2923_v22 }
0x1467   :  { %v3560_v7 = vpop.eup %3559 }
0x1468   :  { %1455 = vrot.lane.b32.xlu1 %v3560_v7, %s3712_s0  ;;  %v3562_v0 = vpop.eup %3561 }
0x1469   :  { %v1424_v26 = vadd.f32 1.0, %v3562_v0 }
0x146b   :  { %3563 = vrcp.f32 %v1424_v26 }
0x146c   :  { %3565 = vpow2.f32 %v2924_v56 }
0x1475   :  { %v3564_v59 = vpop.eup %3563 }
0x1476   :  { %v3566_v10 = vpop.eup %3565  ;;  %v1428_v18 = vmul.f32 %v3564_v59, %v4196_v38 }
0x1477   :  { %v1449_v53 = vadd.f32 1.0, %v3566_v10 }
0x1479   :  { %3567 = vrcp.f32 %v1449_v53 }
0x1483   :  { %v3568_v55 = vpop.eup %3567 }
0x1484   :  { %v1453_v43 = vmul.f32 %v3568_v55, %v4201_v50 }
0x149f   :  { %v1431_v11 = vpop.permute.xlu0 %1430 }
0x14a0   :  { %v1433_v25 = vmul.f32 %v3564_v59, %v1431_v11 }
0x14a2   :  { %1435 = vrot.lane.b32.xlu0 %v1433_v25, %s3712_s0 }
0x14da   :  { %v1456_v57 = vpop.permute.xlu1 %1455 }
0x14db   :  { %v1458_v33 = vmul.f32 %v3568_v55, %v1456_v57 }
0x14dd   :  { %1460 = vrot.lane.b32.xlu1 %v1458_v33, %s3712_s0 }
0x1514   :  { %v1436_v61 = vpop.permute.xlu0 %1435 }
0x1515   :  { %v4236_v2 = vadd.f32 %v1436_v61, %v1428_v18 }
0x1517   :  { %3569 = vtanh.f32 %v4236_v2 }
0x1521   :  { %v3570_v23 = vpop.eup %3569 }
0x1522   :  { %1441 = vrot.lane.b32.xlu0 %v3570_v23, %s3712_s0 }
0x154f   :  { %v1461_v60 = vpop.permute.xlu1 %1460 }
0x1550   :  { %v4241_v24 = vadd.f32 %v1461_v60, %v1453_v43 }
0x1552   :  { %3571 = vtanh.f32 %v4241_v24 }
0x155c   :  { %v3572_v8 = vpop.eup %3571 }
0x155d   :  { %1466 = vrot.lane.b32.xlu1 %v3572_v8, %s3712_s0 }
0x1594   :  { %v1442_v32 = vpop.permute.xlu0 %1441 }
0x1595   :  { %v4245_v38 = vmul.f32 %v3564_v59, %v1442_v32 }
0x1597   :  { %v1472_v49 = vpack.c.bf16 %v4245_v38, %v4245_v38 }
0x1599   :  { %1474 = vrot.lane.b32.xlu0 %v1472_v49, %s3713_s3 }
0x15cf   :  { %v1467_v14 = vpop.permute.xlu1 %1466 }
0x15d0   :  { %v4250_v15 = vmul.f32 %v3568_v55, %v1467_v14 }
0x15d2   :  { %v1519_v50 = vpack.c.bf16 %v4250_v15, %v4250_v15 }
0x15d4   :  { %1521 = vrot.lane.b32.xlu1 %v1519_v50, %s3713_s3 }
0x160b   :  { %v1475_v4 = vpop.permute.xlu0 %1474 }
0x160c   :  { %3218 = vmatmul.mubr.msk.bf16.vlgmr.msra.gmra.mrb[48].mxu0 %vm110_vm1, %v1475_v4 }
0x160d   :  { %3230 = vmatpush3.bf16.msra.mxu0 %v4159_v9  ;;  %3233 = vmatprep.mubr.msk.bf16.mxu0 %vm3711_vm0, %v3709_v1 }
0x160e   :  { %3231 = vmatprep.subr.bf16.mxu0 %v3709_v1 }
0x1611   :  { %3232 = vmatpush3.bf16.msra.mxu0 %v4168_v28 }
0x1612   :  { %3245 = vmatprep.subr.bf16.mxu0 %v3709_v1 }
0x1646   :  { %v1522_v20 = vpop.permute.xlu1 %1521 }
0x1647   :  { %3226 = vmatmul.mubr.msk.bf16.vlgmr.msra.gmra.mrb[48].mxu1 %vm110_vm1, %v1522_v20 }
0x1648   :  { %3238 = vmatpush3.bf16.msra.mxu1 %v4176_v42  ;;  %3241 = vmatprep.mubr.msk.bf16.mxu1 %vm3711_vm0, %v3709_v1 }
0x1649   :  { %3239 = vmatprep.subr.bf16.mxu1 %v3709_v1 }
0x164c   :  { %3240 = vmatpush3.bf16.msra.mxu1 %v4185_v39 }
0x164d   :  { %3253 = vmatprep.subr.bf16.mxu1 %v3709_v1 }
0x16df   :  { %v1513_v7 = vpop.f32.mrb[48].mxu0 }
0x16e0   :  { %v1566_v22 = vadd.f32 %v1513_v7, %v3888_v6  ;;  %v3219_v0 = vpop.f32.mrb[49].mxu0 }
0x16e1   :  { %v1516_v26 = vpop.f32.mrb[50].mxu0 }
0x16e2   :  { %3573 = vtanh.f32 %v1566_v22  ;;  %v3220_v59 = vpop.f32.mrb[51].mxu0  ;;  %v2927_v33 = vmul.f32 -1.442695, %v1566_v22 }
0x16ec   :  { %v3574_v11 = vpop.eup %3573 }
0x16ed   :  { %1576 = vrot.lane.b32.xlu0 %v3574_v11, %s3712_s0 }
0x171a   :  { %v1560_v25 = vpop.f32.mrb[48].mxu1 }
0x171b   :  { %v1591_v56 = vadd.f32 %v1560_v25, %v3885_v3  ;;  %v3227_v10 = vpop.f32.mrb[49].mxu1 }
0x171c   :  { %v1563_v53 = vpop.f32.mrb[50].mxu1 }
0x171d   :  { %3575 = vtanh.f32 %v1591_v56  ;;  %v3228_v55 = vpop.f32.mrb[51].mxu1  ;;  %v2928_v60 = vmul.f32 -1.442695, %v1591_v56 }
0x171e   :  { %3577 = vpow2.f32 %v2927_v33 }
0x1727   :  { %v3576_v57 = vpop.eup %3575 }
0x1728   :  { %1601 = vrot.lane.b32.xlu1 %v3576_v57, %s3712_s0  ;;  %v3578_v6 = vpop.eup %3577 }
0x1729   :  { %v1570_v18 = vadd.f32 1.0, %v3578_v6 }
0x172b   :  { %3579 = vrcp.f32 %v1570_v18 }
0x172c   :  { %3581 = vpow2.f32 %v2928_v60 }
0x1735   :  { %v3580_v61 = vpop.eup %3579 }
0x1736   :  { %v3582_v3 = vpop.eup %3581  ;;  %v1574_v50 = vmul.f32 %v3580_v61, %v4236_v2 }
0x1737   :  { %v1595_v8 = vadd.f32 1.0, %v3582_v3 }
0x1739   :  { %3583 = vrcp.f32 %v1595_v8 }
0x1743   :  { %v3584_v32 = vpop.eup %3583 }
0x1744   :  { %v1599_v22 = vmul.f32 %v3584_v32, %v4241_v24 }
0x175f   :  { %v1577_v23 = vpop.permute.xlu0 %1576 }
0x1760   :  { %v1579_v43 = vmul.f32 %v3580_v61, %v1577_v23 }
0x1762   :  { %1581 = vrot.lane.b32.xlu0 %v1579_v43, %s3712_s0 }
0x179a   :  { %v1602_v49 = vpop.permute.xlu1 %1601 }
0x179b   :  { %v1604_v14 = vmul.f32 %v3584_v32, %v1602_v49 }
0x179d   :  { %1606 = vrot.lane.b32.xlu1 %v1604_v14, %s3712_s0 }
0x17d4   :  { %v1582_v4 = vpop.permute.xlu0 %1581 }
0x17d5   :  { %v4276_v20 = vadd.f32 %v1582_v4, %v1574_v50 }
0x17d7   :  { %3585 = vtanh.f32 %v4276_v20 }
0x17e1   :  { %v3586_v7 = vpop.eup %3585 }
0x17e2   :  { %1587 = vrot.lane.b32.xlu0 %v3586_v7, %s3712_s0 }
0x180f   :  { %v1607_v0 = vpop.permute.xlu1 %1606 }
0x1810   :  { %v4281_v26 = vadd.f32 %v1607_v0, %v1599_v22 }
0x1812   :  { %3587 = vtanh.f32 %v4281_v26 }
0x181c   :  { %v3588_v59 = vpop.eup %3587 }
0x181d   :  { %1612 = vrot.lane.b32.xlu1 %v3588_v59, %s3712_s0 }
0x1854   :  { %v1588_v11 = vpop.permute.xlu0 %1587 }
0x1855   :  { %v4285_v2 = vmul.f32 %v3580_v61, %v1588_v11 }
0x1857   :  { %v1618_v25 = vpack.c.bf16 %v4285_v2, %v4285_v2 }
0x1859   :  { %1620 = vrot.lane.b32.xlu0 %v1618_v25, %s3713_s3 }
0x188f   :  { %v1613_v56 = vpop.permute.xlu1 %1612 }
0x1890   :  { %v4290_v10 = vmul.f32 %v3584_v32, %v1613_v56 }
0x1892   :  { %v1665_v24 = vpack.c.bf16 %v4290_v10, %v4290_v10 }
0x1894   :  { %1667 = vrot.lane.b32.xlu1 %v1665_v24, %s3713_s3 }
0x18cb   :  { %v1621_v53 = vpop.permute.xlu0 %1620 }
0x18cc   :  { %3234 = vmatmul.mubr.msk.bf16.vlgmr.msra.gmra.mrb[52].mxu0 %vm110_vm1, %v1621_v53 }
0x18cd   :  { %3246 = vmatpush3.bf16.msra.mxu0 %v4159_v9  ;;  %3249 = vmatprep.mubr.msk.bf16.mxu0 %vm3711_vm0, %v3709_v1 }
0x18ce   :  { %3247 = vmatprep.subr.bf16.mxu0 %v3709_v1 }
0x18d1   :  { %3248 = vmatpush3.bf16.msra.mxu0 %v4168_v28 }
0x18d2   :  { %3261 = vmatprep.subr.bf16.mxu0 %v3709_v1 }
0x1906   :  { %v1668_v55 = vpop.permute.xlu1 %1667 }
0x1907   :  { %3242 = vmatmul.mubr.msk.bf16.vlgmr.msra.gmra.mrb[52].mxu1 %vm110_vm1, %v1668_v55 }
0x1908   :  { %3254 = vmatpush3.bf16.msra.mxu1 %v4176_v42  ;;  %3257 = vmatprep.mubr.msk.bf16.mxu1 %vm3711_vm0, %v3709_v1 }
0x1909   :  { %3255 = vmatprep.subr.bf16.mxu1 %v3709_v1 }
0x190c   :  { %3256 = vmatpush3.bf16.msra.mxu1 %v4185_v39 }
0x190d   :  { %3269 = vmatprep.subr.bf16.mxu1 %v3709_v1 }
0x199f   :  { %v1659_v57 = vpop.f32.mrb[52].mxu0 }
0x19a0   :  { %v1712_v33 = vadd.f32 %v1659_v57, %v3894_v13  ;;  %v3235_v6 = vpop.f32.mrb[53].mxu0 }
0x19a1   :  { %v1662_v18 = vpop.f32.mrb[54].mxu0 }
0x19a2   :  { %3589 = vtanh.f32 %v1712_v33  ;;  %v3236_v61 = vpop.f32.mrb[55].mxu0  ;;  %v2931_v14 = vmul.f32 -1.442695, %v1712_v33 }
0x19ac   :  { %v3590_v23 = vpop.eup %3589 }
0x19ad   :  { %1722 = vrot.lane.b32.xlu0 %v3590_v23, %s3712_s0 }
0x19da   :  { %v1706_v43 = vpop.f32.mrb[52].mxu1 }
0x19db   :  { %v1737_v60 = vadd.f32 %v1706_v43, %v3879_v62  ;;  %v3243_v3 = vpop.f32.mrb[53].mxu1 }
0x19dc   :  { %v1709_v8 = vpop.f32.mrb[54].mxu1 }
0x19dd   :  { %3591 = vtanh.f32 %v1737_v60  ;;  %v3244_v32 = vpop.f32.mrb[55].mxu1  ;;  %v2932_v0 = vmul.f32 -1.442695, %v1737_v60 }
0x19de   :  { %3593 = vpow2.f32 %v2931_v14 }
0x19e7   :  { %v3592_v49 = vpop.eup %3591 }
0x19e8   :  { %1747 = vrot.lane.b32.xlu1 %v3592_v49, %s3712_s0  ;;  %v3594_v13 = vpop.eup %3593 }
0x19e9   :  { %v1716_v50 = vadd.f32 1.0, %v3594_v13 }
0x19eb   :  { %3595 = vrcp.f32 %v1716_v50 }
0x19ec   :  { %3597 = vpow2.f32 %v2932_v0 }
0x19f5   :  { %v3596_v4 = vpop.eup %3595 }
0x19f6   :  { %v3598_v62 = vpop.eup %3597  ;;  %v1720_v24 = vmul.f32 %v3596_v4, %v4276_v20 }
0x19f7   :  { %v1741_v59 = vadd.f32 1.0, %v3598_v62 }
0x19f9   :  { %3599 = vrcp.f32 %v1741_v59 }
0x1a03   :  { %v3600_v11 = vpop.eup %3599 }
0x1a04   :  { %v1745_v33 = vmul.f32 %v3600_v11, %v4281_v26 }
0x1a1f   :  { %v1723_v7 = vpop.permute.xlu0 %1722 }
0x1a20   :  { %v1725_v22 = vmul.f32 %v3596_v4, %v1723_v7 }
0x1a22   :  { %1727 = vrot.lane.b32.xlu0 %v1725_v22, %s3712_s0 }
0x1a5a   :  { %v1748_v25 = vpop.permute.xlu1 %1747 }
0x1a5b   :  { %v1750_v56 = vmul.f32 %v3600_v11, %v1748_v25 }
0x1a5d   :  { %1752 = vrot.lane.b32.xlu1 %v1750_v56, %s3712_s0 }
0x1a94   :  { %v1728_v53 = vpop.permute.xlu0 %1727 }
0x1a95   :  { %v4316_v55 = vadd.f32 %v1728_v53, %v1720_v24 }
0x1a97   :  { %3601 = vtanh.f32 %v4316_v55 }
0x1aa1   :  { %v3602_v57 = vpop.eup %3601 }
0x1aa2   :  { %1733 = vrot.lane.b32.xlu0 %v3602_v57, %s3712_s0 }
0x1acf   :  { %v1753_v6 = vpop.permute.xlu1 %1752 }
0x1ad0   :  { %v4321_v18 = vadd.f32 %v1753_v6, %v1745_v33 }
0x1ad2   :  { %3603 = vtanh.f32 %v4321_v18 }
0x1adc   :  { %v3604_v61 = vpop.eup %3603 }
0x1add   :  { %1758 = vrot.lane.b32.xlu1 %v3604_v61, %s3712_s0 }
0x1b14   :  { %v1734_v23 = vpop.permute.xlu0 %1733 }
0x1b15   :  { %v4325_v20 = vmul.f32 %v3596_v4, %v1734_v23 }
0x1b17   :  { %v1764_v43 = vpack.c.bf16 %v4325_v20, %v4325_v20 }
0x1b19   :  { %1766 = vrot.lane.b32.xlu0 %v1764_v43, %s3713_s3 }
0x1b4f   :  { %v1759_v60 = vpop.permute.xlu1 %1758 }
0x1b50   :  { %v4330_v3 = vmul.f32 %v3600_v11, %v1759_v60 }
0x1b52   :  { %v1811_v26 = vpack.c.bf16 %v4330_v3, %v4330_v3 }
0x1b54   :  { %1813 = vrot.lane.b32.xlu1 %v1811_v26, %s3713_s3 }
0x1b8b   :  { %v1767_v8 = vpop.permute.xlu0 %1766 }
0x1b8c   :  { %3250 = vmatmul.mubr.msk.bf16.vlgmr.msra.gmra.mrb[56].mxu0 %vm110_vm1, %v1767_v8 }
0x1b8d   :  { %3262 = vmatpush3.bf16.msra.mxu0 %v4159_v9  ;;  %3265 = vmatprep.mubr.msk.bf16.mxu0 %vm3711_vm0, %v3709_v1 }
0x1b8e   :  { %3263 = vmatprep.subr.bf16.mxu0 %v3709_v1 }
0x1b91   :  { %3264 = vmatpush3.bf16.msra.mxu0 %v4168_v28 }
0x1b92   :  { %3277 = vmatprep.subr.bf16.mxu0 %v3709_v1 }
0x1bc6   :  { %v1814_v32 = vpop.permute.xlu1 %1813 }
0x1bc7   :  { %3258 = vmatmul.mubr.msk.bf16.vlgmr.msra.gmra.mrb[56].mxu1 %vm110_vm1, %v1814_v32 }
0x1bc8   :  { %3270 = vmatpush3.bf16.msra.mxu1 %v4176_v42  ;;  %3273 = vmatprep.mubr.msk.bf16.mxu1 %vm3711_vm0, %v3709_v1 }
0x1bc9   :  { %3271 = vmatprep.subr.bf16.mxu1 %v3709_v1 }
0x1bcc   :  { %3272 = vmatpush3.bf16.msra.mxu1 %v4185_v39 }
0x1bcd   :  { %3285 = vmatprep.subr.bf16.mxu1 %v3709_v1 }
0x1c5f   :  { %v1805_v49 = vpop.f32.mrb[56].mxu0 }
0x1c60   :  { %v1858_v14 = vadd.f32 %v1805_v49, %v3900_v17  ;;  %v3251_v13 = vpop.f32.mrb[57].mxu0 }
0x1c61   :  { %v1808_v50 = vpop.f32.mrb[58].mxu0 }
0x1c62   :  { %3605 = vtanh.f32 %v1858_v14  ;;  %v3252_v4 = vpop.f32.mrb[59].mxu0  ;;  %v2935_v56 = vmul.f32 -1.442695, %v1858_v14 }
0x1c6c   :  { %v3606_v7 = vpop.eup %3605 }
0x1c6d   :  { %1868 = vrot.lane.b32.xlu0 %v3606_v7, %s3712_s0 }
0x1c9a   :  { %v1852_v22 = vpop.f32.mrb[56].mxu1 }
0x1c9b   :  { %v1883_v0 = vadd.f32 %v1852_v22, %v3873_v58  ;;  %v3259_v62 = vpop.f32.mrb[57].mxu1 }
0x1c9c   :  { %v1855_v59 = vpop.f32.mrb[58].mxu1 }
0x1c9d   :  { %3607 = vtanh.f32 %v1883_v0  ;;  %v3260_v11 = vpop.f32.mrb[59].mxu1  ;;  %v2936_v6 = vmul.f32 -1.442695, %v1883_v0 }
0x1c9e   :  { %3609 = vpow2.f32 %v2935_v56 }
0x1ca7   :  { %v3608_v25 = vpop.eup %3607 }
0x1ca8   :  { %1893 = vrot.lane.b32.xlu1 %v3608_v25, %s3712_s0  ;;  %v3610_v17 = vpop.eup %3609 }
0x1ca9   :  { %v1862_v24 = vadd.f32 1.0, %v3610_v17 }
0x1cab   :  { %3611 = vrcp.f32 %v1862_v24 }
0x1cac   :  { %3613 = vpow2.f32 %v2936_v6 }
0x1cb5   :  { %v3612_v53 = vpop.eup %3611 }
0x1cb6   :  { %v3614_v58 = vpop.eup %3613  ;;  %v1866_v26 = vmul.f32 %v3612_v53, %v4316_v55 }
0x1cb7   :  { %v1887_v61 = vadd.f32 1.0, %v3614_v58 }
0x1cb9   :  { %3615 = vrcp.f32 %v1887_v61 }
0x1cc3   :  { %v3616_v23 = vpop.eup %3615 }
0x1cc4   :  { %v1891_v14 = vmul.f32 %v3616_v23, %v4321_v18 }
0x1cdf   :  { %v1869_v57 = vpop.permute.xlu0 %1868 }
0x1ce0   :  { %v1871_v33 = vmul.f32 %v3612_v53, %v1869_v57 }
0x1ce2   :  { %1873 = vrot.lane.b32.xlu0 %v1871_v33, %s3712_s0 }
0x1d1a   :  { %v1894_v43 = vpop.permute.xlu1 %1893 }
0x1d1b   :  { %v1896_v60 = vmul.f32 %v3616_v23, %v1894_v43 }
0x1d1d   :  { %1898 = vrot.lane.b32.xlu1 %v1896_v60, %s3712_s0 }
0x1d54   :  { %v1874_v8 = vpop.permute.xlu0 %1873 }
0x1d55   :  { %v4356_v32 = vadd.f32 %v1874_v8, %v1866_v26 }
0x1d57   :  { %3617 = vtanh.f32 %v4356_v32 }
0x1d61   :  { %v3618_v49 = vpop.eup %3617 }
0x1d62   :  { %1879 = vrot.lane.b32.xlu0 %v3618_v49, %s3712_s0 }
0x1d8f   :  { %v1899_v13 = vpop.permute.xlu1 %1898 }
0x1d90   :  { %v4361_v50 = vadd.f32 %v1899_v13, %v1891_v14 }
0x1d92   :  { %3619 = vtanh.f32 %v4361_v50 }
0x1d9c   :  { %v3620_v4 = vpop.eup %3619 }
0x1d9d   :  { %1904 = vrot.lane.b32.xlu1 %v3620_v4, %s3712_s0 }
0x1dd4   :  { %v1880_v7 = vpop.permute.xlu0 %1879 }
0x1dd5   :  { %v4365_v55 = vmul.f32 %v3612_v53, %v1880_v7 }
0x1dd7   :  { %v1910_v22 = vpack.c.bf16 %v4365_v55, %v4365_v55 }
0x1dd9   :  { %1912 = vrot.lane.b32.xlu0 %v1910_v22, %s3713_s3 }
0x1e0f   :  { %v1905_v0 = vpop.permute.xlu1 %1904 }
0x1e10   :  { %v4370_v62 = vmul.f32 %v3616_v23, %v1905_v0 }
0x1e12   :  { %v1957_v18 = vpack.c.bf16 %v4370_v62, %v4370_v62 }
0x1e14   :  { %1959 = vrot.lane.b32.xlu1 %v1957_v18, %s3713_s3 }
0x1e4b   :  { %v1913_v59 = vpop.permute.xlu0 %1912 }
0x1e4c   :  { %3266 = vmatmul.mubr.msk.bf16.vlgmr.msra.gmra.mrb[60].mxu0 %vm110_vm1, %v1913_v59 }
0x1e4d   :  { %3278 = vmatpush3.bf16.msra.mxu0 %v4159_v9  ;;  %3281 = vmatprep.mubr.msk.bf16.mxu0 %vm3711_vm0, %v3709_v1 }
0x1e4e   :  { %3279 = vmatprep.subr.bf16.mxu0 %v3709_v1 }
0x1e51   :  { %3280 = vmatpush3.bf16.msra.mxu0 %v4168_v28 }
0x1e52   :  { %3293 = vmatprep.subr.bf16.mxu0 %v3709_v1 }
0x1e86   :  { %v1960_v11 = vpop.permute.xlu1 %1959 }
0x1e87   :  { %3274 = vmatmul.mubr.msk.bf16.vlgmr.msra.gmra.mrb[60].mxu1 %vm110_vm1, %v1960_v11 }
0x1e88   :  { %3286 = vmatpush3.bf16.msra.mxu1 %v4176_v42  ;;  %3289 = vmatprep.mubr.msk.bf16.mxu1 %vm3711_vm0, %v3709_v1 }
0x1e89   :  { %3287 = vmatprep.subr.bf16.mxu1 %v3709_v1 }
0x1e8c   :  { %3288 = vmatpush3.bf16.msra.mxu1 %v4185_v39 }
0x1e8d   :  { %3301 = vmatprep.subr.bf16.mxu1 %v3709_v1 }
0x1f1f   :  { %v1951_v25 = vpop.f32.mrb[60].mxu0 }
0x1f20   :  { %v2004_v56 = vadd.f32 %v1951_v25, %v3906_v21  ;;  %v3267_v17 = vpop.f32.mrb[61].mxu0 }
0x1f21   :  { %v1954_v24 = vpop.f32.mrb[62].mxu0 }
0x1f22   :  { %3621 = vtanh.f32 %v2004_v56  ;;  %v3268_v53 = vpop.f32.mrb[63].mxu0  ;;  %v2939_v60 = vmul.f32 -1.442695, %v2004_v56 }
0x1f2c   :  { %v3622_v57 = vpop.eup %3621 }
0x1f2d   :  { %2014 = vrot.lane.b32.xlu0 %v3622_v57, %s3712_s0 }
0x1f5a   :  { %v1998_v33 = vpop.f32.mrb[60].mxu1 }
0x1f5b   :  { %v2029_v6 = vadd.f32 %v1998_v33, %v3867_v54  ;;  %v3275_v58 = vpop.f32.mrb[61].mxu1 }
0x1f5c   :  { %v2001_v61 = vpop.f32.mrb[62].mxu1 }
0x1f5d   :  { %3623 = vtanh.f32 %v2029_v6  ;;  %v3276_v23 = vpop.f32.mrb[63].mxu1  ;;  %v2940_v13 = vmul.f32 -1.442695, %v2029_v6 }
0x1f5e   :  { %3625 = vpow2.f32 %v2939_v60 }
0x1f67   :  { %v3624_v43 = vpop.eup %3623 }
0x1f68   :  { %2039 = vrot.lane.b32.xlu1 %v3624_v43, %s3712_s0  ;;  %v3626_v21 = vpop.eup %3625 }
0x1f69   :  { %v2008_v26 = vadd.f32 1.0, %v3626_v21 }
0x1f6b   :  { %3627 = vrcp.f32 %v2008_v26 }
0x1f6c   :  { %3629 = vpow2.f32 %v2940_v13 }
0x1f75   :  { %v3628_v8 = vpop.eup %3627 }
0x1f76   :  { %v3630_v54 = vpop.eup %3629  ;;  %v2012_v18 = vmul.f32 %v3628_v8, %v4356_v32 }
0x1f77   :  { %v2033_v4 = vadd.f32 1.0, %v3630_v54 }
0x1f79   :  { %3631 = vrcp.f32 %v2033_v4 }
0x1f83   :  { %v3632_v7 = vpop.eup %3631 }
0x1f84   :  { %v2037_v56 = vmul.f32 %v3632_v7, %v4361_v50 }
0x1f9f   :  { %v2015_v49 = vpop.permute.xlu0 %2014 }
0x1fa0   :  { %v2017_v14 = vmul.f32 %v3628_v8, %v2015_v49 }
0x1fa2   :  { %2019 = vrot.lane.b32.xlu0 %v2017_v14, %s3712_s0 }
0x1fda   :  { %v2040_v22 = vpop.permute.xlu1 %2039 }
0x1fdb   :  { %v2042_v0 = vmul.f32 %v3632_v7, %v2040_v22 }
0x1fdd   :  { %2044 = vrot.lane.b32.xlu1 %v2042_v0, %s3712_s0 }
0x2014   :  { %v2020_v59 = vpop.permute.xlu0 %2019 }
0x2015   :  { %v4396_v11 = vadd.f32 %v2020_v59, %v2012_v18 }
0x2017   :  { %3633 = vtanh.f32 %v4396_v11 }
0x2021   :  { %v3634_v25 = vpop.eup %3633 }
0x2022   :  { %2025 = vrot.lane.b32.xlu0 %v3634_v25, %s3712_s0 }
0x204f   :  { %v2045_v17 = vpop.permute.xlu1 %2044 }
0x2050   :  { %v4401_v24 = vadd.f32 %v2045_v17, %v2037_v56 }
0x2052   :  { %3635 = vtanh.f32 %v4401_v24 }
0x205c   :  { %v3636_v53 = vpop.eup %3635 }
0x205d   :  { %2050 = vrot.lane.b32.xlu1 %v3636_v53, %s3712_s0 }
0x2094   :  { %v2026_v57 = vpop.permute.xlu0 %2025 }
0x2095   :  { %v4405_v32 = vmul.f32 %v3628_v8, %v2026_v57 }
0x2097   :  { %v2056_v33 = vpack.c.bf16 %v4405_v32, %v4405_v32 }
0x2099   :  { %2058 = vrot.lane.b32.xlu0 %v2056_v33, %s3713_s3 }
0x20cf   :  { %v2051_v6 = vpop.permute.xlu1 %2050 }
0x20d0   :  { %v4410_v58 = vmul.f32 %v3632_v7, %v2051_v6 }
0x20d2   :  { %v2103_v50 = vpack.c.bf16 %v4410_v58, %v4410_v58 }
0x20d4   :  { %2105 = vrot.lane.b32.xlu1 %v2103_v50, %s3713_s3 }
0x210b   :  { %v2059_v61 = vpop.permute.xlu0 %2058 }
0x210c   :  { %3282 = vmatmul.mubr.msk.bf16.vlgmr.msra.gmra.mrb[64].mxu0 %vm110_vm1, %v2059_v61 }
0x210d   :  { %3294 = vmatpush3.bf16.msra.mxu0 %v4159_v9  ;;  %3297 = vmatprep.mubr.msk.bf16.mxu0 %vm3711_vm0, %v3709_v1 }
0x210e   :  { %3295 = vmatprep.subr.bf16.mxu0 %v3709_v1 }
0x2111   :  { %3296 = vmatpush3.bf16.msra.mxu0 %v4168_v28 }
0x2112   :  { %3309 = vmatprep.subr.bf16.mxu0 %v3709_v1 }
0x2146   :  { %v2106_v23 = vpop.permute.xlu1 %2105 }
0x2147   :  { %3290 = vmatmul.mubr.msk.bf16.vlgmr.msra.gmra.mrb[64].mxu1 %vm110_vm1, %v2106_v23 }
0x2148   :  { %3302 = vmatpush3.bf16.msra.mxu1 %v4176_v42  ;;  %3305 = vmatprep.mubr.msk.bf16.mxu1 %vm3711_vm0, %v3709_v1 }
0x2149   :  { %3303 = vmatprep.subr.bf16.mxu1 %v3709_v1 }
0x214c   :  { %3304 = vmatpush3.bf16.msra.mxu1 %v4185_v39 }
0x214d   :  { %3317 = vmatprep.subr.bf16.mxu1 %v3709_v1 }
0x21df   :  { %v2097_v43 = vpop.f32.mrb[64].mxu0 }
0x21e0   :  { %v2150_v60 = vadd.f32 %v2097_v43, %v3912_v27  ;;  %v3283_v21 = vpop.f32.mrb[65].mxu0 }
0x21e1   :  { %v2100_v26 = vpop.f32.mrb[66].mxu0 }
0x21e2   :  { %3637 = vtanh.f32 %v2150_v60  ;;  %v3284_v8 = vpop.f32.mrb[67].mxu0  ;;  %v2943_v0 = vmul.f32 -1.442695, %v2150_v60 }
0x21ec   :  { %v3638_v49 = vpop.eup %3637 }
0x21ed   :  { %2160 = vrot.lane.b32.xlu0 %v3638_v49, %s3712_s0 }
0x221a   :  { %v2144_v14 = vpop.f32.mrb[64].mxu1 }
0x221b   :  { %v2175_v13 = vadd.f32 %v2144_v14, %v3860_v46  ;;  %v3291_v54 = vpop.f32.mrb[65].mxu1 }
0x221c   :  { %v2147_v4 = vpop.f32.mrb[66].mxu1 }
0x221d   :  { %3639 = vtanh.f32 %v2175_v13  ;;  %v3292_v7 = vpop.f32.mrb[67].mxu1  ;;  %v2944_v17 = vmul.f32 -1.442695, %v2175_v13 }
0x221e   :  { %3641 = vpow2.f32 %v2943_v0 }
0x2227   :  { %v3640_v22 = vpop.eup %3639 }
0x2228   :  { %2185 = vrot.lane.b32.xlu1 %v3640_v22, %s3712_s0  ;;  %v3642_v27 = vpop.eup %3641 }
0x2229   :  { %v2154_v18 = vadd.f32 1.0, %v3642_v27 }
0x222b   :  { %3643 = vrcp.f32 %v2154_v18 }
0x222c   :  { %3645 = vpow2.f32 %v2944_v17 }
0x2235   :  { %v3644_v59 = vpop.eup %3643 }
0x2236   :  { %v3646_v46 = vpop.eup %3645  ;;  %v2158_v50 = vmul.f32 %v3644_v59, %v4396_v11 }
0x2237   :  { %v2179_v53 = vadd.f32 1.0, %v3646_v46 }
0x2239   :  { %3647 = vrcp.f32 %v2179_v53 }
0x2243   :  { %v3648_v57 = vpop.eup %3647 }
0x2244   :  { %v2183_v60 = vmul.f32 %v3648_v57, %v4401_v24 }
0x225f   :  { %v2161_v25 = vpop.permute.xlu0 %2160 }
0x2260   :  { %v2163_v56 = vmul.f32 %v3644_v59, %v2161_v25 }
0x2262   :  { %2165 = vrot.lane.b32.xlu0 %v2163_v56, %s3712_s0 }
0x229a   :  { %v2186_v33 = vpop.permute.xlu1 %2185 }
0x229b   :  { %v2188_v6 = vmul.f32 %v3648_v57, %v2186_v33 }
0x229d   :  { %2190 = vrot.lane.b32.xlu1 %v2188_v6, %s3712_s0 }
0x22d4   :  { %v2166_v61 = vpop.permute.xlu0 %2165 }
0x22d5   :  { %v4436_v23 = vadd.f32 %v2166_v61, %v2158_v50 }
0x22d7   :  { %3649 = vtanh.f32 %v4436_v23 }
0x22e1   :  { %v3650_v43 = vpop.eup %3649 }
0x22e2   :  { %2171 = vrot.lane.b32.xlu0 %v3650_v43, %s3712_s0 }
0x230f   :  { %v2191_v21 = vpop.permute.xlu1 %2190 }
0x2310   :  { %v4441_v26 = vadd.f32 %v2191_v21, %v2183_v60 }
0x2312   :  { %3651 = vtanh.f32 %v4441_v26 }
0x231c   :  { %v3652_v8 = vpop.eup %3651 }
0x231d   :  { %2196 = vrot.lane.b32.xlu1 %v3652_v8, %s3712_s0 }
0x2354   :  { %v2172_v49 = vpop.permute.xlu0 %2171 }
0x2355   :  { %v4445_v11 = vmul.f32 %v3644_v59, %v2172_v49 }
0x2357   :  { %v2202_v14 = vpack.c.bf16 %v4445_v11, %v4445_v11 }
0x2359   :  { %2204 = vrot.lane.b32.xlu0 %v2202_v14, %s3713_s3 }
0x238f   :  { %v2197_v13 = vpop.permute.xlu1 %2196 }
0x2390   :  { %v4450_v54 = vmul.f32 %v3648_v57, %v2197_v13 }
0x2392   :  { %v2249_v24 = vpack.c.bf16 %v4450_v54, %v4450_v54 }
0x2394   :  { %2251 = vrot.lane.b32.xlu1 %v2249_v24, %s3713_s3 }
0x23cb   :  { %v2205_v4 = vpop.permute.xlu0 %2204 }
0x23cc   :  { %3298 = vmatmul.mubr.msk.bf16.vlgmr.msra.gmra.mrb[68].mxu0 %vm110_vm1, %v2205_v4 }
0x23cd   :  { %3310 = vmatpush3.bf16.msra.mxu0 %v4159_v9  ;;  %3313 = vmatprep.mubr.msk.bf16.mxu0 %vm3711_vm0, %v3709_v1 }
0x23ce   :  { %3311 = vmatprep.subr.bf16.mxu0 %v3709_v1 }
0x23d1   :  { %3312 = vmatpush3.bf16.msra.mxu0 %v4168_v28 }
0x23d2   :  { %3325 = vmatprep.subr.bf16.mxu0 %v3709_v1 }
0x2406   :  { %v2252_v7 = vpop.permute.xlu1 %2251 }
0x2407   :  { %3306 = vmatmul.mubr.msk.bf16.vlgmr.msra.gmra.mrb[68].mxu1 %vm110_vm1, %v2252_v7 }
0x2408   :  { %3318 = vmatpush3.bf16.msra.mxu1 %v4176_v42  ;;  %3321 = vmatprep.mubr.msk.bf16.mxu1 %vm3711_vm0, %v3709_v1 }
0x2409   :  { %3319 = vmatprep.subr.bf16.mxu1 %v3709_v1 }
0x240c   :  { %3320 = vmatpush3.bf16.msra.mxu1 %v4185_v39 }
0x240d   :  { %3333 = vmatprep.subr.bf16.mxu1 %v3709_v1 }
0x249f   :  { %v2243_v9 = vpop.f32.mrb[68].mxu0 }
0x24a0   :  { %v2296_v22 = vadd.f32 %v2243_v9, %v3918_v34  ;;  %v3299_v28 = vpop.f32.mrb[69].mxu0 }
0x24a1   :  { %v2246_v0 = vpop.f32.mrb[70].mxu0 }
0x24a2   :  { %3653 = vtanh.f32 %v2296_v22  ;;  %v3300_v27 = vpop.f32.mrb[71].mxu0  ;;  %v2947_v46 = vmul.f32 -1.442695, %v2296_v22 }
0x24ac   :  { %v3654_v18 = vpop.eup %3653 }
0x24ad   :  { %2306 = vrot.lane.b32.xlu0 %v3654_v18, %s3712_s0 }
0x24da   :  { %v2290_v42 = vpop.f32.mrb[68].mxu1 }
0x24db   :  { %v2321_v59 = vadd.f32 %v2290_v42, %v3854_v41  ;;  %v3307_v25 = vpop.f32.mrb[69].mxu1  ;;  %v3705_v42 = vld [vmem:[%s4689_s2] sm:$0xff]  }
0x24dc   :  { %v2293_v56 = vpop.f32.mrb[70].mxu1 }
0x24dd   :  { %3655 = vtanh.f32 %v2321_v59  ;;  %v3308_v17 = vpop.f32.mrb[71].mxu1  ;;  %v2948_v50 = vmul.f32 -1.442695, %v2321_v59  ;;  %v3706_v59 = vld [vmem:[%s4689_s2 + $0x8] sm:$0xff]   ;;  %v3707_v56 = vld [vmem:[%s4689_s2 + $0x10] sm:$0xff]  }
0x24de   :  { %3657 = vpow2.f32 %v2947_v46  ;;  %v3708_v17 = vld [vmem:[%s4689_s2 + $0x18] sm:$0xff]   ;;  %s3714_s2 = smov 96  }
0x24e7   :  { %v3656_v39 = vpop.eup %3655 }
0x24e8   :  { %2331 = vrot.lane.b32.xlu1 %v3656_v39, %s3712_s0  ;;  %v3658_v34 = vpop.eup %3657 }
0x24e9   :  { %v2300_v53 = vadd.f32 1.0, %v3658_v34 }
0x24eb   :  { %3659 = vrcp.f32 %v2300_v53 }
0x24ec   :  { %3661 = vpow2.f32 %v2948_v50 }
0x24f5   :  { %v3660_v57 = vpop.eup %3659 }
0x24f6   :  { %v3662_v41 = vpop.eup %3661  ;;  %v2304_v8 = vmul.f32 %v3660_v57, %v4436_v23 }
0x24f7   :  { %v2325_v61 = vadd.f32 1.0, %v3662_v41 }
0x24f9   :  { %3663 = vrcp.f32 %v2325_v61 }
0x2503   :  { %v3664_v43 = vpop.eup %3663 }
0x2504   :  { %v2329_v24 = vmul.f32 %v3664_v43, %v4441_v26 }
0x251f   :  { %v2307_v33 = vpop.permute.xlu0 %2306 }
0x2520   :  { %v2309_v6 = vmul.f32 %v3660_v57, %v2307_v33 }
0x2522   :  { %2311 = vrot.lane.b32.xlu0 %v2309_v6, %s3712_s0 }
0x255a   :  { %v2332_v60 = vpop.permute.xlu1 %2331 }
0x255b   :  { %v2334_v21 = vmul.f32 %v3664_v43, %v2332_v60 }
0x255d   :  { %2336 = vrot.lane.b32.xlu1 %v2334_v21, %s3712_s0 }
0x2594   :  { %v2312_v49 = vpop.permute.xlu0 %2311 }
0x2595   :  { %v4476_v14 = vadd.f32 %v2312_v49, %v2304_v8 }
0x2597   :  { %3665 = vtanh.f32 %v4476_v14 }
0x25a1   :  { %v3666_v13 = vpop.eup %3665 }
0x25a2   :  { %2317 = vrot.lane.b32.xlu0 %v3666_v13, %s3712_s0 }
0x25cf   :  { %v2337_v4 = vpop.permute.xlu1 %2336 }
0x25d0   :  { %v4481_v7 = vadd.f32 %v2337_v4, %v2329_v24 }
0x25d2   :  { %3667 = vtanh.f32 %v4481_v7 }
0x25dc   :  { %v3668_v9 = vpop.eup %3667 }
0x25dd   :  { %2342 = vrot.lane.b32.xlu1 %v3668_v9, %s3712_s0 }
0x2614   :  { %v2318_v22 = vpop.permute.xlu0 %2317 }
0x2615   :  { %v4485_v23 = vmul.f32 %v3660_v57, %v2318_v22 }
0x2617   :  { %v2348_v28 = vpack.c.bf16 %v4485_v23, %v4485_v23 }
0x2619   :  { %2350 = vrot.lane.b32.xlu0 %v2348_v28, %s3713_s3 }
0x264f   :  { %v2343_v0 = vpop.permute.xlu1 %2342 }
0x2650   :  { %v4490_v27 = vmul.f32 %v3664_v43, %v2343_v0 }
0x2652   :  { %v2395_v26 = vpack.c.bf16 %v4490_v27, %v4490_v27 }
0x2654   :  { %2397 = vrot.lane.b32.xlu1 %v2395_v26, %s3713_s3 }
0x268b   :  { %v2351_v18 = vpop.permute.xlu0 %2350 }
0x268c   :  { %3314 = vmatmul.mubr.msk.bf16.vlgmr.msra.gmra.mrb[72].mxu0 %vm110_vm1, %v2351_v18 }
0x268d   :  { %3326 = vmatpush3.bf16.msra.mxu0 %v3705_v42  ;;  %3329 = vmatprep.mubr.msk.bf16.mxu0 %vm3711_vm0, %v3709_v1 }
0x268e   :  { %3327 = vmatprep.subr.bf16.mxu0 %v3709_v1 }
0x2691   :  { %3328 = vmatpush3.bf16.msra.mxu0 %v3706_v59 }
0x26c6   :  { %v2398_v25 = vpop.permute.xlu1 %2397 }
0x26c7   :  { %3322 = vmatmul.mubr.msk.bf16.vlgmr.msra.gmra.mrb[72].mxu1 %vm110_vm1, %v2398_v25 }
0x26c8   :  { %3334 = vmatpush3.bf16.msra.mxu1 %v3707_v56  ;;  %3337 = vmatprep.mubr.msk.bf16.mxu1 %vm3711_vm0, %v3709_v1 }
0x26c9   :  { %3335 = vmatprep.subr.bf16.mxu1 %v3709_v1 }
0x26cc   :  { %3336 = vmatpush3.bf16.msra.mxu1 %v3708_v17 }
0x275f   :  { %v2389_v39 = vpop.f32.mrb[72].mxu0 }
0x2760   :  { %v2442_v46 = vadd.f32 %v2389_v39, %v3924_v40  ;;  %v3315_v34 = vpop.f32.mrb[73].mxu0 }
0x2761   :  { %v2392_v53 = vpop.f32.mrb[74].mxu0 }
0x2762   :  { %3669 = vtanh.f32 %v2442_v46  ;;  %v3316_v57 = vpop.f32.mrb[75].mxu0  ;;  %v2951_v60 = vmul.f32 -1.442695, %v2442_v46 }
0x276c   :  { %v3670_v33 = vpop.eup %3669 }
0x276d   :  { %2452 = vrot.lane.b32.xlu0 %v3670_v33, %s3712_s0 }
0x279a   :  { %v2436_v6 = vpop.f32.mrb[72].mxu1 }
0x279b   :  { %v2467_v50 = vadd.f32 %v2436_v6, %v3847_v36  ;;  %v3323_v41 = vpop.f32.mrb[73].mxu1 }
0x279c   :  { %v2439_v1 = vpop.f32.mrb[74].mxu1 }
0x279d   :  { %3671 = vtanh.f32 %v2467_v50  ;;  %v3324_v61 = vpop.f32.mrb[75].mxu1  ;;  %v2952_v24 = vmul.f32 -1.442695, %v2467_v50 }
0x279e   :  { %3673 = vpow2.f32 %v2951_v60 }
0x27a7   :  { %v3672_v43 = vpop.eup %3671 }
0x27a8   :  { %2477 = vrot.lane.b32.xlu1 %v3672_v43, %s3712_s0  ;;  %v3674_v40 = vpop.eup %3673 }
0x27a9   :  { %v2446_v21 = vadd.f32 1.0, %v3674_v40 }
0x27ab   :  { %3675 = vrcp.f32 %v2446_v21 }
0x27ac   :  { %3677 = vpow2.f32 %v2952_v24 }
0x27b5   :  { %v3676_v8 = vpop.eup %3675 }
0x27b6   :  { %v3678_v36 = vpop.eup %3677  ;;  %v2450_v0 = vmul.f32 %v3676_v8, %v4476_v14 }
0x27b7   :  { %v2471_v4 = vadd.f32 1.0, %v3678_v36 }
0x27b9   :  { %3679 = vrcp.f32 %v2471_v4 }
0x27c3   :  { %v3680_v9 = vpop.eup %3679 }
0x27c4   :  { %v2475_v59 = vmul.f32 %v3680_v9, %v4481_v7 }
0x27df   :  { %v2453_v49 = vpop.permute.xlu0 %2452 }
0x27e0   :  { %v2455_v13 = vmul.f32 %v3676_v8, %v2453_v49 }
0x27e2   :  { %2457 = vrot.lane.b32.xlu0 %v2455_v13, %s3712_s0 }
0x281a   :  { %v2478_v22 = vpop.permute.xlu1 %2477 }
0x281b   :  { %v2480_v28 = vmul.f32 %v3680_v9, %v2478_v22 }
0x281d   :  { %2482 = vrot.lane.b32.xlu1 %v2480_v28, %s3712_s0 }
0x2854   :  { %v2458_v26 = vpop.permute.xlu0 %2457 }
0x2855   :  { %v2460_v18 = vadd.f32 %v2458_v26, %v2450_v0 }
0x2857   :  { %3681 = vtanh.f32 %v2460_v18 }
0x2861   :  { %v3682_v42 = vpop.eup %3681 }
0x2862   :  { %2463 = vrot.lane.b32.xlu0 %v3682_v42, %s3712_s0 }
0x288f   :  { %v2483_v25 = vpop.permute.xlu1 %2482 }
0x2890   :  { %v4524_v56 = vadd.f32 %v2483_v25, %v2475_v59 }
0x2892   :  { %3683 = vtanh.f32 %v4524_v56 }
0x289c   :  { %v3684_v17 = vpop.eup %3683 }
0x289d   :  { %2488 = vrot.lane.b32.xlu1 %v3684_v17, %s3712_s0 }
0x28d4   :  { %v2464_v39 = vpop.permute.xlu0 %2463 }
0x28d5   :  { %v4528_v46 = vmul.f32 %v3676_v8, %v2464_v39 }
0x28d7   :  { %v2494_v14 = vpack.c.bf16 %v4528_v46, %v4528_v46 }
0x28d9   :  { %2496 = vrot.lane.b32.xlu0 %v2494_v14, %s3713_s3 }
0x290f   :  { %v2489_v34 = vpop.permute.xlu1 %2488 }
0x2910   :  { %v4533_v53 = vmul.f32 %v3680_v9, %v2489_v34  ;;  %v3347_v34 = vpack.i.bf16 %v3985_v16, %v3945_v35  ;;  %v3387_v35 = vpack.i.bf16 %v4370_v62, %v4410_v58  ;;  %v3397_v16 = vpack.i.bf16 %v4210_v19, %v4250_v15 }
0x2911   :  { %v3352_v62 = vpack.i.bf16 %v4065_v45, %v4025_v51  ;;  %v3362_v58 = vpack.i.bf16 %v4245_v38, %v4205_v12  ;;  %v3372_v19 = vpack.i.bf16 %v4405_v32, %v4365_v55  ;;  %v3382_v15 = vpack.i.bf16 %v4450_v54, %v4490_v27 }
0x2912   :  { %v2541_v7 = vpack.c.bf16 %v4533_v53, %v4533_v53  ;;  %v3392_v51 = vpack.i.bf16 %v4290_v10, %v4330_v3  ;;  %v3402_v45 = vpack.i.bf16 %v4110_v30, %v4150_v52 }
0x2914   :  { %2543 = vrot.lane.b32.xlu1 %v2541_v7, %s3713_s3  ;;  %v3357_v7 = vpack.i.bf16 %v4145_v63, %v4105_v31 }
0x294b   :  { %v2497_v57 = vpop.permute.xlu0 %2496 }
0x294c   :  { %3330 = vmatmul.mubr.msk.bf16.vlgmr.msra.gmra.mrb[76].mxu0 %vm110_vm1, %v2497_v57  ;;  %v3367_v57 = vpack.i.bf16 %v4325_v20, %v4285_v2 }
0x2986   :  { %v2544_v33 = vpop.permute.xlu1 %2543 }
0x2987   :  { %3338 = vmatmul.mubr.msk.bf16.vlgmr.msra.gmra.mrb[76].mxu1 %vm110_vm1, %v2544_v33 }
0x2a1f   :  { %v2535_v6 = vpop.f32.mrb[76].mxu0 }
0x2a20   :  { %v2588_v50 = vadd.f32 %v2535_v6, %v3930_v48  ;;  %v3331_v41 = vpop.f32.mrb[77].mxu0 }
0x2a21   :  { %v2538_v1 = vpop.f32.mrb[78].mxu0 }
0x2a22   :  { %3685 = vtanh.f32 %v2588_v50  ;;  %v3332_v61 = vpop.f32.mrb[79].mxu0  ;;  %v2955_v24 = vmul.f32 -1.442695, %v2588_v50 }
0x2a2c   :  { %v3686_v43 = vpop.eup %3685 }
0x2a2d   :  { %2598 = vrot.lane.b32.xlu0 %v3686_v43, %s3712_s0 }
0x2a5a   :  { %v2582_v60 = vpop.f32.mrb[76].mxu1 }
0x2a5b   :  { %v2613_v40 = vadd.f32 %v2582_v60, %v3839_v29  ;;  %v3339_v21 = vpop.f32.mrb[77].mxu1 }
0x2a5c   :  { %v2585_v8 = vpop.f32.mrb[78].mxu1 }
0x2a5d   :  { %3687 = vtanh.f32 %v2613_v40  ;;  %v3340_v49 = vpop.f32.mrb[79].mxu1  ;;  %v2956_v28 = vmul.f32 -1.442695, %v2613_v40 }
0x2a5e   :  { %3689 = vpow2.f32 %v2955_v24 }
0x2a67   :  { %v3688_v13 = vpop.eup %3687 }
0x2a68   :  { %2623 = vrot.lane.b32.xlu1 %v3688_v13, %s3712_s0  ;;  %v3690_v48 = vpop.eup %3689 }
0x2a69   :  { %v2592_v36 = vadd.f32 1.0, %v3690_v48  ;;  %v3417_v48 = vpack.i.bf16 %v4030_v44, %v4070_v37 }
0x2a6b   :  { %3691 = vrcp.f32 %v2592_v36 }
0x2a6c   :  { %3693 = vpow2.f32 %v2956_v28 }
0x2a75   :  { %v3692_v4 = vpop.eup %3691 }
0x2a76   :  { %v3694_v29 = vpop.eup %3693  ;;  %v2596_v25 = vmul.f32 %v3692_v4, %v2460_v18  ;;  %v3377_v18 = vpack.i.bf16 %v4485_v23, %v4445_v11  ;;  %v3422_v11 = vpack.i.bf16 %v3950_v47, %v3990_v5 }
0x2a77   :  { %v2617_v0 = vadd.f32 1.0, %v3694_v29 }
0x2a79   :  { %3695 = vrcp.f32 %v2617_v0 }
0x2a83   :  { %v4545_v26 = vpop.eup %3695 }
0x2a84   :  { %v2621_v31 = vmul.f32 %v4545_v26, %v4524_v56 }
0x2a9f   :  { %v2599_v9 = vpop.permute.xlu0 %2598 }
0x2aa0   :  { %v2601_v22 = vmul.f32 %v3692_v4, %v2599_v9 }
0x2aa2   :  { %2603 = vrot.lane.b32.xlu0 %v2601_v22, %s3712_s0 }
0x2ada   :  { %v2624_v42 = vpop.permute.xlu1 %2623 }
0x2adb   :  { %v2626_v59 = vmul.f32 %v4545_v26, %v2624_v42 }
0x2add   :  { %2628 = vrot.lane.b32.xlu1 %v2626_v59, %s3712_s0 }
0x2b14   :  { %v2604_v17 = vpop.permute.xlu0 %2603 }
0x2b15   :  { %v2606_v39 = vadd.f32 %v2604_v17, %v2596_v25 }
0x2b17   :  { %3697 = vtanh.f32 %v2606_v39 }
0x2b21   :  { %v3698_v14 = vpop.eup %3697 }
0x2b22   :  { %2609 = vrot.lane.b32.xlu0 %v3698_v14, %s3712_s0 }
0x2b26   :  { %3348 = vrot.lane.b32.xlu0 %v3347_v34, %s3713_s3 }
0x2b2a   :  { %3358 = vrot.lane.b32.xlu0 %v3357_v7, %s3713_s3 }
0x2b2e   :  { %3368 = vrot.lane.b32.xlu0 %v3367_v57, %s3713_s3 }
0x2b32   :  { %3378 = vrot.lane.b32.xlu0 %v3377_v18, %s3713_s3 }
0x2b36   :  { %3388 = vrot.lane.b32.xlu0 %v3387_v35, %s3714_s2 }
0x2b3a   :  { %3398 = vrot.lane.b32.xlu0 %v3397_v16, %s3714_s2 }
0x2b4f   :  { %v2629_v63 = vpop.permute.xlu1 %2628 }
0x2b50   :  { %v2631_v2 = vadd.f32 %v2629_v63, %v2621_v31 }
0x2b52   :  { %3699 = vtanh.f32 %v2631_v2 }
0x2b5c   :  { %v3700_v20 = vpop.eup %3699 }
0x2b5d   :  { %2634 = vrot.lane.b32.xlu1 %v3700_v20, %s3712_s0 }
0x2b61   :  { %3353 = vrot.lane.b32.xlu1 %v3352_v62, %s3713_s3 }
0x2b65   :  { %3363 = vrot.lane.b32.xlu1 %v3362_v58, %s3713_s3 }
0x2b69   :  { %3373 = vrot.lane.b32.xlu1 %v3372_v19, %s3713_s3 }
0x2b6d   :  { %3383 = vrot.lane.b32.xlu1 %v3382_v15, %s3714_s2 }
0x2b71   :  { %3393 = vrot.lane.b32.xlu1 %v3392_v51, %s3714_s2 }
0x2b75   :  { %3403 = vrot.lane.b32.xlu1 %v3402_v45, %s3714_s2 }
0x2b94   :  { %v2610_v12 = vpop.permute.xlu0 %2609 }
0x2b95   :  { %v2612_v38 = vmul.f32 %v3692_v4, %v2610_v12 }
0x2b97   :  { %v3407_v55 = vpack.i.bf16 %v2612_v38, %v4528_v46 }
0x2b98   :  { %v4590_v32 = vpop.permute.xlu0 %3348 }
0x2b99   :  { %3408 = vrot.lane.b32.xlu1 %v3407_v55, %s3713_s3 }
0x2b9c   :  { %v3359_v54 = vpop.permute.xlu0 %3358 }
0x2b9d   :  { %3423 = vrot.lane.b32.xlu1 %v3422_v11, %s3714_s2  ;;  %v3361_v52 = vunpack.i.h.bf16 %v3359_v54  ;;  %v3360_v23 = vunpack.i.l.bf16 %v3359_v54 }
0x2ba0   :  { %v3369_v10 = vpop.permute.xlu0 %3368 }
0x2ba1   :  { %v3371_v47 = vunpack.i.h.bf16 %v3369_v10  ;;  %v3370_v5 = vunpack.i.l.bf16 %v3369_v10 }
0x2ba4   :  { %v4596_v3 = vpop.permute.xlu0 %3378 }
0x2ba8   :  { %v3389_v30 = vpop.permute.xlu0 %3388 }
0x2ba9   :  { %v3391_v27 = vunpack.i.h.bf16 %v3389_v30  ;;  %v3390_v56 = vunpack.i.l.bf16 %v3389_v30 }
0x2bab   :  { %v2771_v46 = vsel %vm110_vm1, %v3361_v52, %v3391_v27  ;;  %v2770_v33 = vsel %vm110_vm1, %v3360_v23, %v3390_v56  ;;  %v3351_v52 = vunpack.i.h.bf16 %v4590_v32  ;;  %v3350_v23 = vunpack.i.l.bf16 %v4590_v32 }
0x2bac   :  { %v2978_v6 = vpack.c.bf16 %v2771_v46, %v2771_v46  ;;  %v2977_v50 = vpack.c.bf16 %v2770_v33, %v2770_v33  ;;  %v3399_v41 = vpop.permute.xlu0 %3398 }
0x2bad   :  { %v3401_v1 = vunpack.i.h.bf16 %v3399_v41  ;;  %v3400_v61 = vunpack.i.l.bf16 %v3399_v41 }
0x2bae   :  { %2852 = vst.msk [vmem:[%s4692_s4 + $0x14] sm:$0xf] %vm2846_vm2, %v2978_v6  ;;  %2851 = vst.msk [vmem:[%s4692_s4 + $0x10] sm:$0xf] %vm2846_vm2, %v2977_v50 }
0x2baf   :  { %v2775_v43 = vsel %vm110_vm1, %v3371_v47, %v3401_v1  ;;  %v2774_v60 = vsel %vm110_vm1, %v3370_v5, %v3400_v61  ;;  %v3381_v47 = vunpack.i.h.bf16 %v4596_v3  ;;  %v3380_v5 = vunpack.i.l.bf16 %v4596_v3 }
0x2bb0   :  { %v2982_v40 = vpack.c.bf16 %v2775_v43, %v2775_v43  ;;  %v2981_v21 = vpack.c.bf16 %v2774_v60, %v2774_v60 }
0x2bb2   :  { %2856 = vst.msk [vmem:[%s4692_s4 + $0x24] sm:$0xf] %vm2846_vm2, %v2982_v40  ;;  %2855 = vst.msk [vmem:[%s4692_s4 + $0x20] sm:$0xf] %vm2846_vm2, %v2981_v21 }
0x2bcf   :  { %v2635_v8 = vpop.permute.xlu1 %2634 }
0x2bd0   :  { %v2637_v49 = vmul.f32 %v4545_v26, %v2635_v8 }
0x2bd2   :  { %v3412_v13 = vpack.i.bf16 %v4533_v53, %v2637_v49 }
0x2bd3   :  { %v3354_v24 = vpop.permute.xlu1 %3353 }
0x2bd4   :  { %3413 = vrot.lane.b32.xlu0 %v3412_v13, %s3714_s2  ;;  %v3356_v22 = vunpack.i.h.bf16 %v3354_v24  ;;  %v3355_v28 = vunpack.i.l.bf16 %v3354_v24 }
0x2bd7   :  { %v3364_v36 = vpop.permute.xlu1 %3363 }
0x2bd8   :  { %3418 = vrot.lane.b32.xlu0 %v3417_v48, %s3714_s2  ;;  %v3366_v17 = vunpack.i.h.bf16 %v3364_v36  ;;  %v3365_v39 = vunpack.i.l.bf16 %v3364_v36 }
0x2bdb   :  { %v3374_v4 = vpop.permute.xlu1 %3373 }
0x2bdc   :  { %v3376_v35 = vunpack.i.h.bf16 %v3374_v4  ;;  %v3375_v16 = vunpack.i.l.bf16 %v3374_v4 }
0x2bdf   :  { %v3384_v9 = vpop.permute.xlu1 %3383 }
0x2be0   :  { %v3386_v29 = vunpack.i.h.bf16 %v3384_v9  ;;  %v3385_v0 = vunpack.i.l.bf16 %v3384_v9 }
0x2be2   :  { %v2768_v42 = vsel %vm110_vm1, %v3355_v28, %v3385_v0  ;;  %v2769_v26 = vsel %vm110_vm1, %v3356_v22, %v3386_v29 }
0x2be3   :  { %v2975_v53 = vpack.c.bf16 %v2768_v42, %v2768_v42  ;;  %v2976_v59 = vpack.c.bf16 %v2769_v26, %v2769_v26  ;;  %v3394_v25 = vpop.permute.xlu1 %3393 }
0x2be4   :  { %v3396_v14 = vunpack.i.h.bf16 %v3394_v25  ;;  %v3395_v44 = vunpack.i.l.bf16 %v3394_v25 }
0x2be5   :  { %2849 = vst.msk [vmem:[%s4692_s4 + $0x8] sm:$0xf] %vm2846_vm2, %v2975_v53  ;;  %2850 = vst.msk [vmem:[%s4692_s4 + $0xc] sm:$0xf] %vm2846_vm2, %v2976_v59 }
0x2be6   :  { %v2772_v37 = vsel %vm110_vm1, %v3365_v39, %v3395_v44  ;;  %v2773_v34 = vsel %vm110_vm1, %v3366_v17, %v3396_v14 }
0x2be7   :  { %v2979_v7 = vpack.c.bf16 %v2772_v37, %v2772_v37  ;;  %v2980_v57 = vpack.c.bf16 %v2773_v34, %v2773_v34  ;;  %v3404_v18 = vpop.permute.xlu1 %3403 }
0x2be8   :  { %v3406_v31 = vunpack.i.h.bf16 %v3404_v18  ;;  %v3405_v63 = vunpack.i.l.bf16 %v3404_v18 }
0x2be9   :  { %2853 = vst.msk [vmem:[%s4692_s4 + $0x18] sm:$0xf] %vm2846_vm2, %v2979_v7  ;;  %2854 = vst.msk [vmem:[%s4692_s4 + $0x1c] sm:$0xf] %vm2846_vm2, %v2980_v57 }
0x2bea   :  { %v2776_v2 = vsel %vm110_vm1, %v3375_v16, %v3405_v63  ;;  %v2777_v20 = vsel %vm110_vm1, %v3376_v35, %v3406_v31 }
0x2beb   :  { %v2983_v62 = vpack.c.bf16 %v2776_v2, %v2776_v2  ;;  %v2984_v58 = vpack.c.bf16 %v2777_v20, %v2777_v20 }
0x2bed   :  { %2857 = vst.msk [vmem:[%s4692_s4 + $0x28] sm:$0xf] %vm2846_vm2, %v2983_v62  ;;  %2858 = vst.msk [vmem:[%s4692_s4 + $0x2c] sm:$0xf] %vm2846_vm2, %v2984_v58 }
0x2c0b   :  { %v3409_v19 = vpop.permute.xlu1 %3408 }
0x2c0c   :  { %v3411_v51 = vunpack.i.h.bf16 %v3409_v19  ;;  %v3410_v45 = vunpack.i.l.bf16 %v3409_v19 }
0x2c0f   :  { %v3424_v15 = vpop.permute.xlu1 %3423 }
0x2c10   :  { %v3426_v12 = vunpack.i.h.bf16 %v3424_v15  ;;  %v3425_v38 = vunpack.i.l.bf16 %v3424_v15 }
0x2c12   :  { %v2780_v55 = vsel %vm110_vm1, %v3410_v45, %v3425_v38  ;;  %v2781_v11 = vsel %vm110_vm1, %v3411_v51, %v3426_v12 }
0x2c13   :  { %v2987_v54 = vpack.c.bf16 %v2780_v55, %v2780_v55  ;;  %v2988_v10 = vpack.c.bf16 %v2781_v11, %v2781_v11 }
0x2c15   :  { %2861 = vst.msk [vmem:[%s4692_s4 + $0x38] sm:$0xf] %vm2846_vm2, %v2987_v54  ;;  %2862 = vst.msk [vmem:[%s4692_s4 + $0x3c] sm:$0xf] %vm2846_vm2, %v2988_v10 }
0x2c46   :  { %v3414_v30 = vpop.permute.xlu0 %3413 }
0x2c47   :  { %v3416_v27 = vunpack.i.h.bf16 %v3414_v30  ;;  %v3415_v56 = vunpack.i.l.bf16 %v3414_v30 }
0x2c49   :  { %v2767_v46 = vsel %vm110_vm1, %v3351_v52, %v3416_v27  ;;  %v2766_v33 = vsel %vm110_vm1, %v3350_v23, %v3415_v56 }
0x2c4a   :  { %v2974_v6 = vpack.c.bf16 %v2767_v46, %v2767_v46  ;;  %v2973_v50 = vpack.c.bf16 %v2766_v33, %v2766_v33  ;;  %v3419_v41 = vpop.permute.xlu0 %3418 }
0x2c4b   :  { %v3421_v1 = vunpack.i.h.bf16 %v3419_v41  ;;  %v3420_v61 = vunpack.i.l.bf16 %v3419_v41 }
0x2c4c   :  { %2848 = vst.msk [vmem:[%s4692_s4 + $0x4] sm:$0xf] %vm2846_vm2, %v2974_v6  ;;  %2847 = vst.msk [vmem:[%s4692_s4] sm:$0xf] %vm2846_vm2, %v2973_v50 }
0x2c4d   :  { %v2779_v32 = vsel %vm110_vm1, %v3381_v47, %v3421_v1  ;;  %v2778_v43 = vsel %vm110_vm1, %v3380_v5, %v3420_v61 }
0x2c4e   :  { %v2986_v60 = vpack.c.bf16 %v2779_v32, %v2779_v32  ;;  %v2985_v40 = vpack.c.bf16 %v2778_v43, %v2778_v43 }
0x2c50   :  { %2860 = vst.msk [vmem:[%s4692_s4 + $0x34] sm:$0xf] %vm2846_vm2, %v2986_v60  ;;  %2859 = vst.msk [vmem:[%s4692_s4 + $0x30] sm:$0xf] %vm2846_vm2, %v2985_v40 }

// kernel: lstm_cnn_forward.4
= control target key start
LH: loop header
LB: loop body
LE: loop exit
PB: predicated region body
PF: predicated region fallthrough
CT: control target
= control target key end

     0   :  { %v3744_v1 = vmov 0.0   ;;  %v3745_v2 = vmov 0   ;;  %vm3746_vm0 = vmmov 0   ;;  %vm134_vm1 = vcmask 523264   ;;  %s4748_s1 = inlined_call_operand.vmem [shape: bf16[64,256], index: 1, kind: input, shape index: {}]   ;;  %s4749_s2 = inlined_call_operand.vmem [shape: bf16[2,32,128], index: 2, kind: input, shape index: {}]   ;;  %s4750_s0 = inlined_call_operand.vmem [shape: bf16[128,64], index: 0, kind: input, shape index: {}]   ;;  %s4751_s3 = inlined_call_operand.vmem [shape: f32[1,256], index: 3, kind: input, shape index: {}]   ;;  %s4752_s4 = inlined_call_operand.vmem [shape: bf16[128,64], index: 4, kind: output, shape index: {}]  }
   0x1   :  { %v3456_v0 = vld [vmem:[%s4748_s1 + $0x4] ss:$8 sps:$4 sm:$0xff]   ;;  %3114 = vmatprep.subr.bf16.mxu1 %v3744_v1  ;;  %191 = vmatprep.mubr.bf16.mxu0 %v3745_v2  ;;  %v3458_v3 = vld [vmem:[%s4748_s1] ss:$8 sps:$4 sm:$0xff]   ;;  %v3459_v4 = vld [vmem:[%s4748_s1 + $0x14] ss:$8 sps:$4 sm:$0xff]   ;;  %v44_v22 = vlaneseq }
   0x2   :  { %3118 = vmatprep.mubr.msk.bf16.mxu1 %vm3746_vm0, %v3744_v1  ;;  %159 = vmatprep.subr.bf16.mxu0 %v3456_v0  ;;  %v3461_v5 = vld [vmem:[%s4748_s1 + $0x10] ss:$8 sps:$4 sm:$0xff]   ;;  %v3462_v6 = vld [vmem:[%s4748_s1 + $0x24] ss:$8 sps:$4 sm:$0xff]   ;;  %v3464_v8 = vld [vmem:[%s4748_s1 + $0x20] ss:$8 sps:$4 sm:$0xff]  }
   0x3   :  { %160 = vmatpush1.bf16.msra.mxu0 %v3458_v3  ;;  %v3797_v7 = vld [vmem:[%s4749_s2] sm:$0xff]   ;;  %v3807_v9 = vld [vmem:[%s4749_s2 + $0x8] sm:$0xff]   ;;  %v3466_v10 = vld [vmem:[%s4748_s1 + $0x34] ss:$8 sps:$4 sm:$0xff]   ;;  %v45_v23 = vshrl.u32 %v44_v22, 7  ;;  %vm327_vm2 = vcmask 261120  }
   0x4   :  { %161 = vmatprep.subr.bf16.mxu0 %v3459_v4  ;;  %3115 = vmatpush3.bf16.msra.mxu1 %v3797_v7  ;;  %v3468_v11 = vld [vmem:[%s4748_s1 + $0x30] ss:$8 sps:$4 sm:$0xff]   ;;  %v3470_v12 = vld [vmem:[%s4750_s0] sm:$0xff]   ;;  %v3471_v15 = vld [vmem:[%s4750_s0 + $0x8] sm:$0xff]   ;;  %vm2871_vm3 = vcmask 519168  }
   0x5   :  { %3116 = vmatprep.subr.bf16.mxu1 %v3744_v1  ;;  %v3826_v13 = vld [vmem:[%s4749_s2 + $0x10] sm:$0xff]   ;;  %v3833_v14 = vld [vmem:[%s4749_s2 + $0x18] sm:$0xff]   ;;  %v3474_v18 = vld [vmem:[%s4750_s0 + $0x20] sm:$0xff]   ;;  %v46_v24 = vsub.s32 0, %v45_v23  ;;  %v50_v26 = vsub.s32 1, %v45_v23 }
   0x6   :  { %v3472_v16 = vld [vmem:[%s4750_s0 + $0x10] sm:$0xff]   ;;  %v3473_v17 = vld [vmem:[%s4750_s0 + $0x18] sm:$0xff]   ;;  %v3475_v19 = vld [vmem:[%s4750_s0 + $0x28] sm:$0xff]  }
   0x7   :  { %162 = vmatpush1.bf16.msra.mxu0 %v3461_v5  ;;  %v3476_v20 = vld [vmem:[%s4750_s0 + $0x30] sm:$0xff]   ;;  %v3479_v21 = vld [vmem:[%s4750_s0 + $0x38] sm:$0xff]   ;;  %v42_v25 = vld [vmem:[%s4751_s3] sm:$0x3]  ;;  %s3747_s0 = smov 32   ;;  %s3748_s3 = smov 64  }
   0x8   :  { %163 = vmatprep.subr.bf16.mxu0 %v3462_v6  ;;  %3117 = vmatpush3.bf16.msra.mxu1 %v3807_v9  ;;  %v3890_v29 = vrot.slane %v42_v25, %v46_v24  ;;  %v3892_v31 = vrot.slane %v42_v25, %v50_v26 }
   0x9   :  { %3122 = vmatprep.subr.bf16.mxu1 %v3744_v1 }
   0xb   :  { %164 = vmatpush1.bf16.msra.mxu0 %v3464_v8  ;;  %3119 = vmatmul.mubr.bf16.vlgmr.msra.gmra.mrb[0].mxu1 %v3745_v2 }
   0xc   :  { %165 = vmatprep.subr.bf16.mxu0 %v3466_v10  ;;  %3126 = vmatprep.mubr.msk.bf16.mxu1 %vm3746_vm0, %v3744_v1 }
   0xd   :  { %3123 = vmatpush3.bf16.msra.mxu1 %v3826_v13 }
   0xe   :  { %3124 = vmatprep.subr.bf16.mxu1 %v3744_v1 }
   0xf   :  { %166 = vmatpush1.bf16.msra.mxu0 %v3468_v11 }
  0x10   :  { %3186 = vmatprep.subr.bf16.mxu0 %v3744_v1 }
  0x11   :  { %3125 = vmatpush3.bf16.msra.mxu1 %v3833_v14 }
  0x12   :  { %2908 = vmatmul.mubr.msk.bf16.vlgmr.msra.gmra.mrb[0].mxu0 %vm134_vm1, %v3470_v12  ;;  %3130 = vmatprep.subr.bf16.mxu1 %v3744_v1 }
  0x13   :  { %201 = vmatprep.mubr.bf16.mxu0 %v3745_v2  ;;  %3187 = vmatpush3.bf16.msra.mxu0 %v3826_v13 }
  0x14   :  { %3188 = vmatprep.subr.bf16.mxu0 %v3744_v1  ;;  %3127 = vmatmul.mubr.bf16.vlgmr.msra.gmra.mrb[4].mxu1 %v3745_v2 }
  0x15   :  { %3131 = vmatpush3.bf16.msra.mxu1 %v3797_v7  ;;  %3134 = vmatprep.mubr.msk.bf16.mxu1 %vm3746_vm0, %v3744_v1 }
  0x16   :  { %3132 = vmatprep.subr.bf16.mxu1 %v3744_v1 }
  0x17   :  { %3189 = vmatpush3.bf16.msra.mxu0 %v3833_v14 }
  0x18   :  { %3202 = vmatprep.subr.bf16.mxu0 %v3744_v1 }
  0x19   :  { %3133 = vmatpush3.bf16.msra.mxu1 %v3807_v9 }
  0x1a   :  { %2909 = vmatmul.mubr.msk.bf16.gmra.mrb[4].mxu0 %vm134_vm1, %v3471_v15  ;;  %3138 = vmatprep.subr.bf16.mxu1 %v3744_v1 }
  0x1b   :  { %211 = vmatprep.mubr.bf16.mxu0 %v3745_v2 }
  0x22   :  { %2910 = vmatmul.mubr.msk.bf16.gmra.mrb[8].mxu0 %vm134_vm1, %v3472_v16 }
  0x23   :  { %221 = vmatprep.mubr.bf16.mxu0 %v3745_v2 }
  0x2a   :  { %2911 = vmatmul.mubr.msk.bf16.gmra.mrb[12].mxu0 %vm134_vm1, %v3473_v17 }
  0x2b   :  { %231 = vmatprep.mubr.bf16.mxu0 %v3745_v2 }
  0x32   :  { %2912 = vmatmul.mubr.msk.bf16.gmra.mrb[16].mxu0 %vm134_vm1, %v3474_v18 }
  0x33   :  { %241 = vmatprep.mubr.bf16.mxu0 %v3745_v2 }
  0x3a   :  { %2913 = vmatmul.mubr.msk.bf16.gmra.mrb[20].mxu0 %vm134_vm1, %v3475_v19 }
  0x3b   :  { %251 = vmatprep.mubr.bf16.mxu0 %v3745_v2 }
  0x42   :  { %2914 = vmatmul.mubr.msk.bf16.gmra.mrb[24].mxu0 %vm134_vm1, %v3476_v20 }
  0x43   :  { %261 = vmatprep.mubr.bf16.mxu0 %v3745_v2 }
  0x4a   :  { %2915 = vmatmul.mubr.msk.bf16.gmra.mrb[28].mxu0 %vm134_vm1, %v3479_v21 }
  0x4b   :  { %3190 = vmatprep.mubr.msk.bf16.mxu0 %vm3746_vm0, %v3744_v1 }
  0xde   :  { %v365_v27 = vpop.f32.mrb[0].mxu1 }
  0xdf   :  { %v3120_v28 = vpop.f32.mrb[1].mxu1 }
  0xe0   :  { %v368_v30 = vpop.f32.mrb[2].mxu1 }
  0xe1   :  { %v3121_v32 = vpop.f32.mrb[3].mxu1 }
  0xe5   :  { %v193_v33 = vpop.f32.mrb[0].mxu0 }
  0xe6   :  { %v194_v34 = vadd.f32 %v193_v33, %v3890_v29  ;;  %v195_v35 = vpop.f32.mrb[1].mxu0 }
  0xe7   :  { %v3896_v36 = vadd.f32 %v195_v35, %v3892_v31  ;;  %v197_v37 = vpop.f32.mrb[2].mxu0  ;;  %v3907_v42 = vpop.f32.mrb[4].mxu1 }
  0xe8   :  { %v3899_v38 = vadd.f32 %v197_v37, %v3890_v29  ;;  %v3901_v39 = vadd.f32 %v365_v27, %v194_v34  ;;  %v199_v40 = vpop.f32.mrb[3].mxu0  ;;  %v3128_v43 = vpop.f32.mrb[5].mxu1 }
  0xe9   :  { %v3904_v41 = vadd.f32 %v199_v40, %v3892_v31  ;;  %v420_v45 = vpop.f32.mrb[6].mxu1 }
  0xea   :  { %3480 = vtanh.f32 %v3901_v39  ;;  %v3129_v48 = vpop.f32.mrb[7].mxu1 }
  0xed   :  { %v203_v44 = vpop.f32.mrb[4].mxu0 }
  0xee   :  { %v3910_v46 = vadd.f32 %v203_v44, %v3890_v29  ;;  %v205_v47 = vpop.f32.mrb[5].mxu0 }
  0xef   :  { %v3913_v49 = vadd.f32 %v205_v47, %v3892_v31  ;;  %v207_v50 = vpop.f32.mrb[6].mxu0 }
  0xf0   :  { %v3916_v51 = vadd.f32 %v207_v50, %v3890_v29  ;;  %v209_v52 = vpop.f32.mrb[7].mxu0 }
  0xf1   :  { %v3919_v53 = vadd.f32 %v209_v52, %v3892_v31 }
  0xf4   :  { %v3481_v54 = vpop.eup %3480 }
  0xf5   :  { %v213_v55 = vpop.f32.mrb[8].mxu0  ;;  %433 = vrot.lane.b32.xlu0 %v3481_v54, %s3747_s0 }
  0xf6   :  { %v3923_v56 = vadd.f32 %v213_v55, %v3890_v29  ;;  %v215_v57 = vpop.f32.mrb[9].mxu0 }
  0xf7   :  { %v3926_v58 = vadd.f32 %v215_v57, %v3892_v31  ;;  %v217_v59 = vpop.f32.mrb[10].mxu0 }
  0xf8   :  { %v3929_v60 = vadd.f32 %v217_v59, %v3890_v29  ;;  %v219_v61 = vpop.f32.mrb[11].mxu0  ;;  %v2924_v59 = vmul.f32 -1.442695, %v3901_v39 }
  0xf9   :  { %v3932_v62 = vadd.f32 %v219_v61, %v3892_v31 }
  0xfd   :  { %v223_v63 = vpop.f32.mrb[12].mxu0 }
  0xfe   :  { %v3935_v0 = vadd.f32 %v223_v63, %v3890_v29  ;;  %v225_v2 = vpop.f32.mrb[13].mxu0 }
  0xff   :  { %v3938_v3 = vadd.f32 %v225_v2, %v3892_v31  ;;  %v227_v4 = vpop.f32.mrb[14].mxu0 }
 0x100   :  { %v3941_v5 = vadd.f32 %v227_v4, %v3890_v29  ;;  %v229_v6 = vpop.f32.mrb[15].mxu0 }
 0x101   :  { %v3944_v8 = vadd.f32 %v229_v6, %v3892_v31 }
 0x105   :  { %v233_v10 = vpop.f32.mrb[16].mxu0 }
 0x106   :  { %v3947_v11 = vadd.f32 %v233_v10, %v3890_v29  ;;  %v235_v12 = vpop.f32.mrb[17].mxu0 }
 0x107   :  { %v3950_v15 = vadd.f32 %v235_v12, %v3892_v31  ;;  %v237_v16 = vpop.f32.mrb[18].mxu0 }
 0x108   :  { %v3953_v17 = vadd.f32 %v237_v16, %v3890_v29  ;;  %v239_v18 = vpop.f32.mrb[19].mxu0 }
 0x109   :  { %v3956_v19 = vadd.f32 %v239_v18, %v3892_v31 }
 0x10d   :  { %v243_v20 = vpop.f32.mrb[20].mxu0 }
 0x10e   :  { %v3959_v21 = vadd.f32 %v243_v20, %v3890_v29  ;;  %v245_v22 = vpop.f32.mrb[21].mxu0 }
 0x10f   :  { %v3962_v23 = vadd.f32 %v245_v22, %v3892_v31  ;;  %v247_v24 = vpop.f32.mrb[22].mxu0 }
 0x110   :  { %v3965_v25 = vadd.f32 %v247_v24, %v3890_v29  ;;  %v249_v26 = vpop.f32.mrb[23].mxu0 }
 0x111   :  { %v3968_v27 = vadd.f32 %v249_v26, %v3892_v31 }
 0x115   :  { %v253_v28 = vpop.f32.mrb[24].mxu0 }
 0x116   :  { %v3971_v30 = vadd.f32 %v253_v28, %v3890_v29  ;;  %v255_v32 = vpop.f32.mrb[25].mxu0 }
 0x117   :  { %v3974_v33 = vadd.f32 %v255_v32, %v3892_v31  ;;  %v257_v34 = vpop.f32.mrb[26].mxu0 }
 0x118   :  { %v3977_v35 = vadd.f32 %v257_v34, %v3890_v29  ;;  %v259_v37 = vpop.f32.mrb[27].mxu0 }
 0x119   :  { %v3980_v40 = vadd.f32 %v259_v37, %v3892_v31 }
 0x11d   :  { %v263_v43 = vpop.f32.mrb[28].mxu0 }
 0x11e   :  { %v3983_v44 = vadd.f32 %v263_v43, %v3890_v29  ;;  %v265_v45 = vpop.f32.mrb[29].mxu0 }
 0x11f   :  { %v3986_v47 = vadd.f32 %v265_v45, %v3892_v31  ;;  %v267_v48 = vpop.f32.mrb[30].mxu0 }
 0x120   :  { %v3989_v50 = vadd.f32 %v267_v48, %v3890_v29  ;;  %v269_v52 = vpop.f32.mrb[31].mxu0 }
 0x121   :  { %v270_v54 = vadd.f32 %v269_v52, %v3892_v31 }
 0x123   :  { %v448_v55 = vadd.f32 %v3907_v42, %v270_v54 }
 0x125   :  { %3482 = vtanh.f32 %v448_v55  ;;  %v2925_v29 = vmul.f32 -1.442695, %v448_v55 }
 0x126   :  { %3484 = vpow2.f32 %v2924_v59 }
 0x12f   :  { %v3483_v57 = vpop.eup %3482 }
 0x130   :  { %458 = vrot.lane.b32.xlu0 %v3483_v57, %s3747_s0  ;;  %v3485_v61 = vpop.eup %3484 }
 0x131   :  { %v427_v63 = vadd.f32 1.0, %v3485_v61 }
 0x133   :  { %3486 = vrcp.f32 %v427_v63 }
 0x134   :  { %3488 = vpow2.f32 %v2925_v29 }
 0x13d   :  { %v3487_v2 = vpop.eup %3486 }
 0x13e   :  { %v3489_v31 = vpop.eup %3488  ;;  %v431_v39 = vmul.f32 0.0, %v3487_v2 }
 0x13f   :  { %v452_v10 = vadd.f32 1.0, %v3489_v31 }
 0x141   :  { %3490 = vrcp.f32 %v452_v10 }
 0x14b   :  { %v3491_v42 = vpop.eup %3490 }
 0x14c   :  { %v456_v24 = vmul.f32 0.0, %v3491_v42 }
 0x167   :  { %v434_v4 = vpop.permute.xlu0 %433 }
 0x168   :  { %v436_v6 = vmul.f32 %v3487_v2, %v434_v4 }
 0x16a   :  { %438 = vrot.lane.b32.xlu1 %v436_v6, %s3747_s0 }
 0x1a2   :  { %v459_v12 = vpop.permute.xlu0 %458 }
 0x1a3   :  { %v461_v16 = vmul.f32 %v3491_v42, %v459_v12 }
 0x1a5   :  { %463 = vrot.lane.b32.xlu1 %v461_v16, %s3747_s0 }
 0x1dc   :  { %v439_v18 = vpop.permute.xlu1 %438 }
 0x1dd   :  { %v3997_v20 = vadd.f32 %v439_v18, %v431_v39 }
 0x1df   :  { %3492 = vtanh.f32 %v3997_v20 }
 0x1e9   :  { %v3493_v22 = vpop.eup %3492 }
 0x1ea   :  { %444 = vrot.lane.b32.xlu0 %v3493_v22, %s3747_s0 }
 0x217   :  { %v464_v26 = vpop.permute.xlu1 %463 }
 0x218   :  { %v4001_v28 = vadd.f32 %v464_v26, %v456_v24 }
 0x21a   :  { %3494 = vtanh.f32 %v4001_v28 }
 0x224   :  { %v3495_v32 = vpop.eup %3494 }
 0x225   :  { %469 = vrot.lane.b32.xlu1 %v3495_v32, %s3747_s0 }
 0x25c   :  { %v445_v34 = vpop.permute.xlu0 %444 }
 0x25d   :  { %v4005_v37 = vmul.f32 %v3487_v2, %v445_v34 }
 0x25f   :  { %v475_v43 = vpack.c.bf16 %v4005_v37, %v4005_v37 }
 0x261   :  { %477 = vrot.lane.b32.xlu0 %v475_v43, %s3748_s3 }
 0x297   :  { %v470_v45 = vpop.permute.xlu1 %469 }
 0x298   :  { %v4010_v48 = vmul.f32 %v3491_v42, %v470_v45 }
 0x29a   :  { %v522_v52 = vpack.c.bf16 %v4010_v48, %v4010_v48 }
 0x29c   :  { %524 = vrot.lane.b32.xlu1 %v522_v52, %s3748_s3 }
 0x2d3   :  { %v478_v54 = vpop.permute.xlu0 %477 }
 0x2d4   :  { %3135 = vmatmul.mubr.msk.bf16.vlgmr.msra.gmra.mrb[8].mxu1 %vm327_vm2, %v478_v54 }
 0x2d5   :  { %3139 = vmatpush3.bf16.msra.mxu1 %v3826_v13  ;;  %3142 = vmatprep.mubr.msk.bf16.mxu1 %vm3746_vm0, %v3744_v1 }
 0x2d6   :  { %3140 = vmatprep.subr.bf16.mxu1 %v3744_v1 }
 0x2d9   :  { %3141 = vmatpush3.bf16.msra.mxu1 %v3833_v14 }
 0x2da   :  { %3146 = vmatprep.subr.bf16.mxu1 %v3744_v1 }
 0x30e   :  { %v525_v55 = vpop.permute.xlu1 %524 }
 0x30f   :  { %3143 = vmatmul.mubr.msk.bf16.vlgmr.msra.gmra.mrb[12].mxu1 %vm327_vm2, %v525_v55 }
 0x310   :  { %3147 = vmatpush3.bf16.msra.mxu1 %v3797_v7  ;;  %3150 = vmatprep.mubr.msk.bf16.mxu1 %vm3746_vm0, %v3744_v1 }
 0x311   :  { %3148 = vmatprep.subr.bf16.mxu1 %v3744_v1 }
 0x314   :  { %3149 = vmatpush3.bf16.msra.mxu1 %v3807_v9 }
 0x315   :  { %3154 = vmatprep.subr.bf16.mxu1 %v3744_v1 }
 0x3a7   :  { %v516_v57 = vpop.f32.mrb[8].mxu1 }
 0x3a8   :  { %v569_v59 = vadd.f32 %v516_v57, %v3899_v38  ;;  %v3136_v61 = vpop.f32.mrb[9].mxu1 }
 0x3a9   :  { %v519_v63 = vpop.f32.mrb[10].mxu1 }
 0x3aa   :  { %3496 = vtanh.f32 %v569_v59  ;;  %v3137_v2 = vpop.f32.mrb[11].mxu1  ;;  %v2928_v16 = vmul.f32 -1.442695, %v569_v59 }
 0x3b4   :  { %v3497_v4 = vpop.eup %3496 }
 0x3b5   :  { %579 = vrot.lane.b32.xlu0 %v3497_v4, %s3747_s0 }
 0x3e2   :  { %v563_v6 = vpop.f32.mrb[12].mxu1 }
 0x3e3   :  { %v594_v29 = vadd.f32 %v563_v6, %v3986_v47  ;;  %v3144_v31 = vpop.f32.mrb[13].mxu1 }
 0x3e4   :  { %v566_v10 = vpop.f32.mrb[14].mxu1 }
 0x3e5   :  { %3498 = vtanh.f32 %v594_v29  ;;  %v3145_v42 = vpop.f32.mrb[15].mxu1  ;;  %v2929_v26 = vmul.f32 -1.442695, %v594_v29 }
 0x3e6   :  { %3500 = vpow2.f32 %v2928_v16 }
 0x3ef   :  { %v3499_v12 = vpop.eup %3498 }
 0x3f0   :  { %604 = vrot.lane.b32.xlu1 %v3499_v12, %s3747_s0  ;;  %v3501_v38 = vpop.eup %3500 }
 0x3f1   :  { %v573_v39 = vadd.f32 1.0, %v3501_v38 }
 0x3f3   :  { %3502 = vrcp.f32 %v573_v39 }
 0x3f4   :  { %3504 = vpow2.f32 %v2929_v26 }
 0x3fd   :  { %v3503_v18 = vpop.eup %3502 }
 0x3fe   :  { %v3505_v47 = vpop.eup %3504  ;;  %v577_v52 = vmul.f32 %v3503_v18, %v3997_v20 }
 0x3ff   :  { %v598_v32 = vadd.f32 1.0, %v3505_v47 }
 0x401   :  { %3506 = vrcp.f32 %v598_v32 }
 0x40b   :  { %v3507_v34 = vpop.eup %3506 }
 0x40c   :  { %v602_v59 = vmul.f32 %v3507_v34, %v4001_v28 }
 0x427   :  { %v580_v22 = vpop.permute.xlu0 %579 }
 0x428   :  { %v582_v24 = vmul.f32 %v3503_v18, %v580_v22 }
 0x42a   :  { %584 = vrot.lane.b32.xlu0 %v582_v24, %s3747_s0 }
 0x462   :  { %v605_v43 = vpop.permute.xlu1 %604 }
 0x463   :  { %v607_v45 = vmul.f32 %v3507_v34, %v605_v43 }
 0x465   :  { %609 = vrot.lane.b32.xlu1 %v607_v45, %s3747_s0 }
 0x49c   :  { %v585_v54 = vpop.permute.xlu0 %584 }
 0x49d   :  { %v4036_v55 = vadd.f32 %v585_v54, %v577_v52 }
 0x49f   :  { %3508 = vtanh.f32 %v4036_v55 }
 0x4a9   :  { %v3509_v57 = vpop.eup %3508 }
 0x4aa   :  { %590 = vrot.lane.b32.xlu0 %v3509_v57, %s3747_s0 }
 0x4d7   :  { %v610_v61 = vpop.permute.xlu1 %609 }
 0x4d8   :  { %v4041_v63 = vadd.f32 %v610_v61, %v602_v59 }
 0x4da   :  { %3510 = vtanh.f32 %v4041_v63 }
 0x4e4   :  { %v3511_v2 = vpop.eup %3510 }
 0x4e5   :  { %615 = vrot.lane.b32.xlu1 %v3511_v2, %s3747_s0 }
 0x51c   :  { %v591_v4 = vpop.permute.xlu0 %590 }
 0x51d   :  { %v4045_v20 = vmul.f32 %v3503_v18, %v591_v4 }
 0x51f   :  { %v621_v6 = vpack.c.bf16 %v4045_v20, %v4045_v20 }
 0x521   :  { %623 = vrot.lane.b32.xlu0 %v621_v6, %s3748_s3 }
 0x557   :  { %v616_v29 = vpop.permute.xlu1 %615 }
 0x558   :  { %v4050_v31 = vmul.f32 %v3507_v34, %v616_v29 }
 0x55a   :  { %v668_v28 = vpack.c.bf16 %v4050_v31, %v4050_v31 }
 0x55c   :  { %670 = vrot.lane.b32.xlu1 %v668_v28, %s3748_s3 }
 0x593   :  { %v624_v10 = vpop.permute.xlu0 %623 }
 0x594   :  { %3151 = vmatmul.mubr.msk.bf16.vlgmr.msra.gmra.mrb[16].mxu1 %vm327_vm2, %v624_v10 }
 0x595   :  { %3155 = vmatpush3.bf16.msra.mxu1 %v3826_v13  ;;  %3158 = vmatprep.mubr.msk.bf16.mxu1 %vm3746_vm0, %v3744_v1 }
 0x596   :  { %3156 = vmatprep.subr.bf16.mxu1 %v3744_v1 }
 0x599   :  { %3157 = vmatpush3.bf16.msra.mxu1 %v3833_v14 }
 0x59a   :  { %3162 = vmatprep.subr.bf16.mxu1 %v3744_v1 }
 0x5ce   :  { %v671_v42 = vpop.permute.xlu1 %670 }
 0x5cf   :  { %3159 = vmatmul.mubr.msk.bf16.vlgmr.msra.gmra.mrb[20].mxu1 %vm327_vm2, %v671_v42 }
 0x5d0   :  { %3163 = vmatpush3.bf16.msra.mxu1 %v3797_v7  ;;  %3166 = vmatprep.mubr.msk.bf16.mxu1 %vm3746_vm0, %v3744_v1 }
 0x5d1   :  { %3164 = vmatprep.subr.bf16.mxu1 %v3744_v1 }
 0x5d4   :  { %3165 = vmatpush3.bf16.msra.mxu1 %v3807_v9 }
 0x5d5   :  { %3170 = vmatprep.subr.bf16.mxu1 %v3744_v1 }
 0x667   :  { %v662_v12 = vpop.f32.mrb[16].mxu1 }
 0x668   :  { %v715_v16 = vadd.f32 %v662_v12, %v3910_v46  ;;  %v3152_v38 = vpop.f32.mrb[17].mxu1 }
 0x669   :  { %v665_v39 = vpop.f32.mrb[18].mxu1 }
 0x66a   :  { %3512 = vtanh.f32 %v715_v16  ;;  %v3153_v18 = vpop.f32.mrb[19].mxu1  ;;  %v2932_v45 = vmul.f32 -1.442695, %v715_v16 }
 0x674   :  { %v3513_v22 = vpop.eup %3512 }
 0x675   :  { %725 = vrot.lane.b32.xlu0 %v3513_v22, %s3747_s0 }
 0x6a2   :  { %v709_v24 = vpop.f32.mrb[20].mxu1 }
 0x6a3   :  { %v740_v26 = vadd.f32 %v709_v24, %v3980_v40  ;;  %v3160_v47 = vpop.f32.mrb[21].mxu1 }
 0x6a4   :  { %v712_v32 = vpop.f32.mrb[22].mxu1 }
 0x6a5   :  { %3514 = vtanh.f32 %v740_v26  ;;  %v3161_v34 = vpop.f32.mrb[23].mxu1  ;;  %v2933_v61 = vmul.f32 -1.442695, %v740_v26 }
 0x6a6   :  { %3516 = vpow2.f32 %v2932_v45 }
 0x6af   :  { %v3515_v43 = vpop.eup %3514 }
 0x6b0   :  { %750 = vrot.lane.b32.xlu1 %v3515_v43, %s3747_s0  ;;  %v3517_v46 = vpop.eup %3516 }
 0x6b1   :  { %v719_v52 = vadd.f32 1.0, %v3517_v46 }
 0x6b3   :  { %3518 = vrcp.f32 %v719_v52 }
 0x6b4   :  { %3520 = vpow2.f32 %v2933_v61 }
 0x6bd   :  { %v3519_v54 = vpop.eup %3518 }
 0x6be   :  { %v3521_v40 = vpop.eup %3520  ;;  %v723_v28 = vmul.f32 %v3519_v54, %v4036_v55 }
 0x6bf   :  { %v744_v2 = vadd.f32 1.0, %v3521_v40 }
 0x6c1   :  { %3522 = vrcp.f32 %v744_v2 }
 0x6cb   :  { %v3523_v4 = vpop.eup %3522 }
 0x6cc   :  { %v748_v16 = vmul.f32 %v3523_v4, %v4041_v63 }
 0x6e7   :  { %v726_v57 = vpop.permute.xlu0 %725 }
 0x6e8   :  { %v728_v59 = vmul.f32 %v3519_v54, %v726_v57 }
 0x6ea   :  { %730 = vrot.lane.b32.xlu0 %v728_v59, %s3747_s0 }
 0x722   :  { %v751_v6 = vpop.permute.xlu1 %750 }
 0x723   :  { %v753_v29 = vmul.f32 %v3523_v4, %v751_v6 }
 0x725   :  { %755 = vrot.lane.b32.xlu1 %v753_v29, %s3747_s0 }
 0x75c   :  { %v731_v10 = vpop.permute.xlu0 %730 }
 0x75d   :  { %v4076_v42 = vadd.f32 %v731_v10, %v723_v28 }
 0x75f   :  { %3524 = vtanh.f32 %v4076_v42 }
 0x769   :  { %v3525_v12 = vpop.eup %3524 }
 0x76a   :  { %736 = vrot.lane.b32.xlu0 %v3525_v12, %s3747_s0 }
 0x797   :  { %v756_v38 = vpop.permute.xlu1 %755 }
 0x798   :  { %v4081_v39 = vadd.f32 %v756_v38, %v748_v16 }
 0x79a   :  { %3526 = vtanh.f32 %v4081_v39 }
 0x7a4   :  { %v3527_v18 = vpop.eup %3526 }
 0x7a5   :  { %761 = vrot.lane.b32.xlu1 %v3527_v18, %s3747_s0 }
 0x7dc   :  { %v737_v22 = vpop.permute.xlu0 %736 }
 0x7dd   :  { %v4085_v55 = vmul.f32 %v3519_v54, %v737_v22 }
 0x7df   :  { %v767_v24 = vpack.c.bf16 %v4085_v55, %v4085_v55 }
 0x7e1   :  { %769 = vrot.lane.b32.xlu0 %v767_v24, %s3748_s3 }
 0x817   :  { %v762_v26 = vpop.permute.xlu1 %761 }
 0x818   :  { %v4090_v47 = vmul.f32 %v3523_v4, %v762_v26 }
 0x81a   :  { %v814_v63 = vpack.c.bf16 %v4090_v47, %v4090_v47 }
 0x81c   :  { %816 = vrot.lane.b32.xlu1 %v814_v63, %s3748_s3 }
 0x853   :  { %v770_v32 = vpop.permute.xlu0 %769 }
 0x854   :  { %3167 = vmatmul.mubr.msk.bf16.vlgmr.msra.gmra.mrb[24].mxu1 %vm327_vm2, %v770_v32 }
 0x855   :  { %3171 = vmatpush3.bf16.msra.mxu1 %v3826_v13  ;;  %3174 = vmatprep.mubr.msk.bf16.mxu1 %vm3746_vm0, %v3744_v1 }
 0x856   :  { %3172 = vmatprep.subr.bf16.mxu1 %v3744_v1 }
 0x859   :  { %3173 = vmatpush3.bf16.msra.mxu1 %v3833_v14 }
 0x85a   :  { %3178 = vmatprep.subr.bf16.mxu1 %v3744_v1 }
 0x88e   :  { %v817_v34 = vpop.permute.xlu1 %816 }
 0x88f   :  { %3175 = vmatmul.mubr.msk.bf16.vlgmr.msra.gmra.mrb[28].mxu1 %vm327_vm2, %v817_v34 }
 0x890   :  { %3179 = vmatpush3.bf16.msra.mxu1 %v3797_v7  ;;  %3182 = vmatprep.mubr.msk.bf16.mxu1 %vm3746_vm0, %v3744_v1 }
 0x891   :  { %3180 = vmatprep.subr.bf16.mxu1 %v3744_v1 }
 0x894   :  { %3181 = vmatpush3.bf16.msra.mxu1 %v3807_v9 }
 0x895   :  { %3194 = vmatprep.subr.bf16.mxu1 %v3744_v1 }
 0x927   :  { %v808_v43 = vpop.f32.mrb[24].mxu1 }
 0x928   :  { %v861_v45 = vadd.f32 %v808_v43, %v3916_v51  ;;  %v3168_v46 = vpop.f32.mrb[25].mxu1 }
 0x929   :  { %v811_v52 = vpop.f32.mrb[26].mxu1 }
 0x92a   :  { %3528 = vtanh.f32 %v861_v45  ;;  %v3169_v54 = vpop.f32.mrb[27].mxu1  ;;  %v2936_v29 = vmul.f32 -1.442695, %v861_v45 }
 0x934   :  { %v3529_v57 = vpop.eup %3528 }
 0x935   :  { %871 = vrot.lane.b32.xlu0 %v3529_v57, %s3747_s0 }
 0x962   :  { %v855_v59 = vpop.f32.mrb[28].mxu1 }
 0x963   :  { %v886_v61 = vadd.f32 %v855_v59, %v3974_v33  ;;  %v3176_v40 = vpop.f32.mrb[29].mxu1 }
 0x964   :  { %v858_v2 = vpop.f32.mrb[30].mxu1 }
 0x965   :  { %3530 = vtanh.f32 %v886_v61  ;;  %v3177_v4 = vpop.f32.mrb[31].mxu1  ;;  %v2937_v38 = vmul.f32 -1.442695, %v886_v61 }
 0x966   :  { %3532 = vpow2.f32 %v2936_v29 }
 0x96f   :  { %v3531_v6 = vpop.eup %3530 }
 0x970   :  { %896 = vrot.lane.b32.xlu1 %v3531_v6, %s3747_s0  ;;  %v3533_v51 = vpop.eup %3532 }
 0x971   :  { %v865_v28 = vadd.f32 1.0, %v3533_v51 }
 0x973   :  { %3534 = vrcp.f32 %v865_v28 }
 0x974   :  { %3536 = vpow2.f32 %v2937_v38 }
 0x97d   :  { %v3535_v10 = vpop.eup %3534 }
 0x97e   :  { %v3537_v33 = vpop.eup %3536  ;;  %v869_v63 = vmul.f32 %v3535_v10, %v4076_v42 }
 0x97f   :  { %v890_v18 = vadd.f32 1.0, %v3537_v33 }
 0x981   :  { %3538 = vrcp.f32 %v890_v18 }
 0x98b   :  { %v3539_v22 = vpop.eup %3538 }
 0x98c   :  { %v894_v45 = vmul.f32 %v3539_v22, %v4081_v39 }
 0x9a7   :  { %v872_v12 = vpop.permute.xlu0 %871 }
 0x9a8   :  { %v874_v16 = vmul.f32 %v3535_v10, %v872_v12 }
 0x9aa   :  { %876 = vrot.lane.b32.xlu0 %v874_v16, %s3747_s0 }
 0x9e2   :  { %v897_v24 = vpop.permute.xlu1 %896 }
 0x9e3   :  { %v899_v26 = vmul.f32 %v3539_v22, %v897_v24 }
 0x9e5   :  { %901 = vrot.lane.b32.xlu1 %v899_v26, %s3747_s0 }
 0xa1c   :  { %v877_v32 = vpop.permute.xlu0 %876 }
 0xa1d   :  { %v4116_v34 = vadd.f32 %v877_v32, %v869_v63 }
 0xa1f   :  { %3540 = vtanh.f32 %v4116_v34 }
 0xa29   :  { %v3541_v43 = vpop.eup %3540 }
 0xa2a   :  { %882 = vrot.lane.b32.xlu0 %v3541_v43, %s3747_s0 }
 0xa57   :  { %v902_v46 = vpop.permute.xlu1 %901 }
 0xa58   :  { %v4121_v52 = vadd.f32 %v902_v46, %v894_v45 }
 0xa5a   :  { %3542 = vtanh.f32 %v4121_v52 }
 0xa64   :  { %v3543_v54 = vpop.eup %3542 }
 0xa65   :  { %907 = vrot.lane.b32.xlu1 %v3543_v54, %s3747_s0 }
 0xa9c   :  { %v883_v57 = vpop.permute.xlu0 %882 }
 0xa9d   :  { %v4125_v42 = vmul.f32 %v3535_v10, %v883_v57 }
 0xa9f   :  { %v913_v59 = vpack.c.bf16 %v4125_v42, %v4125_v42 }
 0xaa1   :  { %915 = vrot.lane.b32.xlu0 %v913_v59, %s3748_s3 }
 0xad7   :  { %v908_v61 = vpop.permute.xlu1 %907 }
 0xad8   :  { %v4130_v40 = vmul.f32 %v3539_v22, %v908_v61 }
 0xada   :  { %v960_v39 = vpack.c.bf16 %v4130_v40, %v4130_v40 }
 0xadc   :  { %962 = vrot.lane.b32.xlu1 %v960_v39, %s3748_s3 }
 0xb13   :  { %v916_v2 = vpop.permute.xlu0 %915 }
 0xb14   :  { %3183 = vmatmul.mubr.msk.bf16.vlgmr.msra.gmra.mrb[32].mxu1 %vm327_vm2, %v916_v2 }
 0xb15   :  { %3195 = vmatpush3.bf16.msra.mxu1 %v3797_v7  ;;  %3198 = vmatprep.mubr.msk.bf16.mxu1 %vm3746_vm0, %v3744_v1 }
 0xb16   :  { %3196 = vmatprep.subr.bf16.mxu1 %v3744_v1 }
 0xb19   :  { %3197 = vmatpush3.bf16.msra.mxu1 %v3807_v9 }
 0xb1a   :  { %3210 = vmatprep.subr.bf16.mxu1 %v3744_v1 }
 0xb4e   :  { %v963_v4 = vpop.permute.xlu1 %962 }
 0xb4f   :  { %3191 = vmatmul.mubr.msk.bf16.vlgmr.msra.gmra.mrb[32].mxu0 %vm327_vm2, %v963_v4 }
 0xb50   :  { %3203 = vmatpush3.bf16.msra.mxu0 %v3826_v13  ;;  %3206 = vmatprep.mubr.msk.bf16.mxu0 %vm3746_vm0, %v3744_v1 }
 0xb51   :  { %3204 = vmatprep.subr.bf16.mxu0 %v3744_v1 }
 0xb54   :  { %3205 = vmatpush3.bf16.msra.mxu0 %v3833_v14 }
 0xb55   :  { %3218 = vmatprep.subr.bf16.mxu0 %v3744_v1 }
 0xbe7   :  { %v954_v6 = vpop.f32.mrb[32].mxu1 }
 0xbe8   :  { %v1007_v29 = vadd.f32 %v954_v6, %v3923_v56  ;;  %v3184_v51 = vpop.f32.mrb[33].mxu1 }
 0xbe9   :  { %v957_v28 = vpop.f32.mrb[34].mxu1 }
 0xbea   :  { %3544 = vtanh.f32 %v1007_v29  ;;  %v3185_v10 = vpop.f32.mrb[35].mxu1  ;;  %v2940_v26 = vmul.f32 -1.442695, %v1007_v29 }
 0xbf4   :  { %v3545_v12 = vpop.eup %3544 }
 0xbf5   :  { %1017 = vrot.lane.b32.xlu0 %v3545_v12, %s3747_s0 }
 0xc22   :  { %v1001_v16 = vpop.f32.mrb[32].mxu0 }
 0xc23   :  { %v1032_v38 = vadd.f32 %v1001_v16, %v3968_v27  ;;  %v3192_v33 = vpop.f32.mrb[33].mxu0 }
 0xc24   :  { %v1004_v18 = vpop.f32.mrb[34].mxu0 }
 0xc25   :  { %3546 = vtanh.f32 %v1032_v38  ;;  %v3193_v22 = vpop.f32.mrb[35].mxu0  ;;  %v2941_v46 = vmul.f32 -1.442695, %v1032_v38 }
 0xc26   :  { %3548 = vpow2.f32 %v2940_v26 }
 0xc2f   :  { %v3547_v24 = vpop.eup %3546 }
 0xc30   :  { %1042 = vrot.lane.b32.xlu1 %v3547_v24, %s3747_s0  ;;  %v3549_v56 = vpop.eup %3548 }
 0xc31   :  { %v1011_v63 = vadd.f32 1.0, %v3549_v56 }
 0xc33   :  { %3550 = vrcp.f32 %v1011_v63 }
 0xc34   :  { %3552 = vpow2.f32 %v2941_v46 }
 0xc3d   :  { %v3551_v32 = vpop.eup %3550 }
 0xc3e   :  { %v3553_v27 = vpop.eup %3552  ;;  %v1015_v39 = vmul.f32 %v3551_v32, %v4116_v34 }
 0xc3f   :  { %v1036_v54 = vadd.f32 1.0, %v3553_v27 }
 0xc41   :  { %3554 = vrcp.f32 %v1036_v54 }
 0xc4b   :  { %v3555_v57 = vpop.eup %3554 }
 0xc4c   :  { %v1040_v29 = vmul.f32 %v3555_v57, %v4121_v52 }
 0xc67   :  { %v1018_v43 = vpop.permute.xlu0 %1017 }
 0xc68   :  { %v1020_v45 = vmul.f32 %v3551_v32, %v1018_v43 }
 0xc6a   :  { %1022 = vrot.lane.b32.xlu0 %v1020_v45, %s3747_s0 }
 0xca2   :  { %v1043_v59 = vpop.permute.xlu1 %1042 }
 0xca3   :  { %v1045_v61 = vmul.f32 %v3555_v57, %v1043_v59 }
 0xca5   :  { %1047 = vrot.lane.b32.xlu1 %v1045_v61, %s3747_s0 }
 0xcdc   :  { %v1023_v2 = vpop.permute.xlu0 %1022 }
 0xcdd   :  { %v4156_v4 = vadd.f32 %v1023_v2, %v1015_v39 }
 0xcdf   :  { %3556 = vtanh.f32 %v4156_v4 }
 0xce9   :  { %v3557_v6 = vpop.eup %3556 }
 0xcea   :  { %1028 = vrot.lane.b32.xlu0 %v3557_v6, %s3747_s0 }
 0xd17   :  { %v1048_v51 = vpop.permute.xlu1 %1047 }
 0xd18   :  { %v4161_v28 = vadd.f32 %v1048_v51, %v1040_v29 }
 0xd1a   :  { %3558 = vtanh.f32 %v4161_v28 }
 0xd24   :  { %v3559_v10 = vpop.eup %3558 }
 0xd25   :  { %1053 = vrot.lane.b32.xlu1 %v3559_v10, %s3747_s0 }
 0xd5c   :  { %v1029_v12 = vpop.permute.xlu0 %1028 }
 0xd5d   :  { %v4165_v34 = vmul.f32 %v3551_v32, %v1029_v12 }
 0xd5f   :  { %v1059_v16 = vpack.c.bf16 %v4165_v34, %v4165_v34 }
 0xd61   :  { %1061 = vrot.lane.b32.xlu0 %v1059_v16, %s3748_s3 }
 0xd97   :  { %v1054_v38 = vpop.permute.xlu1 %1053 }
 0xd98   :  { %v4170_v33 = vmul.f32 %v3555_v57, %v1054_v38 }
 0xd9a   :  { %v1106_v52 = vpack.c.bf16 %v4170_v33, %v4170_v33 }
 0xd9c   :  { %1108 = vrot.lane.b32.xlu1 %v1106_v52, %s3748_s3 }
 0xdd3   :  { %v1062_v18 = vpop.permute.xlu0 %1061 }
 0xdd4   :  { %3199 = vmatmul.mubr.msk.bf16.vlgmr.msra.gmra.mrb[36].mxu1 %vm327_vm2, %v1062_v18 }
 0xdd5   :  { %3211 = vmatpush3.bf16.msra.mxu1 %v3797_v7  ;;  %3214 = vmatprep.mubr.msk.bf16.mxu1 %vm3746_vm0, %v3744_v1 }
 0xdd6   :  { %3212 = vmatprep.subr.bf16.mxu1 %v3744_v1 }
 0xdd9   :  { %3213 = vmatpush3.bf16.msra.mxu1 %v3807_v9 }
 0xdda   :  { %3226 = vmatprep.subr.bf16.mxu1 %v3744_v1 }
 0xe0e   :  { %v1109_v22 = vpop.permute.xlu1 %1108 }
 0xe0f   :  { %3207 = vmatmul.mubr.msk.bf16.vlgmr.msra.gmra.mrb[36].mxu0 %vm327_vm2, %v1109_v22 }
 0xe10   :  { %3219 = vmatpush3.bf16.msra.mxu0 %v3826_v13  ;;  %3222 = vmatprep.mubr.msk.bf16.mxu0 %vm3746_vm0, %v3744_v1 }
 0xe11   :  { %3220 = vmatprep.subr.bf16.mxu0 %v3744_v1 }
 0xe14   :  { %3221 = vmatpush3.bf16.msra.mxu0 %v3833_v14 }
 0xe15   :  { %3234 = vmatprep.subr.bf16.mxu0 %v3744_v1 }
 0xea7   :  { %v1100_v7 = vpop.f32.mrb[36].mxu1 }
 0xea8   :  { %v1153_v24 = vadd.f32 %v1100_v7, %v3929_v60  ;;  %v3200_v9 = vpop.f32.mrb[37].mxu1 }
 0xea9   :  { %v1103_v26 = vpop.f32.mrb[38].mxu1 }
 0xeaa   :  { %3560 = vtanh.f32 %v1153_v24  ;;  %v3201_v56 = vpop.f32.mrb[39].mxu1  ;;  %v2944_v27 = vmul.f32 -1.442695, %v1153_v24 }
 0xeb4   :  { %v3561_v63 = vpop.eup %3560 }
 0xeb5   :  { %1163 = vrot.lane.b32.xlu0 %v3561_v63, %s3747_s0 }
 0xee2   :  { %v1147_v13 = vpop.f32.mrb[36].mxu0 }
 0xee3   :  { %v1178_v32 = vadd.f32 %v1147_v13, %v3962_v23  ;;  %v3208_v43 = vpop.f32.mrb[37].mxu0  ;;  %v4219_v13 = vld [vmem:[%s4749_s2] sm:$0xff]  }
 0xee4   :  { %v1150_v45 = vpop.f32.mrb[38].mxu0 }
 0xee5   :  { %3562 = vtanh.f32 %v1178_v32  ;;  %v3209_v46 = vpop.f32.mrb[39].mxu0  ;;  %v2945_v39 = vmul.f32 -1.442695, %v1178_v32  ;;  %v4228_v32 = vld [vmem:[%s4749_s2 + $0x8] sm:$0xff]   ;;  %v4236_v45 = vld [vmem:[%s4749_s2 + $0x10] sm:$0xff]  }
 0xee6   :  { %3564 = vpow2.f32 %v2944_v27  ;;  %v4245_v46 = vld [vmem:[%s4749_s2 + $0x18] sm:$0xff]  }
 0xeef   :  { %v3563_v14 = vpop.eup %3562 }
 0xef0   :  { %1188 = vrot.lane.b32.xlu1 %v3563_v14, %s3747_s0  ;;  %v3565_v60 = vpop.eup %3564 }
 0xef1   :  { %v1157_v54 = vadd.f32 1.0, %v3565_v60 }
 0xef3   :  { %3566 = vrcp.f32 %v1157_v54 }
 0xef4   :  { %3568 = vpow2.f32 %v2945_v39 }
 0xefd   :  { %v3567_v57 = vpop.eup %3566 }
 0xefe   :  { %v3569_v23 = vpop.eup %3568  ;;  %v1161_v10 = vmul.f32 %v3567_v57, %v4156_v4 }
 0xeff   :  { %v1182_v2 = vadd.f32 1.0, %v3569_v23 }
 0xf01   :  { %3570 = vrcp.f32 %v1182_v2 }
 0xf0b   :  { %v3571_v6 = vpop.eup %3570 }
 0xf0c   :  { %v1186_v52 = vmul.f32 %v3571_v6, %v4161_v28 }
 0xf27   :  { %v1164_v59 = vpop.permute.xlu0 %1163 }
 0xf28   :  { %v1166_v61 = vmul.f32 %v3567_v57, %v1164_v59 }
 0xf2a   :  { %1168 = vrot.lane.b32.xlu0 %v1166_v61, %s3747_s0 }
 0xf62   :  { %v1189_v29 = vpop.permute.xlu1 %1188 }
 0xf63   :  { %v1191_v51 = vmul.f32 %v3571_v6, %v1189_v29 }
 0xf65   :  { %1193 = vrot.lane.b32.xlu1 %v1191_v51, %s3747_s0 }
 0xf9c   :  { %v1169_v12 = vpop.permute.xlu0 %1168 }
 0xf9d   :  { %v4196_v16 = vadd.f32 %v1169_v12, %v1161_v10 }
 0xf9f   :  { %3572 = vtanh.f32 %v4196_v16 }
 0xfa9   :  { %v3573_v38 = vpop.eup %3572 }
 0xfaa   :  { %1174 = vrot.lane.b32.xlu0 %v3573_v38, %s3747_s0 }
 0xfd7   :  { %v1194_v18 = vpop.permute.xlu1 %1193 }
 0xfd8   :  { %v4201_v22 = vadd.f32 %v1194_v18, %v1186_v52 }
 0xfda   :  { %3574 = vtanh.f32 %v4201_v22 }
 0xfe4   :  { %v3575_v7 = vpop.eup %3574 }
 0xfe5   :  { %1199 = vrot.lane.b32.xlu1 %v3575_v7, %s3747_s0 }
0x101c   :  { %v1175_v24 = vpop.permute.xlu0 %1174 }
0x101d   :  { %v4205_v4 = vmul.f32 %v3567_v57, %v1175_v24 }
0x101f   :  { %v1205_v9 = vpack.c.bf16 %v4205_v4, %v4205_v4 }
0x1021   :  { %1207 = vrot.lane.b32.xlu0 %v1205_v9, %s3748_s3 }
0x1057   :  { %v1200_v26 = vpop.permute.xlu1 %1199 }
0x1058   :  { %v4210_v56 = vmul.f32 %v3571_v6, %v1200_v26 }
0x105a   :  { %v1252_v28 = vpack.c.bf16 %v4210_v56, %v4210_v56 }
0x105c   :  { %1254 = vrot.lane.b32.xlu1 %v1252_v28, %s3748_s3 }
0x1093   :  { %v1208_v63 = vpop.permute.xlu0 %1207 }
0x1094   :  { %3215 = vmatmul.mubr.msk.bf16.vlgmr.msra.gmra.mrb[40].mxu1 %vm327_vm2, %v1208_v63 }
0x1095   :  { %3227 = vmatpush3.bf16.msra.mxu1 %v4219_v13  ;;  %3230 = vmatprep.mubr.msk.bf16.mxu1 %vm3746_vm0, %v3744_v1 }
0x1096   :  { %3228 = vmatprep.subr.bf16.mxu1 %v3744_v1 }
0x1099   :  { %3229 = vmatpush3.bf16.msra.mxu1 %v4228_v32 }
0x109a   :  { %3242 = vmatprep.subr.bf16.mxu1 %v3744_v1 }
0x10ce   :  { %v1255_v43 = vpop.permute.xlu1 %1254 }
0x10cf   :  { %3223 = vmatmul.mubr.msk.bf16.vlgmr.msra.gmra.mrb[40].mxu0 %vm327_vm2, %v1255_v43 }
0x10d0   :  { %3235 = vmatpush3.bf16.msra.mxu0 %v4236_v45  ;;  %3238 = vmatprep.mubr.msk.bf16.mxu0 %vm3746_vm0, %v3744_v1 }
0x10d1   :  { %3236 = vmatprep.subr.bf16.mxu0 %v3744_v1 }
0x10d4   :  { %3237 = vmatpush3.bf16.msra.mxu0 %v4245_v46 }
0x10d5   :  { %3250 = vmatprep.subr.bf16.mxu0 %v3744_v1 }
0x1167   :  { %v1246_v14 = vpop.f32.mrb[40].mxu1 }
0x1168   :  { %v1299_v27 = vadd.f32 %v1246_v14, %v3935_v0  ;;  %v3216_v60 = vpop.f32.mrb[41].mxu1 }
0x1169   :  { %v1249_v54 = vpop.f32.mrb[42].mxu1 }
0x116a   :  { %3576 = vtanh.f32 %v1299_v27  ;;  %v3217_v57 = vpop.f32.mrb[43].mxu1  ;;  %v2948_v51 = vmul.f32 -1.442695, %v1299_v27 }
0x1174   :  { %v3577_v59 = vpop.eup %3576 }
0x1175   :  { %1309 = vrot.lane.b32.xlu0 %v3577_v59, %s3747_s0 }
0x11a2   :  { %v1293_v61 = vpop.f32.mrb[40].mxu0 }
0x11a3   :  { %v1324_v39 = vadd.f32 %v1293_v61, %v3956_v19  ;;  %v3224_v23 = vpop.f32.mrb[41].mxu0 }
0x11a4   :  { %v1296_v2 = vpop.f32.mrb[42].mxu0 }
0x11a5   :  { %3578 = vtanh.f32 %v1324_v39  ;;  %v3225_v6 = vpop.f32.mrb[43].mxu0  ;;  %v2949_v18 = vmul.f32 -1.442695, %v1324_v39 }
0x11a6   :  { %3580 = vpow2.f32 %v2948_v51 }
0x11af   :  { %v3579_v29 = vpop.eup %3578 }
0x11b0   :  { %1334 = vrot.lane.b32.xlu1 %v3579_v29, %s3747_s0  ;;  %v3581_v0 = vpop.eup %3580 }
0x11b1   :  { %v1303_v10 = vadd.f32 1.0, %v3581_v0 }
0x11b3   :  { %3582 = vrcp.f32 %v1303_v10 }
0x11b4   :  { %3584 = vpow2.f32 %v2949_v18 }
0x11bd   :  { %v3583_v12 = vpop.eup %3582 }
0x11be   :  { %v3585_v19 = vpop.eup %3584  ;;  %v1307_v28 = vmul.f32 %v3583_v12, %v4196_v16 }
0x11bf   :  { %v1328_v7 = vadd.f32 1.0, %v3585_v19 }
0x11c1   :  { %3586 = vrcp.f32 %v1328_v7 }
0x11cb   :  { %v3587_v24 = vpop.eup %3586 }
0x11cc   :  { %v1332_v27 = vmul.f32 %v3587_v24, %v4201_v22 }
0x11e7   :  { %v1310_v38 = vpop.permute.xlu0 %1309 }
0x11e8   :  { %v1312_v52 = vmul.f32 %v3583_v12, %v1310_v38 }
0x11ea   :  { %1314 = vrot.lane.b32.xlu0 %v1312_v52, %s3747_s0 }
0x1222   :  { %v1335_v9 = vpop.permute.xlu1 %1334 }
0x1223   :  { %v1337_v26 = vmul.f32 %v3587_v24, %v1335_v9 }
0x1225   :  { %1339 = vrot.lane.b32.xlu1 %v1337_v26, %s3747_s0 }
0x125c   :  { %v1315_v63 = vpop.permute.xlu0 %1314 }
0x125d   :  { %v4256_v43 = vadd.f32 %v1315_v63, %v1307_v28 }
0x125f   :  { %3588 = vtanh.f32 %v4256_v43 }
0x1269   :  { %v3589_v14 = vpop.eup %3588 }
0x126a   :  { %1320 = vrot.lane.b32.xlu0 %v3589_v14, %s3747_s0 }
0x1297   :  { %v1340_v60 = vpop.permute.xlu1 %1339 }
0x1298   :  { %v4261_v54 = vadd.f32 %v1340_v60, %v1332_v27 }
0x129a   :  { %3590 = vtanh.f32 %v4261_v54 }
0x12a4   :  { %v3591_v57 = vpop.eup %3590 }
0x12a5   :  { %1345 = vrot.lane.b32.xlu1 %v3591_v57, %s3747_s0 }
0x12dc   :  { %v1321_v59 = vpop.permute.xlu0 %1320 }
0x12dd   :  { %v4265_v16 = vmul.f32 %v3583_v12, %v1321_v59 }
0x12df   :  { %v1351_v61 = vpack.c.bf16 %v4265_v16, %v4265_v16 }
0x12e1   :  { %1353 = vrot.lane.b32.xlu0 %v1351_v61, %s3748_s3 }
0x1317   :  { %v1346_v39 = vpop.permute.xlu1 %1345 }
0x1318   :  { %v4270_v23 = vmul.f32 %v3587_v24, %v1346_v39 }
0x131a   :  { %v1398_v22 = vpack.c.bf16 %v4270_v23, %v4270_v23 }
0x131c   :  { %1400 = vrot.lane.b32.xlu1 %v1398_v22, %s3748_s3 }
0x1353   :  { %v1354_v2 = vpop.permute.xlu0 %1353 }
0x1354   :  { %3231 = vmatmul.mubr.msk.bf16.vlgmr.msra.gmra.mrb[44].mxu1 %vm327_vm2, %v1354_v2 }
0x1355   :  { %3243 = vmatpush3.bf16.msra.mxu1 %v4219_v13  ;;  %3246 = vmatprep.mubr.msk.bf16.mxu1 %vm3746_vm0, %v3744_v1 }
0x1356   :  { %3244 = vmatprep.subr.bf16.mxu1 %v3744_v1 }
0x1359   :  { %3245 = vmatpush3.bf16.msra.mxu1 %v4228_v32 }
0x135a   :  { %3258 = vmatprep.subr.bf16.mxu1 %v3744_v1 }
0x138e   :  { %v1401_v6 = vpop.permute.xlu1 %1400 }
0x138f   :  { %3239 = vmatmul.mubr.msk.bf16.vlgmr.msra.gmra.mrb[44].mxu0 %vm327_vm2, %v1401_v6 }
0x1390   :  { %3251 = vmatpush3.bf16.msra.mxu0 %v4236_v45  ;;  %3254 = vmatprep.mubr.msk.bf16.mxu0 %vm3746_vm0, %v3744_v1 }
0x1391   :  { %3252 = vmatprep.subr.bf16.mxu0 %v3744_v1 }
0x1394   :  { %3253 = vmatpush3.bf16.msra.mxu0 %v4245_v46 }
0x1395   :  { %3266 = vmatprep.subr.bf16.mxu0 %v3744_v1 }
0x1427   :  { %v1392_v29 = vpop.f32.mrb[44].mxu1 }
0x1428   :  { %v1445_v51 = vadd.f32 %v1392_v29, %v3941_v5  ;;  %v3232_v0 = vpop.f32.mrb[45].mxu1 }
0x1429   :  { %v1395_v10 = vpop.f32.mrb[46].mxu1 }
0x142a   :  { %3592 = vtanh.f32 %v1445_v51  ;;  %v3233_v12 = vpop.f32.mrb[47].mxu1  ;;  %v2952_v26 = vmul.f32 -1.442695, %v1445_v51 }
0x1434   :  { %v3593_v38 = vpop.eup %3592 }
0x1435   :  { %1455 = vrot.lane.b32.xlu0 %v3593_v38, %s3747_s0 }
0x1462   :  { %v1439_v52 = vpop.f32.mrb[44].mxu0 }
0x1463   :  { %v1470_v18 = vadd.f32 %v1439_v52, %v3950_v15  ;;  %v3240_v19 = vpop.f32.mrb[45].mxu0 }
0x1464   :  { %v1442_v7 = vpop.f32.mrb[46].mxu0 }
0x1465   :  { %3594 = vtanh.f32 %v1470_v18  ;;  %v3241_v24 = vpop.f32.mrb[47].mxu0  ;;  %v2953_v60 = vmul.f32 -1.442695, %v1470_v18 }
0x1466   :  { %3596 = vpow2.f32 %v2952_v26 }
0x146f   :  { %v3595_v9 = vpop.eup %3594 }
0x1470   :  { %1480 = vrot.lane.b32.xlu1 %v3595_v9, %s3747_s0  ;;  %v3597_v5 = vpop.eup %3596 }
0x1471   :  { %v1449_v28 = vadd.f32 1.0, %v3597_v5 }
0x1473   :  { %3598 = vrcp.f32 %v1449_v28 }
0x1474   :  { %3600 = vpow2.f32 %v2953_v60 }
0x147d   :  { %v3599_v63 = vpop.eup %3598 }
0x147e   :  { %v3601_v15 = vpop.eup %3600  ;;  %v1453_v22 = vmul.f32 %v3599_v63, %v4256_v43 }
0x147f   :  { %v1474_v57 = vadd.f32 1.0, %v3601_v15 }
0x1481   :  { %3602 = vrcp.f32 %v1474_v57 }
0x148b   :  { %v3603_v59 = vpop.eup %3602 }
0x148c   :  { %v1478_v51 = vmul.f32 %v3603_v59, %v4261_v54 }
0x14a7   :  { %v1456_v14 = vpop.permute.xlu0 %1455 }
0x14a8   :  { %v1458_v27 = vmul.f32 %v3599_v63, %v1456_v14 }
0x14aa   :  { %1460 = vrot.lane.b32.xlu0 %v1458_v27, %s3747_s0 }
0x14e2   :  { %v1481_v61 = vpop.permute.xlu1 %1480 }
0x14e3   :  { %v1483_v39 = vmul.f32 %v3603_v59, %v1481_v61 }
0x14e5   :  { %1485 = vrot.lane.b32.xlu1 %v1483_v39, %s3747_s0 }
0x151c   :  { %v1461_v2 = vpop.permute.xlu0 %1460 }
0x151d   :  { %v4296_v6 = vadd.f32 %v1461_v2, %v1453_v22 }
0x151f   :  { %3604 = vtanh.f32 %v4296_v6 }
0x1529   :  { %v3605_v29 = vpop.eup %3604 }
0x152a   :  { %1466 = vrot.lane.b32.xlu0 %v3605_v29, %s3747_s0 }
0x1557   :  { %v1486_v0 = vpop.permute.xlu1 %1485 }
0x1558   :  { %v4301_v10 = vadd.f32 %v1486_v0, %v1478_v51 }
0x155a   :  { %3606 = vtanh.f32 %v4301_v10 }
0x1564   :  { %v3607_v12 = vpop.eup %3606 }
0x1565   :  { %1491 = vrot.lane.b32.xlu1 %v3607_v12, %s3747_s0 }
0x159c   :  { %v1467_v38 = vpop.permute.xlu0 %1466 }
0x159d   :  { %v4305_v43 = vmul.f32 %v3599_v63, %v1467_v38 }
0x159f   :  { %v1497_v52 = vpack.c.bf16 %v4305_v43, %v4305_v43 }
0x15a1   :  { %1499 = vrot.lane.b32.xlu0 %v1497_v52, %s3748_s3 }
0x15d7   :  { %v1492_v18 = vpop.permute.xlu1 %1491 }
0x15d8   :  { %v4310_v19 = vmul.f32 %v3603_v59, %v1492_v18 }
0x15da   :  { %v1544_v54 = vpack.c.bf16 %v4310_v19, %v4310_v19 }
0x15dc   :  { %1546 = vrot.lane.b32.xlu1 %v1544_v54, %s3748_s3 }
0x1613   :  { %v1500_v7 = vpop.permute.xlu0 %1499 }
0x1614   :  { %3247 = vmatmul.mubr.msk.bf16.vlgmr.msra.gmra.mrb[48].mxu1 %vm327_vm2, %v1500_v7 }
0x1615   :  { %3259 = vmatpush3.bf16.msra.mxu1 %v4219_v13  ;;  %3262 = vmatprep.mubr.msk.bf16.mxu1 %vm3746_vm0, %v3744_v1 }
0x1616   :  { %3260 = vmatprep.subr.bf16.mxu1 %v3744_v1 }
0x1619   :  { %3261 = vmatpush3.bf16.msra.mxu1 %v4228_v32 }
0x161a   :  { %3274 = vmatprep.subr.bf16.mxu1 %v3744_v1 }
0x164e   :  { %v1547_v24 = vpop.permute.xlu1 %1546 }
0x164f   :  { %3255 = vmatmul.mubr.msk.bf16.vlgmr.msra.gmra.mrb[48].mxu0 %vm327_vm2, %v1547_v24 }
0x1650   :  { %3267 = vmatpush3.bf16.msra.mxu0 %v4236_v45  ;;  %3270 = vmatprep.mubr.msk.bf16.mxu0 %vm3746_vm0, %v3744_v1 }
0x1651   :  { %3268 = vmatprep.subr.bf16.mxu0 %v3744_v1 }
0x1654   :  { %3269 = vmatpush3.bf16.msra.mxu0 %v4245_v46 }
0x1655   :  { %3282 = vmatprep.subr.bf16.mxu0 %v3744_v1 }
0x16e7   :  { %v1538_v9 = vpop.f32.mrb[48].mxu1 }
0x16e8   :  { %v1591_v26 = vadd.f32 %v1538_v9, %v3947_v11  ;;  %v3248_v5 = vpop.f32.mrb[49].mxu1 }
0x16e9   :  { %v1541_v28 = vpop.f32.mrb[50].mxu1 }
0x16ea   :  { %3608 = vtanh.f32 %v1591_v26  ;;  %v3249_v63 = vpop.f32.mrb[51].mxu1  ;;  %v2956_v39 = vmul.f32 -1.442695, %v1591_v26 }
0x16f4   :  { %v3609_v14 = vpop.eup %3608 }
0x16f5   :  { %1601 = vrot.lane.b32.xlu0 %v3609_v14, %s3747_s0 }
0x1722   :  { %v1585_v27 = vpop.f32.mrb[48].mxu0 }
0x1723   :  { %v1616_v60 = vadd.f32 %v1585_v27, %v3944_v8  ;;  %v3256_v15 = vpop.f32.mrb[49].mxu0 }
0x1724   :  { %v1588_v57 = vpop.f32.mrb[50].mxu0 }
0x1725   :  { %3610 = vtanh.f32 %v1616_v60  ;;  %v3257_v59 = vpop.f32.mrb[51].mxu0  ;;  %v2957_v0 = vmul.f32 -1.442695, %v1616_v60 }
0x1726   :  { %3612 = vpow2.f32 %v2956_v39 }
0x172f   :  { %v3611_v61 = vpop.eup %3610 }
0x1730   :  { %1626 = vrot.lane.b32.xlu1 %v3611_v61, %s3747_s0  ;;  %v3613_v11 = vpop.eup %3612 }
0x1731   :  { %v1595_v22 = vadd.f32 1.0, %v3613_v11 }
0x1733   :  { %3614 = vrcp.f32 %v1595_v22 }
0x1734   :  { %3616 = vpow2.f32 %v2957_v0 }
0x173d   :  { %v3615_v2 = vpop.eup %3614 }
0x173e   :  { %v3617_v8 = vpop.eup %3616  ;;  %v1599_v54 = vmul.f32 %v3615_v2, %v4296_v6 }
0x173f   :  { %v1620_v12 = vadd.f32 1.0, %v3617_v8 }
0x1741   :  { %3618 = vrcp.f32 %v1620_v12 }
0x174b   :  { %v3619_v38 = vpop.eup %3618 }
0x174c   :  { %v1624_v26 = vmul.f32 %v3619_v38, %v4301_v10 }
0x1767   :  { %v1602_v29 = vpop.permute.xlu0 %1601 }
0x1768   :  { %v1604_v51 = vmul.f32 %v3615_v2, %v1602_v29 }
0x176a   :  { %1606 = vrot.lane.b32.xlu0 %v1604_v51, %s3747_s0 }
0x17a2   :  { %v1627_v52 = vpop.permute.xlu1 %1626 }
0x17a3   :  { %v1629_v18 = vmul.f32 %v3619_v38, %v1627_v52 }
0x17a5   :  { %1631 = vrot.lane.b32.xlu1 %v1629_v18, %s3747_s0 }
0x17dc   :  { %v1607_v7 = vpop.permute.xlu0 %1606 }
0x17dd   :  { %v4336_v24 = vadd.f32 %v1607_v7, %v1599_v54 }
0x17df   :  { %3620 = vtanh.f32 %v4336_v24 }
0x17e9   :  { %v3621_v9 = vpop.eup %3620 }
0x17ea   :  { %1612 = vrot.lane.b32.xlu0 %v3621_v9, %s3747_s0 }
0x1817   :  { %v1632_v5 = vpop.permute.xlu1 %1631 }
0x1818   :  { %v4341_v28 = vadd.f32 %v1632_v5, %v1624_v26 }
0x181a   :  { %3622 = vtanh.f32 %v4341_v28 }
0x1824   :  { %v3623_v63 = vpop.eup %3622 }
0x1825   :  { %1637 = vrot.lane.b32.xlu1 %v3623_v63, %s3747_s0 }
0x185c   :  { %v1613_v14 = vpop.permute.xlu0 %1612 }
0x185d   :  { %v4345_v6 = vmul.f32 %v3615_v2, %v1613_v14 }
0x185f   :  { %v1643_v27 = vpack.c.bf16 %v4345_v6, %v4345_v6 }
0x1861   :  { %1645 = vrot.lane.b32.xlu0 %v1643_v27, %s3748_s3 }
0x1897   :  { %v1638_v60 = vpop.permute.xlu1 %1637 }
0x1898   :  { %v4350_v15 = vmul.f32 %v3619_v38, %v1638_v60 }
0x189a   :  { %v1690_v10 = vpack.c.bf16 %v4350_v15, %v4350_v15 }
0x189c   :  { %1692 = vrot.lane.b32.xlu1 %v1690_v10, %s3748_s3 }
0x18d3   :  { %v1646_v57 = vpop.permute.xlu0 %1645 }
0x18d4   :  { %3263 = vmatmul.mubr.msk.bf16.vlgmr.msra.gmra.mrb[52].mxu1 %vm327_vm2, %v1646_v57 }
0x18d5   :  { %3275 = vmatpush3.bf16.msra.mxu1 %v4219_v13  ;;  %3278 = vmatprep.mubr.msk.bf16.mxu1 %vm3746_vm0, %v3744_v1 }
0x18d6   :  { %3276 = vmatprep.subr.bf16.mxu1 %v3744_v1 }
0x18d9   :  { %3277 = vmatpush3.bf16.msra.mxu1 %v4228_v32 }
0x18da   :  { %3290 = vmatprep.subr.bf16.mxu1 %v3744_v1 }
0x190e   :  { %v1693_v59 = vpop.permute.xlu1 %1692 }
0x190f   :  { %3271 = vmatmul.mubr.msk.bf16.vlgmr.msra.gmra.mrb[52].mxu0 %vm327_vm2, %v1693_v59 }
0x1910   :  { %3283 = vmatpush3.bf16.msra.mxu0 %v4236_v45  ;;  %3286 = vmatprep.mubr.msk.bf16.mxu0 %vm3746_vm0, %v3744_v1 }
0x1911   :  { %3284 = vmatprep.subr.bf16.mxu0 %v3744_v1 }
0x1914   :  { %3285 = vmatpush3.bf16.msra.mxu0 %v4245_v46 }
0x1915   :  { %3298 = vmatprep.subr.bf16.mxu0 %v3744_v1 }
0x19a7   :  { %v1684_v61 = vpop.f32.mrb[52].mxu1 }
0x19a8   :  { %v1737_v39 = vadd.f32 %v1684_v61, %v3953_v17  ;;  %v3264_v11 = vpop.f32.mrb[53].mxu1 }
0x19a9   :  { %v1687_v22 = vpop.f32.mrb[54].mxu1 }
0x19aa   :  { %3624 = vtanh.f32 %v1737_v39  ;;  %v3265_v2 = vpop.f32.mrb[55].mxu1  ;;  %v2960_v18 = vmul.f32 -1.442695, %v1737_v39 }
0x19b4   :  { %v3625_v29 = vpop.eup %3624 }
0x19b5   :  { %1747 = vrot.lane.b32.xlu0 %v3625_v29, %s3747_s0 }
0x19e2   :  { %v1731_v51 = vpop.f32.mrb[52].mxu0 }
0x19e3   :  { %v1762_v0 = vadd.f32 %v1731_v51, %v3938_v3  ;;  %v3272_v8 = vpop.f32.mrb[53].mxu0 }
0x19e4   :  { %v1734_v12 = vpop.f32.mrb[54].mxu0 }
0x19e5   :  { %3626 = vtanh.f32 %v1762_v0  ;;  %v3273_v38 = vpop.f32.mrb[55].mxu0  ;;  %v2961_v5 = vmul.f32 -1.442695, %v1762_v0 }
0x19e6   :  { %3628 = vpow2.f32 %v2960_v18 }
0x19ef   :  { %v3627_v52 = vpop.eup %3626 }
0x19f0   :  { %1772 = vrot.lane.b32.xlu1 %v3627_v52, %s3747_s0  ;;  %v3629_v17 = vpop.eup %3628 }
0x19f1   :  { %v1741_v54 = vadd.f32 1.0, %v3629_v17 }
0x19f3   :  { %3630 = vrcp.f32 %v1741_v54 }
0x19f4   :  { %3632 = vpow2.f32 %v2961_v5 }
0x19fd   :  { %v3631_v7 = vpop.eup %3630 }
0x19fe   :  { %v3633_v3 = vpop.eup %3632  ;;  %v1745_v10 = vmul.f32 %v3631_v7, %v4336_v24 }
0x19ff   :  { %v1766_v63 = vadd.f32 1.0, %v3633_v3 }
0x1a01   :  { %3634 = vrcp.f32 %v1766_v63 }
0x1a0b   :  { %v3635_v14 = vpop.eup %3634 }
0x1a0c   :  { %v1770_v39 = vmul.f32 %v3635_v14, %v4341_v28 }
0x1a27   :  { %v1748_v9 = vpop.permute.xlu0 %1747 }
0x1a28   :  { %v1750_v26 = vmul.f32 %v3631_v7, %v1748_v9 }
0x1a2a   :  { %1752 = vrot.lane.b32.xlu0 %v1750_v26, %s3747_s0 }
0x1a62   :  { %v1773_v27 = vpop.permute.xlu1 %1772 }
0x1a63   :  { %v1775_v60 = vmul.f32 %v3635_v14, %v1773_v27 }
0x1a65   :  { %1777 = vrot.lane.b32.xlu1 %v1775_v60, %s3747_s0 }
0x1a9c   :  { %v1753_v57 = vpop.permute.xlu0 %1752 }
0x1a9d   :  { %v4376_v59 = vadd.f32 %v1753_v57, %v1745_v10 }
0x1a9f   :  { %3636 = vtanh.f32 %v4376_v59 }
0x1aa9   :  { %v3637_v61 = vpop.eup %3636 }
0x1aaa   :  { %1758 = vrot.lane.b32.xlu0 %v3637_v61, %s3747_s0 }
0x1ad7   :  { %v1778_v11 = vpop.permute.xlu1 %1777 }
0x1ad8   :  { %v4381_v22 = vadd.f32 %v1778_v11, %v1770_v39 }
0x1ada   :  { %3638 = vtanh.f32 %v4381_v22 }
0x1ae4   :  { %v3639_v2 = vpop.eup %3638 }
0x1ae5   :  { %1783 = vrot.lane.b32.xlu1 %v3639_v2, %s3747_s0 }
0x1b1c   :  { %v1759_v29 = vpop.permute.xlu0 %1758 }
0x1b1d   :  { %v4385_v24 = vmul.f32 %v3631_v7, %v1759_v29 }
0x1b1f   :  { %v1789_v51 = vpack.c.bf16 %v4385_v24, %v4385_v24 }
0x1b21   :  { %1791 = vrot.lane.b32.xlu0 %v1789_v51, %s3748_s3 }
0x1b57   :  { %v1784_v0 = vpop.permute.xlu1 %1783 }
0x1b58   :  { %v4390_v8 = vmul.f32 %v3635_v14, %v1784_v0 }
0x1b5a   :  { %v1836_v28 = vpack.c.bf16 %v4390_v8, %v4390_v8 }
0x1b5c   :  { %1838 = vrot.lane.b32.xlu1 %v1836_v28, %s3748_s3 }
0x1b93   :  { %v1792_v12 = vpop.permute.xlu0 %1791 }
0x1b94   :  { %3279 = vmatmul.mubr.msk.bf16.vlgmr.msra.gmra.mrb[56].mxu1 %vm327_vm2, %v1792_v12 }
0x1b95   :  { %3291 = vmatpush3.bf16.msra.mxu1 %v4219_v13  ;;  %3294 = vmatprep.mubr.msk.bf16.mxu1 %vm3746_vm0, %v3744_v1 }
0x1b96   :  { %3292 = vmatprep.subr.bf16.mxu1 %v3744_v1 }
0x1b99   :  { %3293 = vmatpush3.bf16.msra.mxu1 %v4228_v32 }
0x1b9a   :  { %3306 = vmatprep.subr.bf16.mxu1 %v3744_v1 }
0x1bce   :  { %v1839_v38 = vpop.permute.xlu1 %1838 }
0x1bcf   :  { %3287 = vmatmul.mubr.msk.bf16.vlgmr.msra.gmra.mrb[56].mxu0 %vm327_vm2, %v1839_v38 }
0x1bd0   :  { %3299 = vmatpush3.bf16.msra.mxu0 %v4236_v45  ;;  %3302 = vmatprep.mubr.msk.bf16.mxu0 %vm3746_vm0, %v3744_v1 }
0x1bd1   :  { %3300 = vmatprep.subr.bf16.mxu0 %v3744_v1 }
0x1bd4   :  { %3301 = vmatpush3.bf16.msra.mxu0 %v4245_v46 }
0x1bd5   :  { %3314 = vmatprep.subr.bf16.mxu0 %v3744_v1 }
0x1c67   :  { %v1830_v52 = vpop.f32.mrb[56].mxu1 }
0x1c68   :  { %v1883_v18 = vadd.f32 %v1830_v52, %v3959_v21  ;;  %v3280_v17 = vpop.f32.mrb[57].mxu1 }
0x1c69   :  { %v1833_v54 = vpop.f32.mrb[58].mxu1 }
0x1c6a   :  { %3640 = vtanh.f32 %v1883_v18  ;;  %v3281_v7 = vpop.f32.mrb[59].mxu1  ;;  %v2964_v60 = vmul.f32 -1.442695, %v1883_v18 }
0x1c74   :  { %v3641_v9 = vpop.eup %3640 }
0x1c75   :  { %1893 = vrot.lane.b32.xlu0 %v3641_v9, %s3747_s0 }
0x1ca2   :  { %v1877_v26 = vpop.f32.mrb[56].mxu0 }
0x1ca3   :  { %v1908_v5 = vadd.f32 %v1877_v26, %v3932_v62  ;;  %v3288_v3 = vpop.f32.mrb[57].mxu0 }
0x1ca4   :  { %v1880_v63 = vpop.f32.mrb[58].mxu0 }
0x1ca5   :  { %3642 = vtanh.f32 %v1908_v5  ;;  %v3289_v14 = vpop.f32.mrb[59].mxu0  ;;  %v2965_v11 = vmul.f32 -1.442695, %v1908_v5 }
0x1ca6   :  { %3644 = vpow2.f32 %v2964_v60 }
0x1caf   :  { %v3643_v27 = vpop.eup %3642 }
0x1cb0   :  { %1918 = vrot.lane.b32.xlu1 %v3643_v27, %s3747_s0  ;;  %v3645_v21 = vpop.eup %3644 }
0x1cb1   :  { %v1887_v10 = vadd.f32 1.0, %v3645_v21 }
0x1cb3   :  { %3646 = vrcp.f32 %v1887_v10 }
0x1cb4   :  { %3648 = vpow2.f32 %v2965_v11 }
0x1cbd   :  { %v3647_v57 = vpop.eup %3646 }
0x1cbe   :  { %v3649_v62 = vpop.eup %3648  ;;  %v1891_v28 = vmul.f32 %v3647_v57, %v4376_v59 }
0x1cbf   :  { %v1912_v2 = vadd.f32 1.0, %v3649_v62 }
0x1cc1   :  { %3650 = vrcp.f32 %v1912_v2 }
0x1ccb   :  { %v3651_v29 = vpop.eup %3650 }
0x1ccc   :  { %v1916_v18 = vmul.f32 %v3651_v29, %v4381_v22 }
0x1ce7   :  { %v1894_v61 = vpop.permute.xlu0 %1893 }
0x1ce8   :  { %v1896_v39 = vmul.f32 %v3647_v57, %v1894_v61 }
0x1cea   :  { %1898 = vrot.lane.b32.xlu0 %v1896_v39, %s3747_s0 }
0x1d22   :  { %v1919_v51 = vpop.permute.xlu1 %1918 }
0x1d23   :  { %v1921_v0 = vmul.f32 %v3651_v29, %v1919_v51 }
0x1d25   :  { %1923 = vrot.lane.b32.xlu1 %v1921_v0, %s3747_s0 }
0x1d5c   :  { %v1899_v12 = vpop.permute.xlu0 %1898 }
0x1d5d   :  { %v4416_v38 = vadd.f32 %v1899_v12, %v1891_v28 }
0x1d5f   :  { %3652 = vtanh.f32 %v4416_v38 }
0x1d69   :  { %v3653_v52 = vpop.eup %3652 }
0x1d6a   :  { %1904 = vrot.lane.b32.xlu0 %v3653_v52, %s3747_s0 }
0x1d97   :  { %v1924_v17 = vpop.permute.xlu1 %1923 }
0x1d98   :  { %v4421_v54 = vadd.f32 %v1924_v17, %v1916_v18 }
0x1d9a   :  { %3654 = vtanh.f32 %v4421_v54 }
0x1da4   :  { %v3655_v7 = vpop.eup %3654 }
0x1da5   :  { %1929 = vrot.lane.b32.xlu1 %v3655_v7, %s3747_s0 }
0x1ddc   :  { %v1905_v9 = vpop.permute.xlu0 %1904 }
0x1ddd   :  { %v4425_v59 = vmul.f32 %v3647_v57, %v1905_v9 }
0x1ddf   :  { %v1935_v26 = vpack.c.bf16 %v4425_v59, %v4425_v59 }
0x1de1   :  { %1937 = vrot.lane.b32.xlu0 %v1935_v26, %s3748_s3 }
0x1e17   :  { %v1930_v5 = vpop.permute.xlu1 %1929 }
0x1e18   :  { %v4430_v3 = vmul.f32 %v3651_v29, %v1930_v5 }
0x1e1a   :  { %v1982_v22 = vpack.c.bf16 %v4430_v3, %v4430_v3 }
0x1e1c   :  { %1984 = vrot.lane.b32.xlu1 %v1982_v22, %s3748_s3 }
0x1e53   :  { %v1938_v63 = vpop.permute.xlu0 %1937 }
0x1e54   :  { %3295 = vmatmul.mubr.msk.bf16.vlgmr.msra.gmra.mrb[60].mxu1 %vm327_vm2, %v1938_v63 }
0x1e55   :  { %3307 = vmatpush3.bf16.msra.mxu1 %v4219_v13  ;;  %3310 = vmatprep.mubr.msk.bf16.mxu1 %vm3746_vm0, %v3744_v1 }
0x1e56   :  { %3308 = vmatprep.subr.bf16.mxu1 %v3744_v1 }
0x1e59   :  { %3309 = vmatpush3.bf16.msra.mxu1 %v4228_v32 }
0x1e5a   :  { %3322 = vmatprep.subr.bf16.mxu1 %v3744_v1 }
0x1e8e   :  { %v1985_v14 = vpop.permute.xlu1 %1984 }
0x1e8f   :  { %3303 = vmatmul.mubr.msk.bf16.vlgmr.msra.gmra.mrb[60].mxu0 %vm327_vm2, %v1985_v14 }
0x1e90   :  { %3315 = vmatpush3.bf16.msra.mxu0 %v4236_v45  ;;  %3318 = vmatprep.mubr.msk.bf16.mxu0 %vm3746_vm0, %v3744_v1 }
0x1e91   :  { %3316 = vmatprep.subr.bf16.mxu0 %v3744_v1 }
0x1e94   :  { %3317 = vmatpush3.bf16.msra.mxu0 %v4245_v46 }
0x1e95   :  { %3330 = vmatprep.subr.bf16.mxu0 %v3744_v1 }
0x1f27   :  { %v1976_v27 = vpop.f32.mrb[60].mxu1 }
0x1f28   :  { %v2029_v60 = vadd.f32 %v1976_v27, %v3965_v25  ;;  %v3296_v21 = vpop.f32.mrb[61].mxu1 }
0x1f29   :  { %v1979_v10 = vpop.f32.mrb[62].mxu1 }
0x1f2a   :  { %3656 = vtanh.f32 %v2029_v60  ;;  %v3297_v57 = vpop.f32.mrb[63].mxu1  ;;  %v2968_v0 = vmul.f32 -1.442695, %v2029_v60 }
0x1f34   :  { %v3657_v61 = vpop.eup %3656 }
0x1f35   :  { %2039 = vrot.lane.b32.xlu0 %v3657_v61, %s3747_s0 }
0x1f62   :  { %v2023_v39 = vpop.f32.mrb[60].mxu0 }
0x1f63   :  { %v2054_v11 = vadd.f32 %v2023_v39, %v3926_v58  ;;  %v3304_v62 = vpop.f32.mrb[61].mxu0 }
0x1f64   :  { %v2026_v2 = vpop.f32.mrb[62].mxu0 }
0x1f65   :  { %3658 = vtanh.f32 %v2054_v11  ;;  %v3305_v29 = vpop.f32.mrb[63].mxu0  ;;  %v2969_v17 = vmul.f32 -1.442695, %v2054_v11 }
0x1f66   :  { %3660 = vpow2.f32 %v2968_v0 }
0x1f6f   :  { %v3659_v51 = vpop.eup %3658 }
0x1f70   :  { %2064 = vrot.lane.b32.xlu1 %v3659_v51, %s3747_s0  ;;  %v3661_v25 = vpop.eup %3660 }
0x1f71   :  { %v2033_v28 = vadd.f32 1.0, %v3661_v25 }
0x1f73   :  { %3662 = vrcp.f32 %v2033_v28 }
0x1f74   :  { %3664 = vpow2.f32 %v2969_v17 }
0x1f7d   :  { %v3663_v12 = vpop.eup %3662 }
0x1f7e   :  { %v3665_v58 = vpop.eup %3664  ;;  %v2037_v22 = vmul.f32 %v3663_v12, %v4416_v38 }
0x1f7f   :  { %v2058_v7 = vadd.f32 1.0, %v3665_v58 }
0x1f81   :  { %3666 = vrcp.f32 %v2058_v7 }
0x1f8b   :  { %v3667_v9 = vpop.eup %3666 }
0x1f8c   :  { %v2062_v60 = vmul.f32 %v3667_v9, %v4421_v54 }
0x1fa7   :  { %v2040_v52 = vpop.permute.xlu0 %2039 }
0x1fa8   :  { %v2042_v18 = vmul.f32 %v3663_v12, %v2040_v52 }
0x1faa   :  { %2044 = vrot.lane.b32.xlu0 %v2042_v18, %s3747_s0 }
0x1fe2   :  { %v2065_v26 = vpop.permute.xlu1 %2064 }
0x1fe3   :  { %v2067_v5 = vmul.f32 %v3667_v9, %v2065_v26 }
0x1fe5   :  { %2069 = vrot.lane.b32.xlu1 %v2067_v5, %s3747_s0 }
0x201c   :  { %v2045_v63 = vpop.permute.xlu0 %2044 }
0x201d   :  { %v4456_v14 = vadd.f32 %v2045_v63, %v2037_v22 }
0x201f   :  { %3668 = vtanh.f32 %v4456_v14 }
0x2029   :  { %v3669_v27 = vpop.eup %3668 }
0x202a   :  { %2050 = vrot.lane.b32.xlu0 %v3669_v27, %s3747_s0 }
0x2057   :  { %v2070_v21 = vpop.permute.xlu1 %2069 }
0x2058   :  { %v4461_v10 = vadd.f32 %v2070_v21, %v2062_v60 }
0x205a   :  { %3670 = vtanh.f32 %v4461_v10 }
0x2064   :  { %v3671_v57 = vpop.eup %3670 }
0x2065   :  { %2075 = vrot.lane.b32.xlu1 %v3671_v57, %s3747_s0 }
0x209c   :  { %v2051_v61 = vpop.permute.xlu0 %2050 }
0x209d   :  { %v4465_v38 = vmul.f32 %v3663_v12, %v2051_v61 }
0x209f   :  { %v2081_v39 = vpack.c.bf16 %v4465_v38, %v4465_v38 }
0x20a1   :  { %2083 = vrot.lane.b32.xlu0 %v2081_v39, %s3748_s3 }
0x20d7   :  { %v2076_v11 = vpop.permute.xlu1 %2075 }
0x20d8   :  { %v4470_v62 = vmul.f32 %v3667_v9, %v2076_v11 }
0x20da   :  { %v2128_v54 = vpack.c.bf16 %v4470_v62, %v4470_v62 }
0x20dc   :  { %2130 = vrot.lane.b32.xlu1 %v2128_v54, %s3748_s3 }
0x2113   :  { %v2084_v2 = vpop.permute.xlu0 %2083 }
0x2114   :  { %3311 = vmatmul.mubr.msk.bf16.vlgmr.msra.gmra.mrb[64].mxu1 %vm327_vm2, %v2084_v2 }
0x2115   :  { %3323 = vmatpush3.bf16.msra.mxu1 %v4219_v13  ;;  %3326 = vmatprep.mubr.msk.bf16.mxu1 %vm3746_vm0, %v3744_v1 }
0x2116   :  { %3324 = vmatprep.subr.bf16.mxu1 %v3744_v1 }
0x2119   :  { %3325 = vmatpush3.bf16.msra.mxu1 %v4228_v32 }
0x211a   :  { %3338 = vmatprep.subr.bf16.mxu1 %v3744_v1 }
0x214e   :  { %v2131_v29 = vpop.permute.xlu1 %2130 }
0x214f   :  { %3319 = vmatmul.mubr.msk.bf16.vlgmr.msra.gmra.mrb[64].mxu0 %vm327_vm2, %v2131_v29 }
0x2150   :  { %3331 = vmatpush3.bf16.msra.mxu0 %v4236_v45  ;;  %3334 = vmatprep.mubr.msk.bf16.mxu0 %vm3746_vm0, %v3744_v1 }
0x2151   :  { %3332 = vmatprep.subr.bf16.mxu0 %v3744_v1 }
0x2154   :  { %3333 = vmatpush3.bf16.msra.mxu0 %v4245_v46 }
0x2155   :  { %3346 = vmatprep.subr.bf16.mxu0 %v3744_v1 }
0x21e7   :  { %v2122_v51 = vpop.f32.mrb[64].mxu1 }
0x21e8   :  { %v2175_v0 = vadd.f32 %v2122_v51, %v3971_v30  ;;  %v3312_v25 = vpop.f32.mrb[65].mxu1 }
0x21e9   :  { %v2125_v28 = vpop.f32.mrb[66].mxu1 }
0x21ea   :  { %3672 = vtanh.f32 %v2175_v0  ;;  %v3313_v12 = vpop.f32.mrb[67].mxu1  ;;  %v2972_v5 = vmul.f32 -1.442695, %v2175_v0 }
0x21f4   :  { %v3673_v52 = vpop.eup %3672 }
0x21f5   :  { %2185 = vrot.lane.b32.xlu0 %v3673_v52, %s3747_s0 }
0x2222   :  { %v2169_v18 = vpop.f32.mrb[64].mxu0 }
0x2223   :  { %v2200_v17 = vadd.f32 %v2169_v18, %v3919_v53  ;;  %v3320_v58 = vpop.f32.mrb[65].mxu0 }
0x2224   :  { %v2172_v7 = vpop.f32.mrb[66].mxu0 }
0x2225   :  { %3674 = vtanh.f32 %v2200_v17  ;;  %v3321_v9 = vpop.f32.mrb[67].mxu0  ;;  %v2973_v21 = vmul.f32 -1.442695, %v2200_v17 }
0x2226   :  { %3676 = vpow2.f32 %v2972_v5 }
0x222f   :  { %v3675_v26 = vpop.eup %3674 }
0x2230   :  { %2210 = vrot.lane.b32.xlu1 %v3675_v26, %s3747_s0  ;;  %v3677_v30 = vpop.eup %3676 }
0x2231   :  { %v2179_v22 = vadd.f32 1.0, %v3677_v30 }
0x2233   :  { %3678 = vrcp.f32 %v2179_v22 }
0x2234   :  { %3680 = vpow2.f32 %v2973_v21 }
0x223d   :  { %v3679_v63 = vpop.eup %3678 }
0x223e   :  { %v3681_v53 = vpop.eup %3680  ;;  %v2183_v54 = vmul.f32 %v3679_v63, %v4456_v14 }
0x223f   :  { %v2204_v57 = vadd.f32 1.0, %v3681_v53 }
0x2241   :  { %3682 = vrcp.f32 %v2204_v57 }
0x224b   :  { %v3683_v61 = vpop.eup %3682 }
0x224c   :  { %v2208_v0 = vmul.f32 %v3683_v61, %v4461_v10 }
0x2267   :  { %v2186_v27 = vpop.permute.xlu0 %2185 }
0x2268   :  { %v2188_v60 = vmul.f32 %v3679_v63, %v2186_v27 }
0x226a   :  { %2190 = vrot.lane.b32.xlu0 %v2188_v60, %s3747_s0 }
0x22a2   :  { %v2211_v39 = vpop.permute.xlu1 %2210 }
0x22a3   :  { %v2213_v11 = vmul.f32 %v3683_v61, %v2211_v39 }
0x22a5   :  { %2215 = vrot.lane.b32.xlu1 %v2213_v11, %s3747_s0 }
0x22dc   :  { %v2191_v2 = vpop.permute.xlu0 %2190 }
0x22dd   :  { %v4496_v29 = vadd.f32 %v2191_v2, %v2183_v54 }
0x22df   :  { %3684 = vtanh.f32 %v4496_v29 }
0x22e9   :  { %v3685_v51 = vpop.eup %3684 }
0x22ea   :  { %2196 = vrot.lane.b32.xlu0 %v3685_v51, %s3747_s0 }
0x2317   :  { %v2216_v25 = vpop.permute.xlu1 %2215 }
0x2318   :  { %v4501_v28 = vadd.f32 %v2216_v25, %v2208_v0 }
0x231a   :  { %3686 = vtanh.f32 %v4501_v28 }
0x2324   :  { %v3687_v12 = vpop.eup %3686 }
0x2325   :  { %2221 = vrot.lane.b32.xlu1 %v3687_v12, %s3747_s0 }
0x235c   :  { %v2197_v52 = vpop.permute.xlu0 %2196 }
0x235d   :  { %v4505_v14 = vmul.f32 %v3679_v63, %v2197_v52 }
0x235f   :  { %v2227_v18 = vpack.c.bf16 %v4505_v14, %v4505_v14 }
0x2361   :  { %2229 = vrot.lane.b32.xlu0 %v2227_v18, %s3748_s3 }
0x2397   :  { %v2222_v17 = vpop.permute.xlu1 %2221 }
0x2398   :  { %v4510_v58 = vmul.f32 %v3683_v61, %v2222_v17 }
0x239a   :  { %v2274_v10 = vpack.c.bf16 %v4510_v58, %v4510_v58 }
0x239c   :  { %2276 = vrot.lane.b32.xlu1 %v2274_v10, %s3748_s3 }
0x23d3   :  { %v2230_v7 = vpop.permute.xlu0 %2229 }
0x23d4   :  { %3327 = vmatmul.mubr.msk.bf16.vlgmr.msra.gmra.mrb[68].mxu1 %vm327_vm2, %v2230_v7 }
0x23d5   :  { %3339 = vmatpush3.bf16.msra.mxu1 %v4219_v13  ;;  %3342 = vmatprep.mubr.msk.bf16.mxu1 %vm3746_vm0, %v3744_v1 }
0x23d6   :  { %3340 = vmatprep.subr.bf16.mxu1 %v3744_v1 }
0x23d9   :  { %3341 = vmatpush3.bf16.msra.mxu1 %v4228_v32 }
0x23da   :  { %3354 = vmatprep.subr.bf16.mxu1 %v3744_v1 }
0x240e   :  { %v2277_v9 = vpop.permute.xlu1 %2276 }
0x240f   :  { %3335 = vmatmul.mubr.msk.bf16.vlgmr.msra.gmra.mrb[68].mxu0 %vm327_vm2, %v2277_v9 }
0x2410   :  { %3347 = vmatpush3.bf16.msra.mxu0 %v4236_v45  ;;  %3350 = vmatprep.mubr.msk.bf16.mxu0 %vm3746_vm0, %v3744_v1 }
0x2411   :  { %3348 = vmatprep.subr.bf16.mxu0 %v3744_v1 }
0x2414   :  { %3349 = vmatpush3.bf16.msra.mxu0 %v4245_v46 }
0x2415   :  { %3362 = vmatprep.subr.bf16.mxu0 %v3744_v1 }
0x24a7   :  { %v2268_v13 = vpop.f32.mrb[68].mxu1 }
0x24a8   :  { %v2321_v26 = vadd.f32 %v2268_v13, %v3977_v35  ;;  %v3328_v32 = vpop.f32.mrb[69].mxu1 }
0x24a9   :  { %v2271_v5 = vpop.f32.mrb[70].mxu1 }
0x24aa   :  { %3688 = vtanh.f32 %v2321_v26  ;;  %v3329_v30 = vpop.f32.mrb[71].mxu1  ;;  %v2976_v53 = vmul.f32 -1.442695, %v2321_v26 }
0x24b4   :  { %v3689_v22 = vpop.eup %3688 }
0x24b5   :  { %2331 = vrot.lane.b32.xlu0 %v3689_v22, %s3747_s0 }
0x24e2   :  { %v2315_v45 = vpop.f32.mrb[68].mxu0 }
0x24e3   :  { %v2346_v63 = vadd.f32 %v2315_v45, %v3913_v49  ;;  %v3336_v27 = vpop.f32.mrb[69].mxu0  ;;  %v3740_v45 = vld [vmem:[%s4749_s2] sm:$0xff]  }
0x24e4   :  { %v2318_v60 = vpop.f32.mrb[70].mxu0 }
0x24e5   :  { %3690 = vtanh.f32 %v2346_v63  ;;  %v3337_v21 = vpop.f32.mrb[71].mxu0  ;;  %v2977_v54 = vmul.f32 -1.442695, %v2346_v63  ;;  %v3741_v63 = vld [vmem:[%s4749_s2 + $0x8] sm:$0xff]   ;;  %v3742_v60 = vld [vmem:[%s4749_s2 + $0x10] sm:$0xff]  }
0x24e6   :  { %3692 = vpow2.f32 %v2976_v53  ;;  %v3743_v21 = vld [vmem:[%s4749_s2 + $0x18] sm:$0xff]   ;;  %s3749_s2 = smov 96  }
0x24ef   :  { %v3691_v46 = vpop.eup %3690 }
0x24f0   :  { %2356 = vrot.lane.b32.xlu1 %v3691_v46, %s3747_s0  ;;  %v3693_v35 = vpop.eup %3692 }
0x24f1   :  { %v2325_v57 = vadd.f32 1.0, %v3693_v35 }
0x24f3   :  { %3694 = vrcp.f32 %v2325_v57 }
0x24f4   :  { %3696 = vpow2.f32 %v2977_v54 }
0x24fd   :  { %v3695_v61 = vpop.eup %3694 }
0x24fe   :  { %v3697_v49 = vpop.eup %3696  ;;  %v2329_v12 = vmul.f32 %v3695_v61, %v4496_v29 }
0x24ff   :  { %v2350_v2 = vadd.f32 1.0, %v3697_v49 }
0x2501   :  { %3698 = vrcp.f32 %v2350_v2 }
0x250b   :  { %v3699_v51 = vpop.eup %3698 }
0x250c   :  { %v2354_v10 = vmul.f32 %v3699_v51, %v4501_v28 }
0x2527   :  { %v2332_v39 = vpop.permute.xlu0 %2331 }
0x2528   :  { %v2334_v11 = vmul.f32 %v3695_v61, %v2332_v39 }
0x252a   :  { %2336 = vrot.lane.b32.xlu0 %v2334_v11, %s3747_s0 }
0x2562   :  { %v2357_v0 = vpop.permute.xlu1 %2356 }
0x2563   :  { %v2359_v25 = vmul.f32 %v3699_v51, %v2357_v0 }
0x2565   :  { %2361 = vrot.lane.b32.xlu1 %v2359_v25, %s3747_s0 }
0x259c   :  { %v2337_v52 = vpop.permute.xlu0 %2336 }
0x259d   :  { %v4536_v18 = vadd.f32 %v2337_v52, %v2329_v12 }
0x259f   :  { %3700 = vtanh.f32 %v4536_v18 }
0x25a9   :  { %v3701_v17 = vpop.eup %3700 }
0x25aa   :  { %2342 = vrot.lane.b32.xlu0 %v3701_v17, %s3747_s0 }
0x25d7   :  { %v2362_v7 = vpop.permute.xlu1 %2361 }
0x25d8   :  { %v4541_v9 = vadd.f32 %v2362_v7, %v2354_v10 }
0x25da   :  { %3702 = vtanh.f32 %v4541_v9 }
0x25e4   :  { %v3703_v13 = vpop.eup %3702 }
0x25e5   :  { %2367 = vrot.lane.b32.xlu1 %v3703_v13, %s3747_s0 }
0x261c   :  { %v2343_v26 = vpop.permute.xlu0 %2342 }
0x261d   :  { %v4545_v29 = vmul.f32 %v3695_v61, %v2343_v26 }
0x261f   :  { %v2373_v32 = vpack.c.bf16 %v4545_v29, %v4545_v29 }
0x2621   :  { %2375 = vrot.lane.b32.xlu0 %v2373_v32, %s3748_s3 }
0x2657   :  { %v2368_v5 = vpop.permute.xlu1 %2367 }
0x2658   :  { %v4550_v30 = vmul.f32 %v3699_v51, %v2368_v5 }
0x265a   :  { %v2420_v28 = vpack.c.bf16 %v4550_v30, %v4550_v30 }
0x265c   :  { %2422 = vrot.lane.b32.xlu1 %v2420_v28, %s3748_s3 }
0x2693   :  { %v2376_v22 = vpop.permute.xlu0 %2375 }
0x2694   :  { %3343 = vmatmul.mubr.msk.bf16.vlgmr.msra.gmra.mrb[72].mxu1 %vm327_vm2, %v2376_v22 }
0x2695   :  { %3355 = vmatpush3.bf16.msra.mxu1 %v3740_v45  ;;  %3358 = vmatprep.mubr.msk.bf16.mxu1 %vm3746_vm0, %v3744_v1 }
0x2696   :  { %3356 = vmatprep.subr.bf16.mxu1 %v3744_v1 }
0x2699   :  { %3357 = vmatpush3.bf16.msra.mxu1 %v3741_v63 }
0x26ce   :  { %v2423_v27 = vpop.permute.xlu1 %2422 }
0x26cf   :  { %3351 = vmatmul.mubr.msk.bf16.vlgmr.msra.gmra.mrb[72].mxu0 %vm327_vm2, %v2423_v27 }
0x26d0   :  { %3363 = vmatpush3.bf16.msra.mxu0 %v3742_v60  ;;  %3366 = vmatprep.mubr.msk.bf16.mxu0 %vm3746_vm0, %v3744_v1 }
0x26d1   :  { %3364 = vmatprep.subr.bf16.mxu0 %v3744_v1 }
0x26d4   :  { %3365 = vmatpush3.bf16.msra.mxu0 %v3743_v21 }
0x2767   :  { %v2414_v46 = vpop.f32.mrb[72].mxu1 }
0x2768   :  { %v2467_v53 = vadd.f32 %v2414_v46, %v3983_v44  ;;  %v3344_v35 = vpop.f32.mrb[73].mxu1 }
0x2769   :  { %v2417_v57 = vpop.f32.mrb[74].mxu1 }
0x276a   :  { %3704 = vtanh.f32 %v2467_v53  ;;  %v3345_v61 = vpop.f32.mrb[75].mxu1  ;;  %v2980_v0 = vmul.f32 -1.442695, %v2467_v53 }
0x2774   :  { %v3705_v39 = vpop.eup %3704 }
0x2775   :  { %2477 = vrot.lane.b32.xlu0 %v3705_v39, %s3747_s0 }
0x27a2   :  { %v2461_v11 = vpop.f32.mrb[72].mxu0 }
0x27a3   :  { %v2492_v54 = vadd.f32 %v2461_v11, %v3904_v41  ;;  %v3352_v49 = vpop.f32.mrb[73].mxu0 }
0x27a4   :  { %v2464_v1 = vpop.f32.mrb[74].mxu0 }
0x27a5   :  { %3706 = vtanh.f32 %v2492_v54  ;;  %v3353_v2 = vpop.f32.mrb[75].mxu0  ;;  %v2981_v10 = vmul.f32 -1.442695, %v2492_v54 }
0x27a6   :  { %3708 = vpow2.f32 %v2980_v0 }
0x27af   :  { %v3707_v51 = vpop.eup %3706 }
0x27b0   :  { %2502 = vrot.lane.b32.xlu1 %v3707_v51, %s3747_s0  ;;  %v3709_v44 = vpop.eup %3708 }
0x27b1   :  { %v2471_v25 = vadd.f32 1.0, %v3709_v44 }
0x27b3   :  { %3710 = vrcp.f32 %v2471_v25 }
0x27b4   :  { %3712 = vpow2.f32 %v2981_v10 }
0x27bd   :  { %v3711_v12 = vpop.eup %3710 }
0x27be   :  { %v3713_v41 = vpop.eup %3712  ;;  %v2475_v5 = vmul.f32 %v3711_v12, %v4536_v18 }
0x27bf   :  { %v2496_v7 = vadd.f32 1.0, %v3713_v41 }
0x27c1   :  { %3714 = vrcp.f32 %v2496_v7 }
0x27cb   :  { %v3715_v13 = vpop.eup %3714 }
0x27cc   :  { %v2500_v63 = vmul.f32 %v3715_v13, %v4541_v9 }
0x27e7   :  { %v2478_v52 = vpop.permute.xlu0 %2477 }
0x27e8   :  { %v2480_v17 = vmul.f32 %v3711_v12, %v2478_v52 }
0x27ea   :  { %2482 = vrot.lane.b32.xlu0 %v2480_v17, %s3747_s0 }
0x2822   :  { %v2503_v26 = vpop.permute.xlu1 %2502 }
0x2823   :  { %v2505_v32 = vmul.f32 %v3715_v13, %v2503_v26 }
0x2825   :  { %2507 = vrot.lane.b32.xlu1 %v2505_v32, %s3747_s0 }
0x285c   :  { %v2483_v28 = vpop.permute.xlu0 %2482 }
0x285d   :  { %v2485_v22 = vadd.f32 %v2483_v28, %v2475_v5 }
0x285f   :  { %3716 = vtanh.f32 %v2485_v22 }
0x2869   :  { %v3717_v45 = vpop.eup %3716 }
0x286a   :  { %2488 = vrot.lane.b32.xlu0 %v3717_v45, %s3747_s0 }
0x2897   :  { %v2508_v27 = vpop.permute.xlu1 %2507 }
0x2898   :  { %v4584_v60 = vadd.f32 %v2508_v27, %v2500_v63 }
0x289a   :  { %3718 = vtanh.f32 %v4584_v60 }
0x28a4   :  { %v3719_v21 = vpop.eup %3718 }
0x28a5   :  { %2513 = vrot.lane.b32.xlu1 %v3719_v21, %s3747_s0 }
0x28dc   :  { %v2489_v46 = vpop.permute.xlu0 %2488 }
0x28dd   :  { %v4588_v53 = vmul.f32 %v3711_v12, %v2489_v46 }
0x28df   :  { %v2519_v18 = vpack.c.bf16 %v4588_v53, %v4588_v53 }
0x28e1   :  { %2521 = vrot.lane.b32.xlu0 %v2519_v18, %s3748_s3 }
0x2917   :  { %v2514_v35 = vpop.permute.xlu1 %2513 }
0x2918   :  { %v4593_v57 = vmul.f32 %v3715_v13, %v2514_v35  ;;  %v3376_v35 = vpack.i.bf16 %v4045_v20, %v4005_v37  ;;  %v3416_v37 = vpack.i.bf16 %v4430_v3, %v4470_v62  ;;  %v3426_v20 = vpack.i.bf16 %v4270_v23, %v4310_v19 }
0x2919   :  { %v3381_v3 = vpack.i.bf16 %v4125_v42, %v4085_v55  ;;  %v3391_v62 = vpack.i.bf16 %v4305_v43, %v4265_v16  ;;  %v3401_v23 = vpack.i.bf16 %v4465_v38, %v4425_v59  ;;  %v3411_v19 = vpack.i.bf16 %v4510_v58, %v4550_v30 }
0x291a   :  { %v2566_v9 = vpack.c.bf16 %v4593_v57, %v4593_v57  ;;  %v3421_v55 = vpack.i.bf16 %v4350_v15, %v4390_v8  ;;  %v3431_v42 = vpack.i.bf16 %v4170_v33, %v4210_v56 }
0x291c   :  { %2568 = vrot.lane.b32.xlu1 %v2566_v9, %s3748_s3  ;;  %v3386_v9 = vpack.i.bf16 %v4205_v4, %v4165_v34 }
0x2953   :  { %v2522_v61 = vpop.permute.xlu0 %2521 }
0x2954   :  { %3359 = vmatmul.mubr.msk.bf16.vlgmr.msra.gmra.mrb[76].mxu1 %vm327_vm2, %v2522_v61  ;;  %v3396_v61 = vpack.i.bf16 %v4385_v24, %v4345_v6 }
0x298e   :  { %v2569_v39 = vpop.permute.xlu1 %2568 }
0x298f   :  { %3367 = vmatmul.mubr.msk.bf16.vlgmr.msra.gmra.mrb[76].mxu0 %vm327_vm2, %v2569_v39 }
0x2a27   :  { %v2560_v11 = vpop.f32.mrb[76].mxu1 }
0x2a28   :  { %v2613_v54 = vadd.f32 %v2560_v11, %v3989_v50  ;;  %v3360_v49 = vpop.f32.mrb[77].mxu1 }
0x2a29   :  { %v2563_v1 = vpop.f32.mrb[78].mxu1 }
0x2a2a   :  { %3720 = vtanh.f32 %v2613_v54  ;;  %v3361_v2 = vpop.f32.mrb[79].mxu1  ;;  %v2984_v10 = vmul.f32 -1.442695, %v2613_v54 }
0x2a34   :  { %v3721_v51 = vpop.eup %3720 }
0x2a35   :  { %2623 = vrot.lane.b32.xlu0 %v3721_v51, %s3747_s0 }
0x2a62   :  { %v2607_v0 = vpop.f32.mrb[76].mxu0 }
0x2a63   :  { %v2638_v44 = vadd.f32 %v2607_v0, %v3896_v36  ;;  %v3368_v25 = vpop.f32.mrb[77].mxu0 }
0x2a64   :  { %v2610_v12 = vpop.f32.mrb[78].mxu0 }
0x2a65   :  { %3722 = vtanh.f32 %v2638_v44  ;;  %v3369_v52 = vpop.f32.mrb[79].mxu0  ;;  %v2985_v32 = vmul.f32 -1.442695, %v2638_v44 }
0x2a66   :  { %3724 = vpow2.f32 %v2984_v10 }
0x2a6f   :  { %v3723_v17 = vpop.eup %3722 }
0x2a70   :  { %2648 = vrot.lane.b32.xlu1 %v3723_v17, %s3747_s0  ;;  %v3725_v50 = vpop.eup %3724 }
0x2a71   :  { %v2617_v41 = vadd.f32 1.0, %v3725_v50  ;;  %v3446_v50 = vpack.i.bf16 %v4090_v47, %v4130_v40 }
0x2a73   :  { %3726 = vrcp.f32 %v2617_v41 }
0x2a74   :  { %3728 = vpow2.f32 %v2985_v32 }
0x2a7d   :  { %v3727_v7 = vpop.eup %3726 }
0x2a7e   :  { %v3729_v36 = vpop.eup %3728  ;;  %v2621_v27 = vmul.f32 %v3727_v7, %v2485_v22  ;;  %v3406_v22 = vpack.i.bf16 %v4545_v29, %v4505_v14  ;;  %v3451_v14 = vpack.i.bf16 %v4010_v48, %v4050_v31 }
0x2a7f   :  { %v2642_v5 = vadd.f32 1.0, %v3729_v36 }
0x2a81   :  { %3730 = vrcp.f32 %v2642_v5 }
0x2a8b   :  { %v4605_v28 = vpop.eup %3730 }
0x2a8c   :  { %v2646_v34 = vmul.f32 %v4605_v28, %v4584_v60 }
0x2aa7   :  { %v2624_v13 = vpop.permute.xlu0 %2623 }
0x2aa8   :  { %v2626_v26 = vmul.f32 %v3727_v7, %v2624_v13 }
0x2aaa   :  { %2628 = vrot.lane.b32.xlu0 %v2626_v26, %s3747_s0 }
0x2ae2   :  { %v2649_v45 = vpop.permute.xlu1 %2648 }
0x2ae3   :  { %v2651_v63 = vmul.f32 %v4605_v28, %v2649_v45 }
0x2ae5   :  { %2653 = vrot.lane.b32.xlu1 %v2651_v63, %s3747_s0 }
0x2b1c   :  { %v2629_v21 = vpop.permute.xlu0 %2628 }
0x2b1d   :  { %v2631_v46 = vadd.f32 %v2629_v21, %v2621_v27 }
0x2b1f   :  { %3732 = vtanh.f32 %v2631_v46 }
0x2b29   :  { %v3733_v18 = vpop.eup %3732 }
0x2b2a   :  { %2634 = vrot.lane.b32.xlu0 %v3733_v18, %s3747_s0 }
0x2b2e   :  { %3377 = vrot.lane.b32.xlu0 %v3376_v35, %s3748_s3 }
0x2b32   :  { %3387 = vrot.lane.b32.xlu0 %v3386_v9, %s3748_s3 }
0x2b36   :  { %3397 = vrot.lane.b32.xlu0 %v3396_v61, %s3748_s3 }
0x2b3a   :  { %3407 = vrot.lane.b32.xlu0 %v3406_v22, %s3748_s3 }
0x2b3e   :  { %3417 = vrot.lane.b32.xlu0 %v3416_v37, %s3749_s2 }
0x2b42   :  { %3427 = vrot.lane.b32.xlu0 %v3426_v20, %s3749_s2 }
0x2b57   :  { %v2654_v4 = vpop.permute.xlu1 %2653 }
0x2b58   :  { %v2656_v6 = vadd.f32 %v2654_v4, %v2646_v34 }
0x2b5a   :  { %3734 = vtanh.f32 %v2656_v6 }
0x2b64   :  { %v3735_v24 = vpop.eup %3734 }
0x2b65   :  { %2659 = vrot.lane.b32.xlu1 %v3735_v24, %s3747_s0 }
0x2b69   :  { %3382 = vrot.lane.b32.xlu1 %v3381_v3, %s3748_s3 }
0x2b6d   :  { %3392 = vrot.lane.b32.xlu1 %v3391_v62, %s3748_s3 }
0x2b71   :  { %3402 = vrot.lane.b32.xlu1 %v3401_v23, %s3748_s3 }
0x2b75   :  { %3412 = vrot.lane.b32.xlu1 %v3411_v19, %s3749_s2 }
0x2b79   :  { %3422 = vrot.lane.b32.xlu1 %v3421_v55, %s3749_s2 }
0x2b7d   :  { %3432 = vrot.lane.b32.xlu1 %v3431_v42, %s3749_s2 }
0x2b9c   :  { %v2635_v16 = vpop.permute.xlu0 %2634 }
0x2b9d   :  { %v2637_v43 = vmul.f32 %v3727_v7, %v2635_v16 }
0x2b9f   :  { %v3436_v59 = vpack.i.bf16 %v2637_v43, %v4588_v53 }
0x2ba0   :  { %v4650_v38 = vpop.permute.xlu0 %3377 }
0x2ba1   :  { %3437 = vrot.lane.b32.xlu1 %v3436_v59, %s3748_s3 }
0x2ba4   :  { %v3388_v58 = vpop.permute.xlu0 %3387 }
0x2ba5   :  { %3452 = vrot.lane.b32.xlu1 %v3451_v14, %s3749_s2  ;;  %v3390_v56 = vunpack.i.h.bf16 %v3388_v58  ;;  %v3389_v29 = vunpack.i.l.bf16 %v3388_v58 }
0x2ba8   :  { %v3398_v15 = vpop.permute.xlu0 %3397 }
0x2ba9   :  { %v3400_v48 = vunpack.i.h.bf16 %v3398_v15  ;;  %v3399_v31 = vunpack.i.l.bf16 %v3398_v15 }
0x2bac   :  { %v4656_v8 = vpop.permute.xlu0 %3407 }
0x2bb0   :  { %v3418_v33 = vpop.permute.xlu0 %3417 }
0x2bb1   :  { %v3420_v30 = vunpack.i.h.bf16 %v3418_v33  ;;  %v3419_v60 = vunpack.i.l.bf16 %v3418_v33 }
0x2bb3   :  { %v2795_v53 = vsel %vm327_vm2, %v3389_v29, %v3419_v60  ;;  %v2796_v39 = vsel %vm327_vm2, %v3390_v56, %v3420_v30  ;;  %v3380_v56 = vunpack.i.h.bf16 %v4650_v38  ;;  %v3379_v29 = vunpack.i.l.bf16 %v4650_v38 }
0x2bb4   :  { %v3006_v11 = vpack.c.bf16 %v2795_v53, %v2795_v53  ;;  %v3007_v54 = vpack.c.bf16 %v2796_v39, %v2796_v39  ;;  %v3428_v49 = vpop.permute.xlu0 %3427 }
0x2bb5   :  { %v3430_v1 = vunpack.i.h.bf16 %v3428_v49  ;;  %v3429_v2 = vunpack.i.l.bf16 %v3428_v49 }
0x2bb6   :  { %2876 = vst.msk [vmem:[%s4752_s4 + $0x10] sm:$0xf] %vm2871_vm3, %v3006_v11  ;;  %2877 = vst.msk [vmem:[%s4752_s4 + $0x14] sm:$0xf] %vm2871_vm3, %v3007_v54 }
0x2bb7   :  { %v2799_v51 = vsel %vm327_vm2, %v3399_v31, %v3429_v2  ;;  %v2800_v0 = vsel %vm327_vm2, %v3400_v48, %v3430_v1  ;;  %v3410_v48 = vunpack.i.h.bf16 %v4656_v8  ;;  %v3409_v31 = vunpack.i.l.bf16 %v4656_v8 }
0x2bb8   :  { %v3010_v44 = vpack.c.bf16 %v2799_v51, %v2799_v51  ;;  %v3011_v25 = vpack.c.bf16 %v2800_v0, %v2800_v0 }
0x2bba   :  { %2880 = vst.msk [vmem:[%s4752_s4 + $0x20] sm:$0xf] %vm2871_vm3, %v3010_v44  ;;  %2881 = vst.msk [vmem:[%s4752_s4 + $0x24] sm:$0xf] %vm2871_vm3, %v3011_v25 }
0x2bd7   :  { %v2660_v12 = vpop.permute.xlu1 %2659 }
0x2bd8   :  { %v2662_v52 = vmul.f32 %v4605_v28, %v2660_v12 }
0x2bda   :  { %v3441_v17 = vpack.i.bf16 %v4593_v57, %v2662_v52 }
0x2bdb   :  { %v3383_v10 = vpop.permute.xlu1 %3382 }
0x2bdc   :  { %3442 = vrot.lane.b32.xlu0 %v3441_v17, %s3749_s2  ;;  %v3385_v26 = vunpack.i.h.bf16 %v3383_v10  ;;  %v3384_v32 = vunpack.i.l.bf16 %v3383_v10 }
0x2bdf   :  { %v3393_v41 = vpop.permute.xlu1 %3392 }
0x2be0   :  { %3447 = vrot.lane.b32.xlu0 %v3446_v50, %s3749_s2  ;;  %v3395_v21 = vunpack.i.h.bf16 %v3393_v41  ;;  %v3394_v46 = vunpack.i.l.bf16 %v3393_v41 }
0x2be3   :  { %v3403_v7 = vpop.permute.xlu1 %3402 }
0x2be4   :  { %v3405_v37 = vunpack.i.h.bf16 %v3403_v7  ;;  %v3404_v20 = vunpack.i.l.bf16 %v3403_v7 }
0x2be7   :  { %v3413_v13 = vpop.permute.xlu1 %3412 }
0x2be8   :  { %v3415_v36 = vunpack.i.h.bf16 %v3413_v13  ;;  %v3414_v5 = vunpack.i.l.bf16 %v3413_v13 }
0x2bea   :  { %v2794_v45 = vsel %vm327_vm2, %v3385_v26, %v3415_v36  ;;  %v2793_v28 = vsel %vm327_vm2, %v3384_v32, %v3414_v5 }
0x2beb   :  { %v3005_v57 = vpack.c.bf16 %v2794_v45, %v2794_v45  ;;  %v3004_v63 = vpack.c.bf16 %v2793_v28, %v2793_v28  ;;  %v3423_v27 = vpop.permute.xlu1 %3422 }
0x2bec   :  { %v3425_v18 = vunpack.i.h.bf16 %v3423_v27  ;;  %v3424_v47 = vunpack.i.l.bf16 %v3423_v27 }
0x2bed   :  { %2875 = vst.msk [vmem:[%s4752_s4 + $0xc] sm:$0xf] %vm2871_vm3, %v3005_v57  ;;  %2874 = vst.msk [vmem:[%s4752_s4 + $0x8] sm:$0xf] %vm2871_vm3, %v3004_v63 }
0x2bee   :  { %v2798_v40 = vsel %vm327_vm2, %v3395_v21, %v3425_v18  ;;  %v2797_v35 = vsel %vm327_vm2, %v3394_v46, %v3424_v47 }
0x2bef   :  { %v3009_v9 = vpack.c.bf16 %v2798_v40, %v2798_v40  ;;  %v3008_v61 = vpack.c.bf16 %v2797_v35, %v2797_v35  ;;  %v3433_v22 = vpop.permute.xlu1 %3432 }
0x2bf0   :  { %v3435_v34 = vunpack.i.h.bf16 %v3433_v22  ;;  %v3434_v4 = vunpack.i.l.bf16 %v3433_v22 }
0x2bf1   :  { %2879 = vst.msk [vmem:[%s4752_s4 + $0x1c] sm:$0xf] %vm2871_vm3, %v3009_v9  ;;  %2878 = vst.msk [vmem:[%s4752_s4 + $0x18] sm:$0xf] %vm2871_vm3, %v3008_v61 }
0x2bf2   :  { %v2801_v6 = vsel %vm327_vm2, %v3404_v20, %v3434_v4  ;;  %v2802_v24 = vsel %vm327_vm2, %v3405_v37, %v3435_v34 }
0x2bf3   :  { %v3012_v3 = vpack.c.bf16 %v2801_v6, %v2801_v6  ;;  %v3013_v62 = vpack.c.bf16 %v2802_v24, %v2802_v24 }
0x2bf5   :  { %2882 = vst.msk [vmem:[%s4752_s4 + $0x28] sm:$0xf] %vm2871_vm3, %v3012_v3  ;;  %2883 = vst.msk [vmem:[%s4752_s4 + $0x2c] sm:$0xf] %vm2871_vm3, %v3013_v62 }
0x2c13   :  { %v3438_v23 = vpop.permute.xlu1 %3437 }
0x2c14   :  { %v3440_v55 = vunpack.i.h.bf16 %v3438_v23  ;;  %v3439_v42 = vunpack.i.l.bf16 %v3438_v23 }
0x2c17   :  { %v3453_v19 = vpop.permute.xlu1 %3452 }
0x2c18   :  { %v3455_v16 = vunpack.i.h.bf16 %v3453_v19  ;;  %v3454_v43 = vunpack.i.l.bf16 %v3453_v19 }
0x2c1a   :  { %v2805_v59 = vsel %vm327_vm2, %v3439_v42, %v3454_v43  ;;  %v2806_v14 = vsel %vm327_vm2, %v3440_v55, %v3455_v16 }
0x2c1b   :  { %v3016_v58 = vpack.c.bf16 %v2805_v59, %v2805_v59  ;;  %v3017_v15 = vpack.c.bf16 %v2806_v14, %v2806_v14 }
0x2c1d   :  { %2886 = vst.msk [vmem:[%s4752_s4 + $0x38] sm:$0xf] %vm2871_vm3, %v3016_v58  ;;  %2887 = vst.msk [vmem:[%s4752_s4 + $0x3c] sm:$0xf] %vm2871_vm3, %v3017_v15 }
0x2c4e   :  { %v3443_v33 = vpop.permute.xlu0 %3442 }
0x2c4f   :  { %v3445_v30 = vunpack.i.h.bf16 %v3443_v33  ;;  %v3444_v60 = vunpack.i.l.bf16 %v3443_v33 }
0x2c51   :  { %v2791_v53 = vsel %vm327_vm2, %v3379_v29, %v3444_v60  ;;  %v2792_v39 = vsel %vm327_vm2, %v3380_v56, %v3445_v30 }
0x2c52   :  { %v3002_v11 = vpack.c.bf16 %v2791_v53, %v2791_v53  ;;  %v3003_v54 = vpack.c.bf16 %v2792_v39, %v2792_v39  ;;  %v3448_v49 = vpop.permute.xlu0 %3447 }
0x2c53   :  { %v3450_v1 = vunpack.i.h.bf16 %v3448_v49  ;;  %v3449_v2 = vunpack.i.l.bf16 %v3448_v49 }
0x2c54   :  { %2872 = vst.msk [vmem:[%s4752_s4] sm:$0xf] %vm2871_vm3, %v3002_v11  ;;  %2873 = vst.msk [vmem:[%s4752_s4 + $0x4] sm:$0xf] %vm2871_vm3, %v3003_v54 }
0x2c55   :  { %v2803_v38 = vsel %vm327_vm2, %v3409_v31, %v3449_v2  ;;  %v2804_v51 = vsel %vm327_vm2, %v3410_v48, %v3450_v1 }
0x2c56   :  { %v3014_v0 = vpack.c.bf16 %v2803_v38, %v2803_v38  ;;  %v3015_v44 = vpack.c.bf16 %v2804_v51, %v2804_v51 }
0x2c58   :  { %2884 = vst.msk [vmem:[%s4752_s4 + $0x30] sm:$0xf] %vm2871_vm3, %v3014_v0  ;;  %2885 = vst.msk [vmem:[%s4752_s4 + $0x34] sm:$0xf] %vm2871_vm3, %v3015_v44 }

// kernel: lstm_cnn_forward.5
= control target key start
LH: loop header
LB: loop body
LE: loop exit
PB: predicated region body
PF: predicated region fallthrough
CT: control target
= control target key end

     0   :  { %v3307_v0 = vmov 0.0   ;;  %vm3308_vm0 = vmmov 0   ;;  %vm131_vm1 = vcmask 523264   ;;  %s3309_s30 = smov 32   ;;  %s3310_s24 = smov 64   ;;  %vm2057_vm2 = vcmask 261120   ;;  %s4205_s1 = inlined_call_operand.vmem [shape: bf16[3,64,32], index: 1, kind: input, shape index: {}]   ;;  %s4206_s0 = inlined_call_operand.vmem [shape: bf16[128,64], index: 0, kind: input, shape index: {}]   ;;  %s4207_s3 = inlined_call_operand.vmem [shape: bf16[5,64,32], index: 3, kind: input, shape index: {}]   ;;  %s4208_s5 = inlined_call_operand.vmem [shape: bf16[7,64,32], index: 5, kind: input, shape index: {}]   ;;  %s4209_s2 = inlined_call_operand.vmem [shape: f32[1,32], index: 2, kind: input, shape index: {}]   ;;  %s4210_s4 = inlined_call_operand.vmem [shape: f32[1,32], index: 4, kind: input, shape index: {}]   ;;  %s4211_s7 = inlined_call_operand.vmem [shape: bf16[96,128], index: 7, kind: input, shape index: {}]   ;;  %s4212_s6 = inlined_call_operand.vmem [shape: f32[1,32], index: 6, kind: input, shape index: {}]   ;;  %s4213_s9 = inlined_call_operand.vmem [shape: bf16[128,2], index: 9, kind: input, shape index: {}]   ;;  %s4214_s8 = inlined_call_operand.vmem [shape: f32[1,128], index: 8, kind: input, shape index: {}]   ;;  %s4215_s10 = inlined_call_operand.vmem [shape: f32[1,2], index: 10, kind: input, shape index: {}]   ;;  %s4216_s11 = inlined_call_operand.vmem [shape: f32[8,2], index: 11, kind: output, shape index: {}]  }
   0x1   :  { %2718 = vmatprep.subr.bf16.mxu0 %v3307_v0  ;;  %2754 = vmatprep.subr.bf16.mxu1 %v3307_v0  ;;  %v3218_v1 = vld [vmem:[%s4205_s1 + $0x20] sm:$0xff]   ;;  %v3220_v3 = vld [vmem:[%s4205_s1 + $0x28] sm:$0xff]   ;;  %v3222_v5 = vld [vmem:[%s4205_s1 + $0x30] sm:$0xff]   ;;  %vm2116_vm3 = vcmask 785408   ;;  %vm2273_vm4 = vcmask 15360  }
   0x2   :  { %v3219_v2 = vld [vmem:[%s4205_s1] sm:$0xff]   ;;  %2726 = vmatprep.mubr.msk.bf16.mxu0 %vm3308_vm0, %v3307_v0  ;;  %2762 = vmatprep.mubr.msk.bf16.mxu1 %vm3308_vm0, %v3307_v0  ;;  %v3221_v4 = vld [vmem:[%s4205_s1 + $0x8] sm:$0xff]   ;;  %v3223_v6 = vld [vmem:[%s4205_s1 + $0x10] sm:$0xff]  }
   0x3   :  { %2719 = vmatpush3.bf16.msra.mxu0 %v3218_v1  ;;  %2755 = vmatpush3.bf16.msra.mxu1 %v3219_v2  ;;  %v3224_v7 = vld [vmem:[%s4205_s1 + $0x38] sm:$0xff]   ;;  %v40_v9 = vld [vmem:[%s4206_s0 + $0x4] sm:$0xf]  ;;  %v41_v10 = vld [vmem:[%s4206_s0 + $0x8] sm:$0xf] }
   0x4   :  { %2720 = vmatprep.subr.bf16.mxu0 %v3307_v0  ;;  %2756 = vmatprep.subr.bf16.mxu1 %v3307_v0  ;;  %v3225_v8 = vld [vmem:[%s4205_s1 + $0x18] sm:$0xff]   ;;  %v39_v11 = vld [vmem:[%s4206_s0] sm:$0xf]  ;;  %v3421_v13 = vcombine.low %v40_v9, %v41_v10  ;;  %v42_v16 = vld [vmem:[%s4206_s0 + $0xc] sm:$0xf] }
   0x5   :  { %v3419_v12 = vld [vmem:[%s4207_s3 + $0x20] sm:$0xff]   ;;  %v3423_v14 = vcombine.low %v39_v11, %v40_v9  ;;  %v43_v17 = vld [vmem:[%s4206_s0 + $0x10] sm:$0xf]  ;;  %v3441_v18 = vld [vmem:[%s4207_s3 + $0x28] sm:$0xff]   ;;  %v3462_v22 = vcombine.low %v41_v10, %v42_v16 }
   0x6   :  { %v3233_v15 = vld [vmem:[%s4205_s1 + $0x40] sm:$0xff]   ;;  %v3235_v19 = vld [vmem:[%s4205_s1 + $0x48] sm:$0xff]   ;;  %v3457_v20 = vld [vmem:[%s4207_s3 + $0x30] sm:$0xff]   ;;  %v3459_v21 = vcombine.low %v42_v16, %v43_v17 }
   0x7   :  { %2721 = vmatpush3.bf16.msra.mxu0 %v3220_v3  ;;  %2757 = vmatpush3.bf16.msra.mxu1 %v3221_v4  ;;  %v3238_v23 = vld [vmem:[%s4205_s1 + $0x50] sm:$0xff]   ;;  %v3478_v25 = vld [vmem:[%s4207_s3 + $0x38] sm:$0xff]   ;;  %v3248_v29 = vld [vmem:[%s4207_s3] sm:$0xff]  }
   0x8   :  { %2722 = vmatprep.subr.bf16.mxu0 %v3307_v0  ;;  %2758 = vmatprep.subr.bf16.mxu1 %v3307_v0  ;;  %v44_v24 = vld [vmem:[%s4206_s0 + $0x14] sm:$0xf]  ;;  %v45_v26 = vld [vmem:[%s4206_s0 + $0x18] sm:$0xf]  ;;  %v46_v31 = vld [vmem:[%s4206_s0 + $0x1c] sm:$0xf] }
   0x9   :  { %v3244_v27 = vld [vmem:[%s4205_s1 + $0x58] sm:$0xff]   ;;  %v3494_v28 = vcombine.low %v44_v24, %v45_v26  ;;  %v3500_v30 = vcombine.low %v43_v17, %v44_v24  ;;  %v47_v32 = vld [vmem:[%s4206_s0 + $0x20] sm:$0xf]  ;;  %v3520_v34 = vcombine.low %v45_v26, %v46_v31  ;;  %v48_v35 = vld [vmem:[%s4206_s0 + $0x24] sm:$0xf] }
   0xa   :  { %v3518_v33 = vcombine.low %v46_v31, %v47_v32  ;;  %v49_v36 = vld [vmem:[%s4206_s0 + $0x28] sm:$0xf]  ;;  %v3538_v38 = vcombine.low %v47_v32, %v48_v35  ;;  %v50_v39 = vld [vmem:[%s4206_s0 + $0x2c] sm:$0xf]  ;;  %v51_v40 = vld [vmem:[%s4206_s0 + $0x30] sm:$0xf] }
   0xb   :  { %2723 = vmatpush3.bf16.msra.mxu0 %v3222_v5  ;;  %2759 = vmatpush3.bf16.msra.mxu1 %v3223_v6  ;;  %v3536_v37 = vcombine.low %v48_v35, %v49_v36  ;;  %v3554_v41 = vcombine.low %v50_v39, %v51_v40  ;;  %v3556_v42 = vcombine.low %v49_v36, %v50_v39  ;;  %v52_v43 = vld [vmem:[%s4206_s0 + $0x34] sm:$0xf]  ;;  %v3570_v44 = vld [vmem:[%s4206_s0 + $0x38] sm:$0xf]  ;;  %v3249_v47 = vld [vmem:[%s4207_s3 + $0x8] sm:$0xff]  }
   0xc   :  { %2724 = vmatprep.subr.bf16.mxu0 %v3307_v0  ;;  %2760 = vmatprep.subr.bf16.mxu1 %v3307_v0  ;;  %v3575_v45 = vcombine.low %v52_v43, %v3570_v44  ;;  %v3577_v46 = vcombine.low %v51_v40, %v52_v43  ;;  %v3250_v48 = vld [vmem:[%s4207_s3 + $0x10] sm:$0xff]   ;;  %v3251_v49 = vld [vmem:[%s4207_s3 + $0x18] sm:$0xff]   ;;  %v3252_v50 = vld [vmem:[%s4207_s3 + $0x40] sm:$0xff]  }
   0xd   :  { %v3253_v51 = vld [vmem:[%s4207_s3 + $0x48] sm:$0xff]   ;;  %v3254_v52 = vld [vmem:[%s4207_s3 + $0x50] sm:$0xff]   ;;  %v3255_v53 = vld [vmem:[%s4207_s3 + $0x58] sm:$0xff]  }
   0xe   :  { %v3256_v54 = vld [vmem:[%s4207_s3 + $0x60] sm:$0xff]   ;;  %v3257_v55 = vld [vmem:[%s4207_s3 + $0x68] sm:$0xff]   ;;  %v54_v56 = vld [vmem:[%s4206_s0 + $0x3c] sm:$0xf] }
   0xf   :  { %2725 = vmatpush3.bf16.msra.mxu0 %v3224_v7  ;;  %2761 = vmatpush3.bf16.msra.mxu1 %v3225_v8  ;;  %v3259_v57 = vld [vmem:[%s4207_s3 + $0x70] sm:$0xff]   ;;  %v3677_v58 = vcombine.low %v3570_v44, %v54_v56  ;;  %v3261_v59 = vld [vmem:[%s4207_s3 + $0x78] sm:$0xff]   ;;  %v3264_v60 = vld [vmem:[%s4207_s3 + $0x80] sm:$0xff]  }
  0x10   :  { %2790 = vmatprep.subr.bf16.mxu0 %v3307_v0  ;;  %3158 = vmatprep.subr.bf16.mxu1 %v3419_v12  ;;  %v3260_v61 = vld [vmem:[%s4208_s5 + $0x20] sm:$0xff]   ;;  %v3262_v62 = vld [vmem:[%s4208_s5 + $0x28] sm:$0xff]   ;;  %v3263_v63 = vld [vmem:[%s4208_s5 + $0x30] sm:$0xff]  }
  0x11   :  { %v3266_v1 = vld [vmem:[%s4207_s3 + $0x88] sm:$0xff]   ;;  %v3265_v2 = vld [vmem:[%s4208_s5 + $0x38] sm:$0xff]   ;;  %v3268_v3 = vld [vmem:[%s4207_s3 + $0x90] sm:$0xff]  }
  0x12   :  { %2727 = vmatmul.mubr.msk.bf16.vlgmr.msra.gmra.mrb[0].mxu0 %vm131_vm1, %v3421_v13  ;;  %2763 = vmatmul.mubr.msk.bf16.vlgmr.msra.gmra.mrb[0].mxu1 %vm131_vm1, %v3423_v14  ;;  %v3267_v4 = vld [vmem:[%s4208_s5] sm:$0xff]   ;;  %v3270_v5 = vld [vmem:[%s4207_s3 + $0x98] sm:$0xff]   ;;  %v3269_v6 = vld [vmem:[%s4208_s5 + $0x8] sm:$0xff]  }
  0x13   :  { %2791 = vmatpush3.bf16.msra.mxu0 %v3233_v15  ;;  %3162 = vmatpush3.bf16.msra.mxu1 %v3419_v12  ;;  %v3272_v7 = vld [vmem:[%s4208_s5 + $0x10] sm:$0xff]   ;;  %v3274_v8 = vld [vmem:[%s4208_s5 + $0x18] sm:$0xff]   ;;  %v3271_v9 = vld [vmem:[%s4208_s5 + $0x40] sm:$0xff]  }
  0x14   :  { %2730 = vmatprep.mubr.msk.bf16.mxu0 %vm3308_vm0, %v3307_v0  ;;  %2766 = vmatprep.mubr.msk.bf16.mxu1 %vm3308_vm0, %v3307_v0  ;;  %v3273_v10 = vld [vmem:[%s4208_s5 + $0x48] sm:$0xff]   ;;  %v3275_v11 = vld [vmem:[%s4208_s5 + $0x50] sm:$0xff]   ;;  %v3278_v15 = vld [vmem:[%s4208_s5 + $0x80] sm:$0xff]  }
  0x15   :  { %2792 = vmatprep.subr.bf16.mxu0 %v3307_v0  ;;  %3159 = vmatprep.subr.bf16.mxu1 %v3441_v18  ;;  %v3279_v16 = vld [vmem:[%s4208_s5 + $0x68] sm:$0xff]   ;;  %v3289_v36 = vld [vmem:[%s4208_s5 + $0xb0] sm:$0xff]   ;;  %v3291_v44 = vld [vmem:[%s4208_s5 + $0xb8] sm:$0xff]  }
  0x16   :  { %v3280_v17 = vld [vmem:[%s4208_s5 + $0x88] sm:$0xff]   ;;  %v3290_v43 = vld [vmem:[%s4208_s5 + $0xd0] sm:$0xff]  }
  0x17   :  { %2793 = vmatpush3.bf16.msra.mxu0 %v3235_v19  ;;  %3163 = vmatpush3.bf16.msra.mxu1 %v3441_v18  ;;  %v3283_v19 = vld [vmem:[%s4208_s5 + $0x78] sm:$0xff]   ;;  %v3287_v24 = vld [vmem:[%s4208_s5 + $0xa8] sm:$0xff]  }
  0x18   :  { %2794 = vmatprep.subr.bf16.mxu0 %v3307_v0  ;;  %3160 = vmatprep.subr.bf16.mxu1 %v3457_v20 }
  0x1a   :  { %2731 = vmatmul.mubr.msk.bf16.gmra.mrb[4].mxu0 %vm131_vm1, %v3459_v21  ;;  %2767 = vmatmul.mubr.msk.bf16.gmra.mrb[4].mxu1 %vm131_vm1, %v3462_v22 }
  0x1b   :  { %2734 = vmatprep.mubr.msk.bf16.mxu0 %vm3308_vm0, %v3307_v0  ;;  %2770 = vmatprep.mubr.msk.bf16.mxu1 %vm3308_vm0, %v3307_v0 }
  0x1c   :  { %2795 = vmatpush3.bf16.msra.mxu0 %v3238_v23  ;;  %3164 = vmatpush3.bf16.msra.mxu1 %v3457_v20  ;;  %v3286_v23 = vld [vmem:[%s4208_s5 + $0xc0] sm:$0xff]  }
  0x1d   :  { %2796 = vmatprep.subr.bf16.mxu0 %v3307_v0  ;;  %3161 = vmatprep.subr.bf16.mxu1 %v3478_v25 }
  0x20   :  { %2797 = vmatpush3.bf16.msra.mxu0 %v3244_v27  ;;  %3165 = vmatpush3.bf16.msra.mxu1 %v3478_v25 }
  0x21   :  { %2826 = vmatprep.subr.bf16.mxu0 %v3419_v12  ;;  %2846 = vmatprep.subr.bf16.mxu1 %v3248_v29 }
  0x22   :  { %2735 = vmatmul.mubr.msk.bf16.gmra.mrb[8].mxu0 %vm131_vm1, %v3494_v28  ;;  %2771 = vmatmul.mubr.msk.bf16.gmra.mrb[8].mxu1 %vm131_vm1, %v3500_v30 }
  0x23   :  { %2738 = vmatprep.mubr.msk.bf16.mxu0 %vm3308_vm0, %v3307_v0  ;;  %2774 = vmatprep.mubr.msk.bf16.mxu1 %vm3308_vm0, %v3307_v0 }
  0x2a   :  { %2739 = vmatmul.mubr.msk.bf16.gmra.mrb[12].mxu0 %vm131_vm1, %v3518_v33  ;;  %2775 = vmatmul.mubr.msk.bf16.gmra.mrb[12].mxu1 %vm131_vm1, %v3520_v34 }
  0x2b   :  { %2742 = vmatprep.mubr.msk.bf16.mxu0 %vm3308_vm0, %v3307_v0  ;;  %2778 = vmatprep.mubr.msk.bf16.mxu1 %vm3308_vm0, %v3307_v0 }
  0x32   :  { %2743 = vmatmul.mubr.msk.bf16.gmra.mrb[16].mxu0 %vm131_vm1, %v3536_v37  ;;  %2779 = vmatmul.mubr.msk.bf16.gmra.mrb[16].mxu1 %vm131_vm1, %v3538_v38 }
  0x33   :  { %2746 = vmatprep.mubr.msk.bf16.mxu0 %vm3308_vm0, %v3307_v0  ;;  %2782 = vmatprep.mubr.msk.bf16.mxu1 %vm3308_vm0, %v3307_v0 }
  0x3a   :  { %2747 = vmatmul.mubr.msk.bf16.gmra.mrb[20].mxu0 %vm131_vm1, %v3554_v41  ;;  %2783 = vmatmul.mubr.msk.bf16.gmra.mrb[20].mxu1 %vm131_vm1, %v3556_v42 }
  0x3b   :  { %2750 = vmatprep.mubr.msk.bf16.mxu0 %vm3308_vm0, %v3307_v0  ;;  %2786 = vmatprep.mubr.msk.bf16.mxu1 %vm3308_vm0, %v3307_v0 }
  0x42   :  { %2751 = vmatmul.mubr.msk.bf16.gmra.mrb[24].mxu0 %vm131_vm1, %v3575_v45  ;;  %2787 = vmatmul.mubr.msk.bf16.gmra.mrb[24].mxu1 %vm131_vm1, %v3577_v46 }
  0x43   :  { %2798 = vmatprep.mubr.msk.bf16.mxu0 %vm3308_vm0, %v3307_v0  ;;  %2838 = vmatprep.mubr.msk.bf16.mxu1 %vm131_vm1, %v3494_v28 }
  0x4a   :  { %2799 = vmatmul.mubr.msk.bf16.vlgmr.msra.gmra.mrb[28].mxu0 %vm131_vm1, %v3462_v22  ;;  %2839 = vmatmul.mubr.msk.bf16.vlgmr.msra.gmra.mrb[28].mxu1 %vm131_vm1, %v3518_v33 }
  0x4b   :  { %2827 = vmatpush3.bf16.msra.mxu0 %v3419_v12  ;;  %2847 = vmatpush3.bf16.msra.mxu1 %v3248_v29  ;;  %v3276_v12 = vld [vmem:[%s4208_s5 + $0x58] sm:$0xff]  }
  0x4c   :  { %2802 = vmatprep.mubr.msk.bf16.mxu0 %vm3308_vm0, %v3307_v0  ;;  %2848 = vmatprep.subr.bf16.mxu1 %v3249_v47 }
  0x4d   :  { %2842 = vmatprep.mubr.msk.bf16.mxu1 %vm131_vm1, %v3536_v37  ;;  %2828 = vmatprep.subr.bf16.mxu0 %v3441_v18 }
  0x4f   :  { %2829 = vmatpush3.bf16.msra.mxu0 %v3441_v18  ;;  %2849 = vmatpush3.bf16.msra.mxu1 %v3249_v47  ;;  %v3282_v18 = vld [vmem:[%s4208_s5 + $0x90] sm:$0xff]  }
  0x50   :  { %2830 = vmatprep.subr.bf16.mxu0 %v3457_v20  ;;  %2850 = vmatprep.subr.bf16.mxu1 %v3250_v48 }
  0x52   :  { %2803 = vmatmul.mubr.msk.bf16.gmra.mrb[32].mxu0 %vm131_vm1, %v3500_v30  ;;  %2843 = vmatmul.mubr.msk.bf16.gmra.mrb[32].mxu1 %vm131_vm1, %v3554_v41 }
  0x53   :  { %2806 = vmatprep.mubr.msk.bf16.mxu0 %vm3308_vm0, %v3307_v0  ;;  %2851 = vmatpush3.bf16.msra.mxu1 %v3250_v48  ;;  %v3292_v48 = vld [vmem:[%s4208_s5 + $0xd8] sm:$0xff]  }
  0x54   :  { %2854 = vmatprep.mubr.msk.bf16.mxu1 %vm131_vm1, %v3423_v14  ;;  %2852 = vmatprep.subr.bf16.mxu1 %v3251_v49 }
  0x55   :  { %2831 = vmatpush3.bf16.msra.mxu0 %v3457_v20  ;;  %v3284_v20 = vld [vmem:[%s4208_s5 + $0x98] sm:$0xff]  }
  0x56   :  { %2832 = vmatprep.subr.bf16.mxu0 %v3478_v25 }
  0x57   :  { %2853 = vmatpush3.bf16.msra.mxu1 %v3251_v49 }
  0x58   :  { %2866 = vmatprep.subr.bf16.mxu1 %v3252_v50 }
  0x59   :  { %2833 = vmatpush3.bf16.msra.mxu0 %v3478_v25  ;;  %v3288_v25 = vld [vmem:[%s4208_s5 + $0xc8] sm:$0xff]  }
  0x5a   :  { %2807 = vmatmul.mubr.msk.bf16.gmra.mrb[36].mxu0 %vm131_vm1, %v3520_v34  ;;  %2926 = vmatprep.subr.bf16.mxu0 %v3307_v0 }
  0x5b   :  { %2855 = vmatmul.mubr.msk.bf16.vlgmr.msra.gmra.mrb[36].mxu1 %vm131_vm1, %v3462_v22  ;;  %2810 = vmatprep.mubr.msk.bf16.mxu0 %vm3308_vm0, %v3307_v0 }
  0x5c   :  { %2867 = vmatpush3.bf16.msra.mxu1 %v3252_v50  ;;  %2858 = vmatprep.mubr.msk.bf16.mxu1 %vm131_vm1, %v3500_v30 }
  0x5d   :  { %2868 = vmatprep.subr.bf16.mxu1 %v3253_v51 }
  0x60   :  { %2869 = vmatpush3.bf16.msra.mxu1 %v3253_v51 }
  0x61   :  { %2870 = vmatprep.subr.bf16.mxu1 %v3254_v52 }
  0x62   :  { %2811 = vmatmul.mubr.msk.bf16.gmra.mrb[40].mxu0 %vm131_vm1, %v3538_v38 }
  0x63   :  { %2859 = vmatmul.mubr.msk.bf16.gmra.mrb[28].mxu1 %vm131_vm1, %v3520_v34  ;;  %2814 = vmatprep.mubr.msk.bf16.mxu0 %vm3308_vm0, %v3307_v0 }
  0x64   :  { %2871 = vmatpush3.bf16.msra.mxu1 %v3254_v52  ;;  %2862 = vmatprep.mubr.msk.bf16.mxu1 %vm131_vm1, %v3538_v38 }
  0x65   :  { %2872 = vmatprep.subr.bf16.mxu1 %v3255_v53 }
  0x68   :  { %2873 = vmatpush3.bf16.msra.mxu1 %v3255_v53 }
  0x69   :  { %2886 = vmatprep.subr.bf16.mxu1 %v3256_v54 }
  0x6a   :  { %2815 = vmatmul.mubr.msk.bf16.gmra.mrb[44].mxu0 %vm131_vm1, %v3556_v42 }
  0x6b   :  { %2863 = vmatmul.mubr.msk.bf16.gmra.mrb[32].mxu1 %vm131_vm1, %v3556_v42  ;;  %2818 = vmatprep.mubr.msk.bf16.mxu0 %vm3308_vm0, %v3307_v0 }
  0x6c   :  { %2874 = vmatprep.mubr.msk.bf16.mxu1 %vm131_vm1, %v3462_v22 }
  0x72   :  { %2819 = vmatmul.mubr.msk.bf16.gmra.mrb[48].mxu0 %vm131_vm1, %v3577_v46 }
  0x73   :  { %2875 = vmatmul.mubr.msk.bf16.vlgmr.msra.gmra.mrb[36].mxu1 %vm131_vm1, %v3500_v30  ;;  %2822 = vmatprep.mubr.msk.bf16.mxu0 %vm3308_vm0, %v3307_v0 }
  0x74   :  { %2887 = vmatpush3.bf16.msra.mxu1 %v3256_v54  ;;  %2878 = vmatprep.mubr.msk.bf16.mxu1 %vm131_vm1, %v3520_v34 }
  0x75   :  { %2888 = vmatprep.subr.bf16.mxu1 %v3257_v55 }
  0x78   :  { %2889 = vmatpush3.bf16.msra.mxu1 %v3257_v55 }
  0x79   :  { %2890 = vmatprep.subr.bf16.mxu1 %v3259_v57 }
  0x7a   :  { %2823 = vmatmul.mubr.msk.bf16.gmra.mrb[52].mxu0 %vm131_vm1, %v3677_v58 }
  0x7b   :  { %2879 = vmatmul.mubr.msk.bf16.gmra.mrb[28].mxu1 %vm131_vm1, %v3538_v38  ;;  %2834 = vmatprep.mubr.msk.bf16.mxu0 %vm131_vm1, %v3421_v13 }
  0x7c   :  { %2891 = vmatpush3.bf16.msra.mxu1 %v3259_v57  ;;  %2882 = vmatprep.mubr.msk.bf16.mxu1 %vm131_vm1, %v3556_v42 }
  0x7d   :  { %2892 = vmatprep.subr.bf16.mxu1 %v3261_v59 }
  0x80   :  { %2893 = vmatpush3.bf16.msra.mxu1 %v3261_v59 }
  0x81   :  { %2906 = vmatprep.subr.bf16.mxu1 %v3264_v60 }
  0x82   :  { %2835 = vmatmul.mubr.msk.bf16.vlgmr.msra.gmra.mrb[56].mxu0 %vm131_vm1, %v3459_v21 }
  0x83   :  { %2883 = vmatmul.mubr.msk.bf16.gmra.mrb[32].mxu1 %vm131_vm1, %v3577_v46  ;;  %2927 = vmatpush3.bf16.msra.mxu0 %v3260_v61 }
  0x84   :  { %2928 = vmatprep.subr.bf16.mxu0 %v3307_v0  ;;  %2894 = vmatprep.mubr.msk.bf16.mxu1 %vm131_vm1, %v3459_v21 }
  0x85   :  { %2934 = vmatprep.mubr.msk.bf16.mxu0 %vm3308_vm0, %v3307_v0 }
  0x87   :  { %2929 = vmatpush3.bf16.msra.mxu0 %v3262_v62 }
  0x88   :  { %2930 = vmatprep.subr.bf16.mxu0 %v3307_v0 }
  0x8b   :  { %2895 = vmatmul.mubr.msk.bf16.vlgmr.msra.gmra.mrb[36].mxu1 %vm131_vm1, %v3494_v28  ;;  %2931 = vmatpush3.bf16.msra.mxu0 %v3263_v63 }
  0x8c   :  { %2907 = vmatpush3.bf16.msra.mxu1 %v3264_v60  ;;  %2932 = vmatprep.subr.bf16.mxu0 %v3307_v0 }
  0x8d   :  { %2898 = vmatprep.mubr.msk.bf16.mxu1 %vm131_vm1, %v3518_v33  ;;  %2908 = vmatprep.subr.bf16.mxu1 %v3266_v1 }
  0x8f   :  { %2933 = vmatpush3.bf16.msra.mxu0 %v3265_v2 }
  0x90   :  { %2954 = vmatprep.subr.bf16.mxu0 %v3307_v0  ;;  %2909 = vmatpush3.bf16.msra.mxu1 %v3266_v1 }
  0x91   :  { %2910 = vmatprep.subr.bf16.mxu1 %v3268_v3 }
  0x92   :  { %2935 = vmatmul.mubr.msk.bf16.vlgmr.msra.gmra.mrb[60].mxu0 %vm131_vm1, %v3421_v13  ;;  %v3277_v13 = vld [vmem:[%s4208_s5 + $0x60] sm:$0xff]  }
  0x93   :  { %2899 = vmatmul.mubr.msk.bf16.gmra.mrb[28].mxu1 %vm131_vm1, %v3536_v37  ;;  %2955 = vmatpush3.bf16.msra.mxu0 %v3267_v4 }
  0x94   :  { %2911 = vmatpush3.bf16.msra.mxu1 %v3268_v3  ;;  %2938 = vmatprep.mubr.msk.bf16.mxu0 %vm3308_vm0, %v3307_v0 }
  0x95   :  { %2902 = vmatprep.mubr.msk.bf16.mxu1 %vm131_vm1, %v3554_v41  ;;  %2956 = vmatprep.subr.bf16.mxu0 %v3307_v0 }
  0x96   :  { %2912 = vmatprep.subr.bf16.mxu1 %v3270_v5 }
  0x97   :  { %2957 = vmatpush3.bf16.msra.mxu0 %v3269_v6 }
  0x98   :  { %2913 = vmatpush3.bf16.msra.mxu1 %v3270_v5  ;;  %2958 = vmatprep.subr.bf16.mxu0 %v3307_v0 }
  0x99   :  { %2982 = vmatprep.subr.bf16.mxu1 %v3307_v0 }
  0x9a   :  { %2939 = vmatmul.mubr.msk.bf16.gmra.mrb[64].mxu0 %vm131_vm1, %v3459_v21 }
  0x9b   :  { %2903 = vmatmul.mubr.msk.bf16.gmra.mrb[32].mxu1 %vm131_vm1, %v3575_v45  ;;  %2942 = vmatprep.mubr.msk.bf16.mxu0 %vm3308_vm0, %v3307_v0 }
  0x9c   :  { %2914 = vmatprep.mubr.msk.bf16.mxu1 %vm131_vm1, %v3500_v30  ;;  %2959 = vmatpush3.bf16.msra.mxu0 %v3272_v7 }
  0x9d   :  { %2960 = vmatprep.subr.bf16.mxu0 %v3307_v0 }
  0xa0   :  { %2961 = vmatpush3.bf16.msra.mxu0 %v3274_v8 }
  0xa1   :  { %3010 = vmatprep.subr.bf16.mxu0 %v3307_v0 }
  0xa2   :  { %2943 = vmatmul.mubr.msk.bf16.gmra.mrb[68].mxu0 %vm131_vm1, %v3494_v28 }
  0xa3   :  { %2915 = vmatmul.mubr.msk.bf16.vlgmr.msra.gmra.mrb[36].mxu1 %vm131_vm1, %v3520_v34  ;;  %2946 = vmatprep.mubr.msk.bf16.mxu0 %vm3308_vm0, %v3307_v0 }
  0xa4   :  { %2983 = vmatpush3.bf16.msra.mxu1 %v3271_v9  ;;  %2918 = vmatprep.mubr.msk.bf16.mxu1 %vm131_vm1, %v3538_v38 }
  0xa5   :  { %2984 = vmatprep.subr.bf16.mxu1 %v3307_v0 }
  0xa8   :  { %2985 = vmatpush3.bf16.msra.mxu1 %v3273_v10 }
  0xa9   :  { %2986 = vmatprep.subr.bf16.mxu1 %v3307_v0 }
  0xaa   :  { %2947 = vmatmul.mubr.msk.bf16.gmra.mrb[72].mxu0 %vm131_vm1, %v3518_v33 }
  0xab   :  { %2919 = vmatmul.mubr.msk.bf16.gmra.mrb[28].mxu1 %vm131_vm1, %v3556_v42  ;;  %2950 = vmatprep.mubr.msk.bf16.mxu0 %vm3308_vm0, %v3307_v0 }
  0xac   :  { %2987 = vmatpush3.bf16.msra.mxu1 %v3275_v11  ;;  %2922 = vmatprep.mubr.msk.bf16.mxu1 %vm131_vm1, %v3577_v46 }
  0xad   :  { %2988 = vmatprep.subr.bf16.mxu1 %v3307_v0 }
  0xb0   :  { %2989 = vmatpush3.bf16.msra.mxu1 %v3276_v12 }
  0xb1   :  { %3038 = vmatprep.subr.bf16.mxu1 %v3307_v0 }
  0xb2   :  { %2951 = vmatmul.mubr.msk.bf16.gmra.mrb[76].mxu0 %vm131_vm1, %v3536_v37 }
  0xb3   :  { %2923 = vmatmul.mubr.msk.bf16.gmra.mrb[32].mxu1 %vm131_vm1, %v3677_v58  ;;  %2962 = vmatprep.mubr.msk.bf16.mxu0 %vm3308_vm0, %v3307_v0 }
  0xb4   :  { %2990 = vmatprep.mubr.msk.bf16.mxu1 %vm3308_vm0, %v3307_v0 }
  0xba   :  { %2963 = vmatmul.mubr.msk.bf16.vlgmr.msra.gmra.mrb[80].mxu0 %vm131_vm1, %v3423_v14  ;;  %v3281_v14 = vld [vmem:[%s4208_s5 + $0x70] sm:$0xff]  }
  0xbb   :  { %2991 = vmatmul.mubr.msk.bf16.vlgmr.msra.gmra.mrb[40].mxu1 %vm131_vm1, %v3462_v22  ;;  %3011 = vmatpush3.bf16.msra.mxu0 %v3277_v13 }
  0xbc   :  { %3039 = vmatpush3.bf16.msra.mxu1 %v3278_v15  ;;  %2966 = vmatprep.mubr.msk.bf16.mxu0 %vm3308_vm0, %v3307_v0 }
  0xbd   :  { %2994 = vmatprep.mubr.msk.bf16.mxu1 %vm3308_vm0, %v3307_v0  ;;  %3012 = vmatprep.subr.bf16.mxu0 %v3307_v0 }
  0xbe   :  { %3040 = vmatprep.subr.bf16.mxu1 %v3307_v0 }
  0xbf   :  { %3013 = vmatpush3.bf16.msra.mxu0 %v3279_v16 }
  0xc0   :  { %3041 = vmatpush3.bf16.msra.mxu1 %v3280_v17  ;;  %3014 = vmatprep.subr.bf16.mxu0 %v3307_v0 }
  0xc1   :  { %3042 = vmatprep.subr.bf16.mxu1 %v3307_v0 }
  0xc2   :  { %2967 = vmatmul.mubr.msk.bf16.gmra.mrb[84].mxu0 %vm131_vm1, %v3462_v22  ;;  %v3285_v22 = vld [vmem:[%s4208_s5 + $0xa0] sm:$0xff]  }
  0xc3   :  { %2995 = vmatmul.mubr.msk.bf16.gmra.mrb[44].mxu1 %vm131_vm1, %v3500_v30  ;;  %2970 = vmatprep.mubr.msk.bf16.mxu0 %vm3308_vm0, %v3307_v0 }
  0xc4   :  { %2998 = vmatprep.mubr.msk.bf16.mxu1 %vm3308_vm0, %v3307_v0  ;;  %3015 = vmatpush3.bf16.msra.mxu0 %v3281_v14 }
  0xc5   :  { %3043 = vmatpush3.bf16.msra.mxu1 %v3282_v18  ;;  %3016 = vmatprep.subr.bf16.mxu0 %v3307_v0 }
  0xc6   :  { %3044 = vmatprep.subr.bf16.mxu1 %v3307_v0 }
  0xc8   :  { %3017 = vmatpush3.bf16.msra.mxu0 %v3283_v19 }
  0xc9   :  { %3045 = vmatpush3.bf16.msra.mxu1 %v3284_v20  ;;  %3066 = vmatprep.subr.bf16.mxu0 %v3307_v0 }
  0xca   :  { %2971 = vmatmul.mubr.msk.bf16.gmra.mrb[88].mxu0 %vm131_vm1, %v3500_v30  ;;  %3094 = vmatprep.subr.bf16.mxu1 %v3307_v0 }
  0xcb   :  { %2999 = vmatmul.mubr.msk.bf16.gmra.mrb[48].mxu1 %vm131_vm1, %v3520_v34  ;;  %2974 = vmatprep.mubr.msk.bf16.mxu0 %vm3308_vm0, %v3307_v0 }
  0xcc   :  { %3002 = vmatprep.mubr.msk.bf16.mxu1 %vm3308_vm0, %v3307_v0 }
  0xd2   :  { %2975 = vmatmul.mubr.msk.bf16.gmra.mrb[92].mxu0 %vm131_vm1, %v3520_v34 }
  0xd3   :  { %3003 = vmatmul.mubr.msk.bf16.gmra.mrb[52].mxu1 %vm131_vm1, %v3538_v38  ;;  %2978 = vmatprep.mubr.msk.bf16.mxu0 %vm3308_vm0, %v3307_v0 }
  0xd4   :  { %3006 = vmatprep.mubr.msk.bf16.mxu1 %vm3308_vm0, %v3307_v0 }
  0xda   :  { %2979 = vmatmul.mubr.msk.bf16.gmra.mrb[96].mxu0 %vm131_vm1, %v3538_v38 }
  0xdb   :  { %3007 = vmatmul.mubr.msk.bf16.gmra.mrb[56].mxu1 %vm131_vm1, %v3556_v42  ;;  %3018 = vmatprep.mubr.msk.bf16.mxu0 %vm3308_vm0, %v3307_v0 }
  0xdc   :  { %3046 = vmatprep.mubr.msk.bf16.mxu1 %vm3308_vm0, %v3307_v0 }
  0xe2   :  { %3019 = vmatmul.mubr.msk.bf16.vlgmr.msra.gmra.mrb[100].mxu0 %vm131_vm1, %v3459_v21 }
  0xe3   :  { %3047 = vmatmul.mubr.msk.bf16.vlgmr.msra.gmra.mrb[60].mxu1 %vm131_vm1, %v3500_v30  ;;  %3067 = vmatpush3.bf16.msra.mxu0 %v3285_v22 }
  0xe4   :  { %3095 = vmatpush3.bf16.msra.mxu1 %v3286_v23  ;;  %3022 = vmatprep.mubr.msk.bf16.mxu0 %vm3308_vm0, %v3307_v0 }
  0xe5   :  { %v187_v26 = vpop.f32.mrb[0].mxu0  ;;  %3050 = vmatprep.mubr.msk.bf16.mxu1 %vm3308_vm0, %v3307_v0  ;;  %3068 = vmatprep.subr.bf16.mxu0 %v3307_v0  ;;  %v330_v21 = vpop.f32.mrb[0].mxu1 }
  0xe6   :  { %v2728_v27 = vpop.f32.mrb[1].mxu0  ;;  %3096 = vmatprep.subr.bf16.mxu1 %v3307_v0  ;;  %v3897_v29 = vadd.f32 %v330_v21, %v187_v26  ;;  %v2764_v30 = vpop.f32.mrb[1].mxu1 }
  0xe7   :  { %v190_v31 = vpop.f32.mrb[2].mxu0  ;;  %3069 = vmatpush3.bf16.msra.mxu0 %v3287_v24  ;;  %v333_v32 = vpop.f32.mrb[2].mxu1 }
  0xe8   :  { %v2729_v35 = vpop.f32.mrb[3].mxu0  ;;  %3097 = vmatpush3.bf16.msra.mxu1 %v3288_v25  ;;  %3070 = vmatprep.subr.bf16.mxu0 %v3307_v0  ;;  %v3903_v39 = vadd.f32 %v333_v32, %v190_v31  ;;  %v2765_v40 = vpop.f32.mrb[3].mxu1 }
  0xe9   :  { %3098 = vmatprep.subr.bf16.mxu1 %v3307_v0 }
  0xea   :  { %3023 = vmatmul.mubr.msk.bf16.gmra.mrb[104].mxu0 %vm131_vm1, %v3494_v28 }
  0xeb   :  { %3051 = vmatmul.mubr.msk.bf16.gmra.mrb[64].mxu1 %vm131_vm1, %v3520_v34  ;;  %3026 = vmatprep.mubr.msk.bf16.mxu0 %vm3308_vm0, %v3307_v0 }
  0xec   :  { %3054 = vmatprep.mubr.msk.bf16.mxu1 %vm3308_vm0, %v3307_v0  ;;  %3071 = vmatpush3.bf16.msra.mxu0 %v3289_v36 }
  0xed   :  { %v195_v47 = vpop.f32.mrb[4].mxu0  ;;  %3099 = vmatpush3.bf16.msra.mxu1 %v3290_v43  ;;  %3072 = vmatprep.subr.bf16.mxu0 %v3307_v0  ;;  %v338_v49 = vpop.f32.mrb[4].mxu1 }
  0xee   :  { %v2732_v50 = vpop.f32.mrb[5].mxu0  ;;  %3100 = vmatprep.subr.bf16.mxu1 %v3307_v0  ;;  %v3925_v51 = vadd.f32 %v338_v49, %v195_v47  ;;  %v2768_v52 = vpop.f32.mrb[5].mxu1 }
  0xef   :  { %v198_v53 = vpop.f32.mrb[6].mxu0  ;;  %v341_v54 = vpop.f32.mrb[6].mxu1 }
  0xf0   :  { %v2733_v55 = vpop.f32.mrb[7].mxu0  ;;  %3073 = vmatpush3.bf16.msra.mxu0 %v3291_v44  ;;  %v3927_v56 = vadd.f32 %v341_v54, %v198_v53  ;;  %v2769_v57 = vpop.f32.mrb[7].mxu1 }
  0xf1   :  { %3101 = vmatpush3.bf16.msra.mxu1 %v3292_v48  ;;  %3122 = vmatprep.subr.bf16.mxu0 %v3307_v0  ;;  %v4002_v55 = vld [vmem:[%s4209_s2] ss:$0 sm:$0xff] }
  0xf2   :  { %3027 = vmatmul.mubr.msk.bf16.gmra.mrb[108].mxu0 %vm131_vm1, %v3518_v33  ;;  %3138 = vmatprep.subr.bf16.mxu1 %v3307_v0 }
  0xf3   :  { %3055 = vmatmul.mubr.msk.bf16.gmra.mrb[68].mxu1 %vm131_vm1, %v3538_v38  ;;  %3030 = vmatprep.mubr.msk.bf16.mxu0 %vm3308_vm0, %v3307_v0 }
  0xf4   :  { %3058 = vmatprep.mubr.msk.bf16.mxu1 %vm3308_vm0, %v3307_v0 }
  0xf5   :  { %v203_v59 = vpop.f32.mrb[8].mxu0  ;;  %v346_v60 = vpop.f32.mrb[8].mxu1 }
  0xf6   :  { %v2736_v61 = vpop.f32.mrb[9].mxu0  ;;  %v3939_v62 = vadd.f32 %v346_v60, %v203_v59  ;;  %v2772_v63 = vpop.f32.mrb[9].mxu1 }
  0xf7   :  { %v206_v1 = vpop.f32.mrb[10].mxu0  ;;  %v349_v2 = vpop.f32.mrb[10].mxu1 }
  0xf8   :  { %v2737_v3 = vpop.f32.mrb[11].mxu0  ;;  %v3941_v4 = vadd.f32 %v349_v2, %v206_v1  ;;  %v2773_v5 = vpop.f32.mrb[11].mxu1 }
  0xfa   :  { %3031 = vmatmul.mubr.msk.bf16.gmra.mrb[112].mxu0 %vm131_vm1, %v3536_v37 }
  0xfb   :  { %3059 = vmatmul.mubr.msk.bf16.gmra.mrb[72].mxu1 %vm131_vm1, %v3556_v42  ;;  %3034 = vmatprep.mubr.msk.bf16.mxu0 %vm3308_vm0, %v3307_v0 }
  0xfc   :  { %3062 = vmatprep.mubr.msk.bf16.mxu1 %vm3308_vm0, %v3307_v0 }
  0xfd   :  { %v211_v6 = vpop.f32.mrb[12].mxu0  ;;  %v354_v7 = vpop.f32.mrb[12].mxu1 }
  0xfe   :  { %v2740_v8 = vpop.f32.mrb[13].mxu0  ;;  %v3951_v9 = vadd.f32 %v354_v7, %v211_v6  ;;  %v2776_v10 = vpop.f32.mrb[13].mxu1 }
  0xff   :  { %v214_v11 = vpop.f32.mrb[14].mxu0  ;;  %v357_v12 = vpop.f32.mrb[14].mxu1 }
 0x100   :  { %v2741_v13 = vpop.f32.mrb[15].mxu0  ;;  %v3953_v15 = vadd.f32 %v357_v12, %v214_v11  ;;  %v2777_v16 = vpop.f32.mrb[15].mxu1 }
 0x102   :  { %3035 = vmatmul.mubr.msk.bf16.gmra.mrb[116].mxu0 %vm131_vm1, %v3554_v41 }
 0x103   :  { %3063 = vmatmul.mubr.msk.bf16.gmra.mrb[76].mxu1 %vm131_vm1, %v3577_v46  ;;  %3074 = vmatprep.mubr.msk.bf16.mxu0 %vm3308_vm0, %v3307_v0 }
 0x104   :  { %3102 = vmatprep.mubr.msk.bf16.mxu1 %vm3308_vm0, %v3307_v0 }
 0x105   :  { %v219_v17 = vpop.f32.mrb[16].mxu0  ;;  %v362_v14 = vpop.f32.mrb[16].mxu1 }
 0x106   :  { %v2744_v18 = vpop.f32.mrb[17].mxu0  ;;  %v3963_v19 = vadd.f32 %v362_v14, %v219_v17  ;;  %v2780_v20 = vpop.f32.mrb[17].mxu1 }
 0x107   :  { %v222_v22 = vpop.f32.mrb[18].mxu0  ;;  %v365_v23 = vpop.f32.mrb[18].mxu1 }
 0x108   :  { %v2745_v24 = vpop.f32.mrb[19].mxu0  ;;  %v3965_v25 = vadd.f32 %v365_v23, %v222_v22  ;;  %v2781_v26 = vpop.f32.mrb[19].mxu1 }
 0x10a   :  { %3075 = vmatmul.mubr.msk.bf16.vlgmr.msra.gmra.mrb[120].mxu0 %vm131_vm1, %v3494_v28 }
 0x10b   :  { %3103 = vmatmul.mubr.msk.bf16.vlgmr.msra.gmra.mrb[80].mxu1 %vm131_vm1, %v3520_v34  ;;  %3078 = vmatprep.mubr.msk.bf16.mxu0 %vm3308_vm0, %v3307_v0 }
 0x10c   :  { %3106 = vmatprep.mubr.msk.bf16.mxu1 %vm3308_vm0, %v3307_v0 }
 0x10d   :  { %v227_v21 = vpop.f32.mrb[20].mxu0  ;;  %v370_v27 = vpop.f32.mrb[20].mxu1 }
 0x10e   :  { %v2748_v30 = vpop.f32.mrb[21].mxu0  ;;  %v3975_v31 = vadd.f32 %v370_v27, %v227_v21  ;;  %v2784_v32 = vpop.f32.mrb[21].mxu1 }
 0x10f   :  { %v230_v35 = vpop.f32.mrb[22].mxu0  ;;  %v373_v36 = vpop.f32.mrb[22].mxu1 }
 0x110   :  { %v2749_v40 = vpop.f32.mrb[23].mxu0  ;;  %v3977_v43 = vadd.f32 %v373_v36, %v230_v35  ;;  %v2785_v28 = vpop.f32.mrb[23].mxu1 }
 0x112   :  { %3079 = vmatmul.mubr.msk.bf16.gmra.mrb[124].mxu0 %vm131_vm1, %v3518_v33 }
 0x113   :  { %3107 = vmatmul.mubr.msk.bf16.gmra.mrb[84].mxu1 %vm131_vm1, %v3538_v38  ;;  %3082 = vmatprep.mubr.msk.bf16.mxu0 %vm3308_vm0, %v3307_v0 }
 0x114   :  { %3110 = vmatprep.mubr.msk.bf16.mxu1 %vm3308_vm0, %v3307_v0 }
 0x115   :  { %v235_v34 = vpop.f32.mrb[24].mxu0  ;;  %v378_v44 = vpop.f32.mrb[24].mxu1 }
 0x116   :  { %v2752_v47 = vpop.f32.mrb[25].mxu0  ;;  %v3987_v48 = vadd.f32 %v378_v44, %v235_v34  ;;  %v2788_v49 = vpop.f32.mrb[25].mxu1 }
 0x117   :  { %v238_v50 = vpop.f32.mrb[26].mxu0  ;;  %v381_v52 = vpop.f32.mrb[26].mxu1 }
 0x118   :  { %v2753_v53 = vpop.f32.mrb[27].mxu0  ;;  %v3989_v54 = vadd.f32 %v381_v52, %v238_v50  ;;  %v2789_v33 = vpop.f32.mrb[27].mxu1 }
 0x11a   :  { %3083 = vmatmul.mubr.msk.bf16.gmra.mrb[128].mxu0 %vm131_vm1, %v3536_v37 }
 0x11b   :  { %3111 = vmatmul.mubr.msk.bf16.gmra.mrb[88].mxu1 %vm131_vm1, %v3556_v42  ;;  %3086 = vmatprep.mubr.msk.bf16.mxu0 %vm3308_vm0, %v3307_v0 }
 0x11c   :  { %3114 = vmatprep.mubr.msk.bf16.mxu1 %vm3308_vm0, %v3307_v0 }
 0x11d   :  { %v458_v38 = vpop.f32.mrb[28].mxu0 }
 0x11e   :  { %v513_v57 = vadd.f32 %v458_v38, %v3897_v29  ;;  %v2800_v59 = vpop.f32.mrb[29].mxu0 }
 0x11f   :  { %v461_v60 = vpop.f32.mrb[30].mxu0 }
 0x120   :  { %v534_v37 = vadd.f32 %v4002_v55, %v513_v57  ;;  %v514_v42 = vadd.f32 %v461_v60, %v3903_v39  ;;  %v2801_v61 = vpop.f32.mrb[31].mxu0 }
 0x122   :  { %v535_v63 = vadd.f32 %v4002_v55, %v514_v42  ;;  %3087 = vmatmul.mubr.msk.bf16.gmra.mrb[132].mxu0 %vm131_vm1, %v3554_v41  ;;  %v548_v1 = vmax.f32 %v534_v37, 0.0 }
 0x123   :  { %3115 = vmatmul.mubr.msk.bf16.gmra.mrb[92].mxu1 %vm131_vm1, %v3577_v46  ;;  %3090 = vmatprep.mubr.msk.bf16.mxu0 %vm3308_vm0, %v3307_v0 }
 0x124   :  { %v549_v29 = vmax.f32 %v535_v63, 0.0  ;;  %3118 = vmatprep.mubr.msk.bf16.mxu1 %vm3308_vm0, %v3307_v0 }
 0x125   :  { %v466_v2 = vpop.f32.mrb[32].mxu0 }
 0x126   :  { %v562_v3 = vmax.f32 %v548_v1, %v549_v29  ;;  %v515_v39 = vadd.f32 %v466_v2, %v3925_v51  ;;  %v2804_v5 = vpop.f32.mrb[33].mxu0 }
 0x127   :  { %v469_v6 = vpop.f32.mrb[34].mxu0 }
 0x128   :  { %v536_v7 = vadd.f32 %v4002_v55, %v515_v39  ;;  %v516_v41 = vadd.f32 %v469_v6, %v3927_v56  ;;  %v2805_v8 = vpop.f32.mrb[35].mxu0 }
 0x12a   :  { %v537_v46 = vadd.f32 %v4002_v55, %v516_v41  ;;  %3091 = vmatmul.mubr.msk.bf16.gmra.mrb[136].mxu0 %vm131_vm1, %v3575_v45  ;;  %v550_v10 = vmax.f32 %v536_v7, 0.0 }
 0x12b   :  { %3119 = vmatmul.mubr.msk.bf16.gmra.mrb[96].mxu1 %vm131_vm1, %v3677_v58  ;;  %3134 = vmatprep.mubr.msk.bf16.mxu0 %vm3308_vm0, %v3307_v0 }
 0x12c   :  { %v551_v51 = vmax.f32 %v537_v46, 0.0  ;;  %3154 = vmatprep.mubr.msk.bf16.mxu1 %vm3308_vm0, %v3307_v0 }
 0x12d   :  { %v474_v11 = vpop.f32.mrb[36].mxu0 }
 0x12e   :  { %v563_v12 = vmax.f32 %v550_v10, %v551_v51  ;;  %v517_v56 = vadd.f32 %v474_v11, %v3939_v62  ;;  %v2808_v13 = vpop.f32.mrb[37].mxu0 }
 0x12f   :  { %v477_v16 = vpop.f32.mrb[38].mxu0 }
 0x130   :  { %v569_v17 = vmax.f32 %v562_v3, %v563_v12  ;;  %v538_v45 = vadd.f32 %v4002_v55, %v517_v56  ;;  %v518_v14 = vadd.f32 %v477_v16, %v3941_v4  ;;  %v2809_v58 = vpop.f32.mrb[39].mxu0 }
 0x132   :  { %v539_v18 = vadd.f32 %v4002_v55, %v518_v14  ;;  %v552_v20 = vmax.f32 %v538_v45, 0.0 }
 0x134   :  { %v553_v22 = vmax.f32 %v539_v18, 0.0 }
 0x135   :  { %v482_v23 = vpop.f32.mrb[40].mxu0 }
 0x136   :  { %v564_v24 = vmax.f32 %v552_v20, %v553_v22  ;;  %v519_v26 = vadd.f32 %v482_v23, %v3951_v9  ;;  %v2812_v21 = vpop.f32.mrb[41].mxu0 }
 0x137   :  { %v485_v27 = vpop.f32.mrb[42].mxu0 }
 0x138   :  { %v540_v62 = vadd.f32 %v4002_v55, %v519_v26  ;;  %v520_v30 = vadd.f32 %v485_v27, %v3953_v15  ;;  %v2813_v32 = vpop.f32.mrb[43].mxu0 }
 0x13a   :  { %v541_v35 = vadd.f32 %v4002_v55, %v520_v30  ;;  %v554_v36 = vmax.f32 %v540_v62, 0.0 }
 0x13c   :  { %v555_v4 = vmax.f32 %v541_v35, 0.0 }
 0x13d   :  { %v490_v40 = vpop.f32.mrb[44].mxu0 }
 0x13e   :  { %v565_v28 = vmax.f32 %v554_v36, %v555_v4  ;;  %v521_v34 = vadd.f32 %v490_v40, %v3963_v19  ;;  %v2816_v44 = vpop.f32.mrb[45].mxu0 }
 0x13f   :  { %v493_v47 = vpop.f32.mrb[46].mxu0 }
 0x140   :  { %v570_v49 = vmax.f32 %v564_v24, %v565_v28  ;;  %v542_v9 = vadd.f32 %v4002_v55, %v521_v34  ;;  %v522_v50 = vadd.f32 %v493_v47, %v3965_v25  ;;  %v2817_v52 = vpop.f32.mrb[47].mxu0  ;;  %v2426_v24 = vld [vmem:[%s4210_s4] ss:$0 sm:$0xff] }
 0x142   :  { %v543_v53 = vadd.f32 %v4002_v55, %v522_v50  ;;  %v4040_v15 = vmax.f32 %v569_v17, %v570_v49  ;;  %v556_v33 = vmax.f32 %v542_v9, 0.0 }
 0x144   :  { %v557_v38 = vmax.f32 %v543_v53, 0.0 }
 0x145   :  { %v498_v57 = vpop.f32.mrb[48].mxu0 }
 0x146   :  { %v566_v59 = vmax.f32 %v556_v33, %v557_v38  ;;  %v523_v60 = vadd.f32 %v498_v57, %v3975_v31  ;;  %v2820_v37 = vpop.f32.mrb[49].mxu0 }
 0x147   :  { %v501_v19 = vpop.f32.mrb[50].mxu0 }
 0x148   :  { %v544_v42 = vadd.f32 %v4002_v55, %v523_v60  ;;  %v524_v61 = vadd.f32 %v501_v19, %v3977_v43  ;;  %v2821_v63 = vpop.f32.mrb[51].mxu0 }
 0x14a   :  { %v545_v25 = vadd.f32 %v4002_v55, %v524_v61  ;;  %v558_v1 = vmax.f32 %v544_v42, 0.0 }
 0x14c   :  { %v559_v29 = vmax.f32 %v545_v25, 0.0 }
 0x14d   :  { %v506_v2 = vpop.f32.mrb[52].mxu0 }
 0x14e   :  { %v567_v3 = vmax.f32 %v558_v1, %v559_v29  ;;  %v525_v39 = vadd.f32 %v506_v2, %v3987_v48  ;;  %v2824_v5 = vpop.f32.mrb[53].mxu0 }
 0x14f   :  { %v509_v6 = vpop.f32.mrb[54].mxu0 }
 0x150   :  { %v571_v7 = vmax.f32 %v566_v59, %v567_v3  ;;  %v546_v31 = vadd.f32 %v4002_v55, %v525_v39  ;;  %v526_v41 = vadd.f32 %v509_v6, %v3989_v54  ;;  %v2825_v8 = vpop.f32.mrb[55].mxu0 }
 0x152   :  { %v547_v46 = vadd.f32 %v4002_v55, %v526_v41  ;;  %v560_v43 = vmax.f32 %v546_v31, 0.0 }
 0x154   :  { %v561_v10 = vmax.f32 %v547_v46, 0.0 }
 0x155   :  { %v2836_v51 = vpop.f32.mrb[56].mxu0 }
 0x156   :  { %v568_v11 = vmax.f32 %v560_v43, %v561_v10  ;;  %v650_v12 = vpop.f32.mrb[57].mxu0 }
 0x157   :  { %v2837_v56 = vpop.f32.mrb[58].mxu0 }
 0x158   :  { %v4050_v13 = vmax.f32 %v571_v7, %v568_v11  ;;  %v653_v16 = vpop.f32.mrb[59].mxu0 }
 0x15a   :  { %v574_v48 = vmax.f32 %v4040_v15, %v4050_v13 }
 0x165   :  { %v4054_v17 = vpop.f32.mrb[60].mxu0 }
 0x166   :  { %v2936_v45 = vpop.f32.mrb[61].mxu0 }
 0x167   :  { %v4056_v14 = vpop.f32.mrb[62].mxu0 }
 0x168   :  { %v2937_v54 = vpop.f32.mrb[63].mxu0 }
 0x16d   :  { %v4058_v58 = vpop.f32.mrb[64].mxu0 }
 0x16e   :  { %v2940_v55 = vpop.f32.mrb[65].mxu0 }
 0x16f   :  { %v4060_v18 = vpop.f32.mrb[66].mxu0 }
 0x170   :  { %v2941_v20 = vpop.f32.mrb[67].mxu0 }
 0x175   :  { %v4062_v22 = vpop.f32.mrb[68].mxu0 }
 0x176   :  { %v2916_v23 = vpop.f32.mrb[36].mxu1  ;;  %v2944_v26 = vpop.f32.mrb[69].mxu0 }
 0x177   :  { %v3166_v21 = vadd.f32 %v2916_v23, %v2836_v51  ;;  %v1121_v27 = vpop.f32.mrb[37].mxu1  ;;  %v4067_v62 = vpop.f32.mrb[70].mxu0 }
 0x178   :  { %v3167_v30 = vadd.f32 %v1121_v27, %v650_v12  ;;  %v2917_v32 = vpop.f32.mrb[38].mxu1  ;;  %v2945_v35 = vpop.f32.mrb[71].mxu0 }
 0x179   :  { %v1189_v36 = vadd.f32 %v3166_v21, %v2426_v24  ;;  %v3168_v4 = vadd.f32 %v2917_v32, %v2837_v56  ;;  %v1124_v40 = vpop.f32.mrb[39].mxu1  ;;  %v3293_v35 = vld [vmem:[%s4211_s7] sm:$0xff]  }
 0x17a   :  { %v1187_v28 = vadd.f32 %v3167_v30, %v2426_v24  ;;  %v3169_v34 = vadd.f32 %v1124_v40, %v653_v16  ;;  %3123 = vmatpush3.bf16.msra.mxu0 %v3293_v35 }
 0x17b   :  { %v1190_v44 = vadd.f32 %v3168_v4, %v2426_v24  ;;  %v1201_v49 = vmax.f32 %v1189_v36, 0.0  ;;  %3124 = vmatprep.subr.bf16.mxu0 %v3307_v0 }
 0x17c   :  { %v1188_v47 = vadd.f32 %v3169_v34, %v2426_v24  ;;  %v1199_v52 = vmax.f32 %v1187_v28, 0.0 }
 0x17d   :  { %v1202_v9 = vmax.f32 %v1190_v44, 0.0  ;;  %v4069_v50 = vpop.f32.mrb[72].mxu0 }
 0x17e   :  { %v1200_v53 = vmax.f32 %v1188_v47, 0.0  ;;  %v2920_v33 = vpop.f32.mrb[28].mxu1  ;;  %v2948_v38 = vpop.f32.mrb[73].mxu0 }
 0x17f   :  { %v1212_v57 = vmax.f32 %v1201_v49, %v1202_v9  ;;  %v1193_v59 = vadd.f32 %v2920_v33, %v2426_v24  ;;  %v1137_v60 = vpop.f32.mrb[29].mxu1  ;;  %v4071_v37 = vpop.f32.mrb[74].mxu0 }
 0x180   :  { %v1211_v19 = vmax.f32 %v1199_v52, %v1200_v53  ;;  %v1191_v42 = vadd.f32 %v2426_v24, %v1137_v60  ;;  %v2921_v61 = vpop.f32.mrb[30].mxu1  ;;  %v2949_v63 = vpop.f32.mrb[75].mxu0 }
 0x181   :  { %v1194_v25 = vadd.f32 %v2921_v61, %v2426_v24  ;;  %v1140_v1 = vpop.f32.mrb[31].mxu1  ;;  %v1205_v3 = vmax.f32 %v1193_v59, 0.0  ;;  %v3296_v63 = vld [vmem:[%s4211_s7 + $0x18] sm:$0xff]  }
 0x182   :  { %v1192_v29 = vadd.f32 %v2426_v24, %v1140_v1  ;;  %v1217_v2 = vmax.f32 %v1211_v19, %v1212_v57  ;;  %v1203_v5 = vmax.f32 %v1191_v42, 0.0  ;;  %v3295_v57 = vld [vmem:[%s4211_s7 + $0x10] sm:$0xff]  }
 0x183   :  { %v1206_v39 = vmax.f32 %v1194_v25, 0.0 }
 0x184   :  { %v1204_v6 = vmax.f32 %v1192_v29, 0.0 }
 0x185   :  { %v1214_v7 = vmax.f32 %v1205_v3, %v1206_v39  ;;  %v4073_v31 = vpop.f32.mrb[76].mxu0 }
 0x186   :  { %v1213_v41 = vmax.f32 %v1203_v5, %v1204_v6  ;;  %v2924_v8 = vpop.f32.mrb[32].mxu1  ;;  %v2952_v46 = vpop.f32.mrb[77].mxu0 }
 0x187   :  { %v1197_v43 = vadd.f32 %v2924_v8, %v2426_v24  ;;  %v1153_v10 = vpop.f32.mrb[33].mxu1  ;;  %v4075_v51 = vpop.f32.mrb[78].mxu0  ;;  %v3298_v46 = vld [vmem:[%s4211_s7 + $0x28] sm:$0xff]  }
 0x188   :  { %v1218_v11 = vmax.f32 %v1213_v41, %v1214_v7  ;;  %v1195_v12 = vadd.f32 %v2426_v24, %v1153_v10  ;;  %v2925_v56 = vpop.f32.mrb[34].mxu1  ;;  %v2953_v16 = vpop.f32.mrb[79].mxu0 }
 0x189   :  { %v1198_v45 = vadd.f32 %v2925_v56, %v2426_v24  ;;  %v1156_v54 = vpop.f32.mrb[35].mxu1  ;;  %v1209_v23 = vmax.f32 %v1197_v43, 0.0 }
 0x18a   :  { %v1196_v55 = vadd.f32 %v2426_v24, %v1156_v54  ;;  %v1220_v20 = vmax.f32 %v1217_v2, %v1218_v11  ;;  %v1207_v21 = vmax.f32 %v1195_v12, 0.0  ;;  %v3294_v24 = vld [vmem:[%s4211_s7 + $0x8] sm:$0xff]  }
 0x18b   :  { %v1210_v26 = vmax.f32 %v1198_v45, 0.0  ;;  %3125 = vmatpush3.bf16.msra.mxu0 %v3294_v24 }
 0x18c   :  { %v1208_v27 = vmax.f32 %v1196_v55, 0.0  ;;  %3126 = vmatprep.subr.bf16.mxu0 %v3307_v0 }
 0x18d   :  { %v1216_v30 = vmax.f32 %v1209_v23, %v1210_v26  ;;  %v1394_v32 = vpop.f32.mrb[80].mxu0 }
 0x18e   :  { %v1215_v36 = vmax.f32 %v1207_v21, %v1208_v27  ;;  %v1395_v4 = vadd.f32 %v1394_v32, %v4054_v17  ;;  %v2964_v40 = vpop.f32.mrb[81].mxu0  ;;  %v1500_v28 = vpop.f32.mrb[40].mxu1 }
 0x18f   :  { %v1397_v34 = vpop.f32.mrb[82].mxu0  ;;  %v2992_v44 = vpop.f32.mrb[41].mxu1  ;;  %3127 = vmatpush3.bf16.msra.mxu0 %v3295_v57 }
 0x190   :  { %v4084_v47 = vadd.f32 %v1500_v28, %v1395_v4  ;;  %v1398_v49 = vadd.f32 %v1397_v34, %v4056_v14  ;;  %v2965_v9 = vpop.f32.mrb[83].mxu0  ;;  %v1503_v52 = vpop.f32.mrb[42].mxu1  ;;  %v1219_v53 = vmax.f32 %v1215_v36, %v1216_v30  ;;  %3128 = vmatprep.subr.bf16.mxu0 %v3307_v0 }
 0x191   :  { %v2993_v33 = vpop.f32.mrb[43].mxu1 }
 0x192   :  { %v4088_v17 = vadd.f32 %v1503_v52, %v1398_v49  ;;  %v1221_v38 = vmax.f32 %v1220_v20, %v1219_v53 }
 0x193   :  { %3129 = vmatpush3.bf16.msra.mxu0 %v3296_v63 }
 0x194   :  { %2050 = vrot.lane.b32.xlu0 %v1221_v38, %s3309_s30  ;;  %3130 = vmatprep.subr.bf16.mxu0 %v3307_v0 }
 0x195   :  { %v1402_v59 = vpop.f32.mrb[84].mxu0 }
 0x196   :  { %v1403_v14 = vadd.f32 %v1402_v59, %v4058_v58  ;;  %v2968_v60 = vpop.f32.mrb[85].mxu0  ;;  %v1508_v19 = vpop.f32.mrb[44].mxu1  ;;  %v3297_v58 = vld [vmem:[%s4211_s7 + $0x20] sm:$0xff]  }
 0x197   :  { %v1405_v42 = vpop.f32.mrb[86].mxu0  ;;  %v2996_v61 = vpop.f32.mrb[45].mxu1  ;;  %3131 = vmatpush3.bf16.msra.mxu0 %v3297_v58 }
 0x198   :  { %v4098_v25 = vadd.f32 %v1508_v19, %v1403_v14  ;;  %v1406_v1 = vadd.f32 %v1405_v42, %v4060_v18  ;;  %v2969_v29 = vpop.f32.mrb[87].mxu0  ;;  %v1511_v2 = vpop.f32.mrb[46].mxu1  ;;  %3132 = vmatprep.subr.bf16.mxu0 %v3307_v0 }
 0x199   :  { %v2997_v3 = vpop.f32.mrb[47].mxu1 }
 0x19a   :  { %v4102_v39 = vadd.f32 %v1511_v2, %v1406_v1 }
 0x19b   :  { %3133 = vmatpush3.bf16.msra.mxu0 %v3298_v46 }
 0x19d   :  { %v1410_v5 = vpop.f32.mrb[88].mxu0 }
 0x19e   :  { %v1411_v6 = vadd.f32 %v1410_v5, %v4062_v22  ;;  %v2972_v7 = vpop.f32.mrb[89].mxu0  ;;  %v1516_v41 = vpop.f32.mrb[48].mxu1 }
 0x19f   :  { %v1413_v18 = vpop.f32.mrb[90].mxu0  ;;  %v3000_v8 = vpop.f32.mrb[49].mxu1 }
 0x1a0   :  { %v1543_v43 = vadd.f32 %v1516_v41, %v1411_v6  ;;  %v1414_v10 = vadd.f32 %v1413_v18, %v4067_v62  ;;  %v2973_v11 = vpop.f32.mrb[91].mxu0  ;;  %v1519_v12 = vpop.f32.mrb[50].mxu1 }
 0x1a1   :  { %v3001_v56 = vpop.f32.mrb[51].mxu1 }
 0x1a2   :  { %v1544_v16 = vadd.f32 %v1519_v12, %v1414_v10 }
 0x1a5   :  { %v1418_v22 = vpop.f32.mrb[92].mxu0 }
 0x1a6   :  { %v1419_v45 = vadd.f32 %v1418_v22, %v4069_v50  ;;  %v2976_v54 = vpop.f32.mrb[93].mxu0  ;;  %v1524_v55 = vpop.f32.mrb[52].mxu1 }
 0x1a7   :  { %v1421_v20 = vpop.f32.mrb[94].mxu0  ;;  %v3004_v23 = vpop.f32.mrb[53].mxu1 }
 0x1a8   :  { %v1545_v26 = vadd.f32 %v1524_v55, %v1419_v45  ;;  %v1422_v21 = vadd.f32 %v1421_v20, %v4071_v37  ;;  %v2977_v27 = vpop.f32.mrb[95].mxu0  ;;  %v1527_v30 = vpop.f32.mrb[54].mxu1 }
 0x1a9   :  { %v3005_v62 = vpop.f32.mrb[55].mxu1 }
 0x1aa   :  { %v1546_v32 = vadd.f32 %v1527_v30, %v1422_v21 }
 0x1ad   :  { %v1426_v35 = vpop.f32.mrb[96].mxu0 }
 0x1ae   :  { %v1427_v36 = vadd.f32 %v1426_v35, %v4073_v31  ;;  %v2980_v4 = vpop.f32.mrb[97].mxu0  ;;  %v1532_v40 = vpop.f32.mrb[56].mxu1 }
 0x1af   :  { %v1429_v28 = vpop.f32.mrb[98].mxu0  ;;  %v3008_v34 = vpop.f32.mrb[57].mxu1 }
 0x1b0   :  { %v1547_v44 = vadd.f32 %v1532_v40, %v1427_v36  ;;  %v1430_v50 = vadd.f32 %v1429_v28, %v4075_v51  ;;  %v2981_v24 = vpop.f32.mrb[99].mxu0  ;;  %v1535_v49 = vpop.f32.mrb[58].mxu1 }
 0x1b1   :  { %v3009_v9 = vpop.f32.mrb[59].mxu1 }
 0x1b2   :  { %v1548_v52 = vadd.f32 %v1535_v49, %v1430_v50 }
 0x1b5   :  { %v1616_v53 = vpop.f32.mrb[100].mxu0 }
 0x1b6   :  { %v1655_v37 = vadd.f32 %v1616_v53, %v4084_v47  ;;  %v3020_v33 = vpop.f32.mrb[101].mxu0  ;;  %v1732_v38 = vpop.f32.mrb[60].mxu1 }
 0x1b7   :  { %v1619_v57 = vpop.f32.mrb[102].mxu0  ;;  %v3048_v59 = vpop.f32.mrb[61].mxu1 }
 0x1b8   :  { %v1771_v14 = vadd.f32 %v1732_v38, %v1655_v37  ;;  %v1656_v31 = vadd.f32 %v1619_v57, %v4088_v17  ;;  %v3021_v60 = vpop.f32.mrb[103].mxu0  ;;  %v1735_v19 = vpop.f32.mrb[62].mxu1 }
 0x1b9   :  { %v3049_v42 = vpop.f32.mrb[63].mxu1 }
 0x1ba   :  { %v1772_v61 = vadd.f32 %v1735_v19, %v1656_v31 }
 0x1bd   :  { %v1624_v63 = vpop.f32.mrb[104].mxu0 }
 0x1be   :  { %v1657_v51 = vadd.f32 %v1624_v63, %v4098_v25  ;;  %v3024_v1 = vpop.f32.mrb[105].mxu0  ;;  %v1740_v29 = vpop.f32.mrb[64].mxu1 }
 0x1bf   :  { %v1627_v2 = vpop.f32.mrb[106].mxu0  ;;  %v3052_v3 = vpop.f32.mrb[65].mxu1 }
 0x1c0   :  { %v1773_v58 = vadd.f32 %v1740_v29, %v1657_v51  ;;  %v1658_v47 = vadd.f32 %v1627_v2, %v4102_v39  ;;  %v3025_v5 = vpop.f32.mrb[107].mxu0  ;;  %v1743_v6 = vpop.f32.mrb[66].mxu1 }
 0x1c1   :  { %v3053_v7 = vpop.f32.mrb[67].mxu1 }
 0x1c2   :  { %v4122_v41 = vadd.f32 %v1743_v6, %v1658_v47 }
 0x1c5   :  { %v1632_v17 = vpop.f32.mrb[108].mxu0 }
 0x1c6   :  { %v1659_v18 = vadd.f32 %v1632_v17, %v1543_v43  ;;  %v3028_v8 = vpop.f32.mrb[109].mxu0  ;;  %v1748_v46 = vpop.f32.mrb[68].mxu1 }
 0x1c7   :  { %v1635_v10 = vpop.f32.mrb[110].mxu0  ;;  %v3056_v11 = vpop.f32.mrb[69].mxu1 }
 0x1c8   :  { %v4124_v12 = vadd.f32 %v1748_v46, %v1659_v18  ;;  %v1660_v25 = vadd.f32 %v1635_v10, %v1544_v16  ;;  %v3029_v56 = vpop.f32.mrb[111].mxu0  ;;  %v1751_v22 = vpop.f32.mrb[70].mxu1 }
 0x1c9   :  { %v3057_v45 = vpop.f32.mrb[71].mxu1 }
 0x1ca   :  { %v4126_v54 = vadd.f32 %v1751_v22, %v1660_v25 }
 0x1cd   :  { %v1640_v39 = vpop.f32.mrb[112].mxu0 }
 0x1ce   :  { %v1661_v55 = vadd.f32 %v1640_v39, %v1545_v26  ;;  %v3032_v20 = vpop.f32.mrb[113].mxu0  ;;  %v1756_v23 = vpop.f32.mrb[72].mxu1 }
 0x1cf   :  { %v1643_v21 = vpop.f32.mrb[114].mxu0  ;;  %v3060_v27 = vpop.f32.mrb[73].mxu1 }
 0x1d0   :  { %v4128_v30 = vadd.f32 %v1756_v23, %v1661_v55  ;;  %v1662_v43 = vadd.f32 %v1643_v21, %v1546_v32  ;;  %v3033_v62 = vpop.f32.mrb[115].mxu0  ;;  %v1759_v35 = vpop.f32.mrb[74].mxu1 }
 0x1d1   :  { %v3061_v36 = vpop.f32.mrb[75].mxu1 }
 0x1d2   :  { %v4130_v4 = vadd.f32 %v1759_v35, %v1662_v43 }
 0x1d5   :  { %v1648_v16 = vpop.f32.mrb[116].mxu0 }
 0x1d6   :  { %v1663_v40 = vadd.f32 %v1648_v16, %v1547_v44  ;;  %v3036_v28 = vpop.f32.mrb[117].mxu0  ;;  %v1764_v34 = vpop.f32.mrb[76].mxu1  ;;  %v4139_v44 = vld [vmem:[%s4212_s6] ss:$0 sm:$0xff] }
 0x1d7   :  { %v1651_v50 = vpop.f32.mrb[118].mxu0  ;;  %v3064_v24 = vpop.f32.mrb[77].mxu1 }
 0x1d8   :  { %v4132_v49 = vadd.f32 %v1764_v34, %v1663_v40  ;;  %v1664_v26 = vadd.f32 %v1651_v50, %v1548_v52  ;;  %v3037_v9 = vpop.f32.mrb[119].mxu0  ;;  %v1767_v53 = vpop.f32.mrb[78].mxu1 }
 0x1d9   :  { %v3065_v37 = vpop.f32.mrb[79].mxu1 }
 0x1da   :  { %v4134_v33 = vadd.f32 %v1767_v53, %v1664_v26 }
 0x1dd   :  { %v1848_v32 = vpop.f32.mrb[120].mxu0 }
 0x1de   :  { %v1887_v38 = vadd.f32 %v1848_v32, %v1771_v14  ;;  %v3076_v57 = vpop.f32.mrb[121].mxu0  ;;  %v1964_v59 = vpop.f32.mrb[80].mxu1 }
 0x1df   :  { %v1851_v31 = vpop.f32.mrb[122].mxu0  ;;  %v3104_v60 = vpop.f32.mrb[81].mxu1 }
 0x1e0   :  { %v2003_v19 = vadd.f32 %v1964_v59, %v1887_v38  ;;  %v1888_v42 = vadd.f32 %v1851_v31, %v1772_v61  ;;  %v3077_v63 = vpop.f32.mrb[123].mxu0  ;;  %v1967_v52 = vpop.f32.mrb[82].mxu1 }
 0x1e1   :  { %v3105_v51 = vpop.f32.mrb[83].mxu1 }
 0x1e2   :  { %v2020_v1 = vadd.f32 %v4139_v44, %v2003_v19  ;;  %v2004_v29 = vadd.f32 %v1967_v52, %v1888_v42 }
 0x1e4   :  { %v2021_v2 = vadd.f32 %v4139_v44, %v2004_v29  ;;  %v2030_v3 = vmax.f32 %v2020_v1, 0.0 }
 0x1e5   :  { %v1856_v14 = vpop.f32.mrb[124].mxu0 }
 0x1e6   :  { %v2031_v47 = vmax.f32 %v2021_v2, 0.0  ;;  %v1889_v5 = vadd.f32 %v1856_v14, %v1773_v58  ;;  %v3080_v6 = vpop.f32.mrb[125].mxu0  ;;  %v1972_v7 = vpop.f32.mrb[84].mxu1 }
 0x1e7   :  { %v1859_v17 = vpop.f32.mrb[126].mxu0  ;;  %v3108_v18 = vpop.f32.mrb[85].mxu1 }
 0x1e8   :  { %v4143_v8 = vmax.f32 %v2030_v3, %v2031_v47  ;;  %v2005_v46 = vadd.f32 %v1972_v7, %v1889_v5  ;;  %v1890_v61 = vadd.f32 %v1859_v17, %v4122_v41  ;;  %v3081_v10 = vpop.f32.mrb[127].mxu0  ;;  %v1975_v11 = vpop.f32.mrb[86].mxu1 }
 0x1e9   :  { %v3109_v25 = vpop.f32.mrb[87].mxu1 }
 0x1ea   :  { %v2022_v56 = vadd.f32 %v4139_v44, %v2005_v46  ;;  %v2006_v22 = vadd.f32 %v1975_v11, %v1890_v61  ;;  %v3299_v11 = vld [vmem:[%s4213_s9] sm:$0xff]  }
 0x1eb   :  { %3139 = vmatpush3.bf16.msra.mxu1 %v3299_v11 }
 0x1ec   :  { %v2023_v45 = vadd.f32 %v4139_v44, %v2006_v22  ;;  %v2032_v55 = vmax.f32 %v2022_v56, 0.0  ;;  %v3300_v56 = vld [vmem:[%s4213_s9 + $0x8] sm:$0xff]   ;;  %3140 = vmatprep.subr.bf16.mxu1 %v3307_v0 }
 0x1ed   :  { %v1864_v39 = vpop.f32.mrb[128].mxu0 }
 0x1ee   :  { %v2033_v58 = vmax.f32 %v2023_v45, 0.0  ;;  %v1891_v20 = vadd.f32 %v1864_v39, %v4124_v12  ;;  %v3084_v23 = vpop.f32.mrb[129].mxu0  ;;  %v1980_v21 = vpop.f32.mrb[88].mxu1  ;;  %v3301_v39 = vld [vmem:[%s4213_s9 + $0x10] sm:$0xff]  }
 0x1ef   :  { %v1867_v27 = vpop.f32.mrb[130].mxu0  ;;  %v3112_v43 = vpop.f32.mrb[89].mxu1  ;;  %3141 = vmatpush3.bf16.msra.mxu1 %v3300_v56  ;;  %v3305_v23 = vld [vmem:[%s4213_s9 + $0x30] sm:$0xff]  }
 0x1f0   :  { %v2041_v62 = vmax.f32 %v2032_v55, %v2033_v58  ;;  %v2007_v35 = vadd.f32 %v1980_v21, %v1891_v20  ;;  %v1892_v41 = vadd.f32 %v1867_v27, %v4126_v54  ;;  %v3085_v36 = vpop.f32.mrb[131].mxu0  ;;  %v1983_v16 = vpop.f32.mrb[90].mxu1  ;;  %3142 = vmatprep.subr.bf16.mxu1 %v3307_v0  ;;  %v3303_v58 = vld [vmem:[%s4213_s9 + $0x20] sm:$0xff]   ;;  %v3304_v20 = vld [vmem:[%s4213_s9 + $0x28] sm:$0xff]  }
 0x1f1   :  { %v3113_v40 = vpop.f32.mrb[91].mxu1 }
 0x1f2   :  { %v2045_v28 = vmax.f32 %v4143_v8, %v2041_v62  ;;  %v2024_v34 = vadd.f32 %v4139_v44, %v2007_v35  ;;  %v2008_v50 = vadd.f32 %v1983_v16, %v1892_v41  ;;  %v3306_v41 = vld [vmem:[%s4213_s9 + $0x38] sm:$0xff]  }
 0x1f3   :  { %3143 = vmatpush3.bf16.msra.mxu1 %v3301_v39 }
 0x1f4   :  { %v2025_v24 = vadd.f32 %v4139_v44, %v2008_v50  ;;  %v2034_v12 = vmax.f32 %v2024_v34, 0.0  ;;  %3144 = vmatprep.subr.bf16.mxu1 %v3307_v0  ;;  %v2547_v34 = vld [vmem:[%s4215_s10] ss:$0 sm:$0xff] }
 0x1f5   :  { %v1872_v26 = vpop.f32.mrb[132].mxu0 }
 0x1f6   :  { %v2035_v9 = vmax.f32 %v2025_v24, 0.0  ;;  %v1893_v53 = vadd.f32 %v1872_v26, %v4128_v30  ;;  %v3088_v37 = vpop.f32.mrb[133].mxu0  ;;  %v1988_v32 = vpop.f32.mrb[92].mxu1 }
 0x1f7   :  { %v1875_v38 = vpop.f32.mrb[134].mxu0  ;;  %v3116_v57 = vpop.f32.mrb[93].mxu1 }
 0x1f8   :  { %v2042_v54 = vmax.f32 %v2034_v12, %v2035_v9  ;;  %v2009_v59 = vadd.f32 %v1988_v32, %v1893_v53  ;;  %v1894_v31 = vadd.f32 %v1875_v38, %v4130_v4  ;;  %v3089_v60 = vpop.f32.mrb[135].mxu0  ;;  %v1991_v19 = vpop.f32.mrb[94].mxu1 }
 0x1f9   :  { %v3117_v42 = vpop.f32.mrb[95].mxu1 }
 0x1fa   :  { %v2026_v63 = vadd.f32 %v4139_v44, %v2009_v59  ;;  %v2010_v52 = vadd.f32 %v1991_v19, %v1894_v31 }
 0x1fc   :  { %v2027_v51 = vadd.f32 %v4139_v44, %v2010_v52  ;;  %v2036_v29 = vmax.f32 %v2026_v63, 0.0 }
 0x1fd   :  { %v1880_v1 = vpop.f32.mrb[136].mxu0 }
 0x1fe   :  { %v2037_v2 = vmax.f32 %v2027_v51, 0.0  ;;  %v1895_v30 = vadd.f32 %v1880_v1, %v4132_v49  ;;  %v3092_v14 = vpop.f32.mrb[137].mxu0  ;;  %v1996_v3 = vpop.f32.mrb[96].mxu1 }
 0x1ff   :  { %v1883_v47 = vpop.f32.mrb[138].mxu0  ;;  %v3120_v5 = vpop.f32.mrb[97].mxu1 }
 0x200   :  { %v2043_v6 = vmax.f32 %v2036_v29, %v2037_v2  ;;  %v2011_v7 = vadd.f32 %v1996_v3, %v1895_v30  ;;  %v1896_v4 = vadd.f32 %v1883_v47, %v4134_v33  ;;  %v3093_v17 = vpop.f32.mrb[139].mxu0  ;;  %v1999_v18 = vpop.f32.mrb[98].mxu1 }
 0x201   :  { %v3121_v8 = vpop.f32.mrb[99].mxu1 }
 0x202   :  { %v2046_v46 = vmax.f32 %v2042_v54, %v2043_v6  ;;  %v2028_v61 = vadd.f32 %v4139_v44, %v2011_v7  ;;  %v2012_v10 = vadd.f32 %v1999_v18, %v1896_v4 }
 0x204   :  { %v2029_v49 = vadd.f32 %v4139_v44, %v2012_v10  ;;  %v2047_v25 = vmax.f32 %v2045_v28, %v2046_v46  ;;  %v2038_v33 = vmax.f32 %v2028_v61, 0.0  ;;  %v3302_v44 = vld [vmem:[%s4213_s9 + $0x18] sm:$0xff]  }
 0x205   :  { %3145 = vmatpush3.bf16.msra.mxu1 %v3302_v44 }
 0x206   :  { %v2039_v22 = vmax.f32 %v2029_v49, 0.0  ;;  %3146 = vmatprep.subr.bf16.mxu1 %v3307_v0  ;;  %v2051_v21 = vpop.permute.xlu0 %2050 }
 0x207   :  { %v2058_v27 = vsel %vm2057_vm2, %v574_v48, %v2051_v21 }
 0x208   :  { %v2044_v45 = vmax.f32 %v2038_v33, %v2039_v22 }
 0x209   :  { %3147 = vmatpush3.bf16.msra.mxu1 %v3303_v58 }
 0x20a   :  { %v2048_v55 = vmax.f32 %v2047_v25, %v2044_v45  ;;  %3148 = vmatprep.subr.bf16.mxu1 %v3307_v0 }
 0x20c   :  { %2054 = vrot.lane.b32.xlu0 %v2048_v55, %s3310_s24 }
 0x20d   :  { %3149 = vmatpush3.bf16.msra.mxu1 %v3304_v20 }
 0x20e   :  { %3150 = vmatprep.subr.bf16.mxu1 %v3307_v0 }
 0x211   :  { %3151 = vmatpush3.bf16.msra.mxu1 %v3305_v23 }
 0x212   :  { %3152 = vmatprep.subr.bf16.mxu1 %v3307_v0  ;;  %v2539_v0 = vld [vmem:[%s4214_s8] ss:$0 sm:$0xff] }
 0x215   :  { %3153 = vmatpush3.bf16.msra.mxu1 %v3306_v41 }
 0x27e   :  { %v2055_v43 = vpop.permute.xlu0 %2054 }
 0x27f   :  { %v2059_v62 = vsel %vm131_vm1, %v2058_v27, %v2055_v43 }
 0x280   :  { %v2060_v35 = vpack.c.bf16 %v2059_v62, %v2059_v62 }
 0x282   :  { %3135 = vmatmul.mubr.msk.bf16.vlgmr.msra.gmra.mrb[140].mxu0 %vm2116_vm3, %v2060_v35 }
 0x355   :  { %v2154_v36 = vpop.f32.mrb[140].mxu0 }
 0x356   :  { %v2155_v16 = vadd.f32 %v2539_v0, %v2154_v36  ;;  %v3136_v40 = vpop.f32.mrb[141].mxu0 }
 0x357   :  { %v2157_v15 = vpop.f32.mrb[142].mxu0 }
 0x358   :  { %v2160_v13 = vmax.f32 %v2155_v16, 0.0  ;;  %v3137_v48 = vpop.f32.mrb[143].mxu0 }
 0x35a   :  { %v2161_v28 = vpack.c.bf16 %v2160_v13, %v2160_v13 }
 0x35c   :  { %3155 = vmatmul.mubr.bf16.vlgmr.msra.gmra.mrb[100].mxu1 %v2161_v28 }
 0x42f   :  { %v2267_v50 = vpop.f32.mrb[100].mxu1 }
 0x430   :  { %v2268_v24 = vadd.f32 %v2547_v34, %v2267_v50  ;;  %v3156_v26 = vpop.f32.mrb[101].mxu1 }
 0x431   :  { %v2270_v12 = vpop.f32.mrb[102].mxu1 }
 0x432   :  { %2274 = vst.msk [vmem:[%s4216_s11] sm:$0xff] %vm2273_vm4, %v2268_v24  ;;  %v3157_v9 = vpop.f32.mrb[103].mxu1 }

</bundles_post_ra>
